<compile_context>
chip_gen: v6e
topology: v6e:2x2x1
jax: 0.10.0
libtpu: 0.0.40
codegen_flags: <defaults>
</compile_context>

<pallas_src>
import numpy as np
import jax
import jax.numpy as jnp
from jax.experimental import pallas as pl
from jax.experimental.pallas import tpu as pltpu

_HIGH = jax.lax.Precision.HIGHEST
_GN_EPS = 1e-5
_LANE = 128


def _round_up(x, m):
    return ((x + m - 1) // m) * m


def _mish(v):
    """x * tanh(softplus(x)) = x*((1+e^x)^2-1)/((1+e^x)^2+1), exact division.
    Clamp at 20 matches PyTorch's softplus threshold (mish(x)==x for x>20)."""
    e = jnp.exp(jnp.minimum(v, 20.0))
    u = (1.0 + e) * (1.0 + e)
    return v * (u - 1.0) / (u + 1.0)


def _mish_ref(v):
    sp = jnp.where(v > 20.0, v, jnp.log1p(jnp.exp(jnp.minimum(v, 20.0))))
    return v * jnp.tanh(sp)


# --------------------------------------------------------------------------
# Fused ResnetBlock kernel (one grid step = one batch element)
# --------------------------------------------------------------------------
def _make_kernel(H, W, Cin_p, Cout_p, use_res_conv):
    Wp = W + 2                       # padded width
    Nw = H * Wp                      # "wide" output rows (2 junk cols per row)
    Lp = (H + 3) * Wp                # padded flat rows (1 top, 2 bottom pad)
    shift = Wp + 1                   # flat offset of image position (0, 0)
    offs = tuple(kh * Wp + kw for kh in range(3) for kw in range(3))

    def _gn_mish(acc, valid, gamma, beta, p_avg):
        # GroupNorm over the H*W valid positions (masked frames included per
        # PyTorch semantics; wide-layout junk columns excluded via `valid`).
        # Two-pass variance; one group-averaging dot per statistic.
        ch_sum = jnp.sum(acc * valid, axis=0, keepdims=True)           # (1,Cp)
        mean_c = jnp.dot(ch_sum, p_avg, preferred_element_type=jnp.float32)
        diff = acc - mean_c
        ch_sqs = jnp.sum(diff * diff * valid, axis=0, keepdims=True)   # (1,Cp)
        var_c = jnp.dot(ch_sqs, p_avg, preferred_element_type=jnp.float32)
        inv_c = jax.lax.rsqrt(var_c + _GN_EPS)
        return _mish(diff * inv_c * gamma + beta)

    def body(xp_ref, mout_ref, valid_ref, temb_ref, w1_ref, w2_ref, wmlp_ref,
             vecs_ref, p_ref, wres_ref, o_ref, scr_ref):
        vecs = vecs_ref[...]
        b1, g1, be1 = vecs[0:1], vecs[1:2], vecs[2:3]
        b2, g2, be2 = vecs[3:4], vecs[4:5], vecs[5:6]
        bm, br = vecs[6:7], vecs[7:8]
        p_avg = p_ref[...]                             # (Cp, Cp) group average
        valid = valid_ref[0]                           # (Nw, 1) junk-col weight
        m_out = mout_ref[0]                            # (Nw, 1) mask, out layout

        # ---- conv1: ONE MXU matmul over an in-VMEM im2col tile (K = 9*Cin_p).
        #      x is pre-masked + zero-padded in the wrapper, streamed bf16.
        cols1 = jnp.concatenate(
            [xp_ref[0, off:off + Nw, :] for off in offs], axis=1)
        acc1 = jnp.dot(cols1, w1_ref[...],
                       preferred_element_type=jnp.float32) + b1
        y1 = _gn_mish(acc1, valid, g1, be1, p_avg)

        # ---- fused time-embedding MLP + masking: result is exactly block2's
        #      conv input (masked, junk columns zero) and stays in VMEM.
        t = jnp.dot(_mish(temb_ref[0]), wmlp_ref[...],
                    preferred_element_type=jnp.float32) + bm           # (1,Cp)
        h2in = (y1 * m_out + t) * m_out                                # (Nw,Cp)

        # Zero ONLY the scratch pad rows (interior fully overwritten, its junk
        # columns already zero via m_out).  Done every step (no program_id
        # gate) so it stays correct under megacore parallel sharding.
        scr_ref[0:shift, :] = jnp.zeros((shift, Cout_p), jnp.bfloat16)
        scr_ref[shift + Nw:Lp, :] = jnp.zeros((Lp - shift - Nw, Cout_p),
                                              jnp.bfloat16)
        scr_ref[shift:shift + Nw, :] = h2in.astype(jnp.bfloat16)

        # ---- conv2: same single-matmul im2col, read straight from the VMEM
        #      scratch (no HBM round trip).
        cols2 = jnp.concatenate(
            [scr_ref[off:off + Nw, :] for off in offs], axis=1)
        acc2 = jnp.dot(cols2, w2_ref[...],
                       preferred_element_type=jnp.float32) + b2
        y2 = _gn_mish(acc2, valid, g2, be2, p_avg)

        # ---- residual fused into the epilogue (identity path skips the matmul)
        xm_res = xp_ref[0, shift:shift + Nw, :]        # already masked (wrapper)
        if wres_ref is not None:
            res = jnp.dot(xm_res, wres_ref[...],
                          preferred_element_type=jnp.float32) + br
        else:
            res = xm_res.astype(jnp.float32)
        o_ref[0] = (y2 * m_out + res).astype(o_ref.dtype)

    if use_res_conv:
        def kernel(xp_ref, mout_ref, valid_ref, temb_ref, w1_ref, w2_ref,
                   wmlp_ref, vecs_ref, p_ref, wres_ref, o_ref, scr_ref):
            body(xp_ref, mout_ref, valid_ref, temb_ref, w1_ref, w2_ref,
                 wmlp_ref, vecs_ref, p_ref, wres_ref, o_ref, scr_ref)
    else:
        def kernel(xp_ref, mout_ref, valid_ref, temb_ref, w1_ref, w2_ref,
                   wmlp_ref, vecs_ref, p_ref, o_ref, scr_ref):
            body(xp_ref, mout_ref, valid_ref, temb_ref, w1_ref, w2_ref,
                 wmlp_ref, vecs_ref, p_ref, None, o_ref, scr_ref)
    return kernel


# --------------------------------------------------------------------------
# Wrapper: NCHW -> pre-masked, channel-padded, flat-padded NHWC; one
# pallas_call over batch; slice back to NCHW.
# --------------------------------------------------------------------------
def resnet_block_forward(x, mask, time_emb, params):
    """x: (B, dim, H, W) NCHW, mask broadcastable to (B, 1, H, W),
    time_emb: (B, time_emb_dim).  Returns (B, dim_out, H, W)."""
    B, Cin, H, W = x.shape
    Cout = params["conv1_w"].shape[0]
    G = params["groups"]
    assert Cout % G == 0
    cpg = Cout // G
    Wp, Nw, Lp = W + 2, H * (W + 2), (H + 3) * (W + 2)
    use_res_conv = (Cin != Cout)
    Cin_p = _round_up(Cin, _LANE)
    Cout_p = _round_up(Cout, _LANE)

    # pre-mask x in the wrapper; XLA fuses the multiply into the pad/transpose
    x_nhwc = jnp.transpose(x, (0, 2, 3, 1)).astype(jnp.float32)
    mask_bhw = jnp.broadcast_to(mask.astype(jnp.float32), (B, 1, H, W))[:, 0]
    xm = x_nhwc * mask_bhw[..., None]

    # zero-pad once: 1 row top / 2 bottom, 1 col each side, channels -> Cin_p;
    # flatten and stream as bf16.
    xp = jnp.pad(xm, ((0, 0), (1, 2), (1, 1), (0, Cin_p - Cin)))
    xp = xp.reshape(B, Lp, Cin_p).astype(jnp.bfloat16)

    # output-("wide")-layout mask column: (B, Nw, 1), zeros at the junk columns
    m_out = jnp.pad(mask_bhw, ((0, 0), (0, 0), (0, 2))).reshape(B, Nw, 1)
    # junk-column weight for GN statistics (batch independent)
    valid = (jnp.arange(Nw) % Wp < W).astype(jnp.float32).reshape(1, Nw, 1)

    temb = time_emb.astype(jnp.float32).reshape(B, 1, -1)
    T = temb.shape[-1]

    def pad_c(v):
        return jnp.pad(v.astype(jnp.float32), (0, Cout_p - Cout))

    # tap-major conv weights, channel-padded lane-dense, streamed bf16
    w1 = jnp.pad(jnp.transpose(params["conv1_w"], (2, 3, 1, 0)),
                 ((0, 0), (0, 0), (0, Cin_p - Cin), (0, Cout_p - Cout)))
    w1 = w1.reshape(9 * Cin_p, Cout_p).astype(jnp.bfloat16)
    w2 = jnp.pad(jnp.transpose(params["conv2_w"], (2, 3, 1, 0)),
                 ((0, 0), (0, 0), (0, Cout_p - Cout), (0, Cout_p - Cout)))
    w2 = w2.reshape(9 * Cout_p, Cout_p).astype(jnp.bfloat16)
    wmlp = jnp.pad(params["mlp_w"].T.astype(jnp.float32),
                   ((0, 0), (0, Cout_p - Cout)))                   # (T, Cout_p)

    if use_res_conv:
        wres = jnp.pad(params["res_w"][:, :, 0, 0].T.astype(jnp.float32),
                       ((0, Cin_p - Cin), (0, Cout_p - Cout))).astype(jnp.bfloat16)
        bres = pad_c(params["res_b"])
    else:
        wres = None
        bres = jnp.zeros((Cout_p,), jnp.float32)

    vecs = jnp.stack([pad_c(params["conv1_b"]), pad_c(params["gn1_g"]),
                      pad_c(params["gn1_b"]), pad_c(params["conv2_b"]),
                      pad_c(params["gn2_g"]), pad_c(params["gn2_b"]),
                      pad_c(params["mlp_b"]), bres])               # (8, Cout_p)

    # group-averaging matrix over REAL channels only: P = M @ M.T / n_norm
    ch = jnp.arange(Cout_p)
    M = ((ch[:, None] // cpg == jnp.arange(G)[None, :])
         & (ch[:, None] < Cout)).astype(jnp.float32)               # (Cout_p, G)
    p_avg = (M @ M.T) / float(H * W * cpg)                         # (Cp, Cp)

    in_specs = [
        pl.BlockSpec((1, Lp, Cin_p), lambda b: (b, 0, 0)),     # padded, masked x
        pl.BlockSpec((1, Nw, 1), lambda b: (b, 0, 0)),         # output-layout mask
        pl.BlockSpec((1, Nw, 1), lambda b: (0, 0, 0)),         # valid-column weight
        pl.BlockSpec((1, 1, T), lambda b: (b, 0, 0)),          # time embedding
        pl.BlockSpec((9 * Cin_p, Cout_p), lambda b: (0, 0)),   # conv1 im2col weight
        pl.BlockSpec((9 * Cout_p, Cout_p), lambda b: (0, 0)),  # conv2 im2col weight
        pl.BlockSpec((T, Cout_p), lambda b: (0, 0)),           # mlp weight
        pl.BlockSpec((8, Cout_p), lambda b: (0, 0)),           # packed bias/gn vecs
        pl.BlockSpec((Cout_p, Cout_p), lambda b: (0, 0)),      # group-average matrix
    ]
    args = [xp, m_out, valid, temb, w1, w2, wmlp, vecs, p_avg]
    if use_res_conv:
        in_specs.append(pl.BlockSpec((Cin_p, Cout_p), lambda b: (0, 0)))
        args.append(wres)

    kernel = _make_kernel(H, W, Cin_p, Cout_p, use_res_conv)
    out_wide = pl.pallas_call(
        kernel,
        out_shape=jax.ShapeDtypeStruct((B, Nw, Cout_p), jnp.float32),
        grid=(B,),
        in_specs=in_specs,
        out_specs=pl.BlockSpec((1, Nw, Cout_p), lambda b: (b, 0, 0)),
        scratch_shapes=[pltpu.VMEM((Lp, Cout_p), jnp.bfloat16)],
        compiler_params=pltpu.CompilerParams(
            dimension_semantics=("parallel",),
            vmem_limit_bytes=48 * 1024 * 1024),
    )(*args)

    # drop junk columns and padded channels, back to NCHW
    out = out_wide.reshape(B, H, Wp, Cout_p)[:, :, :W, :Cout]
    return jnp.transpose(out, (0, 3, 1, 2))


# --------------------------------------------------------------------------
# Deterministic synthetic parameters (PyTorch shapes)
# --------------------------------------------------------------------------
def init_params(key, dim, dim_out, time_emb_dim, groups):
    ks = jax.random.split(key, 12)
    return {
        "conv1_w": 0.2 * jax.random.normal(ks[0], (dim_out, dim, 3, 3), jnp.float32),
        "conv1_b": 0.1 * jax.random.normal(ks[1], (dim_out,), jnp.float32),
        "gn1_g": 1.0 + 0.1 * jax.random.normal(ks[2], (dim_out,), jnp.float32),
        "gn1_b": 0.1 * jax.random.normal(ks[3], (dim_out,), jnp.float32),
        "conv2_w": 0.2 * jax.random.normal(ks[4], (dim_out, dim_out, 3, 3), jnp.float32),
        "conv2_b": 0.1 * jax.random.normal(ks[5], (dim_out,), jnp.float32),
        "gn2_g": 1.0 + 0.1 * jax.random.normal(ks[6], (dim_out,), jnp.float32),
        "gn2_b": 0.1 * jax.random.normal(ks[7], (dim_out,), jnp.float32),
        "mlp_w": 0.2 * jax.random.normal(ks[8], (dim_out, time_emb_dim), jnp.float32),
        "mlp_b": 0.1 * jax.random.normal(ks[9], (dim_out,), jnp.float32),
        "res_w": 0.2 * jax.random.normal(ks[10], (dim_out, dim, 1, 1), jnp.float32),
        "res_b": 0.1 * jax.random.normal(ks[11], (dim_out,), jnp.float32),
        "groups": groups,
    }


# --------------------------------------------------------------------------
# Plain-JAX reference (NCHW, PyTorch semantics, f32 HIGHEST precision)
# --------------------------------------------------------------------------
def _ref_groupnorm(x, G, gamma, beta, eps=_GN_EPS):
    B, C, H, W = x.shape
    xg = x.reshape(B, G, C // G, H, W)
    mean = xg.mean(axis=(2, 3, 4), keepdims=True)
    var = ((xg - mean) ** 2).mean(axis=(2, 3, 4), keepdims=True)
    xn = ((xg - mean) / jnp.sqrt(var + eps)).reshape(B, C, H, W)
    return xn * gamma[None, :, None, None] + beta[None, :, None, None]


def _ref_conv3x3(x, w, b):
    y = jax.lax.conv_general_dilated(
        x, w, (1, 1), "SAME",
        dimension_numbers=("NCHW", "OIHW", "NCHW"), precision=_HIGH)
    return y + b[None, :, None, None]


def _ref_block(x, mask, w, b, g, be, groups):
    return _mish_ref(_ref_groupnorm(_ref_conv3x3(x * mask, w, b), groups, g, be)) * mask


def _ref_resnet(x, mask, time_emb, p):
    h = _ref_block(x, mask, p["conv1_w"], p["conv1_b"], p["gn1_g"], p["gn1_b"], p["groups"])
    t = jnp.dot(_mish_ref(time_emb), p["mlp_w"].T, precision=_HIGH) + p["mlp_b"]
    h = h + t[:, :, None, None]
    h = _ref_block(h, mask, p["conv2_w"], p["conv2_b"], p["gn2_g"], p["gn2_b"], p["groups"])
    xm = x * mask
    if x.shape[1] != p["conv1_w"].shape[0]:
        res = jnp.einsum("bchw,oc->bohw", xm, p["res_w"][:, :, 0, 0],
                         precision=_HIGH) + p["res_b"][None, :, None, None]
    else:
        res = xm
    return h + res


# --------------------------------------------------------------------------
if __name__ == "__main__":
    def run_case(dim, dim_out, B=2, H=16, W=16, time_emb_dim=32, groups=8):
        key = jax.random.PRNGKey(0)
        kx, kt, kp = jax.random.split(key, 3)
        x = jax.random.normal(kx, (B, dim, H, W), jnp.float32)
        # grad-TTS style time mask over the last (W) axis, broadcastable to x
        lengths = jnp.array([W, max(1, (3 * W) // 4)])[:B]
        mask = (jnp.arange(W)[None, None, None, :]
                < lengths[:, None, None, None]).astype(jnp.float32)  # (B,1,1,W)
        time_emb = jax.random.normal(kt, (B, time_emb_dim), jnp.float32)
        params = init_params(kp, dim, dim_out, time_emb_dim, groups)

        out = jax.block_until_ready(resnet_block_forward(x, mask, time_emb, params))
        ref = jax.block_until_ready(_ref_resnet(x, mask, time_emb, params))
        assert out.shape == (B, dim_out, H, W)
        # Kernel streams x / weights as bf16 and runs the convs at MXU-default
        # precision (bf16 multiplies, f32 accumulation); the reference is full
        # f32 HIGHEST, so allow bf16-class deviation on O(1) activations.
        np.testing.assert_allclose(np.asarray(out), np.asarray(ref),
                                   rtol=3e-2, atol=3e-2)

    run_case(4, 16)    # dim != dim_out -> fused 1x1 residual conv
    run_case(16, 16)   # dim == dim_out -> identity residual (no matmul)
    print("KERNEL_OK")
</pallas_src>

<mosaic_0001>
module attributes {stable_mosaic.version = 11 : i64} {
  func.func @kernel(%arg0: i32, %arg1: memref<1x342x128xbf16, #tpu.memory_space<vmem>>, %arg2: memref<1x288x1xf32, #tpu.memory_space<vmem>>, %arg3: memref<1x288x1xf32, #tpu.memory_space<vmem>>, %arg4: memref<1x1x32xf32, #tpu.memory_space<vmem>>, %arg5: memref<1152x128xbf16, #tpu.memory_space<vmem>>, %arg6: memref<1152x128xbf16, #tpu.memory_space<vmem>>, %arg7: memref<32x128xf32, #tpu.memory_space<vmem>>, %arg8: memref<8x128xf32, #tpu.memory_space<vmem>>, %arg9: memref<128x128xf32, #tpu.memory_space<vmem>>, %arg10: memref<128x128xbf16, #tpu.memory_space<vmem>>, %arg11: memref<1x288x128xf32, #tpu.memory_space<vmem>>, %arg12: memref<342x128xbf16, #tpu.memory_space<vmem>>) attributes {dimension_semantics = [#tpu.dimension_semantics<parallel>], iteration_bounds = array<i64: 2>, scalar_prefetch = 0 : i64, scratch_operands = 1 : i64, tpu.core_type = #tpu.core_type<tc>, window_params = [{transform_indices = @transform_0, window_bounds = array<i64: 1, 342, 128>}, {transform_indices = @transform_1, window_bounds = array<i64: 1, 288, 1>}, {pipeline_mode = #tpu.pipeline_mode<synchronous>, transform_indices = @transform_2, window_bounds = array<i64: 1, 288, 1>}, {transform_indices = @transform_3, window_bounds = array<i64: 1, 1, 32>}, {pipeline_mode = #tpu.pipeline_mode<synchronous>, transform_indices = @transform_4, window_bounds = array<i64: 1152, 128>}, {pipeline_mode = #tpu.pipeline_mode<synchronous>, transform_indices = @transform_5, window_bounds = array<i64: 1152, 128>}, {pipeline_mode = #tpu.pipeline_mode<synchronous>, transform_indices = @transform_6, window_bounds = array<i64: 32, 128>}, {pipeline_mode = #tpu.pipeline_mode<synchronous>, transform_indices = @transform_7, window_bounds = array<i64: 8, 128>}, {pipeline_mode = #tpu.pipeline_mode<synchronous>, transform_indices = @transform_8, window_bounds = array<i64: 128, 128>}, {pipeline_mode = #tpu.pipeline_mode<synchronous>, transform_indices = @transform_9, window_bounds = array<i64: 128, 128>}, {transform_indices = @transform_10, window_bounds = array<i64: 1, 288, 128>}]} {
    %c0 = arith.constant 0 : index
    %c0_0 = arith.constant 0 : index
    %0 = vector.load %arg8[%c0, %c0_0] : memref<8x128xf32, #tpu.memory_space<vmem>>, vector<8x128xf32>
    %1 = vector.extract_strided_slice %0 {offsets = [0, 0], sizes = [1, 128], strides = [1, 1]} : vector<8x128xf32> to vector<1x128xf32>
    %2 = vector.extract_strided_slice %0 {offsets = [1, 0], sizes = [1, 128], strides = [1, 1]} : vector<8x128xf32> to vector<1x128xf32>
    %3 = vector.extract_strided_slice %0 {offsets = [2, 0], sizes = [1, 128], strides = [1, 1]} : vector<8x128xf32> to vector<1x128xf32>
    %4 = vector.extract_strided_slice %0 {offsets = [3, 0], sizes = [1, 128], strides = [1, 1]} : vector<8x128xf32> to vector<1x128xf32>
    %5 = vector.extract_strided_slice %0 {offsets = [4, 0], sizes = [1, 128], strides = [1, 1]} : vector<8x128xf32> to vector<1x128xf32>
    %6 = vector.extract_strided_slice %0 {offsets = [5, 0], sizes = [1, 128], strides = [1, 1]} : vector<8x128xf32> to vector<1x128xf32>
    %7 = vector.extract_strided_slice %0 {offsets = [6, 0], sizes = [1, 128], strides = [1, 1]} : vector<8x128xf32> to vector<1x128xf32>
    %8 = vector.extract_strided_slice %0 {offsets = [7, 0], sizes = [1, 128], strides = [1, 1]} : vector<8x128xf32> to vector<1x128xf32>
    %c0_1 = arith.constant 0 : index
    %c0_2 = arith.constant 0 : index
    %9 = vector.load %arg9[%c0_1, %c0_2] : memref<128x128xf32, #tpu.memory_space<vmem>>, vector<128x128xf32>
    %c0_3 = arith.constant 0 : index
    %c0_4 = arith.constant 0 : index
    %c0_5 = arith.constant 0 : index
    %10 = vector.load %arg3[%c0_3, %c0_4, %c0_5] : memref<1x288x1xf32, #tpu.memory_space<vmem>>, vector<1x288x1xf32>
    %11 = vector.shape_cast %10 : vector<1x288x1xf32> to vector<288x1xf32>
    %c0_6 = arith.constant 0 : index
    %c0_7 = arith.constant 0 : index
    %c0_8 = arith.constant 0 : index
    %12 = vector.load %arg2[%c0_6, %c0_7, %c0_8] : memref<1x288x1xf32, #tpu.memory_space<vmem>>, vector<1x288x1xf32>
    %13 = vector.shape_cast %12 : vector<1x288x1xf32> to vector<288x1xf32>
    %c0_9 = arith.constant 0 : index
    %c0_10 = arith.constant 0 : index
    %c0_11 = arith.constant 0 : index
    %14 = vector.load %arg1[%c0_9, %c0_10, %c0_11] : memref<1x342x128xbf16, #tpu.memory_space<vmem>>, vector<1x288x128xbf16>
    %15 = vector.shape_cast %14 : vector<1x288x128xbf16> to vector<288x128xbf16>
    %c0_12 = arith.constant 0 : index
    %c1 = arith.constant 1 : index
    %c0_13 = arith.constant 0 : index
    %16 = vector.load %arg1[%c0_12, %c1, %c0_13] : memref<1x342x128xbf16, #tpu.memory_space<vmem>>, vector<1x288x128xbf16>
    %17 = vector.shape_cast %16 : vector<1x288x128xbf16> to vector<288x128xbf16>
    %c0_14 = arith.constant 0 : index
    %c2 = arith.constant 2 : index
    %c0_15 = arith.constant 0 : index
    %18 = vector.load %arg1[%c0_14, %c2, %c0_15] : memref<1x342x128xbf16, #tpu.memory_space<vmem>>, vector<1x288x128xbf16>
    %19 = vector.shape_cast %18 : vector<1x288x128xbf16> to vector<288x128xbf16>
    %c0_16 = arith.constant 0 : index
    %c18 = arith.constant 18 : index
    %c0_17 = arith.constant 0 : index
    %20 = vector.load %arg1[%c0_16, %c18, %c0_17] : memref<1x342x128xbf16, #tpu.memory_space<vmem>>, vector<1x288x128xbf16>
    %21 = vector.shape_cast %20 : vector<1x288x128xbf16> to vector<288x128xbf16>
    %c0_18 = arith.constant 0 : index
    %c19 = arith.constant 19 : index
    %c0_19 = arith.constant 0 : index
    %22 = vector.load %arg1[%c0_18, %c19, %c0_19] : memref<1x342x128xbf16, #tpu.memory_space<vmem>>, vector<1x288x128xbf16>
    %23 = vector.shape_cast %22 : vector<1x288x128xbf16> to vector<288x128xbf16>
    %c0_20 = arith.constant 0 : index
    %c20 = arith.constant 20 : index
    %c0_21 = arith.constant 0 : index
    %24 = vector.load %arg1[%c0_20, %c20, %c0_21] : memref<1x342x128xbf16, #tpu.memory_space<vmem>>, vector<1x288x128xbf16>
    %25 = vector.shape_cast %24 : vector<1x288x128xbf16> to vector<288x128xbf16>
    %c0_22 = arith.constant 0 : index
    %c36 = arith.constant 36 : index
    %c0_23 = arith.constant 0 : index
    %26 = vector.load %arg1[%c0_22, %c36, %c0_23] : memref<1x342x128xbf16, #tpu.memory_space<vmem>>, vector<1x288x128xbf16>
    %27 = vector.shape_cast %26 : vector<1x288x128xbf16> to vector<288x128xbf16>
    %c0_24 = arith.constant 0 : index
    %c37 = arith.constant 37 : index
    %c0_25 = arith.constant 0 : index
    %28 = vector.load %arg1[%c0_24, %c37, %c0_25] : memref<1x342x128xbf16, #tpu.memory_space<vmem>>, vector<1x288x128xbf16>
    %29 = vector.shape_cast %28 : vector<1x288x128xbf16> to vector<288x128xbf16>
    %c0_26 = arith.constant 0 : index
    %c38 = arith.constant 38 : index
    %c0_27 = arith.constant 0 : index
    %30 = vector.load %arg1[%c0_26, %c38, %c0_27] : memref<1x342x128xbf16, #tpu.memory_space<vmem>>, vector<1x288x128xbf16>
    %31 = vector.shape_cast %30 : vector<1x288x128xbf16> to vector<288x128xbf16>
    %32 = tpu.concatenate %15, %17, %19, %21, %23, %25, %27, %29, %31 in 1 : vector<288x128xbf16>, vector<288x128xbf16>, vector<288x128xbf16>, vector<288x128xbf16>, vector<288x128xbf16>, vector<288x128xbf16>, vector<288x128xbf16>, vector<288x128xbf16>, vector<288x128xbf16> -> vector<288x1152xbf16>
    %c0_28 = arith.constant 0 : index
    %c0_29 = arith.constant 0 : index
    %33 = vector.load %arg5[%c0_28, %c0_29] : memref<1152x128xbf16, #tpu.memory_space<vmem>>, vector<1152x128xbf16>
    %cst = arith.constant dense<0.000000e+00> : vector<288x128xf32>
    %34 = tpu.matmul %32, %33, %cst {dimension_numbers = #tpu.dot_dimension_numbers<[1], [0], [0], [1], [0, 0, 1, 1], [], []>} : vector<288x1152xbf16>, vector<1152x128xbf16>, vector<288x128xf32> -> vector<288x128xf32>
    %35 = vector.broadcast %1 : vector<1x128xf32> to vector<288x128xf32>
    %36 = arith.addf %34, %35 : vector<288x128xf32>
    %37 = vector.broadcast %11 : vector<288x1xf32> to vector<288x128xf32>
    %38 = arith.mulf %36, %37 : vector<288x128xf32>
    %cst_30 = arith.constant dense<0.000000e+00> : vector<128xf32>
    %39 = vector.multi_reduction <add>, %38, %cst_30 [0] : vector<288x128xf32> to vector<128xf32>
    %40 = vector.shape_cast %39 : vector<128xf32> to vector<1x128xf32>
    %cst_31 = arith.constant dense<0.000000e+00> : vector<1x128xf32>
    %41 = tpu.matmul %40, %9, %cst_31 {dimension_numbers = #tpu.dot_dimension_numbers<[1], [0], [0], [1], [0, 0, 1, 1], [], []>} : vector<1x128xf32>, vector<128x128xf32>, vector<1x128xf32> -> vector<1x128xf32>
    %42 = vector.broadcast %41 : vector<1x128xf32> to vector<288x128xf32>
    %43 = arith.subf %36, %42 : vector<288x128xf32>
    %44 = arith.mulf %43, %43 : vector<288x128xf32>
    %45 = vector.broadcast %11 : vector<288x1xf32> to vector<288x128xf32>
    %46 = arith.mulf %44, %45 : vector<288x128xf32>
    %cst_32 = arith.constant dense<0.000000e+00> : vector<128xf32>
    %47 = vector.multi_reduction <add>, %46, %cst_32 [0] : vector<288x128xf32> to vector<128xf32>
    %48 = vector.shape_cast %47 : vector<128xf32> to vector<1x128xf32>
    %cst_33 = arith.constant dense<0.000000e+00> : vector<1x128xf32>
    %49 = tpu.matmul %48, %9, %cst_33 {dimension_numbers = #tpu.dot_dimension_numbers<[1], [0], [0], [1], [0, 0, 1, 1], [], []>} : vector<1x128xf32>, vector<128x128xf32>, vector<1x128xf32> -> vector<1x128xf32>
    %cst_34 = arith.constant 9.99999974E-6 : f32
    %50 = vector.broadcast %cst_34 : f32 to vector<1x128xf32>
    %51 = arith.addf %49, %50 : vector<1x128xf32>
    %52 = math.rsqrt %51 : vector<1x128xf32>
    %53 = vector.broadcast %52 : vector<1x128xf32> to vector<288x128xf32>
    %54 = arith.mulf %43, %53 : vector<288x128xf32>
    %55 = vector.broadcast %2 : vector<1x128xf32> to vector<288x128xf32>
    %56 = arith.mulf %54, %55 : vector<288x128xf32>
    %57 = vector.broadcast %3 : vector<1x128xf32> to vector<288x128xf32>
    %58 = arith.addf %56, %57 : vector<288x128xf32>
    %cst_35 = arith.constant 2.000000e+01 : f32
    %59 = vector.broadcast %cst_35 : f32 to vector<288x128xf32>
    %60 = arith.minimumf %58, %59 : vector<288x128xf32>
    %61 = math.exp %60 : vector<288x128xf32>
    %cst_36 = arith.constant 1.000000e+00 : f32
    %62 = vector.broadcast %cst_36 : f32 to vector<288x128xf32>
    %63 = arith.addf %62, %61 : vector<288x128xf32>
    %cst_37 = arith.constant 1.000000e+00 : f32
    %64 = vector.broadcast %cst_37 : f32 to vector<288x128xf32>
    %65 = arith.addf %64, %61 : vector<288x128xf32>
    %66 = arith.mulf %63, %65 : vector<288x128xf32>
    %cst_38 = arith.constant 1.000000e+00 : f32
    %67 = vector.broadcast %cst_38 : f32 to vector<288x128xf32>
    %68 = arith.subf %66, %67 : vector<288x128xf32>
    %69 = arith.mulf %58, %68 : vector<288x128xf32>
    %cst_39 = arith.constant 1.000000e+00 : f32
    %70 = vector.broadcast %cst_39 : f32 to vector<288x128xf32>
    %71 = arith.addf %66, %70 : vector<288x128xf32>
    %72 = arith.divf %69, %71 : vector<288x128xf32>
    %c0_40 = arith.constant 0 : index
    %c0_41 = arith.constant 0 : index
    %c0_42 = arith.constant 0 : index
    %73 = vector.load %arg4[%c0_40, %c0_41, %c0_42] : memref<1x1x32xf32, #tpu.memory_space<vmem>>, vector<1x1x32xf32>
    %74 = vector.shape_cast %73 : vector<1x1x32xf32> to vector<1x32xf32>
    %cst_43 = arith.constant 2.000000e+01 : f32
    %75 = vector.broadcast %cst_43 : f32 to vector<1x32xf32>
    %76 = arith.minimumf %74, %75 : vector<1x32xf32>
    %77 = math.exp %76 : vector<1x32xf32>
    %cst_44 = arith.constant 1.000000e+00 : f32
    %78 = vector.broadcast %cst_44 : f32 to vector<1x32xf32>
    %79 = arith.addf %78, %77 : vector<1x32xf32>
    %cst_45 = arith.constant 1.000000e+00 : f32
    %80 = vector.broadcast %cst_45 : f32 to vector<1x32xf32>
    %81 = arith.addf %80, %77 : vector<1x32xf32>
    %82 = arith.mulf %79, %81 : vector<1x32xf32>
    %cst_46 = arith.constant 1.000000e+00 : f32
    %83 = vector.broadcast %cst_46 : f32 to vector<1x32xf32>
    %84 = arith.subf %82, %83 : vector<1x32xf32>
    %85 = arith.mulf %74, %84 : vector<1x32xf32>
    %cst_47 = arith.constant 1.000000e+00 : f32
    %86 = vector.broadcast %cst_47 : f32 to vector<1x32xf32>
    %87 = arith.addf %82, %86 : vector<1x32xf32>
    %88 = arith.divf %85, %87 : vector<1x32xf32>
    %c0_48 = arith.constant 0 : index
    %c0_49 = arith.constant 0 : index
    %89 = vector.load %arg7[%c0_48, %c0_49] : memref<32x128xf32, #tpu.memory_space<vmem>>, vector<32x128xf32>
    %cst_50 = arith.constant dense<0.000000e+00> : vector<1x128xf32>
    %90 = tpu.matmul %88, %89, %cst_50 {dimension_numbers = #tpu.dot_dimension_numbers<[1], [0], [0], [1], [0, 0, 1, 1], [], []>} : vector<1x32xf32>, vector<32x128xf32>, vector<1x128xf32> -> vector<1x128xf32>
    %91 = arith.addf %90, %7 : vector<1x128xf32>
    %92 = vector.broadcast %13 : vector<288x1xf32> to vector<288x128xf32>
    %93 = arith.mulf %72, %92 : vector<288x128xf32>
    %94 = vector.broadcast %91 : vector<1x128xf32> to vector<288x128xf32>
    %95 = arith.addf %93, %94 : vector<288x128xf32>
    %96 = vector.broadcast %13 : vector<288x1xf32> to vector<288x128xf32>
    %97 = arith.mulf %95, %96 : vector<288x128xf32>
    %cst_51 = arith.constant 0.000000e+00 : bf16
    %98 = vector.broadcast %cst_51 : bf16 to vector<19x128xbf16>
    %c0_52 = arith.constant 0 : index
    %c0_53 = arith.constant 0 : index
    %99 = vector.load %arg12[%c0_52, %c0_53] : memref<342x128xbf16, #tpu.memory_space<vmem>>, vector<19x128xbf16>
    tpu.vector_store %arg12[%c0_52, %c0_53], %98 {strides = array<i32>} : memref<342x128xbf16, #tpu.memory_space<vmem>>, vector<19x128xbf16>,
    %cst_54 = arith.constant 0.000000e+00 : bf16
    %100 = vector.broadcast %cst_54 : bf16 to vector<35x128xbf16>
    %c307 = arith.constant 307 : index
    %c0_55 = arith.constant 0 : index
    %101 = vector.load %arg12[%c307, %c0_55] : memref<342x128xbf16, #tpu.memory_space<vmem>>, vector<35x128xbf16>
    tpu.vector_store %arg12[%c307, %c0_55], %100 {strides = array<i32>} : memref<342x128xbf16, #tpu.memory_space<vmem>>, vector<35x128xbf16>,
    %102 = arith.truncf %97 : vector<288x128xf32> to vector<288x128xbf16>
    %c19_56 = arith.constant 19 : index
    %c0_57 = arith.constant 0 : index
    %103 = vector.load %arg12[%c19_56, %c0_57] : memref<342x128xbf16, #tpu.memory_space<vmem>>, vector<288x128xbf16>
    tpu.vector_store %arg12[%c19_56, %c0_57], %102 {strides = array<i32>} : memref<342x128xbf16, #tpu.memory_space<vmem>>, vector<288x128xbf16>,
    %c0_58 = arith.constant 0 : index
    %c0_59 = arith.constant 0 : index
    %104 = vector.load %arg12[%c0_58, %c0_59] : memref<342x128xbf16, #tpu.memory_space<vmem>>, vector<288x128xbf16>
    %c1_60 = arith.constant 1 : index
    %c0_61 = arith.constant 0 : index
    %105 = vector.load %arg12[%c1_60, %c0_61] : memref<342x128xbf16, #tpu.memory_space<vmem>>, vector<288x128xbf16>
    %c2_62 = arith.constant 2 : index
    %c0_63 = arith.constant 0 : index
    %106 = vector.load %arg12[%c2_62, %c0_63] : memref<342x128xbf16, #tpu.memory_space<vmem>>, vector<288x128xbf16>
    %c18_64 = arith.constant 18 : index
    %c0_65 = arith.constant 0 : index
    %107 = vector.load %arg12[%c18_64, %c0_65] : memref<342x128xbf16, #tpu.memory_space<vmem>>, vector<288x128xbf16>
    %c19_66 = arith.constant 19 : index
    %c0_67 = arith.constant 0 : index
    %108 = vector.load %arg12[%c19_66, %c0_67] : memref<342x128xbf16, #tpu.memory_space<vmem>>, vector<288x128xbf16>
    %c20_68 = arith.constant 20 : index
    %c0_69 = arith.constant 0 : index
    %109 = vector.load %arg12[%c20_68, %c0_69] : memref<342x128xbf16, #tpu.memory_space<vmem>>, vector<288x128xbf16>
    %c36_70 = arith.constant 36 : index
    %c0_71 = arith.constant 0 : index
    %110 = vector.load %arg12[%c36_70, %c0_71] : memref<342x128xbf16, #tpu.memory_space<vmem>>, vector<288x128xbf16>
    %c37_72 = arith.constant 37 : index
    %c0_73 = arith.constant 0 : index
    %111 = vector.load %arg12[%c37_72, %c0_73] : memref<342x128xbf16, #tpu.memory_space<vmem>>, vector<288x128xbf16>
    %c38_74 = arith.constant 38 : index
    %c0_75 = arith.constant 0 : index
    %112 = vector.load %arg12[%c38_74, %c0_75] : memref<342x128xbf16, #tpu.memory_space<vmem>>, vector<288x128xbf16>
    %113 = tpu.concatenate %104, %105, %106, %107, %108, %109, %110, %111, %112 in 1 : vector<288x128xbf16>, vector<288x128xbf16>, vector<288x128xbf16>, vector<288x128xbf16>, vector<288x128xbf16>, vector<288x128xbf16>, vector<288x128xbf16>, vector<288x128xbf16>, vector<288x128xbf16> -> vector<288x1152xbf16>
    %c0_76 = arith.constant 0 : index
    %c0_77 = arith.constant 0 : index
    %114 = vector.load %arg6[%c0_76, %c0_77] : memref<1152x128xbf16, #tpu.memory_space<vmem>>, vector<1152x128xbf16>
    %cst_78 = arith.constant dense<0.000000e+00> : vector<288x128xf32>
    %115 = tpu.matmul %113, %114, %cst_78 {dimension_numbers = #tpu.dot_dimension_numbers<[1], [0], [0], [1], [0, 0, 1, 1], [], []>} : vector<288x1152xbf16>, vector<1152x128xbf16>, vector<288x128xf32> -> vector<288x128xf32>
    %116 = vector.broadcast %4 : vector<1x128xf32> to vector<288x128xf32>
    %117 = arith.addf %115, %116 : vector<288x128xf32>
    %118 = vector.broadcast %11 : vector<288x1xf32> to vector<288x128xf32>
    %119 = arith.mulf %117, %118 : vector<288x128xf32>
    %cst_79 = arith.constant dense<0.000000e+00> : vector<128xf32>
    %120 = vector.multi_reduction <add>, %119, %cst_79 [0] : vector<288x128xf32> to vector<128xf32>
    %121 = vector.shape_cast %120 : vector<128xf32> to vector<1x128xf32>
    %cst_80 = arith.constant dense<0.000000e+00> : vector<1x128xf32>
    %122 = tpu.matmul %121, %9, %cst_80 {dimension_numbers = #tpu.dot_dimension_numbers<[1], [0], [0], [1], [0, 0, 1, 1], [], []>} : vector<1x128xf32>, vector<128x128xf32>, vector<1x128xf32> -> vector<1x128xf32>
    %123 = vector.broadcast %122 : vector<1x128xf32> to vector<288x128xf32>
    %124 = arith.subf %117, %123 : vector<288x128xf32>
    %125 = arith.mulf %124, %124 : vector<288x128xf32>
    %126 = vector.broadcast %11 : vector<288x1xf32> to vector<288x128xf32>
    %127 = arith.mulf %125, %126 : vector<288x128xf32>
    %cst_81 = arith.constant dense<0.000000e+00> : vector<128xf32>
    %128 = vector.multi_reduction <add>, %127, %cst_81 [0] : vector<288x128xf32> to vector<128xf32>
    %129 = vector.shape_cast %128 : vector<128xf32> to vector<1x128xf32>
    %cst_82 = arith.constant dense<0.000000e+00> : vector<1x128xf32>
    %130 = tpu.matmul %129, %9, %cst_82 {dimension_numbers = #tpu.dot_dimension_numbers<[1], [0], [0], [1], [0, 0, 1, 1], [], []>} : vector<1x128xf32>, vector<128x128xf32>, vector<1x128xf32> -> vector<1x128xf32>
    %cst_83 = arith.constant 9.99999974E-6 : f32
    %131 = vector.broadcast %cst_83 : f32 to vector<1x128xf32>
    %132 = arith.addf %130, %131 : vector<1x128xf32>
    %133 = math.rsqrt %132 : vector<1x128xf32>
    %134 = vector.broadcast %133 : vector<1x128xf32> to vector<288x128xf32>
    %135 = arith.mulf %124, %134 : vector<288x128xf32>
    %136 = vector.broadcast %5 : vector<1x128xf32> to vector<288x128xf32>
    %137 = arith.mulf %135, %136 : vector<288x128xf32>
    %138 = vector.broadcast %6 : vector<1x128xf32> to vector<288x128xf32>
    %139 = arith.addf %137, %138 : vector<288x128xf32>
    %cst_84 = arith.constant 2.000000e+01 : f32
    %140 = vector.broadcast %cst_84 : f32 to vector<288x128xf32>
    %141 = arith.minimumf %139, %140 : vector<288x128xf32>
    %142 = math.exp %141 : vector<288x128xf32>
    %cst_85 = arith.constant 1.000000e+00 : f32
    %143 = vector.broadcast %cst_85 : f32 to vector<288x128xf32>
    %144 = arith.addf %143, %142 : vector<288x128xf32>
    %cst_86 = arith.constant 1.000000e+00 : f32
    %145 = vector.broadcast %cst_86 : f32 to vector<288x128xf32>
    %146 = arith.addf %145, %142 : vector<288x128xf32>
    %147 = arith.mulf %144, %146 : vector<288x128xf32>
    %cst_87 = arith.constant 1.000000e+00 : f32
    %148 = vector.broadcast %cst_87 : f32 to vector<288x128xf32>
    %149 = arith.subf %147, %148 : vector<288x128xf32>
    %150 = arith.mulf %139, %149 : vector<288x128xf32>
    %cst_88 = arith.constant 1.000000e+00 : f32
    %151 = vector.broadcast %cst_88 : f32 to vector<288x128xf32>
    %152 = arith.addf %147, %151 : vector<288x128xf32>
    %153 = arith.divf %150, %152 : vector<288x128xf32>
    %c0_89 = arith.constant 0 : index
    %c19_90 = arith.constant 19 : index
    %c0_91 = arith.constant 0 : index
    %154 = vector.load %arg1[%c0_89, %c19_90, %c0_91] : memref<1x342x128xbf16, #tpu.memory_space<vmem>>, vector<1x288x128xbf16>
    %155 = vector.shape_cast %154 : vector<1x288x128xbf16> to vector<288x128xbf16>
    %c0_92 = arith.constant 0 : index
    %c0_93 = arith.constant 0 : index
    %156 = vector.load %arg10[%c0_92, %c0_93] : memref<128x128xbf16, #tpu.memory_space<vmem>>, vector<128x128xbf16>
    %cst_94 = arith.constant dense<0.000000e+00> : vector<288x128xf32>
    %157 = tpu.matmul %155, %156, %cst_94 {dimension_numbers = #tpu.dot_dimension_numbers<[1], [0], [0], [1], [0, 0, 1, 1], [], []>} : vector<288x128xbf16>, vector<128x128xbf16>, vector<288x128xf32> -> vector<288x128xf32>
    %158 = vector.broadcast %8 : vector<1x128xf32> to vector<288x128xf32>
    %159 = arith.addf %157, %158 : vector<288x128xf32>
    %160 = vector.broadcast %13 : vector<288x1xf32> to vector<288x128xf32>
    %161 = arith.mulf %153, %160 : vector<288x128xf32>
    %162 = arith.addf %161, %159 : vector<288x128xf32>
    %c0_95 = arith.constant 0 : index
    %c0_96 = arith.constant 0 : index
    %c0_97 = arith.constant 0 : index
    %163 = vector.load %arg11[%c0_95, %c0_96, %c0_97] : memref<1x288x128xf32, #tpu.memory_space<vmem>>, vector<1x288x128xf32>
    %164 = vector.shape_cast %163 : vector<1x288x128xf32> to vector<288x128xf32>
    %165 = vector.shape_cast %162 : vector<288x128xf32> to vector<1x288x128xf32>
    tpu.vector_store %arg11[%c0_95, %c0_96, %c0_97], %165 {strides = array<i32>} : memref<1x288x128xf32, #tpu.memory_space<vmem>>, vector<1x288x128xf32>,
    return
  }
  func.func @transform_0(%arg0: i32) -> (i32, i32, i32) {
    %c0_i32 = arith.constant 0 : i32
    %c0_i32_0 = arith.constant 0 : i32
    %c0_i32_1 = arith.constant 0 : i32
    return %arg0, %c0_i32, %c0_i32_0 : i32, i32, i32
  }
  func.func @transform_1(%arg0: i32) -> (i32, i32, i32) {
    %c0_i32 = arith.constant 0 : i32
    %c0_i32_0 = arith.constant 0 : i32
    %c0_i32_1 = arith.constant 0 : i32
    return %arg0, %c0_i32, %c0_i32_0 : i32, i32, i32
  }
  func.func @transform_2(%arg0: i32) -> (i32, i32, i32) {
    %c0_i32 = arith.constant 0 : i32
    %c0_i32_0 = arith.constant 0 : i32
    %c0_i32_1 = arith.constant 0 : i32
    %c0_i32_2 = arith.constant 0 : i32
    return %c0_i32, %c0_i32_0, %c0_i32_1 : i32, i32, i32
  }
  func.func @transform_3(%arg0: i32) -> (i32, i32, i32) {
    %c0_i32 = arith.constant 0 : i32
    %c0_i32_0 = arith.constant 0 : i32
    %c0_i32_1 = arith.constant 0 : i32
    return %arg0, %c0_i32, %c0_i32_0 : i32, i32, i32
  }
  func.func @transform_4(%arg0: i32) -> (i32, i32) {
    %c0_i32 = arith.constant 0 : i32
    %c0_i32_0 = arith.constant 0 : i32
    %c0_i32_1 = arith.constant 0 : i32
    return %c0_i32, %c0_i32_0 : i32, i32
  }
  func.func @transform_5(%arg0: i32) -> (i32, i32) {
    %c0_i32 = arith.constant 0 : i32
    %c0_i32_0 = arith.constant 0 : i32
    %c0_i32_1 = arith.constant 0 : i32
    return %c0_i32, %c0_i32_0 : i32, i32
  }
  func.func @transform_6(%arg0: i32) -> (i32, i32) {
    %c0_i32 = arith.constant 0 : i32
    %c0_i32_0 = arith.constant 0 : i32
    %c0_i32_1 = arith.constant 0 : i32
    return %c0_i32, %c0_i32_0 : i32, i32
  }
  func.func @transform_7(%arg0: i32) -> (i32, i32) {
    %c0_i32 = arith.constant 0 : i32
    %c0_i32_0 = arith.constant 0 : i32
    %c0_i32_1 = arith.constant 0 : i32
    return %c0_i32, %c0_i32_0 : i32, i32
  }
  func.func @transform_8(%arg0: i32) -> (i32, i32) {
    %c0_i32 = arith.constant 0 : i32
    %c0_i32_0 = arith.constant 0 : i32
    %c0_i32_1 = arith.constant 0 : i32
    return %c0_i32, %c0_i32_0 : i32, i32
  }
  func.func @transform_9(%arg0: i32) -> (i32, i32) {
    %c0_i32 = arith.constant 0 : i32
    %c0_i32_0 = arith.constant 0 : i32
    %c0_i32_1 = arith.constant 0 : i32
    return %c0_i32, %c0_i32_0 : i32, i32
  }
  func.func @transform_10(%arg0: i32) -> (i32, i32, i32) {
    %c0_i32 = arith.constant 0 : i32
    %c0_i32_0 = arith.constant 0 : i32
    %c0_i32_1 = arith.constant 0 : i32
    return %arg0, %c0_i32, %c0_i32_0 : i32, i32, i32
  }
}

</mosaic_0001>

<bundles_post_ra>
// kernel: tpu_custom_call.1
= control target key start
LH: loop header
LB: loop body
LE: loop exit
PB: predicated region body
PF: predicated region fallthrough
CT: control target
= control target key end

     0   :  { %15 = vsyncpa [#allocation4], 0  ;;  %s15851_s0 = inlined_call_operand.vmem [shape: bf16[2,342,128], index: 0, kind: input, shape index: {}]   ;;  %s15852_s1 = inlined_call_operand.vmem [shape: f32[2,288,1], index: 1, kind: input, shape index: {}]   ;;  %s15853_s2 = inlined_call_operand.vmem [shape: f32[1,288,1], index: 2, kind: input, shape index: {}]   ;;  %s15854_s3 = inlined_call_operand.vmem [shape: f32[2,1,32], index: 3, kind: input, shape index: {}]   ;;  %s15855_s4 = inlined_call_operand.vmem [shape: bf16[1152,128], index: 4, kind: input, shape index: {}]   ;;  %s15856_s5 = inlined_call_operand.vmem [shape: bf16[1152,128], index: 5, kind: input, shape index: {}]   ;;  %s15857_s6 = inlined_call_operand.vmem [shape: f32[32,128], index: 6, kind: input, shape index: {}]   ;;  %s15858_s7 = inlined_call_operand.vmem [shape: f32[8,128], index: 7, kind: input, shape index: {}]   ;;  %s15859_s8 = inlined_call_operand.vmem [shape: f32[128,128], index: 8, kind: input, shape index: {}]   ;;  %s15860_s9 = inlined_call_operand.vmem [shape: bf16[128,128], index: 9, kind: input, shape index: {}]   ;;  %s15861_s10 = inlined_call_operand.hbm [shape: f32[2,288,128], index: 10, kind: output, shape index: {}]  }
   0x1   :  { %17 = vsyncpa [#allocation4 + $0x1], 0  ;;  %s10160_s13 = smov 0   ;;  %s10162_s14 = smov 0  }
   0x2   :  { %s10164_s15 = smov 0   ;;  %s10166_s16 = smov 0  }
   0x3 LB: > { %s10181_s17 = sadd.s32 4294967295, %s10097_s16   ;;  %s8543_s18 = sadd.s32 4294967294, %s10097_s16   ;;  %s10097_s16 = sphi %s10166_s16, %s16681_s16   ;;  %s10093_s15 = sphi %s10164_s15, %s16680_s15   ;;  %s10089_s14 = sphi %s10162_s14, %s16679_s14   ;;  %s10085_s13 = sphi %s10160_s13, %s16678_s13  }
   0x4   : > { %s10185_s19 = sadd.s32 1, %s10097_s16   ;;  %s255_s20 = sadd.s32 1, %s10093_s15 }
   0x5   : > { %s252_s21 = ssub.s32 %s10097_s16, %s10185_s19  ;;  %p265_p0 = scmp.ne.s32.totalorder %s10093_s15, %s10089_s14 }
   0x6   : > { %p253_p1 = scmp.eq.s32.totalorder %s252_s21, 0  ;;  %p266_p2 = scmp.eq.s32.totalorder %s10181_s17, 1 }
   0x7   : > { %p271_p3 = scmp.ne.s32.totalorder %s10089_s14, %s10085_s13  ;;  %p272_p4 = scmp.eq.s32.totalorder %s8543_s18, 1 }
   0x8   : > { %s10196_s22 = scalar_select %p253_p1, %s10093_s15, %s255_s20  }
   0x9   : > { %p10198_p5 = por %p266_p2, %p265_p0  ;;  %p10202_p6 = por %p272_p4, %p271_p3 }
   0xa   : > { %p8546_p7 = scmp.ge.s32.totalorder %s10097_s16, 1  ;;  %p333_p8 = scmp.lt.s32.totalorder %s10097_s16, 3 }
   0xc   : > { %p334_p9 = pnand %p8546_p7, %p333_p8 }
   0xe   : > { %337 = sbr.rel (%p334_p9) target bundleno = 2622 (0xa3e), region = 60 }
  0x13   : > { %v9453_v0 = vld [vmem:[%s15855_s4 + $0x38] sm:$0xff]   ;;  %v15862_v1 = vmov 0   ;;  %v9455_v3 = vld [vmem:[%s15855_s4 + $0x30] sm:$0xff]   ;;  %v9457_v5 = vld [vmem:[%s15855_s4 + $0x28] sm:$0xff]   ;;  %p379_p10 = scmp.lt.s32.totalorder %s10181_s17, 1  ;;  %vm813_vm1 = vcmask 1046528  }
  0x14   : > { %1831 = vmatprep.subr.bf16.mxu0 %v15862_v1  ;;  %4131 = vst [vmem:[#allocation2] sm:$0xf] %v15862_v1  ;;  %4132 = vst [vmem:[#allocation2 + $0x4] sm:$0xf] %v15862_v1  ;;  %2008 = vmatprep.subr.bf16.mxu1 %v15862_v1  ;;  %v9454_v2 = vld [vmem:[%s15855_s4 + $0xb8] sm:$0xff]   ;;  %v9456_v4 = vld [vmem:[%s15855_s4 + $0xb0] sm:$0xff]  }
  0x15   : > { %4145 = vst [vmem:[#allocation2 + $0x9c] sm:$0xf] %v15862_v1  ;;  %4146 = vst [vmem:[#allocation2 + $0xa0] sm:$0xf] %v15862_v1  ;;  %1832 = vmatpush1.bf16.msra.mxu0 %v9453_v0  ;;  %9451 = vset.pattern.permute.xlu0 %v15862_v1  ;;  %v9458_v6 = vld [vmem:[%s15855_s4 + $0xa8] sm:$0xff]   ;;  %v9459_v7 = vld [vmem:[%s15855_s4 + $0x20] sm:$0xff]  }
  0x16   : > { %2009 = vmatpush1.bf16.msra.mxu1 %v9454_v2  ;;  %1833 = vmatprep.subr.bf16.mxu0 %v15862_v1  ;;  %v9460_v8 = vld [vmem:[%s15855_s4 + $0xa0] sm:$0xff]   ;;  %v9461_v9 = vld [vmem:[%s15855_s4 + $0x18] sm:$0xff]   ;;  %v9463_v11 = vld [vmem:[%s15855_s4 + $0x10] sm:$0xff]   ;;  %s10264_s27 = scalar_select %p379_p10, %s10181_s17, 1  ;;  %vm643_vm0 = vsmask.f32 7424 }
  0x17   : > { %2010 = vmatprep.subr.bf16.mxu1 %v15862_v1  ;;  %9452 = vset.pattern.permute.xlu1 %v15862_v1  ;;  %v9462_v10 = vld [vmem:[%s15855_s4 + $0x98] sm:$0xff]   ;;  %v9464_v12 = vld [vmem:[%s15855_s4 + $0x90] sm:$0xff]   ;;  %v9465_v13 = vld [vmem:[%s15855_s4 + $0x8] sm:$0xff]   ;;  %vm1004_vm2 = vcmask 1045504   ;;  %vm892_vm3 = vsmask.f32 6400 }
  0x18   : > { %v9466_v14 = vld [vmem:[%s15855_s4 + $0x88] sm:$0xff]   ;;  %s9404_s12 = smul.u32 172, %s10264_s27  ;;  %v9467_v15 = vld [vmem:[%s15855_s4] sm:$0xff]   ;;  %v9469_v17 = vld [vmem:[%s15855_s4 + $0x78] sm:$0xff]   ;;  %vm1083_vm4 = vsmask.f32 5376 }
  0x19   : > { %1834 = vmatpush1.bf16.msra.mxu0 %v9455_v3  ;;  %v9468_v16 = vld [vmem:[%s15855_s4 + $0x80] sm:$0xff]   ;;  %v9470_v18 = vld [vmem:[%s15855_s4 + $0xf8] sm:$0xff]   ;;  %v9471_v24 = vld [vmem:[%s15855_s4 + $0x70] sm:$0xff]   ;;  %s9405_s26 = smul.u32 288, %s10264_s27  ;;  %vm1195_vm5 = vcmask 1044480   ;;  %vm4133_vm6 = vcmask 1041408  }
  0x1a   : > { %2011 = vmatpush1.bf16.msra.mxu1 %v9456_v4  ;;  %1835 = vmatprep.subr.bf16.mxu0 %v15862_v1  ;;  %s10286_s29 = scalar_lea.vmem %s15851_s0, %s9404_s12  ;;  %v9472_v31 = vld [vmem:[%s15855_s4 + $0xf0] sm:$0xff]   ;;  %v9473_v39 = vld [vmem:[%s15855_s4 + $0x68] sm:$0xff]   ;;  %v9475_v44 = vld [vmem:[%s15855_s4 + $0x60] sm:$0xff]   ;;  %vm4134_vm7 = vsmask.f32 1280  ;;  %vm4139_vm8 = vcmask 1043457  }
  0x1b   : > { %2012 = vmatprep.subr.bf16.mxu1 %v15862_v1  ;;  %v482_v19 = vld [vmem:[%s10286_s29] sm:$0xf]  ;;  %v10297_v20 = vld [vmem:[%s10286_s29 + $0x4] sm:$0xf]  ;;  %v484_v21 = vld [vmem:[%s10286_s29 + $0x8] sm:$0xf]  ;;  %s11034_s20 = scalar_lea.vmem %s15852_s1, %s9405_s26 }
  0x1c   : > { %v10302_v22 = vld [vmem:[%s10286_s29 + $0xc] sm:$0xf]  ;;  %v10305_v23 = vcombine.low %v482_v19, %v10297_v20  ;;  %v486_v26 = vld [vmem:[%s10286_s29 + $0x10] sm:$0xf]  ;;  %v487_v29 = vld [vmem:[%s10286_s29 + $0x14] sm:$0xf] }
  0x1d   : > { %1836 = vmatpush1.bf16.msra.mxu0 %v9457_v5  ;;  %v10311_v25 = vcombine.low %v484_v21, %v10302_v22  ;;  %v520_v30 = vld [vmem:[%s10286_s29 + $0x8] sm:$0xe]  ;;  %v10323_v33 = vcombine.low %v486_v26, %v487_v29  ;;  %v9476_v45 = vld [vmem:[%s15855_s4 + $0xe0] sm:$0xff]   ;;  %v9477_v46 = vld [vmem:[%s15855_s4 + $0x58] sm:$0xff]   ;;  %vm4140_vm9 = vsmask.f32 7942 }
  0x1e   : > { %2013 = vmatpush1.bf16.msra.mxu1 %v9458_v6  ;;  %1837 = vmatprep.subr.bf16.mxu0 %v15862_v1  ;;  %v645_v27 = vshrl.u32 %v10305_v23, 16  ;;  %v647_v28 = vshll.u32 %v10305_v23, 16  ;;  %v10326_v34 = vcombine.low %v520_v30, %v10302_v22  ;;  %v9474_v41 = vld [vmem:[%s15855_s4 + $0xe8] sm:$0xff]   ;;  %v9478_v47 = vld [vmem:[%s15855_s4 + $0xd8] sm:$0xff]   ;;  %v9479_v48 = vld [vmem:[%s15855_s4 + $0x50] sm:$0xff]   ;;  %vm10101_vm12 = vmmov 0  }
  0x1f   : > { %2014 = vmatprep.subr.bf16.mxu1 %v15862_v1  ;;  %v652_v32 = vshll.u32 %v10311_v25, 16  ;;  %v10330_v37 = vrot.slane %v10323_v33, 1  ;;  %v9480_v49 = vld [vmem:[%s15855_s4 + $0xd0] sm:$0xff]   ;;  %v519_v50 = vld [vmem:[%s10286_s29] sm:$0xe]  ;;  %v9481_v51 = vld [vmem:[%s15855_s4 + $0x48] sm:$0xff]  }
  0x20   : > { %v649_v35 = vrot.slane %v647_v28, 1  ;;  %v880_v38 = vrot.slane %v10326_v34, 1  ;;  %v9482_v52 = vld [vmem:[%s15855_s4 + $0xc8] sm:$0xff]   ;;  %v8568_v53 = vcombine.low %v519_v50, %v10297_v20  ;;  %v656_v54 = vshrl.u32 %v10311_v25, 16  ;;  %v10381_v56 = vld [vmem:[%s10286_s29 + $0x18] sm:$0xff]   ;;  %v9483_v57 = vld [vmem:[%s15855_s4 + $0x40] sm:$0xff]  }
  0x21   : > { %1838 = vmatpush1.bf16.msra.mxu0 %v9459_v7  ;;  %v654_v36 = vrot.slane %v652_v32, 1  ;;  %v660_v55 = vshll.u32 %v10323_v33, 16  ;;  %v9486_v58 = vld [vmem:[%s15855_s4 + $0xc0] sm:$0xff]   ;;  %v815_v60 = vrot.slane %v10311_v25, 1  ;;  %v819_v63 = vrot.slane %v10381_v56, 1  ;;  %v9489_v0 = vld [vmem:[%s15855_s4 + $0x138] sm:$0xff]   ;;  %vm11450_vm10 = vmand %vm4133_vm6, %vm4134_vm7 }
  0x22   : > { %2015 = vmatpush1.bf16.msra.mxu1 %v9460_v8  ;;  %1839 = vmatprep.subr.bf16.mxu0 %v15862_v1  ;;  %v650_v40 = vor.u32 %v649_v35, %v645_v27  ;;  %v881_v42 = vsel %vm813_vm1, %v880_v38, %v10330_v37  ;;  %v814_v59 = vrot.slane %v8568_v53, 1  ;;  %v10397_v2 = vld [vmem:[%s10286_s29 + $0x20] sm:$0xff]   ;;  %v664_v4 = vshrl.u32 %v10323_v33, 16  ;;  %v9508_v8 = vld [vmem:[%s15855_s4 + $0x1b8] sm:$0xff]   ;;  %v10437_v21 = vld [vmem:[%s10286_s29 + $0x28] sm:$0xff]   ;;  %s376_s28 = sand.u32 1, %s10089_s14  }
  0x23   : > { %2016 = vmatprep.subr.bf16.mxu1 %v15862_v1  ;;  %2040 = vmatprep.mubr.bf16.mxu1 %v881_v42  ;;  %v658_v61 = vor.u32 %v656_v54, %v654_v36  ;;  %v662_v62 = vrot.slane %v660_v55, 1  ;;  %v10403_v5 = vshll.u32 %v10381_v56, 16  ;;  %v820_v7 = vsel %vm813_vm1, %v10330_v37, %v819_v63  ;;  %v9496_v29 = vld [vmem:[%s15855_s4 + $0x120] sm:$0xff]   ;;  %v10462_v32 = vld [vmem:[%s10286_s29 + $0x30] sm:$0xff]   ;;  %vm11461_vm11 = vmand %vm4139_vm8, %vm4140_vm9  ;;  %s15580_s30 = smul.u32 288, %s376_s28 }
  0x24   : > { %v655_v43 = vsel %vm643_vm0, %v650_v40, %v654_v36  ;;  %v816_v3 = vsel %vm813_vm1, %v814_v59, %v815_v60  ;;  %v10434_v20 = vshll.u32 %v10397_v2, 16  ;;  %v823_v30 = vrot.slane %v10437_v21, 1  ;;  %v9500_v42 = vld [vmem:[%s15855_s4 + $0x110] sm:$0xff]   ;;  %s9406_s18 = smul.u32 4608, %s10181_s17  ;;  %s15811_s17 = scalar_lea.sflag [#allocation4], %s376_s28 }
  0x25   : > { %1840 = vmatpush1.bf16.msra.mxu0 %v9461_v9  ;;  %1863 = vmatprep.mubr.bf16.mxu0 %v655_v43  ;;  %v663_v6 = vsel %vm643_vm0, %v658_v61, %v662_v62  ;;  %v9492_v9 = vld [vmem:[%s15855_s4 + $0x130] sm:$0xff]   ;;  %v10466_v36 = vshll.u32 %v10437_v21, 16  ;;  %v825_v43 = vrot.slane %v10462_v32, 1  ;;  %vm3765_vm13 = vcmask 261120   ;;  %s15608_s11 = scalar_lea.vmem [#allocation3], %s15580_s30 }
  0x26   : > { %2017 = vmatpush1.bf16.msra.mxu1 %v9462_v10  ;;  %1841 = vmatprep.subr.bf16.mxu0 %v15862_v1  ;;  %v666_v10 = vor.u32 %v664_v4, %v662_v62  ;;  %v678_v28 = vrot.slane %v10434_v20, 1  ;;  %vm4257_vm14 = vsmask.f32 5392  ;;  %s15804_s21 = scalar_lea.hbm %s15861_s10, %s9406_s18 }
  0x27   : > { %2018 = vmatprep.subr.bf16.mxu1 %v15862_v1  ;;  %v10506_v50 = vsel %vm813_vm1, %v823_v30, %v825_v43  ;;  %vm13407_vm15 = vmor %vm4134_vm7, %vm4257_vm14 }
  0x29   : > { %1842 = vmatpush1.bf16.msra.mxu0 %v9463_v11  ;;  %v670_v11 = vrot.slane %v10403_v5, 1 }
  0x2a   : > { %2019 = vmatpush1.bf16.msra.mxu1 %v9464_v12  ;;  %1843 = vmatprep.subr.bf16.mxu0 %v15862_v1  ;;  %v821_v12 = vrot.slane %v10397_v2, 1 }
  0x2b   : > { %2020 = vmatprep.subr.bf16.mxu1 %v15862_v1  ;;  %v671_v19 = vsel %vm643_vm0, %v666_v10, %v670_v11 }
  0x2c   : > { %v10472_v38 = vsel %vm813_vm1, %v821_v12, %v823_v30 }
  0x2d   : > { %1844 = vmatpush1.bf16.msra.mxu0 %v9465_v13  ;;  %v9511_v13 = vld [vmem:[%s15855_s4 + $0x1b0] sm:$0xff]  }
  0x2e   : > { %2021 = vmatpush1.bf16.msra.mxu1 %v9466_v14  ;;  %1845 = vmatprep.subr.bf16.mxu0 %v15862_v1  ;;  %v902_v14 = vrot.slane %v660_v55, 2  ;;  %v10519_v55 = vshrl.u32 %v10462_v32, 16 }
  0x2f   : > { %2022 = vmatprep.subr.bf16.mxu1 %v15862_v1 }
  0x31   : > { %1846 = vmatpush1.bf16.msra.mxu0 %v9467_v15  ;;  %v901_v15 = vrot.slane %v664_v4, 1 }
  0x32   : > { %2023 = vmatpush1.bf16.msra.mxu1 %v9468_v16  ;;  %1847 = vmatprep.subr.bf16.mxu0 %v15862_v1  ;;  %v9494_v16 = vld [vmem:[%s15855_s4 + $0x128] sm:$0xff]  }
  0x33   : > { %2024 = vmatprep.subr.bf16.mxu1 %v15862_v1  ;;  %v10445_v26 = vor.u32 %v902_v14, %v901_v15 }
  0x35   : > { %1848 = vmatpush2.bf16.msra.mxu0 %v9469_v17  ;;  %v10426_v17 = vshrl.u32 %v10381_v56, 16 }
  0x36   : > { %2025 = vmatpush2.bf16.msra.mxu1 %v9470_v18  ;;  %1849 = vmatprep.subr.bf16.mxu0 %v15862_v1  ;;  %v818_v18 = vsel %vm813_vm1, %v815_v60, %v10330_v37  ;;  %v9498_v37 = vld [vmem:[%s15855_s4 + $0x118] sm:$0xff]   ;;  %v1006_v60 = vrot.slane %v10323_v33, 2 }
  0x37   : > { %2026 = vmatprep.subr.bf16.mxu1 %v15862_v1  ;;  %v674_v27 = vor.u32 %v10426_v17, %v670_v11  ;;  %v1093_v11 = vrot.slane %v10403_v5, 3 }
  0x39   : > { %1850 = vmatpush2.bf16.msra.mxu0 %v9471_v24  ;;  %v9514_v24 = vld [vmem:[%s15855_s4 + $0x1a8] sm:$0xff]   ;;  %v679_v35 = vsel %vm643_vm0, %v674_v27, %v678_v28 }
  0x3a   : > { %2027 = vmatpush2.bf16.msra.mxu1 %v9472_v31  ;;  %1851 = vmatprep.subr.bf16.mxu0 %v15862_v1  ;;  %v10458_v31 = vshrl.u32 %v10397_v2, 16 }
  0x3b   : > { %2028 = vmatprep.subr.bf16.mxu1 %v15862_v1 }
  0x3c   : > { %v682_v40 = vor.u32 %v10458_v31, %v678_v28  ;;  %v1096_v27 = vrot.slane %v10458_v31, 2 }
  0x3d   : > { %1852 = vmatpush2.bf16.msra.mxu0 %v9473_v39  ;;  %v9517_v39 = vld [vmem:[%s15855_s4 + $0x198] sm:$0xff]  }
  0x3e   : > { %2029 = vmatpush2.bf16.msra.mxu1 %v9474_v41  ;;  %1853 = vmatprep.subr.bf16.mxu0 %v15862_v1  ;;  %v686_v41 = vrot.slane %v10466_v36, 1 }
  0x3f   : > { %2030 = vmatprep.subr.bf16.mxu1 %v15862_v1 }
  0x41   : > { %1854 = vmatpush2.bf16.msra.mxu0 %v9475_v44  ;;  %v9519_v44 = vld [vmem:[%s15855_s4 + $0x190] sm:$0xff]  }
  0x42   : > { %2031 = vmatpush2.bf16.msra.mxu1 %v9476_v45  ;;  %1855 = vmatprep.subr.bf16.mxu0 %v15862_v1  ;;  %v10492_v45 = vshll.u32 %v10462_v32, 16 }
  0x43   : > { %2032 = vmatprep.subr.bf16.mxu1 %v15862_v1 }
  0x44   : > { %v694_v53 = vrot.slane %v10492_v45, 1 }
  0x45   : > { %1856 = vmatpush2.bf16.msra.mxu0 %v9477_v46  ;;  %v10495_v46 = vld [vmem:[%s10286_s29 + $0x38] sm:$0xff]  }
  0x46   : > { %2033 = vmatpush2.bf16.msra.mxu1 %v9478_v47  ;;  %1857 = vmatprep.subr.bf16.mxu0 %v15862_v1  ;;  %v687_v47 = vsel %vm643_vm0, %v682_v40, %v686_v41  ;;  %v827_v54 = vrot.slane %v10495_v46, 1  ;;  %v10532_v62 = vshrl.u32 %v10495_v46, 16  ;;  %v698_v40 = vor.u32 %v10519_v55, %v694_v53 }
  0x47   : > { %2034 = vmatprep.subr.bf16.mxu1 %v15862_v1 }
  0x49   : > { %1858 = vmatpush2.bf16.msra.mxu0 %v9479_v48  ;;  %v10500_v48 = vshrl.u32 %v10437_v21, 16 }
  0x4a   : > { %2035 = vmatpush2.bf16.msra.mxu1 %v9480_v49  ;;  %1859 = vmatprep.subr.bf16.mxu0 %v15862_v1  ;;  %v9502_v49 = vld [vmem:[%s15855_s4 + $0x108] sm:$0xff]  }
  0x4b   : > { %2036 = vmatprep.subr.bf16.mxu1 %v15862_v1  ;;  %v690_v61 = vor.u32 %v10500_v48, %v686_v41  ;;  %v910_v41 = vrot.slane %v10434_v20, 2 }
  0x4d   : > { %1860 = vmatpush2.bf16.msra.mxu0 %v9481_v51  ;;  %v10509_v51 = vshll.u32 %v10495_v46, 16 }
  0x4e   : > { %2037 = vmatpush2.bf16.msra.mxu1 %v9482_v52  ;;  %1861 = vmatprep.subr.bf16.mxu0 %v15862_v1  ;;  %v9521_v52 = vld [vmem:[%s15855_s4 + $0x188] sm:$0xff]  }
  0x4f   : > { %2038 = vmatprep.subr.bf16.mxu1 %v15862_v1 }
  0x51   : > { %1862 = vmatpush2.bf16.msra.mxu0 %v9483_v57  ;;  %v10522_v57 = vld [vmem:[%s10286_s29 + $0x40] sm:$0xff]  }
  0x52   : > { %2039 = vmatpush2.bf16.msra.mxu1 %v9486_v58  ;;  %2185 = vmatprep.subr.bf16.mxu0 %v15862_v1  ;;  %v525_v58 = vld [vmem:[%s10286_s29 + $0x8] sm:$0xc]  ;;  %v829_v14 = vrot.slane %v10522_v57, 1  ;;  %v10561_v15 = vshrl.u32 %v10522_v57, 16 }
  0x53   : > { %2362 = vmatprep.subr.bf16.mxu1 %v15862_v1  ;;  %v8573_v59 = vcombine.low %v525_v58, %v10302_v22  ;;  %v897_v22 = vshll.u32 %v10326_v34, 16  ;;  %v914_v58 = vrot.slane %v10466_v36, 2 }
  0x54   : > { %1864 = vmatmul.mubr.bf16.vlgmr.msra.gmra.mxu0 %v10305_v23  ;;  %v822_v23 = vsel %vm813_vm1, %v819_v63, %v821_v12  ;;  %v9504_v63 = vld [vmem:[%s15855_s4 + $0x100] sm:$0xff]   ;;  %v905_v12 = vrot.slane %v10426_v17, 1 }
  0x55   : > { %2186 = vmatpush1.bf16.msra.mxu0 %v9489_v0  ;;  %2041 = vmatmul.mubr.bf16.vlgmr.msra.gmra.mxu1 %v816_v3  ;;  %v702_v0 = vrot.slane %v10509_v51, 1  ;;  %v9523_v3 = vld [vmem:[%s15855_s4 + $0x180] sm:$0xff]   ;;  %v1005_v4 = vrot.slane %v8573_v59, 2  ;;  %v1104_v59 = vrot.slane %v10519_v55, 2 }
  0x56   : > { %1871 = vmatprep.mubr.bf16.mxu0 %v663_v6  ;;  %2048 = vmatprep.mubr.bf16.mxu1 %v820_v7 }
  0x57   : > { %2187 = vmatprep.subr.bf16.mxu0 %v15862_v1  ;;  %2363 = vmatpush1.bf16.msra.mxu1 %v9508_v8  ;;  %v10547_v8 = vld [vmem:[%s10286_s29 + $0x48] sm:$0xff]   ;;  %v10554_v10 = vsel %vm1004_vm2, %v1005_v4, %v1006_v60 }
  0x58   : > { %2364 = vmatprep.subr.bf16.mxu1 %v15862_v1 }
  0x59   : > { %2188 = vmatpush1.bf16.msra.mxu0 %v9492_v9  ;;  %v899_v9 = vrot.slane %v897_v22, 2 }
  0x5a   : > { %2189 = vmatprep.subr.bf16.mxu0 %v15862_v1 }
  0x5b   : > { %2365 = vmatpush1.bf16.msra.mxu1 %v9511_v13  ;;  %v695_v13 = vsel %vm643_vm0, %v690_v61, %v694_v53 }
  0x5c   : > { %1872 = vmatmul.mubr.bf16.gmra.mxu0 %v10311_v25  ;;  %2366 = vmatprep.subr.bf16.mxu1 %v15862_v1  ;;  %v9515_v25 = vld [vmem:[%s15855_s4 + $0x1a0] sm:$0xff]  }
  0x5d   : > { %2049 = vmatmul.mubr.bf16.gmra.mxu1 %v818_v18  ;;  %1879 = vmatprep.mubr.bf16.mxu0 %v671_v19  ;;  %v9525_v18 = vld [vmem:[%s15855_s4 + $0x1f8] sm:$0xff]  }
  0x5e   : > { %2056 = vmatprep.mubr.bf16.mxu1 %v822_v23  ;;  %2190 = vmatpush1.bf16.msra.mxu0 %v9494_v16  ;;  %v9507_v16 = vld [vmem:[%s15855_s4 + $0x178] sm:$0xff]  }
  0x5f   : > { %2191 = vmatprep.subr.bf16.mxu0 %v15862_v1  ;;  %2367 = vmatpush1.bf16.msra.mxu1 %v9514_v24  ;;  %v906_v24 = vrot.slane %v10403_v5, 2  ;;  %v10592_v5 = vld [vmem:[%s10286_s29 + $0x50] sm:$0xff]  }
  0x60   : > { %2368 = vmatprep.subr.bf16.mxu1 %v15862_v1  ;;  %v833_v22 = vrot.slane %v10592_v5, 1 }
  0x62   : > { %2192 = vmatpush1.bf16.msra.mxu0 %v9496_v29  ;;  %v831_v29 = vrot.slane %v10547_v8, 1 }
  0x63   : > { %2193 = vmatprep.subr.bf16.mxu0 %v15862_v1  ;;  %2369 = vmatpush1.bf16.msra.mxu1 %v9515_v25  ;;  %v10589_v25 = vshll.u32 %v10547_v8, 16 }
  0x64   : > { %1880 = vmatmul.mubr.bf16.gmra.mxu0 %v10323_v33  ;;  %2370 = vmatprep.subr.bf16.mxu1 %v15862_v1  ;;  %v436_v33 = vld [vmem:[%s15853_s2 + $0xd0] sm:$0xff] }
  0x65   : > { %2057 = vmatmul.mubr.bf16.gmra.mxu1 %v820_v7  ;;  %1887 = vmatprep.mubr.bf16.mxu0 %v679_v35  ;;  %v10544_v7 = vshll.u32 %v10522_v57, 16  ;;  %v907_v35 = vor.u32 %v906_v24, %v905_v12  ;;  %v706_v12 = vor.u32 %v10532_v62, %v702_v0  ;;  %v832_v24 = vsel %vm813_vm1, %v829_v14, %v831_v29 }
  0x66   : > { %2064 = vmatprep.mubr.bf16.mxu1 %v10472_v38  ;;  %2194 = vmatpush1.bf16.msra.mxu0 %v9498_v37  ;;  %v1097_v37 = vrot.slane %v10434_v20, 3 }
  0x67   : > { %2195 = vmatprep.subr.bf16.mxu0 %v15862_v1  ;;  %2371 = vmatpush1.bf16.msra.mxu1 %v9517_v39  ;;  %v710_v28 = vrot.slane %v10544_v7, 1  ;;  %v909_v39 = vrot.slane %v10458_v31, 1  ;;  %v10610_v31 = vsel %vm892_vm3, %v10445_v26, %v907_v35 }
  0x68   : > { %2372 = vmatprep.subr.bf16.mxu1 %v15862_v1 }
  0x6a   : > { %2196 = vmatpush1.bf16.msra.mxu0 %v9500_v42  ;;  %v1100_v42 = vrot.slane %v10500_v48, 2 }
  0x6b   : > { %2197 = vmatprep.subr.bf16.mxu0 %v15862_v1  ;;  %2373 = vmatpush1.bf16.msra.mxu1 %v9519_v44  ;;  %v1098_v44 = vor.u32 %v1097_v37, %v1096_v27  ;;  %v718_v27 = vrot.slane %v10589_v25, 1  ;;  %v9535_v37 = vld [vmem:[%s15855_s4 + $0x1d0] sm:$0xff]  }
  0x6c   : > { %1888 = vmatmul.mubr.bf16.gmra.mxu0 %v10381_v56  ;;  %2374 = vmatprep.subr.bf16.mxu1 %v15862_v1  ;;  %v894_v56 = vshrl.u32 %v10326_v34, 16  ;;  %v1092_v34 = vrot.slane %v10426_v17, 2  ;;  %v10572_v17 = vsel %vm813_vm1, %v825_v43, %v827_v54  ;;  %v1101_v43 = vrot.slane %v10466_v36, 3 }
  0x6d   : > { %2065 = vmatmul.mubr.bf16.gmra.mxu1 %v822_v23  ;;  %1895 = vmatprep.mubr.bf16.mxu0 %v687_v47  ;;  %v10613_v47 = vshrl.u32 %v10547_v8, 16  ;;  %v10641_v36 = vsel %vm813_vm1, %v827_v54, %v829_v14  ;;  %v9526_v14 = vld [vmem:[%s15855_s4 + $0x150] sm:$0xff]  }
  0x6e   : > { %2072 = vmatprep.mubr.bf16.mxu1 %v10506_v50  ;;  %2198 = vmatpush1.bf16.msra.mxu0 %v9502_v49  ;;  %v896_v6 = vrot.slane %v894_v56, 1  ;;  %v10575_v23 = vor.u32 %v1093_v11, %v1092_v34  ;;  %v911_v49 = vor.u32 %v910_v41, %v909_v39  ;;  %v1102_v20 = vor.u32 %v1101_v43, %v1100_v42  ;;  %v9513_v56 = vld [vmem:[%s15855_s4 + $0x168] sm:$0xff]  }
  0x6f   : > { %2199 = vmatprep.subr.bf16.mxu0 %v15862_v1  ;;  %2375 = vmatpush1.bf16.msra.mxu1 %v9521_v52  ;;  %v913_v52 = vrot.slane %v10500_v48, 1  ;;  %v917_v11 = vrot.slane %v10519_v55, 1  ;;  %v9522_v55 = vld [vmem:[%s15855_s4 + $0x158] sm:$0xff]   ;;  %v922_v39 = vrot.slane %v10509_v51, 2  ;;  %v834_v42 = vsel %vm813_vm1, %v831_v29, %v833_v22  ;;  %v9538_v43 = vld [vmem:[%s15855_s4 + $0x1c8] sm:$0xff]   ;;  %v9536_v29 = vld [vmem:[%s15855_s4 + $0x140] sm:$0xff]  }
  0x70   : > { %2376 = vmatprep.subr.bf16.mxu1 %v15862_v1  ;;  %v900_v19 = vor.u32 %v899_v9, %v896_v6  ;;  %v10619_v53 = vsel %vm1083_vm4, %v10575_v23, %v1098_v44  ;;  %v10630_v61 = vsel %vm892_vm3, %v907_v35, %v911_v49  ;;  %v10633_v48 = vsel %vm1083_vm4, %v1098_v44, %v1102_v20  ;;  %v9518_v6 = vld [vmem:[%s15855_s4 + $0x160] sm:$0xff]  }
  0x71   : > { %v915_v4 = vor.u32 %v914_v58, %v913_v52  ;;  %v9531_v9 = vld [vmem:[%s15855_s4 + $0x1e0] sm:$0xff]   ;;  %v10758_v58 = vld [vmem:[%s15855_s4 + $0x238] sm:$0xff]  }
  0x72   : > { %2200 = vmatpush1.bf16.msra.mxu0 %v9504_v63  ;;  %v10585_v30 = vsel %vm892_vm3, %v900_v19, %v10445_v26  ;;  %v703_v26 = vsel %vm643_vm0, %v698_v40, %v702_v0  ;;  %v1105_v63 = vrot.slane %v10492_v45, 3  ;;  %v714_v40 = vor.u32 %v10561_v15, %v710_v28  ;;  %v9540_v52 = vld [vmem:[%s15855_s4 + $0x1c0] sm:$0xff]  }
  0x73   : > { %2201 = vmatprep.subr.bf16.mxu0 %v15862_v1  ;;  %2377 = vmatpush1.bf16.msra.mxu1 %v9523_v3  ;;  %v9529_v3 = vld [vmem:[%s15855_s4 + $0x1e8] sm:$0xff]   ;;  %v10658_v34 = vsel %vm892_vm3, %v911_v49, %v915_v4  ;;  %v722_v49 = vor.u32 %v10613_v47, %v718_v27 }
  0x74   : > { %1896 = vmatmul.mubr.bf16.gmra.mxu0 %v10397_v2  ;;  %2378 = vmatprep.subr.bf16.mxu1 %v15862_v1  ;;  %v9510_v2 = vld [vmem:[%s15855_s4 + $0x170] sm:$0xff]   ;;  %v1106_v54 = vor.u32 %v1105_v63, %v1104_v59  ;;  %v719_v41 = vsel %vm643_vm0, %v714_v40, %v718_v27  ;;  %v10762_v59 = vshrl.u32 %v10592_v5, 16 }
  0x75   : > { %2073 = vmatmul.mubr.bf16.gmra.mxu1 %v10472_v38  ;;  %1903 = vmatprep.mubr.bf16.mxu0 %v695_v13  ;;  %v9527_v38 = vld [vmem:[%s15855_s4 + $0x1f0] sm:$0xff]  }
  0x76   : > { %2080 = vmatprep.mubr.bf16.mxu1 %v10572_v17  ;;  %2202 = vmatpush2.bf16.msra.mxu0 %v9507_v16  ;;  %v1109_v16 = vrot.slane %v10509_v51, 3  ;;  %v10723_v51 = vld [vmem:[%s10286_s29 + $0x58] sm:$0xff]  }
  0x77   : > { %2203 = vmatprep.subr.bf16.mxu0 %v15862_v1  ;;  %2379 = vmatpush2.bf16.msra.mxu1 %v9525_v18  ;;  %v711_v18 = vsel %vm643_vm0, %v706_v12, %v710_v28 }
  0x78   : > { %2380 = vmatprep.subr.bf16.mxu1 %v15862_v1 }
  0x7a   : > { %2204 = vmatpush2.bf16.msra.mxu0 %v9510_v2  ;;  %v9533_v2 = vld [vmem:[%s15855_s4 + $0x1d8] sm:$0xff]  }
  0x7b   : > { %2205 = vmatprep.subr.bf16.mxu0 %v15862_v1  ;;  %2381 = vmatpush2.bf16.msra.mxu1 %v9527_v38  ;;  %v10716_v38 = vshll.u32 %v10592_v5, 16 }
  0x7c   : > { %1904 = vmatmul.mubr.bf16.gmra.mxu0 %v10437_v21  ;;  %2382 = vmatprep.subr.bf16.mxu1 %v15862_v1  ;;  %v918_v21 = vrot.slane %v10492_v45, 2  ;;  %v1108_v45 = vrot.slane %v10532_v62, 2 }
  0x7d   : > { %2081 = vmatmul.mubr.bf16.gmra.mxu1 %v10506_v50  ;;  %1911 = vmatprep.mubr.bf16.mxu0 %v703_v26  ;;  %v10667_v50 = vsel %vm1083_vm4, %v1102_v20, %v1106_v54  ;;  %v726_v44 = vrot.slane %v10716_v38, 1  ;;  %v835_v20 = vrot.slane %v10723_v51, 1 }
  0x7e   : > { %2088 = vmatprep.mubr.bf16.mxu1 %v10641_v36  ;;  %2206 = vmatpush2.bf16.msra.mxu0 %v9513_v56  ;;  %v919_v13 = vor.u32 %v918_v21, %v917_v11  ;;  %v10682_v19 = vor.u32 %v1109_v16, %v1108_v45  ;;  %v9512_v21 = vld [vmem:[%s10286_s29 + $0x68] sm:$0xff]  }
  0x7f   : > { %2207 = vmatprep.subr.bf16.mxu0 %v15862_v1  ;;  %2383 = vmatpush2.bf16.msra.mxu1 %v9529_v3  ;;  %v727_v26 = vsel %vm643_vm0, %v722_v49, %v726_v44  ;;  %v836_v56 = vsel %vm813_vm1, %v833_v22, %v835_v20  ;;  %v730_v3 = vor.u32 %v10762_v59, %v726_v44  ;;  %v839_v12 = vrot.slane %v9512_v21, 1 }
  0x80   : > { %2384 = vmatprep.subr.bf16.mxu1 %v15862_v1  ;;  %v10677_v0 = vsel %vm892_vm3, %v915_v4, %v919_v13  ;;  %v10698_v35 = vsel %vm1083_vm4, %v1106_v54, %v10682_v19  ;;  %v10776_v54 = vshrl.u32 %v10723_v51, 16 }
  0x82   : > { %2208 = vmatpush2.bf16.msra.mxu0 %v9518_v6 }
  0x83   : > { %2209 = vmatprep.subr.bf16.mxu0 %v15862_v1  ;;  %2385 = vmatpush2.bf16.msra.mxu1 %v9531_v9 }
  0x84   : > { %1912 = vmatmul.mubr.bf16.gmra.mxu0 %v10462_v32  ;;  %2386 = vmatprep.subr.bf16.mxu1 %v15862_v1  ;;  %v921_v32 = vrot.slane %v10532_v62, 1  ;;  %v9530_v62 = vld [vmem:[%s15855_s4 + $0x148] sm:$0xff]  }
  0x85   : > { %2089 = vmatmul.mubr.bf16.gmra.mxu1 %v10572_v17  ;;  %1919 = vmatprep.mubr.bf16.mxu0 %v711_v18 }
  0x86   : > { %2096 = vmatprep.mubr.bf16.mxu1 %v832_v24  ;;  %2210 = vmatpush2.bf16.msra.mxu0 %v9522_v55  ;;  %v10713_v17 = vor.u32 %v922_v39, %v921_v32  ;;  %v10805_v39 = vld [vmem:[%s10286_s29 + $0x78] sm:$0xff]  }
  0x87   : > { %2211 = vmatprep.subr.bf16.mxu0 %v15862_v1  ;;  %2387 = vmatpush2.bf16.msra.mxu1 %v9533_v2  ;;  %v10797_v2 = vshrl.u32 %v9512_v21, 16 }
  0x88   : > { %2388 = vmatprep.subr.bf16.mxu1 %v15862_v1  ;;  %v10727_v28 = vsel %vm892_vm3, %v919_v13, %v10713_v17  ;;  %v10784_v13 = vshll.u32 %v9512_v21, 16 }
  0x8a   : > { %2212 = vmatpush2.bf16.msra.mxu0 %v9526_v14  ;;  %v750_v18 = vrot.slane %v10784_v13, 1 }
  0x8b   : > { %2213 = vmatprep.subr.bf16.mxu0 %v15862_v1  ;;  %2389 = vmatpush2.bf16.msra.mxu1 %v9535_v37 }
  0x8c   : > { %1920 = vmatmul.mubr.bf16.gmra.mxu0 %v10495_v46  ;;  %2390 = vmatprep.subr.bf16.mxu1 %v15862_v1  ;;  %v10749_v46 = vshll.u32 %v10723_v51, 16  ;;  %v754_v40 = vor.u32 %v10797_v2, %v750_v18 }
  0x8d   : > { %2097 = vmatmul.mubr.bf16.gmra.mxu1 %v10641_v36  ;;  %1927 = vmatprep.mubr.bf16.mxu0 %v719_v41  ;;  %v9509_v36 = vld [vmem:[%s10286_s29 + $0x60] sm:$0xff]  }
  0x8e   : > { %2104 = vmatprep.mubr.bf16.mxu1 %v834_v42  ;;  %2214 = vmatpush2.bf16.msra.mxu0 %v9530_v62  ;;  %v734_v63 = vrot.slane %v10749_v46, 1  ;;  %v837_v4 = vrot.slane %v9509_v36, 1  ;;  %v10773_v6 = vshll.u32 %v9509_v36, 16  ;;  %v10786_v55 = vshrl.u32 %v9509_v36, 16 }
  0x8f   : > { %2215 = vmatprep.subr.bf16.mxu0 %v15862_v1  ;;  %2391 = vmatpush2.bf16.msra.mxu1 %v9538_v43  ;;  %v843_v62 = vrot.slane %v10805_v39, 1  ;;  %v410_v43 = vld [vmem:[%s15853_s2] sm:$0xff] }
  0x90   : > { %2392 = vmatprep.subr.bf16.mxu1 %v15862_v1  ;;  %v735_v22 = vsel %vm643_vm0, %v730_v3, %v734_v63  ;;  %v838_v9 = vsel %vm813_vm1, %v835_v20, %v837_v4  ;;  %v742_v11 = vrot.slane %v10773_v6, 1  ;;  %v840_v16 = vsel %vm813_vm1, %v837_v4, %v839_v12  ;;  %2718 = vperm.xlu0 %9451, %v410_v43   ;;  %v412_v20 = vld [vmem:[%s15853_s2 + $0x10] sm:$0xff]  ;;  %v413_v3 = vld [vmem:[%s15853_s2 + $0x18] sm:$0xff]  ;;  %v414_v4 = vld [vmem:[%s15853_s2 + $0x20] sm:$0xff] }
  0x91   : > { %2728 = vperm.xlu1 %9452, %v412_v20   ;;  %v420_v20 = vld [vmem:[%s15853_s2 + $0x50] sm:$0xff] }
  0x92   : > { %2216 = vmatpush2.bf16.msra.mxu0 %v9536_v29  ;;  %v10823_v29 = vld [vmem:[%s10286_s29 + $0x80] sm:$0xff]  }
  0x93   : > { %2393 = vmatpush2.bf16.msra.mxu1 %v9540_v52  ;;  %9080 = vmatprep.subr.bf16.mxu0 %v10758_v58  ;;  %v411_v52 = vld [vmem:[%s15853_s2 + $0x8] sm:$0xff] }
  0x94   : > { %1928 = vmatmul.mubr.bf16.gmra.mxu0 %v10522_v57  ;;  %v738_v57 = vor.u32 %v10776_v54, %v734_v63  ;;  %2723 = vperm.xlu0 %9451, %v411_v52   ;;  %v10835_v63 = vshrl.u32 %v10805_v39, 16 }
  0x95   : > { %2105 = vmatmul.mubr.bf16.gmra.mxu1 %v832_v24  ;;  %1935 = vmatprep.mubr.bf16.mxu0 %v727_v26  ;;  %v10792_v24 = vld [vmem:[%s10286_s29 + $0x70] sm:$0xff]  }
  0x96   : > { %2112 = vmatprep.mubr.bf16.mxu1 %v836_v56  ;;  %v743_v45 = vsel %vm643_vm0, %v738_v57, %v742_v11  ;;  %v841_v27 = vrot.slane %v10792_v24, 1  ;;  %v10800_v14 = vshll.u32 %v10792_v24, 16  ;;  %v10812_v41 = vshrl.u32 %v10792_v24, 16  ;;  %2733 = vperm.xlu1 %9452, %v413_v3   ;;  %v421_v3 = vld [vmem:[%s15853_s2 + $0x58] sm:$0xff] }
  0x98   : > { %v842_v32 = vsel %vm813_vm1, %v839_v12, %v841_v27  ;;  %v844_v44 = vsel %vm813_vm1, %v841_v27, %v843_v62  ;;  %2738 = vperm.xlu0 %9451, %v414_v4   ;;  %v415_v12 = vld [vmem:[%s15853_s2 + $0x28] sm:$0xff]  ;;  %v422_v4 = vld [vmem:[%s15853_s2 + $0x60] sm:$0xff] }
  0x9a   : > { %2743 = vperm.xlu1 %9452, %v415_v12   ;;  %v9980_v12 = vld [vmem:[%s10286_s29 + $0x14] sm:$0xf] }
  0x9c   : > { %1936 = vmatmul.mubr.bf16.gmra.mxu0 %v10547_v8  ;;  %v746_v8 = vor.u32 %v10786_v55, %v742_v11  ;;  %v10849_v11 = vld [vmem:[%s10286_s29 + $0x88] sm:$0xff]  }
  0x9d   : > { %2113 = vmatmul.mubr.bf16.gmra.mxu1 %v834_v42  ;;  %1943 = vmatprep.mubr.bf16.mxu0 %v735_v22  ;;  %v10815_v42 = vshll.u32 %v10805_v39, 16  ;;  %v10869_v27 = vshll.u32 %v10849_v11, 16 }
  0x9e   : > { %2120 = vmatprep.mubr.bf16.mxu1 %v838_v9  ;;  %v751_v37 = vsel %vm643_vm0, %v746_v8, %v750_v18  ;;  %v10860_v18 = vrot.slane %v10849_v11, 1  ;;  %v10866_v8 = vshrl.u32 %v10823_v29, 16 }
  0x9f   : > { %v766_v49 = vrot.slane %v10815_v42, 1  ;;  %v782_v43 = vrot.slane %v10869_v27, 1 }
  0xa4   : > { %1944 = vmatmul.mubr.bf16.gmra.mxu0 %v10592_v5  ;;  %v758_v5 = vrot.slane %v10800_v14, 1 }
  0xa5   : > { %2121 = vmatmul.mubr.bf16.gmra.mxu1 %v836_v56  ;;  %1951 = vmatprep.mubr.bf16.mxu0 %v743_v45  ;;  %v845_v56 = vrot.slane %v10823_v29, 1  ;;  %v416_v45 = vld [vmem:[%s15853_s2 + $0x30] sm:$0xff] }
  0xa6   : > { %2128 = vmatprep.mubr.bf16.mxu1 %v840_v16  ;;  %v762_v26 = vor.u32 %v10812_v41, %v758_v5  ;;  %2748 = vperm.xlu0 %9451, %v416_v45  }
  0xa8   : > { %v767_v22 = vsel %vm643_vm0, %v762_v26, %v766_v49  ;;  %v10893_v26 = vshrl.u32 %v10849_v11, 16 }
  0xac   : > { %1952 = vmatmul.mubr.bf16.gmra.mxu0 %v10723_v51  ;;  %v759_v51 = vsel %vm643_vm0, %v754_v40, %v758_v5  ;;  %v9534_v40 = vld [vmem:[%s10286_s29 + $0x90] ss:$0 sps:$4 sm:$0x11]  }
  0xad   : > { %2129 = vmatmul.mubr.bf16.gmra.mxu1 %v838_v9  ;;  %1959 = vmatprep.mubr.bf16.mxu0 %v751_v37  ;;  %v846_v9 = vsel %vm813_vm1, %v843_v62, %v845_v56  ;;  %v417_v37 = vld [vmem:[%s15853_s2 + $0x38] sm:$0xff]  ;;  %v848_v62 = vsel %vm813_vm1, %v845_v56, %v10860_v18  ;;  %v788_v56 = vshll.u32 %v9534_v40, 16 }
  0xae   : > { %2136 = vmatprep.mubr.bf16.mxu1 %v842_v32  ;;  %2753 = vperm.xlu1 %9452, %v417_v37   ;;  %v424_v37 = vld [vmem:[%s15853_s2 + $0x70] sm:$0xff] }
  0xb4   : > { %1960 = vmatmul.mubr.bf16.gmra.mxu0 %v9509_v36  ;;  %v10838_v36 = vshll.u32 %v10823_v29, 16 }
  0xb5   : > { %2137 = vmatmul.mubr.bf16.gmra.mxu1 %v840_v16  ;;  %1967 = vmatprep.mubr.bf16.mxu0 %v759_v51  ;;  %v770_v16 = vor.u32 %v10835_v63, %v766_v49  ;;  %v419_v49 = vld [vmem:[%s15853_s2 + $0x48] sm:$0xff] }
  0xb6   : > { %2144 = vmatprep.mubr.bf16.mxu1 %v844_v44  ;;  %v774_v57 = vrot.slane %v10838_v36, 1  ;;  %2763 = vperm.xlu1 %9452, %v419_v49  }
  0xb8   : > { %v775_v5 = vsel %vm643_vm0, %v770_v16, %v774_v57  ;;  %v778_v52 = vor.u32 %v10866_v8, %v774_v57  ;;  %v423_v16 = vld [vmem:[%s15853_s2 + $0x68] sm:$0xff] }
  0xba   : > { %2773 = vperm.xlu1 %9452, %v421_v3  }
  0xbc   : > { %1968 = vmatmul.mubr.bf16.gmra.mxu0 %v9512_v21  ;;  %v10863_v21 = vld [vmem:[%s10286_s29 + $0x90] sm:$0xff]  }
  0xbd   : > { %2145 = vmatmul.mubr.bf16.gmra.mxu1 %v842_v32  ;;  %1975 = vmatprep.mubr.bf16.mxu0 %v767_v22  ;;  %v418_v32 = vld [vmem:[%s15853_s2 + $0x40] sm:$0xff]  ;;  %v882_v51 = vrot.slane %v10863_v21, 1  ;;  %v783_v22 = vsel %vm643_vm0, %v778_v52, %v782_v43 }
  0xbe   : > { %2152 = vmatprep.mubr.bf16.mxu1 %v846_v9  ;;  %2758 = vperm.xlu0 %9451, %v418_v32   ;;  %v786_v32 = vor.u32 %v10893_v26, %v782_v43 }
  0xbf   : > { %v883_v57 = vsel %vm813_vm1, %v10860_v18, %v882_v51  ;;  %2783 = vperm.xlu1 %9452, %v423_v16   ;;  %v432_v16 = vld [vmem:[%s15853_s2 + $0xb0] sm:$0xff] }
  0xc2   : > { %2768 = vperm.xlu0 %9451, %v420_v20  }
  0xc4   : > { %1976 = vmatmul.mubr.bf16.gmra.mxu0 %v10792_v24  ;;  %v526_v24 = vld [vmem:[%s10286_s29 + $0x10] sm:$0xc] }
  0xc5   : > { %2153 = vmatmul.mubr.bf16.gmra.mxu1 %v844_v44  ;;  %1983 = vmatprep.mubr.bf16.mxu0 %v775_v5  ;;  %v9537_v44 = vld [vmem:[%s10286_s29 + $0x98] ss:$0 sps:$4 sm:$0x11]   ;;  %v8574_v45 = vcombine.low %v526_v24, %v9980_v12  ;;  %v790_v5 = vrot.slane %v788_v56, 1  ;;  %v426_v24 = vld [vmem:[%s15853_s2 + $0x80] sm:$0xff] }
  0xc6   : > { %2160 = vmatprep.mubr.bf16.mxu1 %v848_v62  ;;  %2778 = vperm.xlu0 %9451, %v422_v4   ;;  %v884_v49 = vrot.slane %v9537_v44, 1  ;;  %v427_v4 = vld [vmem:[%s15853_s2 + $0x88] sm:$0xff]  ;;  %v428_v44 = vld [vmem:[%s15853_s2 + $0x90] sm:$0xff] }
  0xc7   : > { %v1085_v20 = vshrl.u32 %v8574_v45, 16  ;;  %v1088_v52 = vshll.u32 %v8574_v45, 16 }
  0xc8   : > { %v885_v3 = vsel %vm813_vm1, %v882_v51, %v884_v49  ;;  %v435_v49 = vld [vmem:[%s15853_s2 + $0xc8] sm:$0xff] }
  0xc9   : > { %v1087_v43 = vrot.slane %v1085_v20, 2  ;;  %v1090_v56 = vrot.slane %v1088_v52, 3 }
  0xca   : > { %2788 = vperm.xlu0 %9451, %v424_v37  }
  0xcb   : > { %v1091_v51 = vor.u32 %v1090_v56, %v1087_v43  ;;  %v441_v56 = vld [vmem:[%s15853_s2 + $0xf8] sm:$0xff] }
  0xcc   : > { %1984 = vmatmul.mubr.bf16.gmra.mxu0 %v10805_v39  ;;  %v425_v39 = vld [vmem:[%s15853_s2 + $0x78] sm:$0xff] }
  0xcd   : > { %2161 = vmatmul.mubr.bf16.gmra.mxu1 %v846_v9  ;;  %1991 = vmatprep.mubr.bf16.mxu0 %v783_v22  ;;  %v791_v9 = vsel %vm643_vm0, %v786_v32, %v790_v5  ;;  %v849_v22 = vrot.slane %v9534_v40, 1  ;;  %v431_v40 = vld [vmem:[%s15853_s2 + $0xa8] sm:$0xff]  ;;  %v434_v32 = vld [vmem:[%s15853_s2 + $0xc0] sm:$0xff] }
  0xce   : > { %2168 = vmatprep.mubr.bf16.mxu1 %v883_v57  ;;  %2793 = vperm.xlu1 %9452, %v425_v39   ;;  %v430_v57 = vld [vmem:[%s15853_s2 + $0xa0] sm:$0xff] }
  0xcf   : > { %2798 = vperm.xlu0 %9451, %v426_v24   ;;  %v850_v12 = vsel %vm813_vm1, %v10860_v18, %v849_v22  ;;  %v10948_v18 = vld [vmem:[%s10286_s29 + $0x18] sm:$0xff]   ;;  %v9545_v39 = vld [vmem:[%s15855_s4 + $0x220] sm:$0xff]   ;;  %v439_v24 = vld [vmem:[%s15853_s2 + $0xe8] sm:$0xff] }
  0xd0   : > { %v1008_v37 = vrot.slane %v10948_v18, 2  ;;  %v443_v22 = vld [vmem:[%s15853_s2 + $0x108] sm:$0xff] }
  0xd2   : > { %2803 = vperm.xlu1 %9452, %v427_v4  }
  0xd3   : > { %2808 = vperm.xlu0 %9451, %v428_v44   ;;  %v9547_v44 = vld [vmem:[%s15855_s4 + $0x210] sm:$0xff]  }
  0xd4   : > { %1992 = vmatmul.mubr.bf16.gmra.mxu0 %v10823_v29  ;;  %v429_v29 = vld [vmem:[%s15853_s2 + $0x98] sm:$0xff] }
  0xd5   : > { %2169 = vmatmul.mubr.bf16.gmra.mxu1 %v848_v62  ;;  %1999 = vmatprep.mubr.bf16.mxu0 %v791_v9  ;;  %v1095_v62 = vsel %vm1083_vm4, %v1091_v51, %v10575_v23  ;;  %v1071_v23 = vrot.slane %v8574_v45, 2  ;;  %v9543_v45 = vld [vmem:[%s15855_s4 + $0x230] sm:$0xff]  }
  0xd6   : > { %2176 = vmatprep.mubr.bf16.mxu1 %v885_v3  ;;  %2813 = vperm.xlu1 %9452, %v429_v29   ;;  %v440_v9 = vld [vmem:[%s15853_s2 + $0xf0] sm:$0xff]  ;;  %v10999_v3 = vld [vmem:[%s10286_s29 + $0x28] sm:$0xff]  }
  0xd7   : > { %2818 = vperm.xlu0 %9451, %v430_v57   ;;  %v1072_v5 = vsel %vm1004_vm2, %v1071_v23, %v1008_v37  ;;  %v1012_v43 = vrot.slane %v10999_v3, 2  ;;  %v444_v51 = vld [vmem:[%s15853_s2 + $0x110] sm:$0xff]  ;;  %v447_v23 = vld [vmem:[%s11034_s20 + $0x8] sm:$0xff] }
  0xd8   : > { %v11025_v29 = vld [vmem:[%s10286_s29 + $0x30] sm:$0xff]  }
  0xd9   : > { %v1014_v57 = vrot.slane %v11025_v29, 2 }
  0xda   : > { %2823 = vperm.xlu1 %9452, %v431_v40   ;;  %v1112_v40 = vrot.slane %v10561_v15, 2 }
  0xdb   : > { %2828 = vperm.xlu0 %9451, %v432_v16   ;;  %v1113_v16 = vrot.slane %v10544_v7, 3 }
  0xdc   : > { %2000 = vmatmul.mubr.bf16.gmra.mxu0 %v10849_v11  ;;  %v433_v11 = vld [vmem:[%s15853_s2 + $0xb8] sm:$0xff] }
  0xdd   : > { %2177 = vmatmul.mubr.bf16.gmra.mxu1 %v850_v12  ;;  %2217 = vmatprep.mubr.bf16.mxu0 %v10554_v10  ;;  %v1009_v10 = vsel %vm1004_vm2, %v1006_v60, %v1008_v37  ;;  %v10974_v60 = vld [vmem:[%s10286_s29 + $0x20] sm:$0xff]  }
  0xde   : > { %2394 = vmatprep.mubr.bf16.mxu1 %v1095_v62  ;;  %2833 = vperm.xlu1 %9452, %v433_v11   ;;  %v1010_v20 = vrot.slane %v10974_v60, 2  ;;  %v446_v12 = vld [vmem:[%s11034_s20] sm:$0xff]  ;;  %v1015_v62 = vsel %vm1004_vm2, %v1012_v43, %v1014_v57  ;;  %v448_v11 = vld [vmem:[%s11034_s20 + $0x10] sm:$0xff] }
  0xdf   : > { %2838 = vperm.xlu0 %9451, %v434_v32   ;;  %v11051_v32 = vld [vmem:[%s10286_s29 + $0x38] sm:$0xff]  }
  0xe0   : > { %v1011_v52 = vsel %vm1004_vm2, %v1008_v37, %v1010_v20  ;;  %v1013_v4 = vsel %vm1004_vm2, %v1010_v20, %v1012_v43  ;;  %v9549_v37 = vld [vmem:[%s15855_s4 + $0x200] sm:$0xff]   ;;  %v1117_v20 = vrot.slane %v10589_v25, 3  ;;  %v926_v43 = vrot.slane %v10544_v7, 2 }
  0xe2   : > { %2843 = vperm.xlu1 %9452, %v435_v49  }
  0xe3   : > { %2848 = vperm.xlu0 %9451, %v436_v33   ;;  %v1116_v33 = vrot.slane %v10613_v47, 2 }
  0xe4   : > { %2218 = vmatmul.mubr.bf16.vlgmr.msra.gmra.mxu0 %v10585_v30  ;;  %v9544_v30 = vld [vmem:[%s15855_s4 + $0x228] sm:$0xff]  }
  0xe5   : > { %9081 = vmatpush3.bf16.msra.mxu0 %v10758_v58  ;;  %2395 = vmatmul.mubr.bf16.vlgmr.msra.gmra.mxu1 %v1072_v5  ;;  %v437_v58 = vld [vmem:[%s15853_s2 + $0xd8] sm:$0xff]  ;;  %v1016_v5 = vrot.slane %v11051_v32, 2 }
  0xe6   : > { %2225 = vmatprep.mubr.bf16.mxu0 %v1009_v10  ;;  %2402 = vmatprep.mubr.bf16.mxu1 %v10619_v53  ;;  %v438_v53 = vld [vmem:[%s15853_s2 + $0xe0] sm:$0xff]  ;;  %v1114_v10 = vor.u32 %v1113_v16, %v1112_v40  ;;  %v929_v16 = vrot.slane %v10613_v47, 1 }
  0xe7   : > { %9082 = vmatprep.subr.bf16.mxu0 %v9543_v45  ;;  %2853 = vperm.xlu1 %9452, %v437_v58   ;;  %v1017_v49 = vsel %vm1004_vm2, %v1014_v57, %v1016_v5  ;;  %v1395_v58 = vlaneseq  ;;  %v393_v57 = vld [vmem:[%s15858_s7] sm:$0xff] }
  0xe8   : > { %2858 = vperm.xlu0 %9451, %v438_v53   ;;  %v452_v53 = vld [vmem:[%s11034_s20 + $0x30] sm:$0xff] }
  0xe9   : > { %9083 = vmatpush3.bf16.msra.mxu0 %v9543_v45  ;;  %v449_v45 = vld [vmem:[%s11034_s20 + $0x18] sm:$0xff] }
  0xea   : > { %9084 = vmatprep.subr.bf16.mxu0 %v9544_v30 }
  0xeb   : > { %2863 = vperm.xlu1 %9452, %v439_v24   ;;  %v453_v24 = vld [vmem:[%s11034_s20 + $0x38] sm:$0xff] }
  0xec   : > { %2226 = vmatmul.mubr.bf16.gmra.mxu0 %v10610_v31  ;;  %v9546_v31 = vld [vmem:[%s15855_s4 + $0x218] sm:$0xff]   ;;  %2868 = vperm.xlu0 %9451, %v440_v9   ;;  %v11070_v9 = vshrl.u32 %v1395_v58, 7 }
  0xed   : > { %2403 = vmatmul.mubr.bf16.gmra.mxu1 %v1011_v52  ;;  %2233 = vmatprep.mubr.bf16.mxu0 %v1011_v52  ;;  %v11066_v52 = vld [vmem:[%s10286_s29 + $0x40] sm:$0xff]  }
  0xee   : > { %2410 = vmatprep.mubr.bf16.mxu1 %v10633_v48  ;;  %9085 = vmatpush3.bf16.msra.mxu0 %v9544_v30  ;;  %v442_v48 = vld [vmem:[%s15853_s2 + $0x100] sm:$0xff]  ;;  %v451_v30 = vld [vmem:[%s11034_s20 + $0x28] sm:$0xff]  ;;  %16093 = vst [vmem:[#allocation6_spill] sm:$0xff] %v11070_v9  ;;  %v11082_v7 = vsub.s32 0, %v11070_v9 }
  0xef   : > { %9086 = vmatprep.subr.bf16.mxu0 %v9545_v39  ;;  %2873 = vperm.xlu1 %9452, %v441_v56  }
  0xf0   : > { %2878 = vperm.xlu0 %9451, %v442_v48   ;;  %16094 = vst [vmem:[#allocation7_spill] sm:$0xff] %v11082_v7 }
  0xf2   : > { %9087 = vmatpush3.bf16.msra.mxu0 %v9545_v39  ;;  %v1118_v39 = vor.u32 %v1117_v20, %v1116_v33  ;;  %v11109_v20 = vld [vmem:[%s10286_s29 + $0x50] sm:$0xff]  }
  0xf3   : > { %9088 = vmatprep.subr.bf16.mxu0 %v9546_v31  ;;  %2883 = vperm.xlu1 %9452, %v443_v22   ;;  %v455_v22 = vld [vmem:[%s11034_s20 + $0x48] sm:$0xff] }
  0xf4   : > { %2234 = vmatmul.mubr.bf16.gmra.mxu0 %v10630_v61  ;;  %v9548_v61 = vld [vmem:[%s15855_s4 + $0x208] sm:$0xff]   ;;  %2888 = vperm.xlu0 %9451, %v444_v51   ;;  %v1119_v48 = vsel %vm1083_vm4, %v1114_v10, %v1118_v39  ;;  %v456_v51 = vld [vmem:[%s11034_s20 + $0x50] sm:$0xff] }
  0xf5   : > { %2411 = vmatmul.mubr.bf16.gmra.mxu1 %v1013_v4  ;;  %2241 = vmatprep.mubr.bf16.mxu0 %v1013_v4  ;;  %v1120_v4 = vrot.slane %v10762_v59, 2 }
  0xf6   : > { %2418 = vmatprep.mubr.bf16.mxu1 %v10667_v50  ;;  %9089 = vmatpush3.bf16.msra.mxu0 %v9546_v31  ;;  %v445_v50 = vld [vmem:[%s15853_s2 + $0x118] sm:$0xff]  ;;  %v454_v31 = vld [vmem:[%s11034_s20 + $0x40] sm:$0xff] }
  0xf7   : > { %9090 = vmatprep.subr.bf16.mxu0 %v9547_v44  ;;  %2893 = vperm.xlu1 %9452, %v445_v50  }
  0xf8   : > { %3841 = vperm.xlu0 %9451, %v446_v12   ;;  %v457_v12 = vld [vmem:[%s11034_s20 + $0x58] sm:$0xff] }
  0xfa   : > { %9091 = vmatpush3.bf16.msra.mxu0 %v9547_v44  ;;  %v1121_v44 = vrot.slane %v10716_v38, 3 }
  0xfb   : > { %9092 = vmatprep.subr.bf16.mxu0 %v9548_v61  ;;  %3846 = vperm.xlu1 %9452, %v447_v23   ;;  %v458_v23 = vld [vmem:[%s11034_s20 + $0x60] sm:$0xff] }
  0xfc   : > { %2242 = vmatmul.mubr.bf16.gmra.mxu0 %v10658_v34  ;;  %3851 = vperm.xlu0 %9451, %v448_v11   ;;  %v450_v34 = vld [vmem:[%s11034_s20 + $0x20] sm:$0xff] }
  0xfd   : > { %2419 = vmatmul.mubr.bf16.gmra.mxu1 %v1015_v62  ;;  %2249 = vmatprep.mubr.bf16.mxu0 %v1015_v62  ;;  %v11094_v62 = vrot.slane %v393_v57, %v11082_v7  ;;  %v9553_v7 = vld [vmem:[%s10286_s29 + $0xa0] ss:$0 sps:$4 sm:$0x33]  }
  0xfe   : > { %2426 = vmatprep.mubr.bf16.mxu1 %v10698_v35  ;;  %9093 = vmatpush3.bf16.msra.mxu0 %v9548_v61  ;;  %v1115_v35 = vsel %vm1083_vm4, %v10682_v19, %v1114_v10  ;;  %v1018_v19 = vrot.slane %v11066_v52, 2  ;;  %v11089_v61 = vld [vmem:[%s10286_s29 + $0x48] sm:$0xff]   ;;  %v1124_v10 = vrot.slane %v10776_v54, 2 }
  0xff   : > { %9094 = vmatprep.subr.bf16.mxu0 %v9549_v37  ;;  %3856 = vperm.xlu1 %9452, %v449_v45   ;;  %v1020_v50 = vrot.slane %v11089_v61, 2  ;;  %v1125_v45 = vrot.slane %v10749_v46, 3 }
 0x100   : > { %3861 = vperm.xlu0 %9451, %v450_v34   ;;  %v1019_v56 = vsel %vm1004_vm2, %v1016_v5, %v1018_v19 }
 0x101   : > { %v1021_v11 = vsel %vm1004_vm2, %v1018_v19, %v1020_v50  ;;  %v1126_v19 = vor.u32 %v1125_v45, %v1124_v10 }
 0x102   : > { %9095 = vmatpush3.bf16.msra.mxu0 %v9549_v37  ;;  %v930_v37 = vrot.slane %v10589_v25, 2 }
 0x103   : > { %6039 = vmatprep.subr.bf16.mxu0 %v15862_v1  ;;  %3866 = vperm.xlu1 %9452, %v451_v30   ;;  %v1022_v30 = vrot.slane %v11109_v20, 2 }
 0x104   : > { %2250 = vmatmul.mubr.bf16.gmra.mxu0 %v10677_v0  ;;  %3871 = vperm.xlu0 %9451, %v452_v53   ;;  %v925_v0 = vrot.slane %v10561_v15, 1 }
 0x105   : > { %2427 = vmatmul.mubr.bf16.gmra.mxu1 %v1017_v49  ;;  %2257 = vmatprep.mubr.bf16.mxu0 %v1017_v49  ;;  %v931_v49 = vor.u32 %v930_v37, %v929_v16  ;;  %v1129_v16 = vrot.slane %v10773_v6, 3 }
 0x106   : > { %2434 = vmatprep.mubr.bf16.mxu1 %v1115_v35  ;;  %v927_v15 = vor.u32 %v926_v43, %v925_v0  ;;  %v460_v35 = vld [vmem:[%s11034_s20 + $0x70] sm:$0xff] }
 0x107   : > { %3876 = vperm.xlu1 %9452, %v453_v24   ;;  %v461_v24 = vld [vmem:[%s11034_s20 + $0x78] sm:$0xff] }
 0x108   : > { %3881 = vperm.xlu0 %9451, %v454_v31   ;;  %v928_v40 = vsel %vm892_vm3, %v10713_v17, %v927_v15  ;;  %v459_v17 = vld [vmem:[%s11034_s20 + $0x68] sm:$0xff]  ;;  %v932_v31 = vsel %vm892_vm3, %v927_v15, %v931_v49 }
 0x10b   : > { %3886 = vperm.xlu1 %9452, %v455_v22   ;;  %v1023_v22 = vsel %vm1004_vm2, %v1020_v50, %v1022_v30 }
 0x10c   : > { %2258 = vmatmul.mubr.bf16.gmra.mxu0 %v10727_v28  ;;  %v1122_v28 = vor.u32 %v1121_v44, %v1120_v4  ;;  %3891 = vperm.xlu0 %9451, %v456_v51   ;;  %v462_v4 = vld [vmem:[%s11034_s20 + $0x80] sm:$0xff] }
 0x10d   : > { %2435 = vmatmul.mubr.bf16.gmra.mxu1 %v1019_v56  ;;  %2265 = vmatprep.mubr.bf16.mxu0 %v1019_v56  ;;  %v933_v56 = vrot.slane %v10762_v59, 1 }
 0x10e   : > { %2442 = vmatprep.mubr.bf16.mxu1 %v1119_v48  ;;  %v1123_v5 = vsel %vm1083_vm4, %v1118_v39, %v1122_v28  ;;  %v934_v48 = vrot.slane %v10716_v38, 2  ;;  %v463_v38 = vld [vmem:[%s11034_s20 + $0x88] sm:$0xff] }
 0x10f   : > { %3896 = vperm.xlu1 %9452, %v457_v12   ;;  %v1127_v12 = vsel %vm1083_vm4, %v1122_v28, %v1126_v19  ;;  %v11130_v28 = vld [vmem:[%s10286_s29 + $0x58] sm:$0xff]  }
 0x110   : > { %3901 = vperm.xlu0 %9451, %v458_v23   ;;  %v935_v37 = vor.u32 %v934_v48, %v933_v56  ;;  %v464_v23 = vld [vmem:[%s11034_s20 + $0x90] sm:$0xff] }
 0x113   : > { %3906 = vperm.xlu1 %9452, %v459_v17  }
 0x114   : > { %v1865_v34 = vpop.f32.mrf.mxu0  ;;  %2266 = vmatmul.mubr.bf16.gmra.mxu0 %v928_v40  ;;  %3911 = vperm.xlu0 %9451, %v460_v35   ;;  %v1128_v40 = vrot.slane %v10786_v55, 2 }
 0x115   : > { %v1866_v47 = vadd.f32 %v1865_v34, %v11094_v62  ;;  %v2042_v25 = vpop.f32.mrf.mxu1  ;;  %2443 = vmatmul.mubr.bf16.gmra.mxu1 %v1021_v11  ;;  %2273 = vmatprep.mubr.bf16.mxu0 %v1021_v11 }
 0x116   : > { %v1867_v33 = vpop.f32.mrf.mxu0  ;;  %2450 = vmatprep.mubr.bf16.mxu1 %v1123_v5  ;;  %v1024_v5 = vrot.slane %v11130_v28, 2  ;;  %v1130_v34 = vor.u32 %v1129_v16, %v1128_v40 }
 0x117   : > { %v11112_v58 = vadd.f32 %v2042_v25, %v1866_v47  ;;  %v2044_v53 = vpop.f32.mrf.mxu1  ;;  %3916 = vperm.xlu1 %9452, %v461_v24   ;;  %v465_v47 = vld [vmem:[%s11034_s20 + $0x98] sm:$0xff]  ;;  %v936_v33 = vsel %vm892_vm3, %v931_v49, %v935_v37  ;;  %v466_v24 = vld [vmem:[%s11034_s20 + $0xa0] sm:$0xff] }
 0x118   : > { %v1868_v39 = vpop.f32.mrf.mxu0  ;;  %3921 = vperm.xlu0 %9451, %v462_v4   ;;  %v937_v53 = vrot.slane %v10776_v54, 1  ;;  %v1131_v48 = vsel %vm1083_vm4, %v1126_v19, %v1130_v34  ;;  %v1132_v4 = vrot.slane %v10797_v2, 2  ;;  %v11151_v19 = vld [vmem:[%s10286_s29 + $0x60] sm:$0xff]  }
 0x119   : > { %v1869_v0 = vadd.f32 %v1868_v39, %v11094_v62  ;;  %v2045_v43 = vpop.f32.mrf.mxu1  ;;  %v938_v39 = vrot.slane %v10749_v46, 2  ;;  %v467_v46 = vld [vmem:[%s11034_s20 + $0xa8] sm:$0xff]  ;;  %v1026_v40 = vrot.slane %v11151_v19, 2 }
 0x11a   : > { %v1870_v44 = vpop.f32.mrf.mxu0 }
 0x11b   : > { %v11121_v51 = vadd.f32 %v2045_v43, %v1869_v0  ;;  %v2047_v57 = vpop.f32.mrf.mxu1  ;;  %3926 = vperm.xlu1 %9452, %v463_v38   ;;  %v1025_v43 = vsel %vm1004_vm2, %v1022_v30, %v1024_v5  ;;  %v1133_v44 = vrot.slane %v10784_v13, 3 }
 0x11c   : > { %v1873_v15 = vpop.f32.mrf.mxu0  ;;  %2274 = vmatmul.mubr.bf16.gmra.mxu0 %v932_v31  ;;  %3931 = vperm.xlu0 %9451, %v464_v23   ;;  %v468_v57 = vld [vmem:[%s11034_s20 + $0xb0] sm:$0xff] }
 0x11d   : > { %v1874_v59 = vadd.f32 %v1873_v15, %v11094_v62  ;;  %v2050_v50 = vpop.f32.mrf.mxu1  ;;  %2451 = vmatmul.mubr.bf16.gmra.mxu1 %v1023_v22  ;;  %2281 = vmatprep.mubr.bf16.mxu0 %v1023_v22  ;;  %v939_v22 = vor.u32 %v938_v39, %v937_v53  ;;  %v1134_v38 = vor.u32 %v1133_v44, %v1132_v4 }
 0x11e   : > { %v1875_v11 = vpop.f32.mrf.mxu0  ;;  %2458 = vmatprep.mubr.bf16.mxu1 %v1127_v12 }
 0x11f   : > { %v11133_v10 = vadd.f32 %v2050_v50, %v1874_v59  ;;  %v2052_v45 = vpop.f32.mrf.mxu1  ;;  %3936 = vperm.xlu1 %9452, %v465_v47   ;;  %v469_v50 = vld [vmem:[%s11034_s20 + $0xb8] sm:$0xff]  ;;  %v942_v47 = vrot.slane %v10773_v6, 2  ;;  %v471_v6 = vld [vmem:[%s11034_s20 + $0xc8] sm:$0xff] }
 0x120   : > { %v1876_v17 = vpop.f32.mrf.mxu0  ;;  %3941 = vperm.xlu0 %9451, %v466_v24   ;;  %v940_v45 = vsel %vm892_vm3, %v935_v37, %v939_v22  ;;  %v1135_v24 = vsel %vm1083_vm4, %v1130_v34, %v1134_v38  ;;  %v11172_v34 = vld [vmem:[%s10286_s29 + $0x68] sm:$0xff]  }
 0x121   : > { %v1877_v25 = vadd.f32 %v1876_v17, %v11094_v62  ;;  %v2053_v35 = vpop.f32.mrf.mxu1  ;;  %v941_v17 = vrot.slane %v10786_v55, 1  ;;  %v1028_v44 = vrot.slane %v11172_v34, 2 }
 0x122   : > { %v1878_v0 = vpop.f32.mrf.mxu0 }
 0x123   : > { %v11142_v31 = vadd.f32 %v2053_v35, %v1877_v25  ;;  %v2055_v56 = vpop.f32.mrf.mxu1  ;;  %3946 = vperm.xlu1 %9452, %v467_v46   ;;  %v470_v25 = vld [vmem:[%s11034_s20 + $0xc0] sm:$0xff]  ;;  %v1136_v0 = vrot.slane %v10812_v41, 2 }
 0x124   : > { %v1881_v49 = vpop.f32.mrf.mxu0  ;;  %2282 = vmatmul.mubr.bf16.gmra.mxu0 %v936_v33  ;;  %3951 = vperm.xlu0 %9451, %v468_v57   ;;  %v1027_v33 = vsel %vm1004_vm2, %v1024_v5, %v1026_v40  ;;  %v943_v56 = vor.u32 %v942_v47, %v941_v17  ;;  %v473_v57 = vld [vmem:[%s11034_s20 + $0xd8] sm:$0xff]  ;;  %v1029_v17 = vsel %vm1004_vm2, %v1026_v40, %v1028_v44 }
 0x125   : > { %v1882_v54 = vadd.f32 %v1881_v49, %v11094_v62  ;;  %v2058_v30 = vpop.f32.mrf.mxu1  ;;  %2459 = vmatmul.mubr.bf16.gmra.mxu1 %v1025_v43  ;;  %2289 = vmatprep.mubr.bf16.mxu0 %v1025_v43  ;;  %v1137_v43 = vrot.slane %v10800_v14, 3 }
 0x126   : > { %v1883_v12 = vpop.f32.mrf.mxu0  ;;  %2466 = vmatprep.mubr.bf16.mxu1 %v1131_v48  ;;  %v472_v48 = vld [vmem:[%s11034_s20 + $0xd0] sm:$0xff] }
 0x127   : > { %v11154_v16 = vadd.f32 %v2058_v30, %v1882_v54  ;;  %v2060_v15 = vpop.f32.mrf.mxu1  ;;  %3956 = vperm.xlu1 %9452, %v469_v50   ;;  %v1138_v54 = vor.u32 %v1137_v43, %v1136_v0  ;;  %v945_v50 = vrot.slane %v10797_v2, 1  ;;  %v476_v0 = vld [vmem:[%s11034_s20 + $0xf0] sm:$0xff] }
 0x128   : > { %v1884_v59 = vpop.f32.mrf.mxu0  ;;  %3961 = vperm.xlu0 %9451, %v470_v25  }
 0x129   : > { %v1885_v23 = vadd.f32 %v1884_v59, %v11094_v62  ;;  %v2061_v11 = vpop.f32.mrf.mxu1  ;;  %v944_v59 = vsel %vm892_vm3, %v939_v22, %v943_v56 }
 0x12a   : > { %v1886_v35 = vpop.f32.mrf.mxu0 }
 0x12b   : > { %v11163_v53 = vadd.f32 %v2061_v11, %v1885_v23  ;;  %v2063_v39 = vpop.f32.mrf.mxu1  ;;  %3966 = vperm.xlu1 %9452, %v471_v6   ;;  %v946_v23 = vrot.slane %v10784_v13, 2  ;;  %v474_v11 = vld [vmem:[%s11034_s20 + $0xe0] sm:$0xff]  ;;  %v1139_v35 = vsel %vm1083_vm4, %v1134_v38, %v1138_v54  ;;  %v475_v13 = vld [vmem:[%s11034_s20 + $0xe8] sm:$0xff]  ;;  %v11193_v38 = vld [vmem:[%s10286_s29 + $0x70] sm:$0xff]  }
 0x12c   : > { %v1889_v37 = vpop.f32.mrf.mxu0  ;;  %2290 = vmatmul.mubr.bf16.gmra.mxu0 %v940_v45  ;;  %3971 = vperm.xlu0 %9451, %v472_v48   ;;  %v1141_v39 = vrot.slane %v10815_v42, 3 }
 0x12d   : > { %v1890_v55 = vadd.f32 %v1889_v37, %v11094_v62  ;;  %v2066_v5 = vpop.f32.mrf.mxu1  ;;  %2467 = vmatmul.mubr.bf16.gmra.mxu1 %v1027_v33  ;;  %2297 = vmatprep.mubr.bf16.mxu0 %v1027_v33  ;;  %v1140_v33 = vrot.slane %v10835_v63, 2  ;;  %v1030_v37 = vrot.slane %v11193_v38, 2 }
 0x12e   : > { %v1891_v4 = vpop.f32.mrf.mxu0  ;;  %2474 = vmatprep.mubr.bf16.mxu1 %v1135_v24  ;;  %v947_v24 = vor.u32 %v946_v23, %v945_v50 }
 0x12f   : > { %v11175_v49 = vadd.f32 %v2066_v5, %v1890_v55  ;;  %v2068_v46 = vpop.f32.mrf.mxu1  ;;  %3976 = vperm.xlu1 %9452, %v473_v57   ;;  %v1142_v5 = vor.u32 %v1141_v39, %v1140_v33  ;;  %v477_v4 = vld [vmem:[%s11034_s20 + $0xf8] sm:$0xff]  ;;  %v1031_v23 = vsel %vm1004_vm2, %v1028_v44, %v1030_v37  ;;  %v480_v39 = vld [vmem:[%s11034_s20 + $0x110] sm:$0xff] }
 0x130   : > { %v1892_v30 = vpop.f32.mrf.mxu0  ;;  %3981 = vperm.xlu0 %9451, %v474_v11   ;;  %v948_v57 = vsel %vm892_vm3, %v943_v56, %v947_v24 }
 0x131   : > { %v1893_v12 = vadd.f32 %v1892_v30, %v11094_v62  ;;  %v2069_v15 = vpop.f32.mrf.mxu1 }
 0x132   : > { %v1894_v45 = vpop.f32.mrf.mxu0 }
 0x133   : > { %v11184_v47 = vadd.f32 %v2069_v15, %v1893_v12  ;;  %v2071_v25 = vpop.f32.mrf.mxu1  ;;  %3986 = vperm.xlu1 %9452, %v475_v13   ;;  %v949_v12 = vrot.slane %v10812_v41, 1  ;;  %v950_v15 = vrot.slane %v10800_v14, 2  ;;  %v479_v14 = vld [vmem:[%s11034_s20 + $0x108] sm:$0xff] }
 0x134   : > { %v1897_v22 = vpop.f32.mrf.mxu0  ;;  %2298 = vmatmul.mubr.bf16.gmra.mxu0 %v944_v59  ;;  %3991 = vperm.xlu0 %9451, %v476_v0   ;;  %v478_v59 = vld [vmem:[%s11034_s20 + $0x100] sm:$0xff]  ;;  %v1144_v25 = vrot.slane %v10866_v8, 2 }
 0x135   : > { %v1898_v2 = vadd.f32 %v1897_v22, %v11094_v62  ;;  %v2074_v40 = vpop.f32.mrf.mxu1  ;;  %2475 = vmatmul.mubr.bf16.gmra.mxu1 %v1029_v17  ;;  %2305 = vmatprep.mubr.bf16.mxu0 %v1029_v17  ;;  %v1143_v17 = vsel %vm1083_vm4, %v1138_v54, %v1142_v5  ;;  %v951_v33 = vor.u32 %v950_v15, %v949_v12  ;;  %v11214_v54 = vld [vmem:[%s10286_s29 + $0x78] sm:$0xff]  }
 0x136   : > { %v1899_v43 = vpop.f32.mrf.mxu0  ;;  %2482 = vmatprep.mubr.bf16.mxu1 %v1139_v35  ;;  %v1145_v35 = vrot.slane %v10838_v36, 3  ;;  %v1032_v13 = vrot.slane %v11214_v54, 2 }
 0x137   : > { %v11196_v6 = vadd.f32 %v2074_v40, %v1898_v2  ;;  %v2076_v55 = vpop.f32.mrf.mxu1  ;;  %3996 = vperm.xlu1 %9452, %v477_v4  }
 0x138   : > { %v1900_v48 = vpop.f32.mrf.mxu0  ;;  %4001 = vperm.xlu0 %9451, %v478_v59   ;;  %v1146_v0 = vor.u32 %v1145_v35, %v1144_v25  ;;  %v481_v55 = vld [vmem:[%s11034_s20 + $0x118] sm:$0xff]  ;;  %v1033_v15 = vsel %vm1004_vm2, %v1030_v37, %v1032_v13  ;;  %v11232_v35 = vld [vmem:[%s10286_s29 + $0x80] sm:$0xff]   ;;  %s391_s20 = scalar_lea.vmem %s15854_s3, %s10264_s27 }
 0x139   : > { %v1901_v46 = vadd.f32 %v1900_v48, %v11094_v62  ;;  %v2077_v30 = vpop.f32.mrf.mxu1 }
 0x13a   : > { %v1902_v50 = vpop.f32.mrf.mxu0 }
 0x13b   : > { %v11205_v11 = vadd.f32 %v2077_v30, %v1901_v46  ;;  %v2079_v45 = vpop.f32.mrf.mxu1  ;;  %4006 = vperm.xlu1 %9452, %v479_v14   ;;  %v952_v46 = vsel %vm892_vm3, %v947_v24, %v951_v33  ;;  %v953_v30 = vrot.slane %v10835_v63, 1 }
 0x13c   : > { %v1905_v56 = vpop.f32.mrf.mxu0  ;;  %2306 = vmatmul.mubr.bf16.gmra.mxu0 %v948_v57  ;;  %4011 = vperm.xlu0 %9451, %v480_v39   ;;  %v954_v57 = vrot.slane %v10815_v42, 2  ;;  %v1148_v45 = vrot.slane %v10893_v26, 2  ;;  %v969_v39 = vshll.u32 %v10863_v21, 16 }
 0x13d   : > { %v1906_v41 = vadd.f32 %v1905_v56, %v11094_v62  ;;  %v2082_v44 = vpop.f32.mrf.mxu1  ;;  %2483 = vmatmul.mubr.bf16.gmra.mxu1 %v1031_v23  ;;  %2313 = vmatprep.mubr.bf16.mxu0 %v1031_v23  ;;  %v1147_v23 = vsel %vm1083_vm4, %v1142_v5, %v1146_v0  ;;  %v1034_v56 = vrot.slane %v11232_v35, 2 }
 0x13e   : > { %v1907_v22 = vpop.f32.mrf.mxu0  ;;  %2490 = vmatprep.mubr.bf16.mxu1 %v1143_v17  ;;  %v1149_v17 = vrot.slane %v10869_v27, 3  ;;  %v955_v42 = vor.u32 %v954_v57, %v953_v30 }
 0x13f   : > { %v11217_v2 = vadd.f32 %v2082_v44, %v1906_v41  ;;  %v2084_v40 = vpop.f32.mrf.mxu1  ;;  %4016 = vperm.xlu1 %9452, %v481_v55   ;;  %v966_v44 = vshrl.u32 %v10863_v21, 16  ;;  %v1035_v30 = vsel %vm1004_vm2, %v1032_v13, %v1034_v56 }
 0x140   : > { %v1908_v43 = vpop.f32.mrf.mxu0  ;;  %v1150_v41 = vor.u32 %v1149_v17, %v1148_v45  ;;  %v956_v55 = vsel %vm892_vm3, %v951_v33, %v955_v42  ;;  %v11252_v33 = vld [vmem:[%s10286_s29 + $0x98] sm:$0xff]  }
 0x141   : > { %v1909_v48 = vadd.f32 %v1908_v43, %v11094_v62  ;;  %v2085_v4 = vpop.f32.mrf.mxu1 }
 0x142   : > { %v1910_v12 = vpop.f32.mrf.mxu0 }
 0x143   : > { %v11225_v59 = vadd.f32 %v2085_v4, %v1909_v48  ;;  %v2087_v50 = vpop.f32.mrf.mxu1  ;;  %v957_v48 = vrot.slane %v10866_v8, 1  ;;  %v958_v4 = vrot.slane %v10838_v36, 2 }
 0x144   : > { %v1913_v25 = vpop.f32.mrf.mxu0  ;;  %2314 = vmatmul.mubr.bf16.gmra.mxu0 %v952_v46  ;;  %v1152_v50 = vrot.slane %v966_v44, 2 }
 0x145   : > { %v1914_v63 = vadd.f32 %v1913_v25, %v11094_v62  ;;  %v2090_v24 = vpop.f32.mrf.mxu1  ;;  %2491 = vmatmul.mubr.bf16.gmra.mxu1 %v1033_v15  ;;  %2321 = vmatprep.mubr.bf16.mxu0 %v1033_v15  ;;  %v1151_v15 = vsel %vm1083_vm4, %v1146_v0, %v1150_v41  ;;  %v959_v13 = vor.u32 %v958_v4, %v957_v48  ;;  %v11256_v25 = vld [vmem:[%s10286_s29 + $0x88] sm:$0xff]   ;;  %v961_v4 = vrot.slane %v10893_v26, 1 }
 0x146   : > { %v1915_v37 = vpop.f32.mrf.mxu0  ;;  %2498 = vmatprep.mubr.bf16.mxu1 %v1147_v23  ;;  %v1153_v23 = vrot.slane %v969_v39, 3  ;;  %v1036_v0 = vrot.slane %v11256_v25, 2 }
 0x147   : > { %v11235_v5 = vadd.f32 %v2090_v24, %v1914_v63  ;;  %v2092_v14 = vpop.f32.mrf.mxu1  ;;  %v960_v48 = vsel %vm892_vm3, %v955_v42, %v959_v13 }
 0x148   : > { %v1916_v22 = vpop.f32.mrf.mxu0  ;;  %v1154_v37 = vor.u32 %v1153_v23, %v1152_v50  ;;  %v1157_v14 = vshrl.u32 %v11252_v33, 16 }
 0x149   : > { %v1917_v40 = vadd.f32 %v1916_v22, %v11094_v62  ;;  %v2093_v43 = vpop.f32.mrf.mxu1  ;;  %v1160_v22 = vshll.u32 %v11252_v33, 16 }
 0x14a   : > { %v1918_v46 = vpop.f32.mrf.mxu0  ;;  %v1155_v23 = vsel %vm1083_vm4, %v1150_v41, %v1154_v37 }
 0x14b   : > { %v11244_v57 = vadd.f32 %v2093_v43, %v1917_v40  ;;  %v2095_v12 = vpop.f32.mrf.mxu1  ;;  %v962_v46 = vrot.slane %v10869_v27, 2 }
 0x14c   : > { %v1921_v8 = vpop.f32.mrf.mxu0  ;;  %2322 = vmatmul.mubr.bf16.gmra.mxu0 %v956_v55  ;;  %v1037_v12 = vsel %vm1004_vm2, %v1034_v56, %v1036_v0 }
 0x14d   : > { %v1922_v36 = vadd.f32 %v1921_v8, %v11094_v62  ;;  %v2098_v45 = vpop.f32.mrf.mxu1  ;;  %2499 = vmatmul.mubr.bf16.gmra.mxu1 %v1035_v30  ;;  %2329 = vmatprep.mubr.bf16.mxu0 %v1035_v30  ;;  %v1159_v8 = vrot.slane %v1157_v14, 2  ;;  %v963_v27 = vor.u32 %v962_v46, %v961_v4  ;;  %v968_v46 = vrot.slane %v966_v44, 1 }
 0x14e   : > { %v1923_v17 = vpop.f32.mrf.mxu0  ;;  %2506 = vmatprep.mubr.bf16.mxu1 %v1151_v15 }
 0x14f   : > { %v11259_v63 = vadd.f32 %v2098_v45, %v1922_v36  ;;  %v2100_v24 = vpop.f32.mrf.mxu1  ;;  %v1162_v36 = vrot.slane %v1160_v22, 3  ;;  %v11272_v45 = vld [vmem:[%s10286_s29 + $0xa0] ss:$0 sps:$4 sm:$0x77]   ;;  %v964_v4 = vsel %vm892_vm3, %v959_v13, %v963_v27 }
 0x150   : > { %v1924_v40 = vpop.f32.mrf.mxu0  ;;  %v11276_v24 = vld [vmem:[%s10286_s29 + $0x90] sm:$0xff]  }
 0x151   : > { %v1925_v43 = vadd.f32 %v1924_v40, %v11094_v62  ;;  %v2101_v55 = vpop.f32.mrf.mxu1  ;;  %v1038_v40 = vrot.slane %v11276_v24, 2  ;;  %v1163_v22 = vor.u32 %v1162_v36, %v1159_v8 }
 0x152   : > { %v1926_v30 = vpop.f32.mrf.mxu0 }
 0x153   : > { %v11268_v15 = vadd.f32 %v2101_v55, %v1925_v43  ;;  %v2103_v50 = vpop.f32.mrf.mxu1  ;;  %v1166_v43 = vshrl.u32 %v11272_v45, 16  ;;  %v1169_v55 = vshll.u32 %v11272_v45, 16  ;;  %v1039_v8 = vsel %vm1004_vm2, %v1036_v0, %v1038_v40 }
 0x154   : > { %v1929_v17 = vpop.f32.mrf.mxu0  ;;  %2330 = vmatmul.mubr.bf16.gmra.mxu0 %v960_v48  ;;  %v971_v50 = vrot.slane %v969_v39, 2  ;;  %v1073_v0 = vrot.slane %v11252_v33, 2 }
 0x155   : > { %v1930_v42 = vadd.f32 %v1929_v17, %v11094_v62  ;;  %v2106_v26 = vpop.f32.mrf.mxu1  ;;  %2507 = vmatmul.mubr.bf16.gmra.mxu1 %v1037_v12  ;;  %2337 = vmatprep.mubr.bf16.mxu0 %v1037_v12 }
 0x156   : > { %v1931_v56 = vpop.f32.mrf.mxu0  ;;  %2514 = vmatprep.mubr.bf16.mxu1 %v1155_v23  ;;  %v9551_v23 = vld [vmem:[%s10286_s29 + $0x98] ss:$0 sps:$4 sm:$0x33]   ;;  %v972_v21 = vor.u32 %v971_v50, %v968_v46 }
 0x157   : > { %v11279_v41 = vadd.f32 %v2106_v26, %v1930_v42  ;;  %v2108_v14 = vpop.f32.mrf.mxu1  ;;  %v1164_v26 = vsel %vm1083_vm4, %v1154_v37, %v1163_v22  ;;  %v1168_v56 = vrot.slane %v1166_v43, 2  ;;  %v975_v39 = vshrl.u32 %v9551_v23, 16 }
 0x158   : > { %v1932_v48 = vpop.f32.mrf.mxu0  ;;  %v1171_v14 = vrot.slane %v1169_v55, 3  ;;  %v1040_v37 = vrot.slane %v9551_v23, 2  ;;  %v973_v46 = vsel %vm892_vm3, %v963_v27, %v972_v21 }
 0x159   : > { %v1933_v30 = vadd.f32 %v1932_v48, %v11094_v62  ;;  %v2109_v12 = vpop.f32.mrf.mxu1  ;;  %v977_v50 = vrot.slane %v975_v39, 1 }
 0x15a   : > { %v1934_v17 = vpop.f32.mrf.mxu0  ;;  %v1041_v9 = vsel %vm1004_vm2, %v1038_v40, %v1040_v37  ;;  %v1197_v37 = vrot.slane %v10948_v18, 3 }
 0x15b   : > { %v11291_v36 = vadd.f32 %v2109_v12, %v1933_v30  ;;  %v2111_v42 = vpop.f32.mrf.mxu1  ;;  %v978_v17 = vshll.u32 %v9551_v23, 16  ;;  %v1172_v30 = vor.u32 %v1171_v14, %v1168_v56  ;;  %v531_v12 = vld [vmem:[%s10286_s29 + $0x10] sm:$0x8]  ;;  %v9997_v23 = vld [vmem:[%s10286_s29 + $0x14] sm:$0xf] }
 0x15c   : > { %v1937_v48 = vpop.f32.mrf.mxu0  ;;  %2338 = vmatmul.mubr.bf16.gmra.mxu0 %v964_v4 }
 0x15d   : > { %v1938_v13 = vadd.f32 %v1937_v48, %v11094_v62  ;;  %v2114_v44 = vpop.f32.mrf.mxu1  ;;  %2515 = vmatmul.mubr.bf16.gmra.mxu1 %v1039_v8  ;;  %2345 = vmatprep.mubr.bf16.mxu0 %v1039_v8  ;;  %v980_v8 = vrot.slane %v978_v17, 2  ;;  %v1173_v14 = vsel %vm1083_vm4, %v1163_v22, %v1172_v30 }
 0x15e   : > { %v1939_v1 = vpop.f32.mrf.mxu0  ;;  %2522 = vmatprep.mubr.bf16.mxu1 %v1164_v26  ;;  %v1074_v26 = vsel %vm1004_vm2, %v1038_v40, %v1073_v0 }
 0x15f   : > { %v11296_v43 = vadd.f32 %v2114_v44, %v1938_v13  ;;  %v2116_v55 = vpop.f32.mrf.mxu1  ;;  %v8578_v13 = vcombine.low %v531_v12, %v9997_v23  ;;  %v981_v39 = vor.u32 %v980_v8, %v977_v50 }
 0x160   : > { %v1940_v4 = vpop.f32.mrf.mxu0 }
 0x161   : > { %v1941_v42 = vadd.f32 %v1940_v4, %v11094_v62  ;;  %v2117_v48 = vpop.f32.mrf.mxu1  ;;  %v1196_v40 = vrot.slane %v8578_v13, 3 }
 0x162   : > { %v1942_v1 = vpop.f32.mrf.mxu0 }
 0x163   : > { %v11305_v44 = vadd.f32 %v2117_v48, %v1941_v42  ;;  %v2119_v56 = vpop.f32.mrf.mxu1  ;;  %v1075_v1 = vrot.slane %v9553_v7, 2  ;;  %v1198_v50 = vsel %vm1195_vm5, %v1196_v40, %v1197_v37 }
 0x164   : > { %v1945_v55 = vpop.f32.mrf.mxu0  ;;  %2346 = vmatmul.mubr.bf16.gmra.mxu0 %v973_v46  ;;  %v982_v46 = vsel %vm892_vm3, %v972_v21, %v981_v39  ;;  %v1199_v56 = vrot.slane %v10974_v60, 3  ;;  %v1201_v21 = vrot.slane %v10999_v3, 3 }
 0x165   : > { %v1946_v4 = vadd.f32 %v1945_v55, %v11094_v62  ;;  %v2122_v27 = vpop.f32.mrf.mxu1  ;;  %2523 = vmatmul.mubr.bf16.gmra.mxu1 %v1074_v26  ;;  %2353 = vmatprep.mubr.bf16.mxu0 %v1041_v9  ;;  %v1076_v9 = vsel %vm1004_vm2, %v1073_v0, %v1075_v1 }
 0x166   : > { %v1947_v17 = vpop.f32.mrf.mxu0  ;;  %2530 = vmatprep.mubr.bf16.mxu1 %v1173_v14  ;;  %v1202_v40 = vsel %vm1195_vm5, %v1199_v56, %v1201_v21 }
 0x167   : > { %v11310_v12 = vadd.f32 %v2122_v27, %v1946_v4  ;;  %v2124_v42 = vpop.f32.mrf.mxu1  ;;  %v1200_v17 = vsel %vm1195_vm5, %v1197_v37, %v1199_v56 }
 0x168   : > { %v1948_v48 = vpop.f32.mrf.mxu0 }
 0x169   : > { %v1949_v22 = vadd.f32 %v1948_v48, %v11094_v62  ;;  %v2125_v30 = vpop.f32.mrf.mxu1 }
 0x16a   : > { %v1950_v23 = vpop.f32.mrf.mxu0 }
 0x16b   : > { %v11316_v8 = vadd.f32 %v2125_v30, %v1949_v22  ;;  %v2127_v7 = vpop.f32.mrf.mxu1  ;;  %v1203_v30 = vrot.slane %v11025_v29, 3  ;;  %v1205_v23 = vrot.slane %v11051_v32, 3 }
 0x16c   : > { %v1953_v26 = vpop.f32.mrf.mxu0  ;;  %2354 = vmatmul.mubr.bf16.gmra.mxu0 %v982_v46 }
 0x16d   : > { %v1954_v18 = vadd.f32 %v1953_v26, %v11094_v62  ;;  %v2130_v13 = vpop.f32.mrf.mxu1  ;;  %2531 = vmatmul.mubr.bf16.gmra.mxu1 %v1076_v9  ;;  %9096 = vmatprep.mubr.bf16.mxu0 %v1198_v50  ;;  %v1206_v56 = vsel %vm1195_vm5, %v1203_v30, %v1205_v23 }
 0x16e   : > { %v1955_v14 = vpop.f32.mrf.mxu0 }
 0x16f   : > { %v11321_v55 = vadd.f32 %v2130_v13, %v1954_v18  ;;  %v2132_v0 = vpop.f32.mrf.mxu1  ;;  %v1204_v18 = vsel %vm1195_vm5, %v1201_v21, %v1203_v30 }
 0x170   : > { %v1956_v4 = vpop.f32.mrf.mxu0 }
 0x171   : > { %v1957_v27 = vadd.f32 %v1956_v4, %v11094_v62  ;;  %v2133_v39 = vpop.f32.mrf.mxu1 }
 0x172   : > { %v1958_v1 = vpop.f32.mrf.mxu0 }
 0x173   : > { %v11326_v42 = vadd.f32 %v2133_v39, %v1957_v27  ;;  %v2135_v48 = vpop.f32.mrf.mxu1  ;;  %v1207_v27 = vrot.slane %v11066_v52, 3 }
 0x174   : > { %v1961_v22 = vpop.f32.mrf.mxu0  ;;  %9097 = vmatmul.mubr.bf16.vlgmr.msra.gmra.mxu0 %v1200_v17  ;;  %v1209_v17 = vrot.slane %v11089_v61, 3  ;;  %v409_v61 = vld [vmem:[%s15859_s8 + $0x78] sm:$0xff] }
 0x175   : > { %v1962_v60 = vadd.f32 %v1961_v22, %v11094_v62  ;;  %v2138_v3 = vpop.f32.mrf.mxu1  ;;  %9100 = vmatprep.mubr.bf16.mxu0 %v1202_v40 }
 0x176   : > { %v1963_v46 = vpop.f32.mrf.mxu0  ;;  %v1210_v30 = vsel %vm1195_vm5, %v1207_v27, %v1209_v17 }
 0x177   : > { %v11331_v9 = vadd.f32 %v2138_v3, %v1962_v60  ;;  %v2140_v37 = vpop.f32.mrf.mxu1  ;;  %v1208_v60 = vsel %vm1195_vm5, %v1205_v23, %v1207_v27  ;;  %v15869_v46 = vmov 0.0   ;;  %v1211_v23 = vrot.slane %v11109_v20, 3 }
 0x178   : > { %v1964_v50 = vpop.f32.mrf.mxu0  ;;  %9132 = vmatprep.subr.mxu1 %v15869_v46 }
 0x179   : > { %v1965_v7 = vadd.f32 %v1964_v50, %v11094_v62  ;;  %v2141_v26 = vpop.f32.mrf.mxu1  ;;  %9133 = vmatpush3.msra.mxu1 %v409_v61  ;;  %v1212_v27 = vsel %vm1195_vm5, %v1209_v17, %v1211_v23 }
 0x17a   : > { %v1966_v13 = vpop.f32.mrf.mxu0  ;;  %9134 = vmatprep.subr.mxu1 %v15869_v46 }
 0x17b   : > { %v11336_v14 = vadd.f32 %v2141_v26, %v1965_v7  ;;  %v2143_v0 = vpop.f32.mrf.mxu1  ;;  %v1213_v13 = vrot.slane %v11130_v28, 3 }
 0x17c   : > { %v1969_v4 = vpop.f32.mrf.mxu0  ;;  %9101 = vmatmul.mubr.bf16.gmra.mxu0 %v1204_v18 }
 0x17d   : > { %v1970_v29 = vadd.f32 %v1969_v4, %v11094_v62  ;;  %v2146_v32 = vpop.f32.mrf.mxu1  ;;  %9104 = vmatprep.mubr.bf16.mxu0 %v1206_v56 }
 0x17e   : > { %v1971_v39 = vpop.f32.mrf.mxu0 }
 0x17f   : > { %v11341_v1 = vadd.f32 %v2146_v32, %v1970_v29  ;;  %v2148_v21 = vpop.f32.mrf.mxu1 }
 0x180   : > { %v1972_v40 = vpop.f32.mrf.mxu0  ;;  %v1214_v21 = vsel %vm1195_vm5, %v1211_v23, %v1213_v13 }
 0x181   : > { %v1973_v48 = vadd.f32 %v1972_v40, %v11094_v62  ;;  %v2149_v22 = vpop.f32.mrf.mxu1 }
 0x182   : > { %v1974_v3 = vpop.f32.mrf.mxu0 }
 0x183   : > { %v11347_v37 = vadd.f32 %v2149_v22, %v1973_v48  ;;  %v2151_v52 = vpop.f32.mrf.mxu1  ;;  %v408_v48 = vld [vmem:[%s15859_s8 + $0x70] sm:$0xff]  ;;  %v1215_v3 = vrot.slane %v11151_v19, 3 }
 0x184   : > { %v1977_v50 = vpop.f32.mrf.mxu0  ;;  %9105 = vmatmul.mubr.bf16.gmra.mxu0 %v1208_v60  ;;  %9135 = vmatpush3.msra.mxu1 %v408_v48 }
 0x185   : > { %v1978_v7 = vadd.f32 %v1977_v50, %v11094_v62  ;;  %v2154_v26 = vpop.f32.mrf.mxu1  ;;  %9108 = vmatprep.mubr.bf16.mxu0 %v1210_v30  ;;  %9136 = vmatprep.subr.mxu1 %v15869_v46  ;;  %v1217_v30 = vrot.slane %v11172_v34, 3  ;;  %v1216_v23 = vsel %vm1195_vm5, %v1213_v13, %v1215_v3 }
 0x186   : > { %v1979_v18 = vpop.f32.mrf.mxu0 }
 0x187   : > { %v11356_v56 = vadd.f32 %v2154_v26, %v1978_v7  ;;  %v2156_v0 = vpop.f32.mrf.mxu1 }
 0x188   : > { %v1980_v4 = vpop.f32.mrf.mxu0  ;;  %v1218_v0 = vsel %vm1195_vm5, %v1215_v3, %v1217_v30 }
 0x189   : > { %v1981_v29 = vadd.f32 %v1980_v4, %v11094_v62  ;;  %v2157_v32 = vpop.f32.mrf.mxu1 }
 0x18a   : > { %v1982_v39 = vpop.f32.mrf.mxu0 }
 0x18b   : > { %v11361_v40 = vadd.f32 %v2157_v32, %v1981_v29  ;;  %v2159_v20 = vpop.f32.mrf.mxu1  ;;  %v11382_v39 = vld [vmem:[%s15859_s8 + $0x68] sm:$0xff] }
 0x18c   : > { %v1985_v28 = vpop.f32.mrf.mxu0  ;;  %9109 = vmatmul.mubr.bf16.gmra.mxu0 %v1212_v27  ;;  %v1219_v27 = vrot.slane %v11193_v38, 3  ;;  %9137 = vmatpush3.msra.mxu1 %v11382_v39 }
 0x18d   : > { %v1986_v22 = vadd.f32 %v1985_v28, %v11094_v62  ;;  %v2162_v60 = vpop.f32.mrf.mxu1  ;;  %9112 = vmatprep.mubr.bf16.mxu0 %v1214_v21  ;;  %v1221_v21 = vrot.slane %v11214_v54, 3  ;;  %9138 = vmatprep.subr.mxu1 %v15869_v46 }
 0x18e   : > { %v1987_v17 = vpop.f32.mrf.mxu0  ;;  %v1220_v38 = vsel %vm1195_vm5, %v1217_v30, %v1219_v27 }
 0x18f   : > { %v11370_v52 = vadd.f32 %v2162_v60, %v1986_v22  ;;  %v2164_v61 = vpop.f32.mrf.mxu1  ;;  %v1222_v17 = vsel %vm1195_vm5, %v1219_v27, %v1221_v21 }
 0x190   : > { %v1988_v50 = vpop.f32.mrf.mxu0 }
 0x191   : > { %v1989_v7 = vadd.f32 %v1988_v50, %v11094_v62  ;;  %v2165_v26 = vpop.f32.mrf.mxu1 }
 0x192   : > { %v1990_v18 = vpop.f32.mrf.mxu0 }
 0x193   : > { %v11375_v4 = vadd.f32 %v2165_v26, %v1989_v7  ;;  %v2167_v19 = vpop.f32.mrf.mxu1  ;;  %v11399_v18 = vld [vmem:[%s15859_s8 + $0x60] sm:$0xff] }
 0x194   : > { %v1993_v29 = vpop.f32.mrf.mxu0  ;;  %9113 = vmatmul.mubr.bf16.gmra.mxu0 %v1216_v23  ;;  %v1223_v23 = vrot.slane %v11232_v35, 3  ;;  %9139 = vmatpush3.msra.mxu1 %v11399_v18 }
 0x195   : > { %v1994_v32 = vadd.f32 %v1993_v29, %v11094_v62  ;;  %v2170_v34 = vpop.f32.mrf.mxu1  ;;  %9116 = vmatprep.mubr.bf16.mxu0 %v1218_v0  ;;  %v1225_v0 = vrot.slane %v11256_v25, 3  ;;  %9140 = vmatprep.subr.mxu1 %v15869_v46 }
 0x196   : > { %v1995_v13 = vpop.f32.mrf.mxu0  ;;  %v1224_v35 = vsel %vm1195_vm5, %v1221_v21, %v1223_v23 }
 0x197   : > { %v11386_v20 = vadd.f32 %v2170_v34, %v1994_v32  ;;  %v2172_v48 = vpop.f32.mrf.mxu1 }
 0x198   : > { %v1996_v28 = vpop.f32.mrf.mxu0  ;;  %v1226_v48 = vsel %vm1195_vm5, %v1223_v23, %v1225_v0 }
 0x199   : > { %v1997_v22 = vadd.f32 %v1996_v28, %v11094_v62  ;;  %v2173_v60 = vpop.f32.mrf.mxu1 }
 0x19a   : > { %v1998_v3 = vpop.f32.mrf.mxu0 }
 0x19b   : > { %v11392_v61 = vadd.f32 %v2173_v60, %v1997_v22  ;;  %v2175_v50 = vpop.f32.mrf.mxu1  ;;  %v1227_v3 = vrot.slane %v11276_v24, 3 }
 0x19c   : > { %v2001_v54 = vpop.f32.mrf.mxu0  ;;  %9117 = vmatmul.mubr.bf16.gmra.mxu0 %v1220_v38 }
 0x19d   : > { %v2002_v7 = vadd.f32 %v2001_v54, %v11094_v62  ;;  %v2178_v26 = vpop.f32.mrf.mxu1  ;;  %9120 = vmatprep.mubr.bf16.mxu0 %v1222_v17  ;;  %v11419_v54 = vld [vmem:[%s15859_s8 + $0x58] sm:$0xff]  ;;  %v1228_v23 = vsel %vm1195_vm5, %v1225_v0, %v1227_v3 }
 0x19e   : > { %v2003_v30 = vpop.f32.mrf.mxu0  ;;  %16095 = vst [vmem:[#allocation8_spill] sm:$0xff] %v11419_v54  ;;  %9141 = vmatpush3.msra.mxu1 %v11419_v54 }
 0x19f   : > { %v11403_v19 = vadd.f32 %v2178_v26, %v2002_v7  ;;  %v2180_v29 = vpop.f32.mrf.mxu1  ;;  %9142 = vmatprep.subr.mxu1 %v15869_v46 }
 0x1a0   : > { %v2004_v32 = vpop.f32.mrf.mxu0 }
 0x1a1   : > { %v2005_v34 = vadd.f32 %v2004_v32, %v11094_v62  ;;  %v2181_v27 = vpop.f32.mrf.mxu1  ;;  %v1229_v62 = vrot.slane %v11252_v33, 3 }
 0x1a2   : > { %v2006_v13 = vpop.f32.mrf.mxu0 }
 0x1a3   : > { %v11409_v28 = vadd.f32 %v2181_v27, %v2005_v34  ;;  %v2183_v22 = vpop.f32.mrf.mxu1  ;;  %v1230_v33 = vsel %vm1195_vm5, %v1227_v3, %v1229_v62 }
 0x1a4   : > { %v2219_v25 = vpop.f32.mrf.mxu0  ;;  %9121 = vmatmul.mubr.bf16.gmra.mxu0 %v1224_v35  ;;  %v1231_v35 = vrot.slane %v11272_v45, 3 }
 0x1a5   : > { %v2220_v60 = vadd.f32 %v2219_v25, %v11112_v58  ;;  %v2396_v38 = vpop.f32.mrf.mxu1  ;;  %9124 = vmatprep.mubr.bf16.mxu0 %v1226_v48  ;;  %v11435_v48 = vld [vmem:[%s15859_s8 + $0x50] sm:$0xff] }
 0x1a6   : > { %v2221_v17 = vpop.f32.mrf.mxu0  ;;  %16096 = vst [vmem:[#allocation9_spill] sm:$0xff] %v11435_v48  ;;  %9143 = vmatpush3.msra.mxu1 %v11435_v48 }
 0x1a7   : > { %v11414_v50 = vadd.f32 %v2396_v38, %v2220_v60  ;;  %v2398_v21 = vpop.f32.mrf.mxu1  ;;  %9144 = vmatprep.subr.mxu1 %v15869_v46 }
 0x1a8   : > { %v2222_v7 = vpop.f32.mrf.mxu0 }
 0x1a9   : > { %v2223_v58 = vadd.f32 %v2222_v7, %v11121_v51  ;;  %v2399_v26 = vpop.f32.mrf.mxu1 }
 0x1aa   : > { %v2224_v24 = vpop.f32.mrf.mxu0 }
 0x1ab   : > { %v11426_v30 = vadd.f32 %v2399_v26, %v2223_v58  ;;  %v2401_v29 = vpop.f32.mrf.mxu1 }
 0x1ac   : > { %v2227_v32 = vpop.f32.mrf.mxu0  ;;  %9125 = vmatmul.mubr.bf16.gmra.mxu0 %v1228_v23  ;;  %v4142_v29 = vld [vmem:[#allocation2 + $0x98] sm:$0xe] }
 0x1ad   : > { %v2228_v34 = vadd.f32 %v2227_v32, %v11133_v10  ;;  %v2404_v27 = vpop.f32.mrf.mxu1  ;;  %9128 = vmatprep.mubr.bf16.mxu0 %v1230_v33  ;;  %v1232_v10 = vsel %vm1195_vm5, %v1229_v62, %v1231_v35  ;;  %v4136_v62 = vld [vmem:[#allocation2 + $0x8] sm:$0x3] }
 0x1ae   : > { %v2229_v51 = vpop.f32.mrf.mxu0 }
 0x1af   : > { %v11430_v13 = vadd.f32 %v2404_v27, %v2228_v34  ;;  %v2406_v0 = vpop.f32.mrf.mxu1  ;;  %v4137_v51 = vsel %vm11450_vm10, 0, %v4136_v62  ;;  %v11479_v62 = vld [vmem:[%s15859_s8 + $0x40] sm:$0xff] }
 0x1b0   : > { %v2230_v22 = vpop.f32.mrf.mxu0  ;;  %v16101_v0 = vmov 0  ;;  %4138 = vst [vmem:[#allocation2 + $0x8] sm:$0x3] %v4137_v51  ;;  %16104 = vst [vmem:[#allocation13_spill] sm:$0xff] %v11479_v62 }
 0x1b1   : > { %v2231_v25 = vadd.f32 %v2230_v22, %v11142_v31  ;;  %v2407_v60 = vpop.f32.mrf.mxu1  ;;  %v16102_v0 = vsel %vm11461_vm11, 4294967295, %v16101_v0 }
 0x1b2   : > { %v2232_v45 = vpop.f32.mrf.mxu0  ;;  %16103 = vst [vmem:[#allocation12_spill] sm:$0xff] %v16102_v0 }
 0x1b3   : > { %v11441_v38 = vadd.f32 %v2407_v60, %v2231_v25  ;;  %v2409_v3 = vpop.f32.mrf.mxu1  ;;  %v4143_v60 = vsel %vm11461_vm11, 0, %v4142_v29 }
 0x1b4   : > { %v2235_v17 = vpop.f32.mrf.mxu0  ;;  %9129 = vmatmul.mubr.bf16.gmra.mxu0 %v1232_v10  ;;  %4144 = vst [vmem:[#allocation2 + $0x98] sm:$0xe] %v4143_v60 }
 0x1b5   : > { %v2236_v21 = vadd.f32 %v2235_v17, %v11154_v16  ;;  %v2412_v7 = vpop.f32.mrf.mxu1  ;;  %v16097_v16 = vmov 0 }
 0x1b6   : > { %v2237_v58 = vpop.f32.mrf.mxu0  ;;  %v16098_v16 = vsel %vm11450_vm10, 4294967295, %v16097_v16 }
 0x1b7   : > { %v11444_v26 = vadd.f32 %v2412_v7, %v2236_v21  ;;  %v2414_v23 = vpop.f32.mrf.mxu1  ;;  %16099 = vst [vmem:[#allocation10_spill] sm:$0xff] %v16098_v16 }
 0x1b8   : > { %v2238_v24 = vpop.f32.mrf.mxu0 }
 0x1b9   : > { %v2239_v31 = vadd.f32 %v2238_v24, %v11163_v53  ;;  %v2415_v33 = vpop.f32.mrf.mxu1  ;;  %v11457_v53 = vld [vmem:[%s15859_s8 + $0x48] sm:$0xff] }
 0x1ba   : > { %v2240_v32 = vpop.f32.mrf.mxu0  ;;  %16100 = vst [vmem:[#allocation11_spill] sm:$0xff] %v11457_v53  ;;  %9145 = vmatpush3.msra.mxu1 %v11457_v53 }
 0x1bb   : > { %v11447_v34 = vadd.f32 %v2415_v33, %v2239_v31  ;;  %v2417_v27 = vpop.f32.mrf.mxu1  ;;  %9146 = vmatprep.subr.mxu1 %v15869_v46 }
 0x1bc   : > { %v2243_v35 = vpop.f32.mrf.mxu0  ;;  %9147 = vmatpush3.msra.mxu1 %v11479_v62 }
 0x1bd   : > { %v2244_v22 = vadd.f32 %v2243_v35, %v11175_v49  ;;  %v2420_v25 = vpop.f32.mrf.mxu1  ;;  %9148 = vmatprep.subr.mxu1 %v15869_v46 }
 0x1be   : > { %v2245_v10 = vpop.f32.mrf.mxu0 }
 0x1bf   : > { %v11470_v45 = vadd.f32 %v2420_v25, %v2244_v22  ;;  %v2422_v3 = vpop.f32.mrf.mxu1 }
 0x1c0   : > { %v2246_v17 = vpop.f32.mrf.mxu0 }
 0x1c1   : > { %v2247_v21 = vadd.f32 %v2246_v17, %v11184_v47  ;;  %v2423_v7 = vpop.f32.mrf.mxu1 }
 0x1c2   : > { %v2248_v58 = vpop.f32.mrf.mxu0 }
 0x1c3   : > { %v11473_v23 = vadd.f32 %v2423_v7, %v2247_v21  ;;  %v2425_v49 = vpop.f32.mrf.mxu1 }
 0x1c4   : > { %v2251_v24 = vpop.f32.mrf.mxu0 }
 0x1c5   : > { %v2252_v31 = vadd.f32 %v2251_v24, %v11196_v6  ;;  %v2428_v33 = vpop.f32.mrf.mxu1 }
 0x1c6   : > { %v2253_v29 = vpop.f32.mrf.mxu0 }
 0x1c7   : > { %v11482_v32 = vadd.f32 %v2428_v33, %v2252_v31  ;;  %v2430_v47 = vpop.f32.mrf.mxu1 }
 0x1c8   : > { %v2254_v27 = vpop.f32.mrf.mxu0 }
 0x1c9   : > { %v2255_v35 = vadd.f32 %v2254_v27, %v11205_v11  ;;  %v2431_v51 = vpop.f32.mrf.mxu1  ;;  %v11495_v11 = vld [vmem:[%s15859_s8 + $0x38] sm:$0xff] }
 0x1ca   : > { %v2256_v22 = vpop.f32.mrf.mxu0  ;;  %16105 = vst [vmem:[#allocation14_spill] sm:$0xff] %v11495_v11  ;;  %9149 = vmatpush3.msra.mxu1 %v11495_v11 }
 0x1cb   : > { %v11486_v6 = vadd.f32 %v2431_v51, %v2255_v35  ;;  %v2433_v25 = vpop.f32.mrf.mxu1  ;;  %9150 = vmatprep.subr.mxu1 %v15869_v46 }
 0x1cc   : > { %v2259_v60 = vpop.f32.mrf.mxu0 }
 0x1cd   : > { %v2260_v10 = vadd.f32 %v2259_v60, %v11217_v2  ;;  %v2436_v3 = vpop.f32.mrf.mxu1 }
 0x1ce   : > { %v2261_v17 = vpop.f32.mrf.mxu0 }
 0x1cf   : > { %v11489_v21 = vadd.f32 %v2436_v3, %v2260_v10  ;;  %v2438_v7 = vpop.f32.mrf.mxu1  ;;  %v11508_v10 = vld [vmem:[%s15859_s8 + $0x30] sm:$0xff] }
 0x1d0   : > { %v2262_v58 = vpop.f32.mrf.mxu0  ;;  %16106 = vst [vmem:[#allocation15_spill] sm:$0xff] %v11508_v10  ;;  %9151 = vmatpush3.msra.mxu1 %v11508_v10 }
 0x1d1   : > { %v2263_v49 = vadd.f32 %v2262_v58, %v11225_v59  ;;  %v2439_v24 = vpop.f32.mrf.mxu1  ;;  %9152 = vmatprep.subr.mxu1 %v15869_v46 }
 0x1d2   : > { %v2264_v31 = vpop.f32.mrf.mxu0 }
 0x1d3   : > { %v11498_v33 = vadd.f32 %v2439_v24, %v2263_v49  ;;  %v2441_v2 = vpop.f32.mrf.mxu1 }
 0x1d4   : > { %v2267_v29 = vpop.f32.mrf.mxu0 }
 0x1d5   : > { %v2268_v47 = vadd.f32 %v2267_v29, %v11235_v5  ;;  %v2444_v27 = vpop.f32.mrf.mxu1 }
 0x1d6   : > { %v2269_v35 = vpop.f32.mrf.mxu0 }
 0x1d7   : > { %v11502_v59 = vadd.f32 %v2444_v27, %v2268_v47  ;;  %v2446_v51 = vpop.f32.mrf.mxu1  ;;  %v11521_v27 = vld [vmem:[%s15859_s8 + $0x28] sm:$0xff] }
 0x1d8   : > { %v2270_v22 = vpop.f32.mrf.mxu0  ;;  %16107 = vst [vmem:[#allocation16_spill] sm:$0xff] %v11521_v27  ;;  %9153 = vmatpush3.msra.mxu1 %v11521_v27 }
 0x1d9   : > { %v2271_v25 = vadd.f32 %v2270_v22, %v11244_v57  ;;  %v2447_v60 = vpop.f32.mrf.mxu1  ;;  %9154 = vmatprep.subr.mxu1 %v15869_v46 }
 0x1da   : > { %v2272_v3 = vpop.f32.mrf.mxu0 }
 0x1db   : > { %v11511_v17 = vadd.f32 %v2447_v60, %v2271_v25  ;;  %v2449_v5 = vpop.f32.mrf.mxu1 }
 0x1dc   : > { %v2275_v7 = vpop.f32.mrf.mxu0 }
 0x1dd   : > { %v2276_v58 = vadd.f32 %v2275_v7, %v11259_v63  ;;  %v2452_v49 = vpop.f32.mrf.mxu1 }
 0x1de   : > { %v2277_v24 = vpop.f32.mrf.mxu0 }
 0x1df   : > { %v11515_v57 = vadd.f32 %v2452_v49, %v2276_v58  ;;  %v2454_v31 = vpop.f32.mrf.mxu1  ;;  %v11534_v24 = vld [vmem:[%s15859_s8 + $0x20] sm:$0xff] }
 0x1e0   : > { %v2278_v2 = vpop.f32.mrf.mxu0  ;;  %16108 = vst [vmem:[#allocation17_spill] sm:$0xff] %v11534_v24  ;;  %9155 = vmatpush3.msra.mxu1 %v11534_v24 }
 0x1e1   : > { %v2279_v29 = vadd.f32 %v2278_v2, %v11268_v15  ;;  %v2455_v47 = vpop.f32.mrf.mxu1  ;;  %9156 = vmatprep.subr.mxu1 %v15869_v46 }
 0x1e2   : > { %v2280_v35 = vpop.f32.mrf.mxu0 }
 0x1e3   : > { %v11524_v51 = vadd.f32 %v2455_v47, %v2279_v29  ;;  %v2457_v63 = vpop.f32.mrf.mxu1 }
 0x1e4   : > { %v2283_v22 = vpop.f32.mrf.mxu0 }
 0x1e5   : > { %v2284_v25 = vadd.f32 %v2283_v22, %v11279_v41  ;;  %v2460_v60 = vpop.f32.mrf.mxu1 }
 0x1e6   : > { %v2285_v3 = vpop.f32.mrf.mxu0 }
 0x1e7   : > { %v11528_v15 = vadd.f32 %v2460_v60, %v2284_v25  ;;  %v2462_v5 = vpop.f32.mrf.mxu1 }
 0x1e8   : > { %v2286_v7 = vpop.f32.mrf.mxu0 }
 0x1e9   : > { %v2287_v58 = vadd.f32 %v2286_v7, %v11291_v36  ;;  %v2463_v49 = vpop.f32.mrf.mxu1 }
 0x1ea   : > { %v2288_v31 = vpop.f32.mrf.mxu0 }
 0x1eb   : > { %v11537_v2 = vadd.f32 %v2463_v49, %v2287_v58  ;;  %v2465_v41 = vpop.f32.mrf.mxu1 }
 0x1ec   : > { %v2291_v29 = vpop.f32.mrf.mxu0 }
 0x1ed   : > { %v2292_v47 = vadd.f32 %v2291_v29, %v11296_v43  ;;  %v2468_v35 = vpop.f32.mrf.mxu1  ;;  %v11550_v43 = vld [vmem:[%s15859_s8 + $0x18] sm:$0xff] }
 0x1ee   : > { %v2293_v63 = vpop.f32.mrf.mxu0  ;;  %16109 = vst [vmem:[#allocation18_spill] sm:$0xff] %v11550_v43  ;;  %9157 = vmatpush3.msra.mxu1 %v11550_v43 }
 0x1ef   : > { %v11541_v36 = vadd.f32 %v2468_v35, %v2292_v47  ;;  %v2470_v22 = vpop.f32.mrf.mxu1  ;;  %9158 = vmatprep.subr.mxu1 %v15869_v46 }
 0x1f0   : > { %v2294_v25 = vpop.f32.mrf.mxu0 }
 0x1f1   : > { %v2295_v60 = vadd.f32 %v2294_v25, %v11305_v44  ;;  %v2471_v3 = vpop.f32.mrf.mxu1 }
 0x1f2   : > { %v2296_v5 = vpop.f32.mrf.mxu0 }
 0x1f3   : > { %v11544_v7 = vadd.f32 %v2471_v3, %v2295_v60  ;;  %v2473_v58 = vpop.f32.mrf.mxu1 }
 0x1f4   : > { %v2299_v49 = vpop.f32.mrf.mxu0 }
 0x1f5   : > { %v2300_v31 = vadd.f32 %v2299_v49, %v11310_v12  ;;  %v2476_v41 = vpop.f32.mrf.mxu1  ;;  %v11563_v49 = vld [vmem:[%s15859_s8 + $0x10] sm:$0xff] }
 0x1f6   : > { %v2301_v29 = vpop.f32.mrf.mxu0  ;;  %16110 = vst [vmem:[#allocation19_spill] sm:$0xff] %v11563_v49  ;;  %9159 = vmatpush3.msra.mxu1 %v11563_v49 }
 0x1f7   : > { %v11553_v47 = vadd.f32 %v2476_v41, %v2300_v31  ;;  %v2478_v44 = vpop.f32.mrf.mxu1  ;;  %9160 = vmatprep.subr.mxu1 %v15869_v46 }
 0x1f8   : > { %v2302_v35 = vpop.f32.mrf.mxu0 }
 0x1f9   : > { %v2303_v63 = vadd.f32 %v2302_v35, %v11316_v8  ;;  %v2479_v22 = vpop.f32.mrf.mxu1 }
 0x1fa   : > { %v2304_v25 = vpop.f32.mrf.mxu0 }
 0x1fb   : > { %v11557_v12 = vadd.f32 %v2479_v22, %v2303_v63  ;;  %v2481_v60 = vpop.f32.mrf.mxu1 }
 0x1fc   : > { %v2307_v3 = vpop.f32.mrf.mxu0 }
 0x1fd   : > { %v2308_v5 = vadd.f32 %v2307_v3, %v11321_v55  ;;  %v2484_v58 = vpop.f32.mrf.mxu1 }
 0x1fe   : > { %v2309_v31 = vpop.f32.mrf.mxu0 }
 0x1ff   : > { %v11566_v41 = vadd.f32 %v2484_v58, %v2308_v5  ;;  %v2486_v8 = vpop.f32.mrf.mxu1 }
 0x200   : > { %v2310_v29 = vpop.f32.mrf.mxu0 }
 0x201   : > { %v2311_v44 = vadd.f32 %v2310_v29, %v11326_v42  ;;  %v2487_v35 = vpop.f32.mrf.mxu1 }
 0x202   : > { %v2312_v63 = vpop.f32.mrf.mxu0 }
 0x203   : > { %v11570_v55 = vadd.f32 %v2487_v35, %v2311_v44  ;;  %v2489_v22 = vpop.f32.mrf.mxu1 }
 0x204   : > { %v2315_v25 = vpop.f32.mrf.mxu0 }
 0x205   : > { %v2316_v60 = vadd.f32 %v2315_v25, %v11331_v9  ;;  %v2492_v3 = vpop.f32.mrf.mxu1  ;;  %v11582_v9 = vld [vmem:[%s15859_s8 + $0x8] sm:$0xff]  ;;  %v16112_v25 = vmov 0.0  }
 0x206   : > { %v2317_v31 = vpop.f32.mrf.mxu0  ;;  %16111 = vst [vmem:[#allocation20_spill] sm:$0xff] %v11582_v9  ;;  %9161 = vmatpush3.msra.mxu1 %v11582_v9  ;;  %9164 = vmatprep.mubr.msk.f32.mxu1 %vm10101_vm12, %v16112_v25 }
 0x207   : > { %v11573_v16 = vadd.f32 %v2492_v3, %v2316_v60  ;;  %v2494_v5 = vpop.f32.mrf.mxu1  ;;  %9162 = vmatprep.subr.mxu1 %v16112_v25 }
 0x208   : > { %v2318_v58 = vpop.f32.mrf.mxu0 }
 0x209   : > { %v2319_v8 = vadd.f32 %v2318_v58, %v11336_v14  ;;  %v2495_v46 = vpop.f32.mrf.mxu1 }
 0x20a   : > { %v2320_v0 = vpop.f32.mrf.mxu0 }
 0x20b   : > { %v11576_v49 = vadd.f32 %v2495_v46, %v2319_v8  ;;  %v2497_v42 = vpop.f32.mrf.mxu1  ;;  %v11591_v46 = vld [vmem:[%s15859_s8] sm:$0xff] }
 0x20c   : > { %v2323_v29 = vpop.f32.mrf.mxu0  ;;  %16113 = vst [vmem:[#allocation21_spill] sm:$0xff] %v11591_v46  ;;  %9163 = vmatpush3.msra.mxu1 %v11591_v46  ;;  %v11606_v46 = vpop.permute.xlu1 %2728 }
 0x20d   : > { %v2324_v44 = vadd.f32 %v2323_v29, %v11341_v1  ;;  %v2500_v35 = vpop.f32.mrf.mxu1  ;;  %9167 = vmatprep.subr.mxu1 %v16112_v25  ;;  %16115 = vst [vmem:[#allocation23_spill] sm:$0xff] %v11606_v46 }
 0x20e   : > { %v2325_v63 = vpop.f32.mrf.mxu0 }
 0x20f   : > { %v11585_v22 = vadd.f32 %v2500_v35, %v2324_v44  ;;  %v2502_v14 = vpop.f32.mrf.mxu1  ;;  %v11603_v63 = vpop.permute.xlu0 %2718 }
 0x210   : > { %v2326_v1 = vpop.f32.mrf.mxu0  ;;  %16114 = vst [vmem:[#allocation22_spill] sm:$0xff] %v11603_v63  ;;  %v11615_v9 = vpop.permute.xlu1 %2733 }
 0x211   : > { %v2327_v0 = vadd.f32 %v2326_v1, %v11347_v37  ;;  %v2503_v60 = vpop.f32.mrf.mxu1  ;;  %16117 = vst [vmem:[#allocation25_spill] sm:$0xff] %v11615_v9 }
 0x212   : > { %v2328_v3 = vpop.f32.mrf.mxu0 }
 0x213   : > { %v11598_v31 = vadd.f32 %v2503_v60, %v2327_v0  ;;  %v2505_v5 = vpop.f32.mrf.mxu1 }
 0x214   : > { %v2331_v58 = vpop.f32.mrf.mxu0 }
 0x215   : > { %v2332_v8 = vadd.f32 %v2331_v58, %v11356_v56  ;;  %v2508_v42 = vpop.f32.mrf.mxu1 }
 0x216   : > { %v2333_v29 = vpop.f32.mrf.mxu0 }
 0x217   : > { %v11601_v44 = vadd.f32 %v2508_v42, %v2332_v8  ;;  %v2510_v35 = vpop.f32.mrf.mxu1  ;;  %v11611_v29 = vpop.permute.xlu0 %2723 }
 0x218   : > { %v2334_v14 = vpop.f32.mrf.mxu0  ;;  %16116 = vst [vmem:[#allocation24_spill] sm:$0xff] %v11611_v29 }
 0x219   : > { %v2335_v37 = vadd.f32 %v2334_v14, %v11361_v40  ;;  %v2511_v1 = vpop.f32.mrf.mxu1 }
 0x21a   : > { %v2336_v3 = vpop.f32.mrf.mxu0 }
 0x21b   : > { %v11608_v0 = vadd.f32 %v2511_v1, %v2335_v37  ;;  %v2513_v60 = vpop.f32.mrf.mxu1 }
 0x21c   : > { %v2339_v5 = vpop.f32.mrf.mxu0  ;;  %v11620_v60 = vpop.permute.xlu0 %2738 }
 0x21d   : > { %v2340_v56 = vadd.f32 %v2339_v5, %v11370_v52  ;;  %v2516_v58 = vpop.f32.mrf.mxu1  ;;  %16118 = vst [vmem:[#allocation26_spill] sm:$0xff] %v11620_v60 }
 0x21e   : > { %v2341_v8 = vpop.f32.mrf.mxu0 }
 0x21f   : > { %v11613_v42 = vadd.f32 %v2516_v58, %v2340_v56  ;;  %v2518_v35 = vpop.f32.mrf.mxu1  ;;  %v11623_v8 = vpop.permute.xlu1 %2743 }
 0x220   : > { %v2342_v40 = vpop.f32.mrf.mxu0  ;;  %16119 = vst [vmem:[#allocation27_spill] sm:$0xff] %v11623_v8 }
 0x221   : > { %v2343_v14 = vadd.f32 %v2342_v40, %v11375_v4  ;;  %v2519_v43 = vpop.f32.mrf.mxu1 }
 0x222   : > { %v2344_v3 = vpop.f32.mrf.mxu0 }
 0x223   : > { %v11618_v37 = vadd.f32 %v2519_v43, %v2343_v14  ;;  %v2521_v1 = vpop.f32.mrf.mxu1  ;;  %v11628_v3 = vpop.permute.xlu0 %2748 }
 0x224   : > { %v2347_v52 = vpop.f32.mrf.mxu0  ;;  %16120 = vst [vmem:[#allocation28_spill] sm:$0xff] %v11628_v3  ;;  %v11632_v10 = vpop.permute.xlu1 %2753 }
 0x225   : > { %v2348_v5 = vadd.f32 %v2347_v52, %v11386_v20  ;;  %v2524_v24 = vpop.f32.mrf.mxu1  ;;  %16121 = vst [vmem:[#allocation29_spill] sm:$0xff] %v11632_v10 }
 0x226   : > { %v2349_v56 = vpop.f32.mrf.mxu0 }
 0x227   : > { %v11625_v58 = vadd.f32 %v2524_v24, %v2348_v5  ;;  %v2526_v35 = vpop.f32.mrf.mxu1 }
 0x228   : > { %v2350_v27 = vpop.f32.mrf.mxu0  ;;  %v11637_v35 = vpop.permute.xlu0 %2758 }
 0x229   : > { %v2351_v4 = vadd.f32 %v2350_v27, %v11392_v61  ;;  %v2527_v40 = vpop.f32.mrf.mxu1  ;;  %16122 = vst [vmem:[#allocation30_spill] sm:$0xff] %v11637_v35 }
 0x22a   : > { %v2352_v43 = vpop.f32.mrf.mxu0 }
 0x22b   : > { %v11630_v14 = vadd.f32 %v2527_v40, %v2351_v4  ;;  %v2529_v1 = vpop.f32.mrf.mxu1  ;;  %v11640_v43 = vpop.permute.xlu1 %2763 }
 0x22c   : > { %v2355_v20 = vpop.f32.mrf.mxu0  ;;  %16123 = vst [vmem:[#allocation31_spill] sm:$0xff] %v11640_v43  ;;  %v11644_v48 = vpop.permute.xlu0 %2768 }
 0x22d   : > { %v2356_v52 = vadd.f32 %v2355_v20, %v11403_v19  ;;  %v2532_v11 = vpop.f32.mrf.mxu1  ;;  %16124 = vst [vmem:[#allocation32_spill] sm:$0xff] %v11644_v48 }
 0x22e   : > { %v2357_v56 = vpop.f32.mrf.mxu0 }
 0x22f   : > { %v11635_v24 = vadd.f32 %v2532_v11, %v2356_v52  ;;  %v2534_v5 = vpop.f32.mrf.mxu1  ;;  %v11646_v20 = vpop.permute.xlu1 %2773 }
 0x230   : > { %v2358_v61 = vpop.f32.mrf.mxu0  ;;  %16125 = vst [vmem:[#allocation33_spill] sm:$0xff] %v11646_v20 }
 0x231   : > { %v2359_v27 = vadd.f32 %v2358_v61, %v11409_v28  ;;  %v2535_v62 = vpop.f32.mrf.mxu1 }
 0x232   : > { %v2360_v4 = vpop.f32.mrf.mxu0 }
 0x233   : > { %v11642_v40 = vadd.f32 %v2535_v62, %v2359_v27  ;;  %v2537_v1 = vpop.f32.mrf.mxu1  ;;  %v11657_v62 = vpop.permute.xlu0 %2778 }
 0x234   : > { %v9098_v53 = vpop.f32.mrf.mxu0  ;;  %16128 = vst [vmem:[#allocation36_spill] sm:$0xff] %v11657_v62  ;;  %v11666_v1 = vpop.permute.xlu1 %2783 }
 0x235   : > { %v11652_v28 = vadd.f32 %v9098_v53, %v11430_v13  ;;  %16129 = vst [vmem:[#allocation37_spill] sm:$0xff] %v11666_v1 }
 0x236   : > { %v2573_v19 = vpop.f32.mrf.mxu0 }
 0x237   : > { %v11649_v52 = vadd.f32 %v2573_v19, %v11414_v50  ;;  %v2898_v13 = vmul.f32 %v11606_v46, %v11652_v28 }
 0x238   : > { %v9099_v11 = vpop.f32.mrf.mxu0 }
 0x239   : > { %16126 = vst [vmem:[#allocation34_spill] sm:$0xff] %v11649_v52  ;;  %v2896_v27 = vmul.f32 %v11603_v63, %v11649_v52  ;;  %v11662_v4 = vadd.f32 %v9099_v11, %v11441_v38  ;;  %v11675_v38 = vpop.permute.xlu0 %2788 }
 0x23a   : > { %v2576_v56 = vpop.f32.mrf.mxu0  ;;  %16130 = vst [vmem:[#allocation38_spill] sm:$0xff] %v11675_v38 }
 0x23b   : > { %v11655_v5 = vadd.f32 %v2576_v56, %v11426_v30  ;;  %v2899_v63 = vmul.f32 %v11615_v9, %v11662_v4 }
 0x23c   : > { %v9102_v61 = vpop.f32.mrf.mxu0 }
 0x23d   : > { %16127 = vst [vmem:[#allocation35_spill] sm:$0xff] %v11655_v5  ;;  %v2897_v50 = vmul.f32 %v11611_v29, %v11655_v5  ;;  %v11678_v29 = vadd.f32 %v9102_v61, %v11470_v45 }
 0x23e   : > { %v2589_v19 = vpop.f32.mrf.mxu0 }
 0x23f   : > { %v2932_v30 = vadd.f32 %v2897_v50, %v2896_v27  ;;  %v11671_v53 = vadd.f32 %v2589_v19, %v11444_v26  ;;  %v11685_v26 = vpop.permute.xlu1 %2793  ;;  %v2902_v45 = vmul.f32 %v11628_v3, %v11678_v29 }
 0x240   : > { %v9103_v56 = vpop.f32.mrf.mxu0  ;;  %16131 = vst [vmem:[#allocation39_spill] sm:$0xff] %v11685_v26 }
 0x241   : > { %v2933_v52 = vadd.f32 %v2932_v30, %v2898_v13  ;;  %v2900_v5 = vmul.f32 %v11620_v60, %v11671_v53  ;;  %v11688_v9 = vadd.f32 %v9103_v56, %v11473_v23 }
 0x242   : > { %v2592_v11 = vpop.f32.mrf.mxu0 }
 0x243   : > { %v2934_v54 = vadd.f32 %v2933_v52, %v2899_v63  ;;  %v11683_v27 = vadd.f32 %v2592_v11, %v11447_v34  ;;  %v11697_v34 = vpop.permute.xlu0 %2798  ;;  %v11701_v23 = vpop.permute.xlu1 %2803 }
 0x244   : > { %v9106_v50 = vpop.f32.mrf.mxu0  ;;  %16132 = vst [vmem:[#allocation40_spill] sm:$0xff] %v11697_v34  ;;  %16133 = vst [vmem:[#allocation41_spill] sm:$0xff] %v11701_v23 }
 0x245   : > { %v2935_v19 = vadd.f32 %v2934_v54, %v2900_v5  ;;  %v2901_v13 = vmul.f32 %v11623_v8, %v11683_v27  ;;  %v2903_v54 = vmul.f32 %v11632_v10, %v11688_v9  ;;  %v11704_v11 = vadd.f32 %v9106_v50, %v11489_v21 }
 0x246   : > { %v2605_v30 = vpop.f32.mrf.mxu0 }
 0x247   : > { %v2936_v61 = vadd.f32 %v2935_v19, %v2901_v13  ;;  %v11695_v63 = vadd.f32 %v2605_v30, %v11482_v32  ;;  %v2906_v21 = vmul.f32 %v11644_v48, %v11704_v11 }
 0x248   : > { %v9107_v52 = vpop.f32.mrf.mxu0 }
 0x249   : > { %v2937_v5 = vadd.f32 %v2936_v61, %v2902_v45  ;;  %v2904_v3 = vmul.f32 %v11637_v35, %v11695_v63  ;;  %v11712_v8 = vadd.f32 %v9107_v52, %v11498_v33  ;;  %v11716_v61 = vpop.permute.xlu0 %2808 }
 0x24a   : > { %v2608_v56 = vpop.f32.mrf.mxu0  ;;  %16134 = vst [vmem:[#allocation42_spill] sm:$0xff] %v11716_v61 }
 0x24b   : > { %v2938_v19 = vadd.f32 %v2937_v5, %v2903_v54  ;;  %v11709_v32 = vadd.f32 %v2608_v56, %v11486_v6  ;;  %v11723_v6 = vpop.permute.xlu1 %2813  ;;  %v2907_v33 = vmul.f32 %v11646_v20, %v11712_v8 }
 0x24c   : > { %v9110_v13 = vpop.f32.mrf.mxu0  ;;  %16135 = vst [vmem:[#allocation43_spill] sm:$0xff] %v11723_v6 }
 0x24d   : > { %v2939_v30 = vadd.f32 %v2938_v19, %v2904_v3  ;;  %v2905_v45 = vmul.f32 %v11640_v43, %v11709_v32  ;;  %v11728_v56 = vadd.f32 %v9110_v13, %v11515_v57 }
 0x24e   : > { %v2621_v10 = vpop.f32.mrf.mxu0 }
 0x24f   : > { %v2940_v50 = vadd.f32 %v2939_v30, %v2905_v45  ;;  %v11721_v54 = vadd.f32 %v2621_v10, %v11502_v59  ;;  %v11735_v59 = vpop.permute.xlu0 %2818  ;;  %v2910_v13 = vmul.f32 %v11675_v38, %v11728_v56 }
 0x250   : > { %v9111_v5 = vpop.f32.mrf.mxu0  ;;  %16136 = vst [vmem:[#allocation44_spill] sm:$0xff] %v11735_v59 }
 0x251   : > { %v2941_v3 = vadd.f32 %v2940_v50, %v2906_v21  ;;  %v2908_v19 = vmul.f32 %v11657_v62, %v11721_v54  ;;  %v11738_v48 = vadd.f32 %v9111_v5, %v11524_v51  ;;  %v11742_v50 = vpop.permute.xlu1 %2823 }
 0x252   : > { %v2624_v52 = vpop.f32.mrf.mxu0  ;;  %16137 = vst [vmem:[#allocation45_spill] sm:$0xff] %v11742_v50 }
 0x253   : > { %v2942_v43 = vadd.f32 %v2941_v3, %v2907_v33  ;;  %v11733_v30 = vadd.f32 %v2624_v52, %v11511_v17  ;;  %v11751_v51 = vpop.permute.xlu0 %2828 }
 0x254   : > { %v9114_v10 = vpop.f32.mrf.mxu0  ;;  %16138 = vst [vmem:[#allocation46_spill] sm:$0xff] %v11751_v51 }
 0x255   : > { %v2943_v45 = vadd.f32 %v2942_v43, %v2908_v19  ;;  %v2909_v21 = vmul.f32 %v11666_v1, %v11733_v30  ;;  %v2911_v43 = vmul.f32 %v11685_v26, %v11738_v48  ;;  %v11754_v19 = vadd.f32 %v9114_v10, %v11541_v36 }
 0x256   : > { %v2637_v57 = vpop.f32.mrf.mxu0 }
 0x257   : > { %v2944_v33 = vadd.f32 %v2943_v45, %v2909_v21  ;;  %v11747_v17 = vadd.f32 %v2637_v57, %v11528_v15  ;;  %v11761_v15 = vpop.permute.xlu1 %2833  ;;  %v2914_v36 = vmul.f32 %v11716_v61, %v11754_v19 }
 0x258   : > { %v9115_v3 = vpop.f32.mrf.mxu0  ;;  %16139 = vst [vmem:[#allocation47_spill] sm:$0xff] %v11761_v15 }
 0x259   : > { %v2945_v52 = vadd.f32 %v2944_v33, %v2910_v13  ;;  %v2912_v1 = vmul.f32 %v11697_v34, %v11747_v17  ;;  %v11764_v26 = vadd.f32 %v9115_v3, %v11544_v7 }
 0x25a   : > { %v2640_v5 = vpop.f32.mrf.mxu0 }
 0x25b   : > { %v2946_v62 = vadd.f32 %v2945_v52, %v2911_v43  ;;  %v11759_v45 = vadd.f32 %v2640_v5, %v11537_v2  ;;  %v11773_v2 = vpop.permute.xlu0 %2838  ;;  %v11777_v7 = vpop.permute.xlu1 %2843 }
 0x25c   : > { %v9118_v21 = vpop.f32.mrf.mxu0  ;;  %16140 = vst [vmem:[#allocation48_spill] sm:$0xff] %v11773_v2  ;;  %16141 = vst [vmem:[#allocation49_spill] sm:$0xff] %v11777_v7 }
 0x25d   : > { %v2947_v57 = vadd.f32 %v2946_v62, %v2912_v1  ;;  %v2913_v13 = vmul.f32 %v11701_v23, %v11759_v45  ;;  %v2915_v62 = vmul.f32 %v11723_v6, %v11764_v26  ;;  %v11780_v5 = vadd.f32 %v9118_v21, %v11566_v41 }
 0x25e   : > { %v2653_v33 = vpop.f32.mrf.mxu0 }
 0x25f   : > { %v2948_v10 = vadd.f32 %v2947_v57, %v2913_v13  ;;  %v11771_v43 = vadd.f32 %v2653_v33, %v11553_v47  ;;  %v2918_v41 = vmul.f32 %v11751_v51, %v11780_v5 }
 0x260   : > { %v9119_v52 = vpop.f32.mrf.mxu0 }
 0x261   : > { %v2949_v1 = vadd.f32 %v2948_v10, %v2914_v36  ;;  %v2916_v61 = vmul.f32 %v11735_v59, %v11771_v43  ;;  %v11788_v23 = vadd.f32 %v9119_v52, %v11570_v55  ;;  %v11792_v10 = vpop.permute.xlu0 %2848 }
 0x262   : > { %v2656_v3 = vpop.f32.mrf.mxu0  ;;  %16142 = vst [vmem:[#allocation50_spill] sm:$0xff] %v11792_v10 }
 0x263   : > { %v2950_v57 = vadd.f32 %v2949_v1, %v2915_v62  ;;  %v11785_v47 = vadd.f32 %v2656_v3, %v11557_v12  ;;  %v11799_v12 = vpop.permute.xlu1 %2853  ;;  %v2919_v55 = vmul.f32 %v11761_v15, %v11788_v23 }
 0x264   : > { %v9122_v13 = vpop.f32.mrf.mxu0  ;;  %16143 = vst [vmem:[#allocation51_spill] sm:$0xff] %v11799_v12 }
 0x265   : > { %v2951_v33 = vadd.f32 %v2950_v57, %v2916_v61  ;;  %v2917_v36 = vmul.f32 %v11742_v50, %v11785_v47  ;;  %v11804_v3 = vadd.f32 %v9122_v13, %v11585_v22 }
 0x266   : > { %v2669_v6 = vpop.f32.mrf.mxu0 }
 0x267   : > { %v2952_v21 = vadd.f32 %v2951_v33, %v2917_v36  ;;  %v11797_v62 = vadd.f32 %v2669_v6, %v11573_v16  ;;  %v11811_v16 = vpop.permute.xlu0 %2858  ;;  %v2922_v13 = vmul.f32 %v11792_v10, %v11804_v3 }
 0x268   : > { %v9123_v1 = vpop.f32.mrf.mxu0  ;;  %16144 = vst [vmem:[#allocation52_spill] sm:$0xff] %v11811_v16 }
 0x269   : > { %v2953_v61 = vadd.f32 %v2952_v21, %v2918_v41  ;;  %v2920_v57 = vmul.f32 %v11773_v2, %v11797_v62  ;;  %v11814_v51 = vadd.f32 %v9123_v1, %v11598_v31  ;;  %v11818_v21 = vpop.permute.xlu1 %2863 }
 0x26a   : > { %v2672_v52 = vpop.f32.mrf.mxu0  ;;  %16145 = vst [vmem:[#allocation53_spill] sm:$0xff] %v11818_v21 }
 0x26b   : > { %v2954_v50 = vadd.f32 %v2953_v61, %v2919_v55  ;;  %v11809_v33 = vadd.f32 %v2672_v52, %v11576_v49  ;;  %v11827_v31 = vpop.permute.xlu0 %2868 }
 0x26c   : > { %v9126_v6 = vpop.f32.mrf.mxu0  ;;  %16146 = vst [vmem:[#allocation54_spill] sm:$0xff] %v11827_v31 }
 0x26d   : > { %v2955_v36 = vadd.f32 %v2954_v50, %v2920_v57  ;;  %v2921_v41 = vmul.f32 %v11777_v7, %v11809_v33  ;;  %v2923_v50 = vmul.f32 %v11799_v12, %v11814_v51  ;;  %v11830_v57 = vadd.f32 %v9126_v6, %v11613_v42 }
 0x26e   : > { %v2685_v22 = vpop.f32.mrf.mxu0 }
 0x26f   : > { %v2956_v55 = vadd.f32 %v2955_v36, %v2921_v41  ;;  %v11823_v49 = vadd.f32 %v2685_v22, %v11601_v44  ;;  %v11837_v44 = vpop.permute.xlu1 %2873  ;;  %v2926_v42 = vmul.f32 %v11827_v31, %v11830_v57 }
 0x270   : > { %v9127_v61 = vpop.f32.mrf.mxu0  ;;  %16147 = vst [vmem:[#allocation55_spill] sm:$0xff] %v11837_v44 }
 0x271   : > { %v2957_v52 = vadd.f32 %v2956_v55, %v2922_v13  ;;  %v2924_v7 = vmul.f32 %v11811_v16, %v11823_v49  ;;  %v11840_v12 = vadd.f32 %v9127_v61, %v11618_v37 }
 0x272   : > { %v2688_v1 = vpop.f32.mrf.mxu0 }
 0x273   : > { %v2958_v2 = vadd.f32 %v2957_v52, %v2923_v50  ;;  %v11835_v36 = vadd.f32 %v2688_v1, %v11608_v0  ;;  %v11849_v0 = vpop.permute.xlu0 %2878  ;;  %v11853_v37 = vpop.permute.xlu1 %2883 }
 0x274   : > { %v9130_v41 = vpop.f32.mrf.mxu0  ;;  %16148 = vst [vmem:[#allocation56_spill] sm:$0xff] %v11849_v0  ;;  %16149 = vst [vmem:[#allocation57_spill] sm:$0xff] %v11853_v37 }
 0x275   : > { %v2959_v22 = vadd.f32 %v2958_v2, %v2924_v7  ;;  %v2925_v13 = vmul.f32 %v11818_v21, %v11835_v36  ;;  %v2927_v2 = vmul.f32 %v11837_v44, %v11840_v12  ;;  %v11856_v1 = vadd.f32 %v9130_v41, %v11635_v24 }
 0x276   : > { %v2701_v55 = vpop.f32.mrf.mxu0 }
 0x277   : > { %v2960_v6 = vadd.f32 %v2959_v22, %v2925_v13  ;;  %v11847_v50 = vadd.f32 %v2701_v55, %v11625_v58  ;;  %v11872_v44 = vpop.permute.xlu1 %2893 }
 0x278   : > { %v9131_v52 = vpop.f32.mrf.mxu0  ;;  %16151 = vst [vmem:[#allocation59_spill] sm:$0xff] %v11872_v44 }
 0x279   : > { %v2961_v7 = vadd.f32 %v2960_v6, %v2926_v42  ;;  %v2928_v31 = vmul.f32 %v11849_v0, %v11847_v50  ;;  %v11864_v55 = vadd.f32 %v9131_v52, %v11642_v40  ;;  %v11868_v6 = vpop.permute.xlu0 %2888 }
 0x27a   : > { %v2704_v61 = vpop.f32.mrf.mxu0  ;;  %16150 = vst [vmem:[#allocation58_spill] sm:$0xff] %v11868_v6  ;;  %v2930_v24 = vmul.f32 %v11868_v6, %v11856_v1 }
 0x27b   : > { %v2962_v22 = vadd.f32 %v2961_v7, %v2927_v2  ;;  %v11861_v58 = vadd.f32 %v2704_v61, %v11630_v14  ;;  %v2931_v2 = vmul.f32 %v11872_v44, %v11864_v55 }
 0x27d   : > { %v2963_v13 = vadd.f32 %v2962_v22, %v2928_v31  ;;  %v2929_v42 = vmul.f32 %v11853_v37, %v11861_v58  ;;  %v9998_v37 = vld [vmem:[%s15859_s8 + $0x78] sm:$0xff] }
 0x27f   : > { %v2964_v41 = vadd.f32 %v2963_v13, %v2929_v42  ;;  %v9999_v13 = vld [vmem:[%s15859_s8 + $0x70] sm:$0xff] }
 0x280   : > { %v16154_v42 = vld [vmem:[#allocation11_spill] sm:$0xff] }
 0x281   : > { %v2965_v14 = vadd.f32 %v2964_v41, %v2930_v24  ;;  %v16155_v24 = vld [vmem:[#allocation13_spill] sm:$0xff]  ;;  %v16158_v41 = vld [vmem:[#allocation16_spill] sm:$0xff] }
 0x283   : > { %v2966_v7 = vadd.f32 %v2965_v14, %v2931_v2  ;;  %v16159_v2 = vld [vmem:[#allocation17_spill] sm:$0xff]  ;;  %v16160_v14 = vld [vmem:[#allocation18_spill] sm:$0xff] }
 0x285   : > { %v2967_v31 = vrot.slane %v2966_v7, 4 }
 0x287   : > { %v2968_v61 = vadd.f32 %v2967_v31, %v2966_v7  ;;  %v16161_v7 = vld [vmem:[#allocation19_spill] sm:$0xff]  ;;  %v16162_v31 = vld [vmem:[#allocation20_spill] sm:$0xff] }
 0x289   : > { %v2969_v40 = vrot.slane %v2968_v61, 2 }
 0x28b   : > { %v2970_v52 = vadd.f32 %v2969_v40, %v2968_v61  ;;  %v16163_v61 = vld [vmem:[#allocation21_spill] sm:$0xff] }
 0x28d   : > { %v2971_v22 = vrot.slane %v2970_v52, 1 }
 0x28f   : > { %v2972_v0 = vadd.f32 %v2971_v22, %v2970_v52  ;;  %v16164_v22 = vld [vmem:[#allocation7_spill] sm:$0xff] }
 0x291   : > { %9165 = vmatmul.mubr.f32.vlgmr.msra.gmra.mxu1 %v2972_v0  ;;  %v16152_v0 = vld [vmem:[#allocation8_spill] sm:$0xff] }
 0x292   : > { %9168 = vmatpush3.msra.mxu1 %v9998_v37  ;;  %9199 = vmatprep.mubr.msk.f32.mxu1 %vm10101_vm12, %v16112_v25  ;;  %v16153_v37 = vld [vmem:[#allocation9_spill] sm:$0xff] }
 0x293   : > { %9169 = vmatprep.subr.mxu1 %v16112_v25 }
 0x294   : > { %9170 = vmatpush3.msra.mxu1 %v9999_v13 }
 0x295   : > { %9171 = vmatprep.subr.mxu1 %v16112_v25 }
 0x296   : > { %9172 = vmatpush3.msra.mxu1 %v11382_v39  ;;  %v16156_v39 = vld [vmem:[#allocation14_spill] sm:$0xff] }
 0x297   : > { %9173 = vmatprep.subr.mxu1 %v16112_v25 }
 0x298   : > { %9174 = vmatpush3.msra.mxu1 %v11399_v18  ;;  %v16157_v18 = vld [vmem:[#allocation15_spill] sm:$0xff] }
 0x299   : > { %9175 = vmatprep.subr.mxu1 %v16112_v25 }
 0x29a   : > { %9176 = vmatpush3.msra.mxu1 %v16152_v0  ;;  %v16165_v0 = vld [vmem:[#allocation34_spill] sm:$0xff] }
 0x29b   : > { %9177 = vmatprep.subr.mxu1 %v16112_v25 }
 0x29c   : > { %9178 = vmatpush3.msra.mxu1 %v16153_v37 }
 0x29d   : > { %9179 = vmatprep.subr.mxu1 %v16112_v25 }
 0x29e   : > { %9180 = vmatpush3.msra.mxu1 %v16154_v42  ;;  %v16166_v42 = vld [vmem:[#allocation35_spill] sm:$0xff] }
 0x29f   : > { %9181 = vmatprep.subr.mxu1 %v16112_v25 }
 0x2a0   : > { %9182 = vmatpush3.msra.mxu1 %v16155_v24 }
 0x2a1   : > { %9183 = vmatprep.subr.mxu1 %v16112_v25 }
 0x2a2   : > { %9184 = vmatpush3.msra.mxu1 %v16156_v39 }
 0x2a3   : > { %9185 = vmatprep.subr.mxu1 %v16112_v25 }
 0x2a4   : > { %9186 = vmatpush3.msra.mxu1 %v16157_v18 }
 0x2a5   : > { %9187 = vmatprep.subr.mxu1 %v16112_v25 }
 0x2a6   : > { %9188 = vmatpush3.msra.mxu1 %v16158_v41 }
 0x2a7   : > { %9189 = vmatprep.subr.mxu1 %v16112_v25 }
 0x2a8   : > { %9190 = vmatpush3.msra.mxu1 %v16159_v2 }
 0x2a9   : > { %9191 = vmatprep.subr.mxu1 %v16112_v25 }
 0x2aa   : > { %9192 = vmatpush3.msra.mxu1 %v16160_v14 }
 0x2ab   : > { %9193 = vmatprep.subr.mxu1 %v16112_v25 }
 0x2ac   : > { %9194 = vmatpush3.msra.mxu1 %v16161_v7 }
 0x2ad   : > { %9195 = vmatprep.subr.mxu1 %v16112_v25 }
 0x2ae   : > { %9196 = vmatpush3.msra.mxu1 %v16162_v31  ;;  %v16169_v31 = vld [vmem:[#allocation22_spill] sm:$0xff] }
 0x2af   : > { %9197 = vmatprep.subr.mxu1 %v16112_v25 }
 0x2b0   : > { %9198 = vmatpush3.msra.mxu1 %v16163_v61  ;;  %v16170_v61 = vld [vmem:[#allocation24_spill] sm:$0xff] }
 0x2b1   : > { %9202 = vmatprep.subr.mxu1 %v16112_v25 }
 0x351   : > { %v3039_v40 = vpop.f32.mrf.mxu1 }
 0x352   : > { %v11915_v13 = vrot.slane %v3039_v40, %v16164_v22 }
 0x353   : > { %v9166_v52 = vpop.f32.mrf.mxu1 }
 0x354   : > { %v11919_v37 = vsub.f32 %v16165_v0, %v11915_v13  ;;  %v11923_v24 = vsub.f32 %v16166_v42, %v11915_v13  ;;  %v11927_v39 = vsub.f32 %v11652_v28, %v11915_v13  ;;  %v11935_v2 = vsub.f32 %v11662_v4, %v11915_v13 }
 0x355   : > { %v11939_v14 = vsub.f32 %v11671_v53, %v11915_v13  ;;  %v11947_v52 = vsub.f32 %v11683_v27, %v11915_v13  ;;  %v11953_v4 = vsub.f32 %v11678_v29, %v11915_v13  ;;  %v11967_v29 = vsub.f32 %v11695_v63, %v11915_v13 }
 0x356   : > { %16167 = vst [vmem:[#allocation8_spill] sm:$0xff] %v11927_v39  ;;  %v3083_v18 = vmul.f32 %v11919_v37, %v11919_v37  ;;  %v3084_v41 = vmul.f32 %v11923_v24, %v11923_v24  ;;  %v3085_v7 = vmul.f32 %v11927_v39, %v11927_v39  ;;  %v3086_v0 = vmul.f32 %v11935_v2, %v11935_v2 }
 0x357   : > { %16168 = vst [vmem:[#allocation9_spill] sm:$0xff] %v11939_v14  ;;  %v3087_v53 = vmul.f32 %v11939_v14, %v11939_v14  ;;  %v3088_v27 = vmul.f32 %v11947_v52, %v11947_v52  ;;  %v3089_v14 = vmul.f32 %v11953_v4, %v11953_v4  ;;  %v11981_v63 = vsub.f32 %v11704_v11, %v11915_v13 }
 0x358   : > { %v3119_v28 = vmul.f32 %v3083_v18, %v16169_v31  ;;  %v3120_v40 = vmul.f32 %v3084_v41, %v16170_v61  ;;  %v3121_v42 = vmul.f32 %v3085_v7, %v11606_v46  ;;  %v11960_v18 = vsub.f32 %v11688_v9, %v11915_v13  ;;  %v16171_v41 = vld [vmem:[#allocation25_spill] sm:$0xff]  ;;  %v16172_v46 = vld [vmem:[#allocation27_spill] sm:$0xff] }
 0x359   : > { %v3122_v61 = vmul.f32 %v3086_v0, %v16171_v41  ;;  %v3123_v7 = vmul.f32 %v3087_v53, %v11620_v60  ;;  %v11974_v9 = vsub.f32 %v11709_v32, %v11915_v13  ;;  %v3124_v0 = vmul.f32 %v3088_v27, %v16172_v46  ;;  %v16173_v41 = vld [vmem:[#allocation28_spill] sm:$0xff]  ;;  %v16174_v60 = vld [vmem:[#allocation29_spill] sm:$0xff] }
 0x35a   : > { %v3155_v39 = vadd.f32 %v3120_v40, %v3119_v28  ;;  %v3090_v40 = vmul.f32 %v11960_v18, %v11960_v18  ;;  %v3125_v53 = vmul.f32 %v3089_v14, %v16173_v41  ;;  %v11988_v32 = vsub.f32 %v11712_v8, %v11915_v13  ;;  %v16175_v41 = vld [vmem:[#allocation31_spill] sm:$0xff] }
 0x35b   : > { %v11995_v11 = vsub.f32 %v11721_v54, %v11915_v13  ;;  %v12002_v8 = vsub.f32 %v11733_v30, %v11915_v13  ;;  %v12009_v54 = vsub.f32 %v11728_v56, %v11915_v13  ;;  %v12016_v30 = vsub.f32 %v11738_v48, %v11915_v13 }
 0x35c   : > { %v3156_v31 = vadd.f32 %v3155_v39, %v3121_v42  ;;  %v3091_v42 = vmul.f32 %v11967_v29, %v11967_v29  ;;  %v3126_v27 = vmul.f32 %v3090_v40, %v16174_v60  ;;  %v16176_v60 = vld [vmem:[#allocation32_spill] sm:$0xff]  ;;  %v12023_v56 = vsub.f32 %v11747_v17, %v11915_v13 }
 0x35d   : > { %v12030_v48 = vsub.f32 %v11759_v45, %v11915_v13  ;;  %v12037_v17 = vsub.f32 %v11754_v19, %v11915_v13  ;;  %v12044_v45 = vsub.f32 %v11764_v26, %v11915_v13  ;;  %v12055_v19 = vsub.f32 %v11771_v43, %v11915_v13 }
 0x35e   : > { %v3157_v28 = vadd.f32 %v3156_v31, %v3122_v61  ;;  %v3092_v61 = vmul.f32 %v11974_v9, %v11974_v9  ;;  %v3127_v14 = vmul.f32 %v3091_v42, %v11637_v35  ;;  %v12071_v43 = vsub.f32 %v11780_v5, %v11915_v13 }
 0x35f   : > { %v12086_v5 = vsub.f32 %v11797_v62, %v11915_v13  ;;  %v12100_v62 = vsub.f32 %v11804_v3, %v11915_v13  ;;  %v12114_v3 = vsub.f32 %v11823_v49, %v11915_v13  ;;  %v12128_v49 = vsub.f32 %v11830_v57, %v11915_v13 }
 0x360   : > { %v3158_v39 = vadd.f32 %v3157_v28, %v3123_v7  ;;  %v3093_v28 = vmul.f32 %v11981_v63, %v11981_v63  ;;  %v3128_v40 = vmul.f32 %v3092_v61, %v16175_v41  ;;  %v12142_v57 = vsub.f32 %v11847_v50, %v11915_v13 }
 0x361   : > { %v12156_v50 = vsub.f32 %v11856_v1, %v11915_v13 }
 0x362   : > { %v3159_v31 = vadd.f32 %v3158_v39, %v3124_v0  ;;  %v3094_v39 = vmul.f32 %v11988_v32, %v11988_v32  ;;  %v3129_v42 = vmul.f32 %v3093_v28, %v16176_v60  ;;  %v16177_v28 = vld [vmem:[#allocation36_spill] sm:$0xff]  ;;  %v3098_v60 = vmul.f32 %v12016_v30, %v12016_v30 }
 0x363   : > { %v3117_v1 = vmul.f32 %v12156_v50, %v12156_v50 }
 0x364   : > { %v3160_v7 = vadd.f32 %v3159_v31, %v3125_v53  ;;  %v3095_v31 = vmul.f32 %v11995_v11, %v11995_v11  ;;  %v3130_v61 = vmul.f32 %v3094_v39, %v11646_v20  ;;  %v16178_v39 = vld [vmem:[#allocation37_spill] sm:$0xff]  ;;  %v3099_v20 = vmul.f32 %v12023_v56, %v12023_v56 }
 0x366   : > { %v3161_v0 = vadd.f32 %v3160_v7, %v3126_v27  ;;  %v3096_v7 = vmul.f32 %v12002_v8, %v12002_v8  ;;  %v3135_v26 = vmul.f32 %v3099_v20, %v11697_v34  ;;  %v3103_v20 = vmul.f32 %v12055_v19, %v12055_v19 }
 0x368   : > { %v3162_v53 = vadd.f32 %v3161_v0, %v3127_v14  ;;  %v3097_v0 = vmul.f32 %v12009_v54, %v12009_v54 }
 0x36a   : > { %v3163_v27 = vadd.f32 %v3162_v53, %v3128_v40  ;;  %v3131_v40 = vmul.f32 %v3095_v31, %v16177_v28  ;;  %v3133_v31 = vmul.f32 %v3097_v0, %v11675_v38  ;;  %v16179_v28 = vld [vmem:[#allocation39_spill] sm:$0xff]  ;;  %v3101_v0 = vmul.f32 %v12037_v17, %v12037_v17 }
 0x36b   : > { %v12079_v38 = vsub.f32 %v11788_v23, %v11915_v13  ;;  %v12093_v23 = vsub.f32 %v11809_v33, %v11915_v13  ;;  %v12107_v33 = vsub.f32 %v11814_v51, %v11915_v13  ;;  %v12121_v51 = vsub.f32 %v11835_v36, %v11915_v13 }
 0x36c   : > { %v3164_v14 = vadd.f32 %v3163_v27, %v3129_v42  ;;  %v3132_v42 = vmul.f32 %v3096_v7, %v16178_v39  ;;  %v3134_v7 = vmul.f32 %v3098_v60, %v16179_v28  ;;  %v3102_v60 = vmul.f32 %v12044_v45, %v12044_v45  ;;  %v12067_v28 = vld [vmem:[%s391_s20] sm:$0x1]  ;;  %s8460_s20 = sshll.u32 %s15608_s11, 4  ;;  %s15806_s20 = int_to_ptr.vmem [resolvable:$true] %s8460_s20 }
 0x36d   : > { %v3106_v39 = vmul.f32 %v12079_v38, %v12079_v38  ;;  %v12135_v36 = vsub.f32 %v11840_v12, %v11915_v13  ;;  %v12149_v12 = vsub.f32 %v11861_v58, %v11915_v13  ;;  %v12163_v58 = vsub.f32 %v11864_v55, %v11915_v13  ;;  %s10037_s25 = scalar_lea.vmem %s15806_s20, 4608 }
 0x36e   : > { %v3165_v53 = vadd.f32 %v3164_v14, %v3130_v61  ;;  %v3100_v14 = vmul.f32 %v12030_v48, %v12030_v48  ;;  %p10038_p11 = scmp.ne.s32.totalorder %s15806_s20, %s10037_s25 }
 0x370   : > { %v3166_v27 = vadd.f32 %v3165_v53, %v3131_v40  ;;  %p10039_p12 = pnand %p10038_p11, %p10198_p5 }
 0x372   : > { %v3167_v61 = vadd.f32 %v3166_v27, %v3132_v42  ;;  %v12062_v42 = vsub.f32 %v11785_v47, %v11915_v13  ;;  %v16180_v27 = vld [vmem:[#allocation41_spill] sm:$0xff]  ;;  %v3748_v47 = vmin.f32 %v12067_v28, 20.0  ;;  %p10040_p13 = pneg %p10039_p12 }
 0x374   : > { %v3168_v40 = vadd.f32 %v3167_v61, %v3133_v31  ;;  %v3136_v31 = vmul.f32 %v3100_v14, %v16180_v27  ;;  %v3104_v14 = vmul.f32 %v12062_v42, %v12062_v42 }
 0x376   : > { %v3169_v53 = vadd.f32 %v3168_v40, %v3134_v7  ;;  %v16181_v7 = vld [vmem:[#allocation42_spill] sm:$0xff] }
 0x377   : > { %v3137_v40 = vmul.f32 %v3101_v0, %v16181_v7  ;;  %v3105_v0 = vmul.f32 %v12071_v43, %v12071_v43  ;;  %v3749_v7 = vmul.f32 1.442695, %v3748_v47 }
 0x378   : > { %v3170_v61 = vadd.f32 %v3169_v53, %v3135_v26  ;;  %v16182_v26 = vld [vmem:[#allocation43_spill] sm:$0xff] }
 0x379   : > { %v3138_v53 = vmul.f32 %v3102_v60, %v16182_v26  ;;  %v16183_v60 = vld [vmem:[#allocation45_spill] sm:$0xff]  ;;  %v3107_v26 = vmul.f32 %v12086_v5, %v12086_v5  ;;  %9684 = vpow2.f32 %v3749_v7 }
 0x37a   : > { %v3171_v34 = vadd.f32 %v3170_v61, %v3136_v31  ;;  %v3139_v31 = vmul.f32 %v3103_v20, %v11735_v59  ;;  %v16184_v20 = vld [vmem:[#allocation46_spill] sm:$0xff] }
 0x37c   : > { %v3172_v27 = vadd.f32 %v3171_v34, %v3137_v40  ;;  %v3140_v34 = vmul.f32 %v3104_v14, %v16183_v60  ;;  %v3142_v14 = vmul.f32 %v3106_v39, %v11761_v15 }
 0x37e   : > { %v3173_v61 = vadd.f32 %v3172_v27, %v3138_v53  ;;  %v3141_v27 = vmul.f32 %v3105_v0, %v16184_v20  ;;  %v3108_v53 = vmul.f32 %v12093_v23, %v12093_v23  ;;  %v16185_v0 = vld [vmem:[#allocation48_spill] sm:$0xff]  ;;  %v16186_v20 = vld [vmem:[#allocation49_spill] sm:$0xff] }
 0x380   : > { %v3174_v40 = vadd.f32 %v3173_v61, %v3139_v31  ;;  %v3109_v61 = vmul.f32 %v12100_v62, %v12100_v62  ;;  %v3144_v39 = vmul.f32 %v3108_v53, %v16186_v20 }
 0x382   : > { %v3175_v47 = vadd.f32 %v3174_v40, %v3140_v34  ;;  %v3143_v34 = vmul.f32 %v3107_v26, %v16185_v0  ;;  %v3110_v40 = vmul.f32 %v12107_v33, %v12107_v33  ;;  %v3145_v26 = vmul.f32 %v3109_v61, %v11792_v10  ;;  %v16187_v0 = vld [vmem:[#allocation51_spill] sm:$0xff] }
 0x383   : > { %v3114_v10 = vmul.f32 %v12135_v36, %v12135_v36 }
 0x384   : > { %v3176_v31 = vadd.f32 %v3175_v47, %v3141_v27  ;;  %v3111_v47 = vmul.f32 %v12114_v3, %v12114_v3  ;;  %v3146_v53 = vmul.f32 %v3110_v40, %v16187_v0  ;;  %v16189_v0 = vld [vmem:[#allocation55_spill] sm:$0xff] }
 0x386   : > { %v3177_v7 = vadd.f32 %v3176_v31, %v3142_v14  ;;  %v3112_v31 = vmul.f32 %v12121_v51, %v12121_v51  ;;  %v3147_v61 = vmul.f32 %v3111_v47, %v11811_v16  ;;  %v16188_v47 = vld [vmem:[#allocation54_spill] sm:$0xff]  ;;  %v3116_v16 = vmul.f32 %v12149_v12, %v12149_v12 }
 0x388   : > { %v3178_v27 = vadd.f32 %v3177_v7, %v3143_v34  ;;  %v3113_v7 = vmul.f32 %v12128_v49, %v12128_v49  ;;  %v3148_v40 = vmul.f32 %v3112_v31, %v11818_v21  ;;  %v3150_v31 = vmul.f32 %v3114_v10, %v16189_v0  ;;  %v16190_v21 = vld [vmem:[#allocation56_spill] sm:$0xff] }
 0x38a   : > { %v3179_v14 = vadd.f32 %v3178_v27, %v3144_v39  ;;  %v9685_v27 = vpop.eup %9684 }
 0x38c   : > { %v3180_v34 = vadd.f32 %v3179_v14, %v3145_v26  ;;  %v3115_v14 = vmul.f32 %v12142_v57, %v12142_v57 }
 0x38e   : > { %v3181_v39 = vadd.f32 %v3180_v34, %v3146_v53  ;;  %v3149_v53 = vmul.f32 %v3113_v7, %v16188_v47  ;;  %v3151_v20 = vmul.f32 %v3115_v14, %v16190_v21  ;;  %v3118_v7 = vmul.f32 %v12163_v58, %v12163_v58 }
 0x38f   : > { %v3153_v47 = vmul.f32 %v3117_v1, %v11868_v6  ;;  %v9558_v1 = vld [vmem:[%s15856_s5 + $0x28] sm:$0xff]  }
 0x390   : > { %v3182_v26 = vadd.f32 %v3181_v39, %v3147_v61  ;;  %v3751_v39 = vadd.f32 1.0, %v9685_v27  ;;  %v3154_v10 = vmul.f32 %v3118_v7, %v11872_v44 }
 0x392   : > { %v3183_v34 = vadd.f32 %v3182_v26, %v3148_v40  ;;  %v16191_v40 = vld [vmem:[#allocation57_spill] sm:$0xff]  ;;  %v3752_v13 = vmul.f32 %v3751_v39, %v3751_v39  ;;  %v9557_v39 = vld [vmem:[%s15856_s5 + $0xb8] sm:$0xff]  }
 0x393   : > { %v3152_v26 = vmul.f32 %v3116_v16, %v16191_v40  ;;  %v3760_v16 = vld [vmem:[%s15857_s6 + $0x10] sm:$0xff] }
 0x394   : > { %v3184_v61 = vadd.f32 %v3183_v34, %v3149_v53  ;;  %v3755_v27 = vadd.f32 1.0, %v3752_v13  ;;  %v8687_v21 = vadd.f32 -1.0, %v3752_v13  ;;  %v9559_v13 = vld [vmem:[%s15856_s5 + $0xb0] sm:$0xff]  }
 0x396   : > { %v3185_v15 = vadd.f32 %v3184_v61, %v3150_v31  ;;  %9686 = vrcp.f32 %v3755_v27  ;;  %v9560_v27 = vld [vmem:[%s15856_s5 + $0x20] sm:$0xff]  }
 0x398   : > { %v3186_v55 = vadd.f32 %v3185_v15, %v3151_v20  ;;  %v3761_v15 = vld [vmem:[%s15857_s6 + $0x18] sm:$0xff] }
 0x39a   : > { %v3187_v60 = vadd.f32 %v3186_v55, %v3152_v26 }
 0x39c   : > { %v3188_v53 = vadd.f32 %v3187_v60, %v3153_v47  ;;  %v3754_v60 = vmul.f32 %v8687_v21, %v12067_v28  ;;  %v16192_v21 = vmov 0   ;;  %v9555_v28 = vld [vmem:[%s15856_s5 + $0x38] sm:$0xff]   ;;  %v9556_v47 = vld [vmem:[%s15856_s5 + $0x30] sm:$0xff]  }
 0x39d   : > { %6040 = vmatpush1.bf16.msra.mxu0 %v9555_v28  ;;  %v9565_v28 = vld [vmem:[%s15856_s5 + $0x10] sm:$0xff]  }
 0x39e   : > { %v3189_v34 = vadd.f32 %v3188_v53, %v3154_v10  ;;  %6041 = vmatprep.subr.bf16.mxu0 %v16192_v21  ;;  %v9561_v10 = vld [vmem:[%s15856_s5 + $0xa8] sm:$0xff]   ;;  %v9563_v53 = vld [vmem:[%s15856_s5 + $0xa0] sm:$0xff]  }
 0x3a0   : > { %v3190_v0 = vrot.slane %v3189_v34, 4 }
 0x3a1   : > { %6042 = vmatpush1.bf16.msra.mxu0 %v9556_v47 }
 0x3a2   : > { %v3191_v59 = vadd.f32 %v3190_v0, %v3189_v34  ;;  %6043 = vmatprep.subr.bf16.mxu0 %v16192_v21 }
 0x3a3   : > { %v9687_v20 = vpop.eup %9686 }
 0x3a4   : > { %v3192_v14 = vrot.slane %v3191_v59, 2  ;;  %v3757_v0 = vmul.f32 %v9687_v20, %v3754_v60  ;;  %v9566_v20 = vld [vmem:[%s15856_s5 + $0x90] sm:$0xff]  }
 0x3a5   : > { %6044 = vmatpush1.bf16.msra.mxu0 %v9558_v1  ;;  %v16194_v1 = vld [vmem:[#allocation8_spill] sm:$0xff] }
 0x3a6   : > { %v3193_v31 = vadd.f32 %v3192_v14, %v3191_v59  ;;  %v3759_v59 = vld [vmem:[%s15857_s6 + $0x8] sm:$0xff]  ;;  %6045 = vmatprep.subr.bf16.mxu0 %v16192_v21  ;;  %v9564_v14 = vld [vmem:[%s15856_s5 + $0x98] sm:$0xff]  }
 0x3a8   : > { %v3194_v61 = vrot.slane %v3193_v31, 1 }
 0x3a9   : > { %6046 = vmatpush1.bf16.msra.mxu0 %v9560_v27 }
 0x3aa   : > { %v3195_v41 = vadd.f32 %v3194_v61, %v3193_v31  ;;  %6047 = vmatprep.subr.bf16.mxu0 %v16192_v21  ;;  %v16193_v31 = vld [vmem:[#allocation6_spill] sm:$0xff] }
 0x3ab   : > { %v3309_v61 = vsub.s32 1, %v16193_v31 }
 0x3ac   : > { %9200 = vmatmul.mubr.f32.vlgmr.msra.gmra.mxu1 %v3195_v41  ;;  %v3758_v41 = vld [vmem:[%s15857_s6] sm:$0xff] }
 0x3ad   : > { %9203 = vmatpush3.msra.mxu1 %v3761_v15  ;;  %9210 = vmatprep.mubr.msk.f32.mxu1 %vm10101_vm12, %v16112_v25  ;;  %v3349_v15 = vsub.s32 2, %v16193_v31 }
 0x3ae   : > { %9204 = vmatprep.subr.mxu1 %v16112_v25 }
 0x3af   : > { %9205 = vmatpush3.msra.mxu1 %v3760_v16  ;;  %v9562_v16 = vld [vmem:[%s15856_s5 + $0x18] sm:$0xff]  }
 0x3b0   : > { %9206 = vmatprep.subr.mxu1 %v16112_v25  ;;  %6048 = vmatpush1.bf16.msra.mxu0 %v9562_v16 }
 0x3b1   : > { %9207 = vmatpush3.msra.mxu1 %v3759_v59  ;;  %6049 = vmatprep.subr.bf16.mxu0 %v16192_v21  ;;  %v12244_v59 = vld [vmem:[%s15858_s7] sm:$0xff] }
 0x3b2   : > { %9208 = vmatprep.subr.mxu1 %v16112_v25 }
 0x3b3   : > { %9209 = vmatpush3.msra.mxu1 %v3758_v41  ;;  %v12247_v41 = vrot.slane %v12244_v59, %v3309_v61 }
 0x3b4   : > { %9211 = vmatmul.mubr.msk.f32.vlgmr.msra.gmra.mxu1 %vm3765_vm13, %v3757_v0  ;;  %6216 = vmatprep.subr.bf16.mxu1 %v16192_v21  ;;  %v12250_v0 = vrot.slane %v12244_v59, %v3349_v15 }
 0x3b5   : > { %6217 = vmatpush1.bf16.msra.mxu1 %v9557_v39  ;;  %6050 = vmatpush1.bf16.msra.mxu0 %v9565_v28 }
 0x3b6   : > { %6218 = vmatprep.subr.bf16.mxu1 %v16192_v21  ;;  %6051 = vmatprep.subr.bf16.mxu0 %v16192_v21 }
 0x3b9   : > { %6219 = vmatpush1.bf16.msra.mxu1 %v9559_v13 }
 0x3ba   : > { %6220 = vmatprep.subr.bf16.mxu1 %v16192_v21 }
 0x3bd   : > { %6221 = vmatpush1.bf16.msra.mxu1 %v9561_v10 }
 0x3be   : > { %6222 = vmatprep.subr.bf16.mxu1 %v16192_v21 }
 0x3c1   : > { %6223 = vmatpush1.bf16.msra.mxu1 %v9563_v53 }
 0x3c2   : > { %6224 = vmatprep.subr.bf16.mxu1 %v16192_v21 }
 0x3c5   : > { %6225 = vmatpush1.bf16.msra.mxu1 %v9564_v14 }
 0x3c6   : > { %6226 = vmatprep.subr.bf16.mxu1 %v16192_v21 }
 0x3c9   : > { %6227 = vmatpush1.bf16.msra.mxu1 %v9566_v20 }
 0x3ca   : > { %6228 = vmatprep.subr.bf16.mxu1 %v16192_v21 }
 0x46c   : > { %v3262_v7 = vpop.f32.mrf.mxu1 }
 0x46d   : > { %v3263_v55 = vadd.f32 1e-05, %v3262_v7 }
 0x46e   : > { %v9201_v26 = vpop.f32.mrf.mxu1 }
 0x46f   : > { %9688 = vrsqrt.f32 %v3263_v55  ;;  %v16195_v55 = vld [vmem:[#allocation9_spill] sm:$0xff] }
 0x47c   : > { %v9689_v34 = vpop.eup %9688 }
 0x47d   : > { %v3270_v60 = vrot.slane %v9689_v34, %v16164_v22 }
 0x47f   : > { %v3271_v47 = vmul.f32 %v3270_v60, %v11919_v37  ;;  %v3272_v39 = vmul.f32 %v3270_v60, %v11923_v24  ;;  %v3273_v7 = vmul.f32 %v3270_v60, %v16194_v1  ;;  %v3274_v26 = vmul.f32 %v3270_v60, %v11935_v2  ;;  %v9568_v37 = vld [vmem:[%s15856_s5 + $0x88] sm:$0xff]  }
 0x480   : > { %v3275_v13 = vmul.f32 %v3270_v60, %v16195_v55  ;;  %v3276_v10 = vmul.f32 %v3270_v60, %v11947_v52  ;;  %v3277_v53 = vmul.f32 %v3270_v60, %v11953_v4  ;;  %v3278_v27 = vmul.f32 %v3270_v60, %v11960_v18  ;;  %6229 = vmatpush1.bf16.msra.mxu1 %v9568_v37 }
 0x481   : > { %v3279_v24 = vmul.f32 %v3270_v60, %v11967_v29  ;;  %v3280_v34 = vmul.f32 %v3270_v60, %v11974_v9  ;;  %v3281_v2 = vmul.f32 %v3270_v60, %v11981_v63  ;;  %v3282_v14 = vmul.f32 %v3270_v60, %v11988_v32  ;;  %v9567_v29 = vld [vmem:[%s15856_s5 + $0x8] sm:$0xff]   ;;  %6230 = vmatprep.subr.bf16.mxu1 %v16192_v21 }
 0x482   : > { %v3283_v52 = vmul.f32 %v3270_v60, %v11995_v11  ;;  %v3284_v4 = vmul.f32 %v3270_v60, %v12002_v8  ;;  %v3285_v18 = vmul.f32 %v3270_v60, %v12009_v54  ;;  %v3286_v61 = vmul.f32 %v3270_v60, %v12016_v30  ;;  %6052 = vmatpush1.bf16.msra.mxu0 %v9567_v29 }
 0x483   : > { %v3287_v9 = vmul.f32 %v3270_v60, %v12023_v56  ;;  %v3288_v63 = vmul.f32 %v3270_v60, %v12030_v48  ;;  %v3289_v32 = vmul.f32 %v3270_v60, %v12037_v17  ;;  %v3290_v15 = vmul.f32 %v3270_v60, %v12044_v45  ;;  %v9570_v56 = vld [vmem:[%s15856_s5 + $0x80] sm:$0xff]   ;;  %6053 = vmatprep.subr.bf16.mxu0 %v16192_v21 }
 0x484   : > { %v3291_v11 = vmul.f32 %v3270_v60, %v12055_v19  ;;  %v3292_v8 = vmul.f32 %v3270_v60, %v12062_v42  ;;  %v3293_v54 = vmul.f32 %v3270_v60, %v12071_v43  ;;  %v3294_v30 = vmul.f32 %v3270_v60, %v12079_v38  ;;  %v12296_v19 = vpop.f32.mrf.mxu1  ;;  %6231 = vmatpush1.bf16.msra.mxu1 %v9570_v56 }
 0x485   : > { %v3295_v48 = vmul.f32 %v3270_v60, %v12086_v5  ;;  %v3296_v17 = vmul.f32 %v3270_v60, %v12093_v23  ;;  %v3297_v45 = vmul.f32 %v3270_v60, %v12100_v62  ;;  %v3298_v16 = vmul.f32 %v3270_v60, %v12107_v33  ;;  %v9569_v5 = vld [vmem:[%s15856_s5] sm:$0xff]   ;;  %6232 = vmatprep.subr.bf16.mxu1 %v16192_v21 }
 0x486   : > { %v3299_v42 = vmul.f32 %v3270_v60, %v12114_v3  ;;  %v3300_v38 = vmul.f32 %v3270_v60, %v12121_v51  ;;  %v3301_v43 = vmul.f32 %v3270_v60, %v12128_v49  ;;  %v3302_v20 = vmul.f32 %v3270_v60, %v12135_v36  ;;  %v9212_v3 = vpop.f32.mrf.mxu1  ;;  %6054 = vmatpush1.bf16.msra.mxu0 %v9569_v5 }
 0x487   : > { %v3303_v23 = vmul.f32 %v3270_v60, %v12142_v57  ;;  %v3304_v62 = vmul.f32 %v3270_v60, %v12149_v12  ;;  %v3305_v33 = vmul.f32 %v3270_v60, %v12156_v50  ;;  %v3306_v28 = vmul.f32 %v3270_v60, %v12163_v58  ;;  %6055 = vmatprep.subr.bf16.mxu0 %v16192_v21 }
 0x488   : > { %v3311_v51 = vmul.f32 %v12247_v41, %v3271_v47  ;;  %v3312_v49 = vmul.f32 %v12247_v41, %v3272_v39  ;;  %v3313_v36 = vmul.f32 %v12247_v41, %v3273_v7  ;;  %v3314_v1 = vmul.f32 %v12247_v41, %v3274_v26 }
 0x489   : > { %v3315_v57 = vmul.f32 %v12247_v41, %v3275_v13  ;;  %v3316_v12 = vmul.f32 %v12247_v41, %v3276_v10  ;;  %v3317_v50 = vmul.f32 %v12247_v41, %v3277_v53  ;;  %v3318_v58 = vmul.f32 %v12247_v41, %v3278_v27 }
 0x48a   : > { %v3319_v60 = vmul.f32 %v12247_v41, %v3279_v24  ;;  %v3320_v47 = vmul.f32 %v12247_v41, %v3280_v34  ;;  %v3321_v39 = vmul.f32 %v12247_v41, %v3281_v2  ;;  %v3322_v7 = vmul.f32 %v12247_v41, %v3282_v14 }
 0x48b   : > { %v3323_v26 = vmul.f32 %v12247_v41, %v3283_v52  ;;  %v3324_v55 = vmul.f32 %v12247_v41, %v3284_v4  ;;  %v3325_v13 = vmul.f32 %v12247_v41, %v3285_v18  ;;  %v3326_v10 = vmul.f32 %v12247_v41, %v3286_v61 }
 0x48c   : > { %v3327_v53 = vmul.f32 %v12247_v41, %v3287_v9  ;;  %v3328_v27 = vmul.f32 %v12247_v41, %v3288_v63  ;;  %v3329_v37 = vmul.f32 %v12247_v41, %v3289_v32  ;;  %v3330_v24 = vmul.f32 %v12247_v41, %v3290_v15 }
 0x48d   : > { %v3331_v34 = vmul.f32 %v12247_v41, %v3291_v11  ;;  %v3332_v2 = vmul.f32 %v12247_v41, %v3292_v8  ;;  %v3333_v14 = vmul.f32 %v12247_v41, %v3293_v54  ;;  %v3334_v52 = vmul.f32 %v12247_v41, %v3294_v30 }
 0x48e   : > { %v3335_v4 = vmul.f32 %v12247_v41, %v3295_v48  ;;  %v3336_v18 = vmul.f32 %v12247_v41, %v3296_v17  ;;  %v3337_v61 = vmul.f32 %v12247_v41, %v3297_v45  ;;  %v12339_v29 = vadd.f32 %v12250_v0, %v3311_v51 }
 0x48f   : > { %v3338_v9 = vmul.f32 %v12247_v41, %v3298_v16  ;;  %v3339_v63 = vmul.f32 %v12247_v41, %v3299_v42  ;;  %v3340_v32 = vmul.f32 %v12247_v41, %v3300_v38  ;;  %v12345_v15 = vadd.f32 %v12250_v0, %v3312_v49 }
 0x490   : > { %v12348_v11 = vmul.f32 %v12247_v41, %v3301_v43  ;;  %v12351_v8 = vmul.f32 %v12247_v41, %v3302_v20  ;;  %v12354_v54 = vmul.f32 %v12247_v41, %v3303_v23  ;;  %v12357_v30 = vadd.f32 %v12250_v0, %v3313_v36 }
 0x491   : > { %v12360_v56 = vmul.f32 %v12247_v41, %v3304_v62  ;;  %v12363_v48 = vmul.f32 %v12247_v41, %v3305_v33  ;;  %v12366_v17 = vmul.f32 %v12247_v41, %v3306_v28  ;;  %v12369_v45 = vadd.f32 %v12250_v0, %v3314_v1 }
 0x492   : > { %v12372_v16 = vadd.f32 %v12250_v0, %v3315_v57  ;;  %v12375_v42 = vadd.f32 %v12250_v0, %v3316_v12  ;;  %v12378_v38 = vadd.f32 %v12250_v0, %v3317_v50  ;;  %v3387_v43 = vmin.f32 %v12339_v29, 20.0 }
 0x493   : > { %v12382_v20 = vadd.f32 %v12250_v0, %v3318_v58  ;;  %v12385_v41 = vadd.f32 %v12250_v0, %v3319_v60  ;;  %v12388_v5 = vadd.f32 %v12250_v0, %v3320_v47  ;;  %v3388_v23 = vmin.f32 %v12345_v15, 20.0 }
 0x494   : > { %v12392_v62 = vadd.f32 %v12250_v0, %v3321_v39  ;;  %v12395_v33 = vadd.f32 %v12250_v0, %v3322_v7  ;;  %v12398_v28 = vadd.f32 %v12250_v0, %v3323_v26  ;;  %v3389_v3 = vmin.f32 %v12357_v30, 20.0 }
 0x495   : > { %16196 = vst [vmem:[#allocation11_spill] sm:$0xff] %v12385_v41  ;;  %16197 = vst [vmem:[#allocation13_spill] sm:$0xff] %v12388_v5  ;;  %v12402_v51 = vadd.f32 %v12250_v0, %v3324_v55  ;;  %v12405_v49 = vadd.f32 %v12250_v0, %v3325_v13  ;;  %v12408_v36 = vadd.f32 %v12250_v0, %v3326_v10  ;;  %v3390_v1 = vmin.f32 %v12369_v45, 20.0 }
 0x496   : > { %16198 = vst [vmem:[#allocation14_spill] sm:$0xff] %v12392_v62  ;;  %16199 = vst [vmem:[#allocation15_spill] sm:$0xff] %v12395_v33  ;;  %v12412_v57 = vadd.f32 %v12250_v0, %v3327_v53  ;;  %v12415_v12 = vadd.f32 %v12250_v0, %v3328_v27  ;;  %v3391_v50 = vmin.f32 %v12372_v16, 20.0  ;;  %v3423_v58 = vmul.f32 1.442695, %v3387_v43 }
 0x497   : > { %16200 = vst [vmem:[#allocation16_spill] sm:$0xff] %v12398_v28  ;;  %16201 = vst [vmem:[#allocation17_spill] sm:$0xff] %v12402_v51  ;;  %v12419_v60 = vadd.f32 %v12250_v0, %v3329_v37  ;;  %v12422_v47 = vadd.f32 %v12250_v0, %v3330_v24  ;;  %v3392_v39 = vmin.f32 %v12375_v42, 20.0  ;;  %v3425_v7 = vmul.f32 1.442695, %v3388_v23 }
 0x498   : > { %16202 = vst [vmem:[#allocation18_spill] sm:$0xff] %v12405_v49  ;;  %16203 = vst [vmem:[#allocation19_spill] sm:$0xff] %v12408_v36  ;;  %v12426_v26 = vadd.f32 %v12250_v0, %v3331_v34  ;;  %v12429_v55 = vadd.f32 %v12250_v0, %v3332_v2  ;;  %v3393_v13 = vmin.f32 %v12378_v38, 20.0  ;;  %v3427_v10 = vmul.f32 1.442695, %v3389_v3 }
 0x499   : > { %16204 = vst [vmem:[#allocation20_spill] sm:$0xff] %v12412_v57  ;;  %16205 = vst [vmem:[#allocation21_spill] sm:$0xff] %v12415_v12  ;;  %v12433_v53 = vadd.f32 %v12250_v0, %v3333_v14  ;;  %v12436_v27 = vadd.f32 %v12250_v0, %v3334_v52  ;;  %v3394_v37 = vmin.f32 %v12382_v20, 20.0  ;;  %v3429_v24 = vmul.f32 1.442695, %v3390_v1 }
 0x49a   : > { %16206 = vst [vmem:[#allocation34_spill] sm:$0xff] %v12419_v60  ;;  %16207 = vst [vmem:[#allocation35_spill] sm:$0xff] %v12422_v47  ;;  %v12440_v43 = vadd.f32 %v12250_v0, %v3335_v4  ;;  %v3395_v34 = vmin.f32 %v12385_v41, 20.0  ;;  %v3431_v23 = vmul.f32 1.442695, %v3391_v50  ;;  %9690 = vpow2.f32 %v3423_v58 }
 0x49b   : > { %16208 = vst [vmem:[#allocation8_spill] sm:$0xff] %v12426_v26  ;;  %16209 = vst [vmem:[#allocation9_spill] sm:$0xff] %v12429_v55  ;;  %v12444_v2 = vadd.f32 %v12250_v0, %v3336_v18  ;;  %v3396_v3 = vmin.f32 %v12388_v5, 20.0  ;;  %v3433_v14 = vmul.f32 1.442695, %v3392_v39  ;;  %9692 = vpow2.f32 %v3425_v7 }
 0x49c   : > { %16210 = vst [vmem:[#allocation60_spill] sm:$0xff] %v12433_v53  ;;  %16211 = vst [vmem:[#allocation61_spill] sm:$0xff] %v12436_v27  ;;  %v12448_v52 = vadd.f32 %v12250_v0, %v3337_v61  ;;  %v3397_v44 = vmin.f32 %v12392_v62, 20.0  ;;  %v3435_v1 = vmul.f32 1.442695, %v3393_v13  ;;  %9694 = vpow2.f32 %v3427_v10 }
 0x49d   : > { %16212 = vst [vmem:[#allocation62_spill] sm:$0xff] %v12440_v43  ;;  %16213 = vst [vmem:[#allocation63_spill] sm:$0xff] %v12444_v2  ;;  %v12452_v4 = vadd.f32 %v12250_v0, %v3338_v9  ;;  %v3398_v50 = vmin.f32 %v12395_v33, 20.0  ;;  %v3437_v58 = vmul.f32 1.442695, %v3394_v37  ;;  %9696 = vpow2.f32 %v3429_v24 }
 0x49e   : > { %16214 = vst [vmem:[#allocation64_spill] sm:$0xff] %v12448_v52  ;;  %v12456_v18 = vadd.f32 %v12250_v0, %v3339_v63  ;;  %v3399_v39 = vmin.f32 %v12398_v28, 20.0  ;;  %v3439_v7 = vmul.f32 1.442695, %v3395_v34  ;;  %9698 = vpow2.f32 %v3431_v23  ;;  %v12473_v23 = vpop.permute.xlu0 %3841 }
 0x49f   : > { %16215 = vst [vmem:[#allocation65_spill] sm:$0xff] %v12452_v4  ;;  %v12460_v61 = vadd.f32 %v12250_v0, %v3340_v32  ;;  %v3400_v13 = vmin.f32 %v12402_v51, 20.0  ;;  %v3441_v10 = vmul.f32 1.442695, %v3396_v3  ;;  %9700 = vpow2.f32 %v3433_v14  ;;  %16220 = vst [vmem:[#allocation70_spill] sm:$0xff] %v12473_v23 }
 0x4a0   : > { %16216 = vst [vmem:[#allocation66_spill] sm:$0xff] %v12456_v18  ;;  %v12465_v9 = vadd.f32 %v12250_v0, %v12348_v11  ;;  %v3401_v37 = vmin.f32 %v12405_v49, 20.0  ;;  %v3443_v24 = vmul.f32 1.442695, %v3397_v44  ;;  %9702 = vpow2.f32 %v3435_v1  ;;  %v12480_v44 = vpop.permute.xlu1 %3846 }
 0x4a1   : > { %16217 = vst [vmem:[#allocation67_spill] sm:$0xff] %v12460_v61  ;;  %v12470_v63 = vadd.f32 %v12250_v0, %v12351_v8  ;;  %v3402_v34 = vmin.f32 %v12408_v36, 20.0  ;;  %v3445_v32 = vmul.f32 1.442695, %v3398_v50  ;;  %9704 = vpow2.f32 %v3437_v58  ;;  %16222 = vst [vmem:[#allocation72_spill] sm:$0xff] %v12480_v44 }
 0x4a2   : > { %16218 = vst [vmem:[#allocation68_spill] sm:$0xff] %v12465_v9  ;;  %v12477_v3 = vadd.f32 %v12250_v0, %v12354_v54  ;;  %v3403_v11 = vmin.f32 %v12412_v57, 20.0  ;;  %v3447_v14 = vmul.f32 1.442695, %v3399_v39  ;;  %9706 = vpow2.f32 %v3439_v7 }
 0x4a3   : > { %16219 = vst [vmem:[#allocation69_spill] sm:$0xff] %v12470_v63  ;;  %v12484_v8 = vadd.f32 %v12250_v0, %v12360_v56  ;;  %v3404_v1 = vmin.f32 %v12415_v12, 20.0  ;;  %v3449_v50 = vmul.f32 1.442695, %v3400_v13  ;;  %9708 = vpow2.f32 %v3441_v10 }
 0x4a4   : > { %16221 = vst [vmem:[#allocation71_spill] sm:$0xff] %v12477_v3  ;;  %v12489_v58 = vadd.f32 %v12250_v0, %v12363_v48  ;;  %v3405_v54 = vmin.f32 %v12419_v60, 20.0  ;;  %v3451_v6 = vmul.f32 1.442695, %v3401_v37  ;;  %9710 = vpow2.f32 %v3443_v24  ;;  %v12505_v25 = vpop.permute.xlu1 %3856 }
 0x4a5   : > { %16223 = vst [vmem:[#allocation73_spill] sm:$0xff] %v12484_v8  ;;  %v12494_v39 = vadd.f32 %v12250_v0, %v12366_v17  ;;  %v3406_v7 = vmin.f32 %v12422_v47, 20.0  ;;  %v3453_v56 = vmul.f32 1.442695, %v3402_v34  ;;  %9712 = vpow2.f32 %v3445_v32  ;;  %v12501_v0 = vpop.permute.xlu0 %3851  ;;  %16227 = vst [vmem:[#allocation77_spill] sm:$0xff] %v12505_v25 }
 0x4a6   : > { %16224 = vst [vmem:[#allocation74_spill] sm:$0xff] %v12489_v58  ;;  %v3407_v40 = vmin.f32 %v12426_v26, 20.0  ;;  %v3408_v13 = vmin.f32 %v12429_v55, 20.0  ;;  %v3455_v10 = vmul.f32 1.442695, %v3403_v11  ;;  %9714 = vpow2.f32 %v3447_v14  ;;  %16226 = vst [vmem:[#allocation76_spill] sm:$0xff] %v12501_v0 }
 0x4a7   : > { %16225 = vst [vmem:[#allocation75_spill] sm:$0xff] %v12494_v39  ;;  %v9691_v48 = vpop.eup %9690  ;;  %v3409_v35 = vmin.f32 %v12433_v53, 20.0  ;;  %v3410_v37 = vmin.f32 %v12436_v27, 20.0  ;;  %v3457_v24 = vmul.f32 1.442695, %v3404_v1  ;;  %9716 = vpow2.f32 %v3449_v50 }
 0x4a8   : > { %v9693_v46 = vpop.eup %9692  ;;  %v3411_v17 = vmin.f32 %v12440_v43, 20.0  ;;  %v3412_v34 = vmin.f32 %v12444_v2, 20.0  ;;  %v3459_v32 = vmul.f32 1.442695, %v3405_v54  ;;  %9718 = vpow2.f32 %v3451_v6 }
 0x4a9   : > { %v9695_v31 = vpop.eup %9694  ;;  %v3413_v11 = vmin.f32 %v12448_v52, 20.0  ;;  %v3414_v14 = vmin.f32 %v12452_v4, 20.0  ;;  %v3461_v44 = vmul.f32 1.442695, %v3406_v7  ;;  %9720 = vpow2.f32 %v3453_v56 }
 0x4aa   : > { %v9697_v1 = vpop.eup %9696  ;;  %v3415_v50 = vmin.f32 %v12456_v18, 20.0  ;;  %v3416_v0 = vmin.f32 %v12460_v61, 20.0  ;;  %v3463_v23 = vmul.f32 1.442695, %v3407_v40  ;;  %9722 = vpow2.f32 %v3455_v10 }
 0x4ab   : > { %v9699_v43 = vpop.eup %9698  ;;  %v3417_v54 = vmin.f32 %v12465_v9, 20.0  ;;  %v3418_v6 = vmin.f32 %v12470_v63, 20.0  ;;  %v3465_v2 = vmul.f32 1.442695, %v3408_v13  ;;  %9724 = vpow2.f32 %v3457_v24  ;;  %v12517_v9 = vpop.permute.xlu0 %3861 }
 0x4ac   : > { %v9701_v25 = vpop.eup %9700  ;;  %v3419_v52 = vmin.f32 %v12477_v3, 20.0  ;;  %v3420_v7 = vmin.f32 %v12484_v8, 20.0  ;;  %v3467_v56 = vmul.f32 1.442695, %v3409_v35  ;;  %9726 = vpow2.f32 %v3459_v32  ;;  %16228 = vst [vmem:[#allocation78_spill] sm:$0xff] %v12517_v9  ;;  %v12519_v3 = vpop.permute.xlu1 %3866 }
 0x4ad   : > { %v9703_v4 = vpop.eup %9702  ;;  %v3421_v18 = vmin.f32 %v12489_v58, 20.0  ;;  %v3422_v40 = vmin.f32 %v12494_v39, 20.0  ;;  %v3469_v10 = vmul.f32 1.442695, %v3410_v37  ;;  %9728 = vpow2.f32 %v3461_v44  ;;  %16229 = vst [vmem:[#allocation79_spill] sm:$0xff] %v12519_v3 }
 0x4ae   : > { %v9705_v61 = vpop.eup %9704  ;;  %v3471_v63 = vmul.f32 1.442695, %v3411_v17  ;;  %v3473_v13 = vmul.f32 1.442695, %v3412_v34  ;;  %v3475_v24 = vmul.f32 1.442695, %v3413_v11  ;;  %9730 = vpow2.f32 %v3463_v23 }
 0x4af   : > { %v9707_v27 = vpop.eup %9706  ;;  %v3477_v8 = vmul.f32 1.442695, %v3414_v14  ;;  %9732 = vpow2.f32 %v3465_v2  ;;  %v3495_v35 = vadd.f32 1.0, %v9691_v48  ;;  %v3763_v32 = vrot.slane %v12244_v59, 6 }
 0x4b0   : > { %v9709_v58 = vpop.eup %9708  ;;  %v3479_v53 = vmul.f32 1.442695, %v3415_v50  ;;  %9734 = vpow2.f32 %v3467_v56  ;;  %v3496_v37 = vadd.f32 1.0, %v9693_v46  ;;  %v3497_v44 = vadd.f32 1.0, %v9695_v31  ;;  %v12525_v46 = vpop.permute.xlu0 %3871 }
 0x4b1   : > { %v9711_v39 = vpop.eup %9710  ;;  %v3481_v55 = vmul.f32 1.442695, %v3416_v0  ;;  %9736 = vpow2.f32 %v3469_v10  ;;  %v3498_v17 = vadd.f32 1.0, %v9697_v1  ;;  %v3499_v34 = vadd.f32 1.0, %v9699_v43  ;;  %16230 = vst [vmem:[#allocation80_spill] sm:$0xff] %v12525_v46 }
 0x4b2   : > { %v9713_v11 = vpop.eup %9712  ;;  %v3483_v23 = vmul.f32 1.442695, %v3417_v54  ;;  %v3485_v9 = vmul.f32 1.442695, %v3418_v6  ;;  %v3487_v26 = vmul.f32 1.442695, %v3419_v52  ;;  %9738 = vpow2.f32 %v3471_v63  ;;  %v12531_v54 = vpop.permute.xlu1 %3876 }
 0x4b3   : > { %v9715_v14 = vpop.eup %9714  ;;  %9740 = vpow2.f32 %v3473_v13  ;;  %v3500_v2 = vadd.f32 1.0, %v9701_v25  ;;  %v12522_v48 = vmul.f32 %v3495_v35, %v3495_v35  ;;  %v3836_v59 = vadd.f32 %v12296_v19, %v3763_v32  ;;  %16231 = vst [vmem:[#allocation81_spill] sm:$0xff] %v12531_v54 }
 0x4b4   : > { %v9717_v50 = vpop.eup %9716  ;;  %v3489_v31 = vmul.f32 1.442695, %v3420_v7  ;;  %9742 = vpow2.f32 %v3475_v24  ;;  %v12527_v0 = vmul.f32 %v3496_v37, %v3496_v37  ;;  %v12529_v43 = vmul.f32 %v3497_v44, %v3497_v44  ;;  %v12559_v44 = vpop.permute.xlu0 %3881 }
 0x4b5   : > { %v9719_v1 = vpop.eup %9718  ;;  %9744 = vpow2.f32 %v3477_v8  ;;  %v3501_v52 = vadd.f32 1.0, %v9703_v4  ;;  %v12533_v63 = vmul.f32 %v3498_v17, %v3498_v17  ;;  %v12535_v25 = vmul.f32 %v3499_v34, %v3499_v34  ;;  %16233 = vst [vmem:[#allocation83_spill] sm:$0xff] %v12559_v44 }
 0x4b6   : > { %v9721_v6 = vpop.eup %9720  ;;  %v3491_v19 = vmul.f32 1.442695, %v3421_v18  ;;  %v3493_v56 = vmul.f32 1.442695, %v3422_v40  ;;  %9746 = vpow2.f32 %v3479_v53  ;;  %v3502_v10 = vadd.f32 1.0, %v9705_v61 }
 0x4b7   : > { %v9723_v7 = vpop.eup %9722  ;;  %9748 = vpow2.f32 %v3481_v55  ;;  %v12537_v13 = vmul.f32 %v3500_v2, %v3500_v2  ;;  %v12540_v24 = vadd.f32 -1.0, %v12522_v48  ;;  %v12543_v35 = vrot.slane %v3836_v59, %v16164_v22  ;;  %v12563_v2 = vpop.permute.xlu1 %3886 }
 0x4b8   : > { %v9725_v4 = vpop.eup %9724  ;;  %9750 = vpow2.f32 %v3483_v23  ;;  %v3503_v8 = vadd.f32 1.0, %v9707_v27  ;;  %v12546_v32 = vadd.f32 -1.0, %v12527_v0  ;;  %v12549_v18 = vadd.f32 -1.0, %v12529_v43  ;;  %16234 = vst [vmem:[#allocation84_spill] sm:$0xff] %v12563_v2 }
 0x4b9   : > { %16232 = vst [vmem:[#allocation82_spill] sm:$0xff] %v12543_v35  ;;  %v9727_v53 = vpop.eup %9726  ;;  %9752 = vpow2.f32 %v3485_v9  ;;  %v12551_v55 = vmul.f32 %v3501_v52, %v3501_v52  ;;  %v12554_v61 = vadd.f32 -1.0, %v12533_v63  ;;  %v12557_v40 = vadd.f32 -1.0, %v12535_v25 }
 0x4ba   : > { %v9729_v37 = vpop.eup %9728  ;;  %9754 = vpow2.f32 %v3487_v26  ;;  %v3504_v27 = vadd.f32 1.0, %v9709_v58  ;;  %v3505_v17 = vadd.f32 1.0, %v9711_v39  ;;  %v12561_v34 = vmul.f32 %v3502_v10, %v3502_v10 }
 0x4bb   : > { %v9731_v23 = vpop.eup %9730  ;;  %9756 = vpow2.f32 %v3489_v31  ;;  %v3506_v9 = vadd.f32 1.0, %v9713_v11  ;;  %v3507_v59 = vadd.f32 1.0, %v9715_v14  ;;  %v12566_v52 = vadd.f32 -1.0, %v12537_v13  ;;  %v12590_v47 = vpop.permute.xlu1 %3896 }
 0x4bc   : > { %v9733_v22 = vpop.eup %9732  ;;  %9758 = vpow2.f32 %v3491_v19  ;;  %v3508_v54 = vadd.f32 1.0, %v9717_v50  ;;  %v3509_v46 = vadd.f32 1.0, %v9719_v1  ;;  %v12568_v3 = vmul.f32 %v3503_v8, %v3503_v8  ;;  %16237 = vst [vmem:[#allocation87_spill] sm:$0xff] %v12590_v47 }
 0x4bd   : > { %v9735_v26 = vpop.eup %9734  ;;  %9760 = vpow2.f32 %v3493_v56  ;;  %v3510_v58 = vadd.f32 1.0, %v9721_v6  ;;  %v3511_v39 = vadd.f32 1.0, %v9723_v7  ;;  %v3512_v10 = vadd.f32 1.0, %v9725_v4  ;;  %v12584_v7 = vpop.permute.xlu0 %3891 }
 0x4be   : > { %v9737_v44 = vpop.eup %9736  ;;  %v3513_v35 = vadd.f32 1.0, %v9727_v53  ;;  %v12570_v2 = vmul.f32 %v3504_v27, %v3504_v27  ;;  %v12572_v11 = vmul.f32 %v3505_v17, %v3505_v17  ;;  %v12575_v14 = vadd.f32 -1.0, %v12551_v55  ;;  %16236 = vst [vmem:[#allocation86_spill] sm:$0xff] %v12584_v7 }
 0x4bf   : > { %v9739_v31 = vpop.eup %9738  ;;  %v3514_v19 = vadd.f32 1.0, %v9729_v37  ;;  %v12577_v50 = vmul.f32 %v3506_v9, %v3506_v9  ;;  %v12579_v1 = vmul.f32 %v3507_v59, %v3507_v59  ;;  %v12582_v56 = vadd.f32 -1.0, %v12561_v34 }
 0x4c0   : > { %v9741_v6 = vpop.eup %9740  ;;  %v3515_v4 = vadd.f32 1.0, %v9731_v23  ;;  %v3516_v8 = vadd.f32 1.0, %v9733_v22  ;;  %v12586_v53 = vmul.f32 %v3508_v54, %v3508_v54  ;;  %v12588_v27 = vmul.f32 %v3509_v46, %v3509_v46 }
 0x4c1   : > { %16235 = vst [vmem:[#allocation85_spill] sm:$0xff] %v12582_v56  ;;  %v9743_v17 = vpop.eup %9742  ;;  %v12592_v37 = vmul.f32 %v3510_v58, %v3510_v58  ;;  %v12594_v9 = vmul.f32 %v3511_v39, %v3511_v39  ;;  %v12596_v59 = vmul.f32 %v3512_v10, %v3512_v10  ;;  %v12599_v60 = vadd.f32 -1.0, %v12568_v3 }
 0x4c2   : > { %v9745_v12 = vpop.eup %9744  ;;  %v3517_v7 = vadd.f32 1.0, %v9735_v26  ;;  %v12601_v23 = vmul.f32 %v3513_v35, %v3513_v35  ;;  %v12604_v22 = vadd.f32 -1.0, %v12570_v2  ;;  %v12607_v46 = vadd.f32 -1.0, %v12572_v11 }
 0x4c3   : > { %16238 = vst [vmem:[#allocation88_spill] sm:$0xff] %v12599_v60  ;;  %v9747_v54 = vpop.eup %9746  ;;  %v3518_v58 = vadd.f32 1.0, %v9737_v44  ;;  %v12609_v47 = vmul.f32 %v3514_v19, %v3514_v19  ;;  %v12612_v39 = vadd.f32 -1.0, %v12577_v50  ;;  %v12615_v10 = vadd.f32 -1.0, %v12579_v1 }
 0x4c4   : > { %16239 = vst [vmem:[#allocation89_spill] sm:$0xff] %v12604_v22  ;;  %16240 = vst [vmem:[#allocation90_spill] sm:$0xff] %v12607_v46  ;;  %v9749_v57 = vpop.eup %9748  ;;  %v12617_v26 = vmul.f32 %v3515_v4, %v3515_v4  ;;  %v12619_v35 = vmul.f32 %v3516_v8, %v3516_v8  ;;  %v12622_v36 = vadd.f32 -1.0, %v12586_v53  ;;  %v12625_v49 = vadd.f32 -1.0, %v12588_v27  ;;  %v12636_v8 = vpop.permute.xlu0 %3901 }
 0x4c5   : > { %16241 = vst [vmem:[#allocation91_spill] sm:$0xff] %v12612_v39  ;;  %16242 = vst [vmem:[#allocation92_spill] sm:$0xff] %v12615_v10  ;;  %v9751_v44 = vpop.eup %9750  ;;  %v3519_v19 = vadd.f32 1.0, %v9739_v31  ;;  %v12628_v51 = vadd.f32 -1.0, %v12592_v37  ;;  %v12631_v28 = vadd.f32 -1.0, %v12594_v9  ;;  %v12634_v10 = vadd.f32 -1.0, %v12596_v59 }
 0x4c6   : > { %16243 = vst [vmem:[#allocation93_spill] sm:$0xff] %v12622_v36  ;;  %16244 = vst [vmem:[#allocation94_spill] sm:$0xff] %v12625_v49  ;;  %v9753_v4 = vpop.eup %9752  ;;  %v3520_v39 = vadd.f32 1.0, %v9741_v6  ;;  %v12638_v33 = vmul.f32 %v3517_v7, %v3517_v7  ;;  %v12641_v36 = vadd.f32 -1.0, %v12601_v23  ;;  %v12644_v31 = vadd.f32 1.0, %v12522_v48 }
 0x4c7   : > { %16245 = vst [vmem:[#allocation95_spill] sm:$0xff] %v12628_v51  ;;  %16246 = vst [vmem:[#allocation96_spill] sm:$0xff] %v12631_v28  ;;  %v9755_v49 = vpop.eup %9754  ;;  %v12646_v51 = vpop.permute.xlu1 %3906  ;;  %v3521_v46 = vadd.f32 1.0, %v9743_v17  ;;  %v12648_v28 = vmul.f32 %v3518_v58, %v3518_v58  ;;  %v3522_v7 = vadd.f32 1.0, %v9745_v12  ;;  %v12657_v62 = vadd.f32 -1.0, %v12617_v26 }
 0x4c8   : > { %16247 = vst [vmem:[#allocation97_spill] sm:$0xff] %v12634_v10  ;;  %16248 = vst [vmem:[#allocation98_spill] sm:$0xff] %v12636_v8  ;;  %v12651_v10 = vadd.f32 -1.0, %v12609_v47  ;;  %v12654_v8 = vadd.f32 1.0, %v12527_v0  ;;  %v9757_v6 = vpop.eup %9756  ;;  %v12660_v48 = vadd.f32 -1.0, %v12619_v35  ;;  %v3523_v58 = vadd.f32 1.0, %v9747_v54 }
 0x4c9   : > { %16249 = vst [vmem:[#allocation99_spill] sm:$0xff] %v12641_v36  ;;  %16250 = vst [vmem:[#allocation100_spill] sm:$0xff] %v12646_v51  ;;  %v12663_v36 = vadd.f32 1.0, %v12529_v43  ;;  %v9759_v17 = vpop.eup %9758  ;;  %v3524_v51 = vadd.f32 1.0, %v9749_v57  ;;  %v12665_v22 = vmul.f32 %v3519_v19, %v3519_v19  ;;  %v3525_v5 = vadd.f32 1.0, %v9751_v44  ;;  %v9572_v43 = vld [vmem:[%s15856_s5 + $0xf8] sm:$0xff]   ;;  %v12686_v44 = vpop.permute.xlu0 %3911 }
 0x4ca   : > { %16251 = vst [vmem:[#allocation101_spill] sm:$0xff] %v12651_v10  ;;  %16252 = vst [vmem:[#allocation102_spill] sm:$0xff] %v12657_v62  ;;  %v12668_v10 = vadd.f32 1.0, %v12533_v63  ;;  %v9761_v0 = vpop.eup %9760  ;;  %v3526_v12 = vadd.f32 1.0, %v9753_v4  ;;  %v12670_v60 = vmul.f32 %v3520_v39, %v3520_v39  ;;  %v12673_v62 = vadd.f32 -1.0, %v12638_v33  ;;  %6233 = vmatpush2.bf16.msra.mxu1 %v9572_v43 }
 0x4cb   : > { %16253 = vst [vmem:[#allocation103_spill] sm:$0xff] %v12660_v48  ;;  %v3527_v48 = vadd.f32 1.0, %v9755_v49  ;;  %v12678_v54 = vmul.f32 %v3521_v46, %v3521_v46  ;;  %v12681_v57 = vadd.f32 -1.0, %v12648_v28  ;;  %v12684_v63 = vadd.f32 1.0, %v12535_v25  ;;  %16256 = vst [vmem:[#allocation106_spill] sm:$0xff] %v12686_v44  ;;  %v9571_v49 = vld [vmem:[%s15856_s5 + $0x78] sm:$0xff]   ;;  %v12696_v46 = vpop.permute.xlu1 %3916  ;;  %6234 = vmatprep.subr.bf16.mxu1 %v16192_v21 }
 0x4cc   : > { %16254 = vst [vmem:[#allocation104_spill] sm:$0xff] %v12673_v62  ;;  %v3528_v39 = vadd.f32 1.0, %v9757_v6  ;;  %v3529_v19 = vadd.f32 1.0, %v9759_v17  ;;  %v12688_v4 = vmul.f32 %v3522_v7, %v3522_v7  ;;  %v12691_v62 = vadd.f32 1.0, %v12537_v13  ;;  %16257 = vst [vmem:[#allocation107_spill] sm:$0xff] %v12696_v46  ;;  %6056 = vmatpush2.bf16.msra.mxu0 %v9571_v49 }
 0x4cd   : > { %16255 = vst [vmem:[#allocation105_spill] sm:$0xff] %v12681_v57  ;;  %v3530_v57 = vadd.f32 1.0, %v9761_v0  ;;  %v3559_v41 = vmul.f32 %v3523_v58, %v3523_v58  ;;  %v3560_v25 = vmul.f32 %v3524_v51, %v3524_v51  ;;  %v12699_v56 = vadd.f32 -1.0, %v12665_v22  ;;  %v9574_v58 = vld [vmem:[%s15856_s5 + $0xf0] sm:$0xff]   ;;  %6057 = vmatprep.subr.bf16.mxu0 %v16192_v21 }
 0x4ce   : > { %v3561_v6 = vmul.f32 %v3525_v5, %v3525_v5  ;;  %v12702_v7 = vmul.f32 %v3526_v12, %v3526_v12  ;;  %v12705_v13 = vadd.f32 -1.0, %v12670_v60  ;;  %v12708_v17 = vadd.f32 1.0, %v12551_v55  ;;  %6235 = vmatpush2.bf16.msra.mxu1 %v9574_v58 }
 0x4cf   : > { %v3563_v51 = vmul.f32 %v3527_v48, %v3527_v48  ;;  %v12714_v0 = vadd.f32 -1.0, %v12678_v54  ;;  %v12717_v43 = vadd.f32 1.0, %v12561_v34  ;;  %v12720_v5 = vadd.f32 1.0, %v12568_v3  ;;  %v9573_v48 = vld [vmem:[%s15856_s5 + $0x70] sm:$0xff]   ;;  %6236 = vmatprep.subr.bf16.mxu1 %v16192_v21  ;;  %v12756_v58 = vpop.permute.xlu1 %3926 }
 0x4d0   : > { %v3564_v12 = vmul.f32 %v3528_v39, %v3528_v39  ;;  %v3565_v55 = vmul.f32 %v3529_v19, %v3529_v19  ;;  %v12724_v49 = vadd.f32 -1.0, %v12688_v4  ;;  %v12727_v46 = vadd.f32 1.0, %v12570_v2  ;;  %v12740_v39 = vpop.permute.xlu0 %3921  ;;  %6058 = vmatpush2.bf16.msra.mxu0 %v9573_v48  ;;  %16264 = vst [vmem:[#allocation114_spill] sm:$0xff] %v12756_v58 }
 0x4d1   : > { %16258 = vst [vmem:[#allocation108_spill] sm:$0xff] %v12714_v0  ;;  %v3566_v34 = vmul.f32 %v3530_v57, %v3530_v57  ;;  %v12732_v44 = vadd.f32 -1.0, %v3559_v41  ;;  %v12734_v3 = vadd.f32 -1.0, %v3560_v25  ;;  %v12737_v0 = vadd.f32 1.0, %v12572_v11  ;;  %16261 = vst [vmem:[#allocation111_spill] sm:$0xff] %v12740_v39  ;;  %v9576_v11 = vld [vmem:[%s15856_s5 + $0xe8] sm:$0xff]   ;;  %6059 = vmatprep.subr.bf16.mxu0 %v16192_v21 }
 0x4d2   : > { %16259 = vst [vmem:[#allocation109_spill] sm:$0xff] %v12724_v49  ;;  %v12742_v19 = vadd.f32 -1.0, %v3561_v6  ;;  %v12745_v2 = vadd.f32 -1.0, %v12702_v7  ;;  %v12748_v49 = vadd.f32 1.0, %v12577_v50  ;;  %v12751_v57 = vadd.f32 1.0, %v12579_v1  ;;  %6237 = vmatpush2.bf16.msra.mxu1 %v9576_v11 }
 0x4d3   : > { %16260 = vst [vmem:[#allocation110_spill] sm:$0xff] %v12734_v3  ;;  %v12758_v3 = vadd.f32 -1.0, %v3563_v51  ;;  %v12761_v39 = vadd.f32 1.0, %v12586_v53  ;;  %v12767_v50 = vadd.f32 1.0, %v12592_v37  ;;  %v12770_v1 = vadd.f32 -1.0, %v3564_v12  ;;  %v9575_v53 = vld [vmem:[%s15856_s5 + $0x68] sm:$0xff]   ;;  %6238 = vmatprep.subr.bf16.mxu1 %v16192_v21 }
 0x4d4   : > { %16262 = vst [vmem:[#allocation112_spill] sm:$0xff] %v12742_v19  ;;  %16263 = vst [vmem:[#allocation113_spill] sm:$0xff] %v12745_v2  ;;  %v12764_v2 = vadd.f32 1.0, %v12588_v27  ;;  %v12772_v48 = vadd.f32 -1.0, %v3565_v55  ;;  %v12775_v19 = vadd.f32 1.0, %v12594_v9  ;;  %v12778_v58 = vadd.f32 1.0, %v12596_v59  ;;  %6060 = vmatpush2.bf16.msra.mxu0 %v9575_v53 }
 0x4d5   : > { %16265 = vst [vmem:[#allocation115_spill] sm:$0xff] %v12767_v50  ;;  %v12783_v27 = vadd.f32 -1.0, %v3566_v34  ;;  %v12786_v37 = vadd.f32 1.0, %v12601_v23  ;;  %v12789_v50 = vadd.f32 1.0, %v12609_v47  ;;  %v12796_v9 = vadd.f32 1.0, %v12619_v35  ;;  %v9578_v47 = vld [vmem:[%s15856_s5 + $0xe0] sm:$0xff]   ;;  %6061 = vmatprep.subr.bf16.mxu0 %v16192_v21 }
 0x4d6   : > { %16266 = vst [vmem:[#allocation116_spill] sm:$0xff] %v12772_v48  ;;  %v12792_v48 = vadd.f32 1.0, %v12617_v26  ;;  %v12799_v59 = vadd.f32 1.0, %v12638_v33  ;;  %v12802_v11 = vadd.f32 1.0, %v12648_v28  ;;  %v12805_v23 = vadd.f32 1.0, %v12665_v22  ;;  %v12821_v28 = vpop.permute.xlu0 %3931  ;;  %6239 = vmatpush2.bf16.msra.mxu1 %v9578_v47  ;;  %v16282_v47 = vld [vmem:[#allocation16_spill] sm:$0xff] }
 0x4d7   : > { %v12811_v26 = vadd.f32 1.0, %v12670_v60  ;;  %v12814_v35 = vadd.f32 1.0, %v12678_v54  ;;  %v12817_v33 = vadd.f32 1.0, %v12688_v4  ;;  %9762 = vrcp.f32 %v12644_v31  ;;  %16268 = vst [vmem:[#allocation118_spill] sm:$0xff] %v12821_v28  ;;  %v9577_v60 = vld [vmem:[%s15856_s5 + $0x60] sm:$0xff]   ;;  %v12833_v54 = vpop.permute.xlu1 %3936  ;;  %6240 = vmatprep.subr.bf16.mxu1 %v16192_v21 }
 0x4d8   : > { %16267 = vst [vmem:[#allocation117_spill] sm:$0xff] %v12805_v23  ;;  %v12823_v22 = vadd.f32 1.0, %v3559_v41  ;;  %v12825_v53 = vadd.f32 1.0, %v3560_v25  ;;  %v12827_v23 = vadd.f32 1.0, %v3561_v6  ;;  %9764 = vrcp.f32 %v12654_v8  ;;  %16269 = vst [vmem:[#allocation119_spill] sm:$0xff] %v12833_v54  ;;  %6062 = vmatpush2.bf16.msra.mxu0 %v9577_v60  ;;  %v16283_v60 = vld [vmem:[#allocation92_spill] sm:$0xff] }
 0x4d9   : > { %v12836_v31 = vadd.f32 1.0, %v12702_v7  ;;  %v12838_v4 = vadd.f32 1.0, %v3563_v51  ;;  %v12840_v41 = vadd.f32 1.0, %v3564_v12  ;;  %9766 = vrcp.f32 %v12663_v36  ;;  %v9580_v7 = vld [vmem:[%s15856_s5 + $0xd8] sm:$0xff]   ;;  %6063 = vmatprep.subr.bf16.mxu0 %v16192_v21 }
 0x4da   : > { %v12844_v25 = vadd.f32 1.0, %v3565_v55  ;;  %v12846_v8 = vadd.f32 1.0, %v3566_v34  ;;  %v12850_v6 = vmul.f32 %v12540_v24, %v12339_v29  ;;  %9768 = vrcp.f32 %v12668_v10  ;;  %6241 = vmatpush2.bf16.msra.mxu1 %v9580_v7  ;;  %v16272_v24 = vld [vmem:[#allocation85_spill] sm:$0xff]  ;;  %v16281_v55 = vld [vmem:[#allocation91_spill] sm:$0xff] }
 0x4db   : > { %v12858_v36 = vmul.f32 %v12546_v32, %v12345_v15  ;;  %v12862_v51 = vmul.f32 %v12549_v18, %v12357_v30  ;;  %v12866_v12 = vmul.f32 %v12554_v61, %v12369_v45  ;;  %9770 = vrcp.f32 %v12684_v63  ;;  %v9579_v45 = vld [vmem:[%s15856_s5 + $0x58] sm:$0xff]   ;;  %6242 = vmatprep.subr.bf16.mxu1 %v16192_v21 }
 0x4dc   : > { %16270 = vst [vmem:[#allocation120_spill] sm:$0xff] %v12844_v25  ;;  %16271 = vst [vmem:[#allocation121_spill] sm:$0xff] %v12846_v8  ;;  %v12872_v29 = vmul.f32 %v12557_v40, %v12372_v16  ;;  %v12876_v15 = vmul.f32 %v12566_v52, %v12375_v42  ;;  %v12880_v30 = vmul.f32 %v12575_v14, %v12378_v38  ;;  %9772 = vrcp.f32 %v12691_v62  ;;  %v16273_v16 = vld [vmem:[#allocation11_spill] sm:$0xff]  ;;  %v16274_v18 = vld [vmem:[#allocation88_spill] sm:$0xff]  ;;  %v12903_v62 = vpop.permute.xlu0 %3941 }
 0x4dd   : > { %v12888_v32 = vmul.f32 %v16272_v24, %v12382_v20  ;;  %v12892_v61 = vmul.f32 %v16274_v18, %v16273_v16  ;;  %v16275_v42 = vld [vmem:[#allocation13_spill] sm:$0xff]  ;;  %9774 = vrcp.f32 %v12708_v17  ;;  %v9581_v38 = vld [vmem:[%s15856_s5 + $0xd0] sm:$0xff]   ;;  %16277 = vst [vmem:[#allocation85_spill] sm:$0xff] %v12903_v62  ;;  %v12915_v7 = vmul.f32 %v16283_v60, %v16282_v47  ;;  %6064 = vmatpush2.bf16.msra.mxu0 %v9579_v45  ;;  %v12921_v24 = vpop.permute.xlu1 %3946  ;;  %v16292_v45 = vld [vmem:[#allocation96_spill] sm:$0xff] }
 0x4de   : > { %v16276_v40 = vld [vmem:[#allocation89_spill] sm:$0xff]  ;;  %v16278_v20 = vld [vmem:[#allocation14_spill] sm:$0xff]  ;;  %v16280_v63 = vld [vmem:[#allocation15_spill] sm:$0xff]  ;;  %9776 = vrcp.f32 %v12717_v43  ;;  %16284 = vst [vmem:[#allocation11_spill] sm:$0xff] %v12921_v24  ;;  %6065 = vmatprep.subr.bf16.mxu0 %v16192_v21  ;;  %6243 = vmatpush2.bf16.msra.mxu1 %v9581_v38 }
 0x4df   : > { %v12896_v52 = vmul.f32 %v16276_v40, %v16275_v42  ;;  %v16279_v14 = vld [vmem:[#allocation90_spill] sm:$0xff]  ;;  %v12911_v34 = vmul.f32 %v16281_v55, %v16280_v63  ;;  %v16285_v16 = vld [vmem:[#allocation17_spill] sm:$0xff]  ;;  %v16289_v63 = vld [vmem:[#allocation19_spill] sm:$0xff]  ;;  %9778 = vrcp.f32 %v12720_v5  ;;  %6244 = vmatprep.subr.bf16.mxu1 %v16192_v21 }
 0x4e0   : > { %v12907_v10 = vmul.f32 %v16279_v14, %v16278_v20  ;;  %v9582_v17 = vld [vmem:[%s15856_s5 + $0x50] sm:$0xff]   ;;  %v16286_v18 = vld [vmem:[#allocation93_spill] sm:$0xff]  ;;  %v16291_v43 = vld [vmem:[#allocation20_spill] sm:$0xff]  ;;  %9780 = vrcp.f32 %v12727_v46 }
 0x4e1   : > { %v12925_v42 = vmul.f32 %v16286_v18, %v16285_v16  ;;  %v16287_v40 = vld [vmem:[#allocation18_spill] sm:$0xff]  ;;  %v16290_v55 = vld [vmem:[#allocation95_spill] sm:$0xff]  ;;  %v12939_v60 = vmul.f32 %v16292_v45, %v16291_v43  ;;  %v16293_v24 = vld [vmem:[#allocation21_spill] sm:$0xff]  ;;  %9782 = vrcp.f32 %v12737_v0  ;;  %6066 = vmatpush2.bf16.msra.mxu0 %v9582_v17 }
 0x4e2   : > { %v16288_v20 = vld [vmem:[#allocation94_spill] sm:$0xff]  ;;  %v12933_v47 = vmul.f32 %v16290_v55, %v16289_v63  ;;  %v16294_v62 = vld [vmem:[#allocation97_spill] sm:$0xff]  ;;  %v16296_v54 = vld [vmem:[#allocation99_spill] sm:$0xff]  ;;  %9784 = vrcp.f32 %v12748_v49  ;;  %6067 = vmatprep.subr.bf16.mxu0 %v16192_v21  ;;  %v12997_v49 = vpop.permute.xlu0 %3951 }
 0x4e3   : > { %v12929_v14 = vmul.f32 %v16288_v20, %v16287_v40  ;;  %v12943_v16 = vmul.f32 %v16294_v62, %v16293_v24  ;;  %v16295_v18 = vld [vmem:[#allocation34_spill] sm:$0xff]  ;;  %v16297_v20 = vld [vmem:[#allocation35_spill] sm:$0xff]  ;;  %v16298_v63 = vld [vmem:[#allocation101_spill] sm:$0xff]  ;;  %9786 = vrcp.f32 %v12751_v57  ;;  %16317 = vst [vmem:[#allocation90_spill] sm:$0xff] %v12997_v49 }
 0x4e4   : > { %v12947_v40 = vmul.f32 %v16296_v54, %v16295_v18  ;;  %v9583_v5 = vld [vmem:[%s15856_s5 + $0xc8] sm:$0xff]   ;;  %v12955_v55 = vmul.f32 %v16298_v63, %v16297_v20  ;;  %v16299_v43 = vld [vmem:[#allocation8_spill] sm:$0xff]  ;;  %v16302_v24 = vld [vmem:[#allocation103_spill] sm:$0xff]  ;;  %9788 = vrcp.f32 %v12761_v39 }
 0x4e5   : > { %v16300_v45 = vld [vmem:[#allocation102_spill] sm:$0xff]  ;;  %v16301_v62 = vld [vmem:[#allocation9_spill] sm:$0xff]  ;;  %v16303_v46 = vld [vmem:[#allocation60_spill] sm:$0xff]  ;;  %6245 = vmatpush2.bf16.msra.mxu1 %v9583_v5  ;;  %9790 = vrcp.f32 %v12764_v2 }
 0x4e6   : > { %v12959_v8 = vmul.f32 %v16300_v45, %v16299_v43  ;;  %v12963_v28 = vmul.f32 %v16302_v24, %v16301_v62  ;;  %v16304_v54 = vld [vmem:[#allocation104_spill] sm:$0xff]  ;;  %v16305_v18 = vld [vmem:[#allocation61_spill] sm:$0xff]  ;;  %v16308_v63 = vld [vmem:[#allocation62_spill] sm:$0xff]  ;;  %6246 = vmatprep.subr.bf16.mxu1 %v16192_v21 }
 0x4e7   : > { %v12969_v38 = vmul.f32 %v16304_v54, %v16303_v46  ;;  %v16306_v25 = vld [vmem:[#allocation105_spill] sm:$0xff]  ;;  %v12977_v43 = vmul.f32 %v12699_v56, %v16308_v63  ;;  %v16309_v45 = vld [vmem:[#allocation63_spill] sm:$0xff]  ;;  %v16311_v24 = vld [vmem:[#allocation64_spill] sm:$0xff]  ;;  %v9763_v56 = vpop.eup %9762 }
 0x4e8   : > { %v12973_v20 = vmul.f32 %v16306_v25, %v16305_v18  ;;  %v9584_v0 = vld [vmem:[%s15856_s5 + $0x48] sm:$0xff]   ;;  %v12985_v62 = vmul.f32 %v12705_v13, %v16309_v45  ;;  %v16312_v46 = vld [vmem:[#allocation108_spill] sm:$0xff]  ;;  %v16320_v13 = vld [vmem:[#allocation67_spill] sm:$0xff]  ;;  %v3676_v39 = vmul.f32 %v9763_v56, %v12850_v6 }
 0x4e9   : > { %v12989_v54 = vmul.f32 %v16312_v46, %v16311_v24  ;;  %v16314_v25 = vld [vmem:[#allocation65_spill] sm:$0xff]  ;;  %v16318_v17 = vld [vmem:[#allocation66_spill] sm:$0xff]  ;;  %v16323_v24 = vld [vmem:[#allocation68_spill] sm:$0xff]  ;;  %6068 = vmatpush2.bf16.msra.mxu0 %v9584_v0 }
 0x4ea   : > { %16307 = vst [vmem:[#allocation88_spill] sm:$0xff] %v12973_v20  ;;  %16310 = vst [vmem:[#allocation13_spill] sm:$0xff] %v12985_v62  ;;  %v16315_v18 = vld [vmem:[#allocation109_spill] sm:$0xff]  ;;  %v13001_v63 = vmul.f32 %v12732_v44, %v16318_v17  ;;  %v16321_v45 = vld [vmem:[#allocation110_spill] sm:$0xff]  ;;  %6069 = vmatprep.subr.bf16.mxu0 %v16192_v21 }
 0x4eb   : > { %16313 = vst [vmem:[#allocation89_spill] sm:$0xff] %v12989_v54  ;;  %v12993_v20 = vmul.f32 %v16315_v18, %v16314_v25  ;;  %v13005_v62 = vmul.f32 %v16321_v45, %v16320_v13  ;;  %v16324_v46 = vld [vmem:[#allocation112_spill] sm:$0xff]  ;;  %v9765_v25 = vpop.eup %9764  ;;  %v13015_v18 = vpop.permute.xlu1 %3956  ;;  %v16327_v44 = vld [vmem:[#allocation69_spill] sm:$0xff]  ;;  %v16330_v13 = vld [vmem:[#allocation71_spill] sm:$0xff] }
 0x4ec   : > { %16319 = vst [vmem:[#allocation15_spill] sm:$0xff] %v13001_v63  ;;  %v13009_v54 = vmul.f32 %v16324_v46, %v16323_v24  ;;  %v9585_v57 = vld [vmem:[%s15856_s5 + $0xc0] sm:$0xff]   ;;  %16326 = vst [vmem:[#allocation92_spill] sm:$0xff] %v13015_v18  ;;  %v13023_v45 = vmul.f32 %v12758_v3, %v16330_v13  ;;  %v9767_v46 = vpop.eup %9766  ;;  %v3678_v3 = vmul.f32 %v9765_v25, %v12858_v36  ;;  %v16335_v56 = vld [vmem:[#allocation75_spill] sm:$0xff] }
 0x4ed   : > { %16316 = vst [vmem:[#allocation14_spill] sm:$0xff] %v12993_v20  ;;  %16322 = vst [vmem:[#allocation91_spill] sm:$0xff] %v13005_v62  ;;  %v16328_v17 = vld [vmem:[#allocation113_spill] sm:$0xff]  ;;  %v4696_v24 = vld [vmem:[#allocation2] sm:$0xf]  ;;  %v9769_v6 = vpop.eup %9768  ;;  %v13043_v13 = vmul.f32 %v12783_v27, %v16335_v56  ;;  %6247 = vmatpush2.bf16.msra.mxu1 %v9585_v57 }
 0x4ee   : > { %16325 = vst [vmem:[#allocation16_spill] sm:$0xff] %v13009_v54  ;;  %v13019_v63 = vmul.f32 %v16328_v17, %v16327_v44  ;;  %v4697_v5 = vld [vmem:[#allocation2 + $0x4] sm:$0xf]  ;;  %v16332_v20 = vld [vmem:[#allocation74_spill] sm:$0xff]  ;;  %v16333_v44 = vld [vmem:[#allocation116_spill] sm:$0xff]  ;;  %v3682_v36 = vmul.f32 %v9769_v6, %v12866_v12  ;;  %6570 = vmatprep.subr.bf16.mxu1 %v16192_v21 }
 0x4ef   : > { %v16331_v54 = vld [vmem:[#allocation73_spill] sm:$0xff]  ;;  %v13034_v17 = vmul.f32 %v16333_v44, %v16332_v20  ;;  %16336 = vst [vmem:[#allocation93_spill] sm:$0xff] %v13043_v13  ;;  %v16337_v20 = vld [vmem:[#allocation70_spill] sm:$0xff]  ;;  %v16338_v0 = vld [vmem:[#allocation72_spill] sm:$0xff]  ;;  %v13052_v44 = vcombine.low %v4696_v24, %v4697_v5  ;;  %v13061_v13 = vpop.permute.xlu0 %3961  ;;  %v13069_v24 = vpop.permute.xlu1 %3966 }
 0x4f0   : > { %16329 = vst [vmem:[#allocation17_spill] sm:$0xff] %v13019_v63  ;;  %v13030_v62 = vmul.f32 %v12770_v1, %v16331_v54  ;;  %v16334_v63 = vld [vmem:[#allocation115_spill] sm:$0xff]  ;;  %v9586_v2 = vld [vmem:[%s15856_s5 + $0x40] sm:$0xff]   ;;  %v3680_v1 = vmul.f32 %v9767_v46, %v12862_v51  ;;  %v4019_v54 = vmul.f32 %v16337_v20, %v3676_v39  ;;  %v4020_v25 = vmul.f32 %v16338_v0, %v3678_v3  ;;  %v16341_v39 = vld [vmem:[#allocation82_spill] sm:$0xff] }
 0x4f1   : > { %9792 = vrcp.f32 %v16334_v63  ;;  %v9771_v63 = vpop.eup %9770  ;;  %16339 = vst [vmem:[#allocation18_spill] sm:$0xff] %v13052_v44  ;;  %v16340_v51 = vld [vmem:[#allocation76_spill] sm:$0xff]  ;;  %16342 = vst [vmem:[#allocation94_spill] sm:$0xff] %v13061_v13  ;;  %v16343_v57 = vld [vmem:[#allocation77_spill] sm:$0xff]  ;;  %6070 = vmatpush2.bf16.msra.mxu0 %v9586_v2 }
 0x4f2   : > { %9794 = vrcp.f32 %v12775_v19  ;;  %v9773_v27 = vpop.eup %9772  ;;  %v3684_v19 = vmul.f32 %v9771_v63, %v12872_v29  ;;  %v4021_v46 = vmul.f32 %v16340_v51, %v3680_v1  ;;  %v13058_v56 = vadd.f32 %v16341_v39, %v4019_v54  ;;  %16344 = vst [vmem:[#allocation19_spill] sm:$0xff] %v13069_v24  ;;  %v16345_v6 = vld [vmem:[#allocation78_spill] sm:$0xff]  ;;  %6393 = vmatprep.subr.bf16.mxu0 %v16192_v21  ;;  %v16346_v2 = vld [vmem:[#allocation79_spill] sm:$0xff] }
 0x4f3   : > { %9796 = vrcp.f32 %v12778_v58  ;;  %v9775_v58 = vpop.eup %9774  ;;  %v3686_v12 = vmul.f32 %v9773_v27, %v12876_v15  ;;  %v4022_v5 = vmul.f32 %v16343_v57, %v3682_v36  ;;  %v13102_v21 = vpop.permute.xlu0 %3971 }
 0x4f4   : > { %9798 = vrcp.f32 %v12786_v37  ;;  %v13067_v37 = vadd.f32 %v16341_v39, %v4020_v25  ;;  %v9777_v29 = vpop.eup %9776  ;;  %v3688_v3 = vmul.f32 %v9775_v58, %v12880_v30  ;;  %v4023_v1 = vmul.f32 %v16345_v6, %v3684_v19  ;;  %v16347_v25 = vld [vmem:[#allocation80_spill] sm:$0xff]  ;;  %16351 = vst [vmem:[#allocation95_spill] sm:$0xff] %v13102_v21 }
 0x4f5   : > { %9800 = vrcp.f32 %v12789_v50  ;;  %v13075_v54 = vadd.f32 %v16341_v39, %v4021_v46  ;;  %v9779_v50 = vpop.eup %9778  ;;  %v3690_v15 = vmul.f32 %v9777_v29, %v12888_v32  ;;  %v4024_v63 = vmul.f32 %v16346_v2, %v3686_v12  ;;  %v16348_v32 = vld [vmem:[#allocation81_spill] sm:$0xff] }
 0x4f6   : > { %9802 = vrcp.f32 %v12792_v48  ;;  %v13082_v36 = vadd.f32 %v16341_v39, %v4022_v5  ;;  %v9781_v48 = vpop.eup %9780  ;;  %v3692_v30 = vmul.f32 %v9779_v50, %v12892_v61  ;;  %v4025_v27 = vmul.f32 %v16347_v25, %v3688_v3  ;;  %v16349_v29 = vld [vmem:[#allocation117_spill] sm:$0xff]  ;;  %v16350_v61 = vld [vmem:[#allocation83_spill] sm:$0xff] }
 0x4f7   : > { %9804 = vrcp.f32 %v12796_v9  ;;  %v13088_v19 = vadd.f32 %v16341_v39, %v4023_v1  ;;  %v9783_v46 = vpop.eup %9782  ;;  %v3694_v9 = vmul.f32 %v9781_v48, %v12896_v52  ;;  %v4026_v58 = vmul.f32 %v16348_v32, %v3690_v15  ;;  %v16352_v52 = vld [vmem:[#allocation84_spill] sm:$0xff] }
 0x4f8   : > { %9806 = vrcp.f32 %v12799_v59  ;;  %v13094_v12 = vadd.f32 %v16341_v39, %v4024_v63  ;;  %v9785_v5 = vpop.eup %9784  ;;  %v3696_v59 = vmul.f32 %v9783_v46, %v12907_v10  ;;  %v4027_v3 = vmul.f32 %v16350_v61, %v3692_v30  ;;  %v16354_v30 = vld [vmem:[#allocation86_spill] sm:$0xff] }
 0x4f9   : > { %9808 = vrcp.f32 %v12802_v11  ;;  %v13100_v1 = vadd.f32 %v16341_v39, %v4025_v27  ;;  %v9787_v50 = vpop.eup %9786  ;;  %v3698_v11 = vmul.f32 %v9785_v5, %v12911_v34  ;;  %v4028_v15 = vmul.f32 %v16352_v52, %v3694_v9  ;;  %v16355_v9 = vld [vmem:[#allocation87_spill] sm:$0xff] }
 0x4fa   : > { %9810 = vrcp.f32 %v16349_v29  ;;  %v13108_v63 = vadd.f32 %v16341_v39, %v4026_v58  ;;  %v9789_v48 = vpop.eup %9788  ;;  %v13110_v29 = vpop.permute.xlu1 %3976  ;;  %v3700_v10 = vmul.f32 %v9787_v50, %v12915_v7  ;;  %v4029_v27 = vmul.f32 %v16354_v30, %v3696_v59  ;;  %v16356_v7 = vld [vmem:[#allocation98_spill] sm:$0xff] }
 0x4fb   : > { %9812 = vrcp.f32 %v12811_v26  ;;  %16353 = vst [vmem:[#allocation20_spill] sm:$0xff] %v13110_v29  ;;  %v13116_v46 = vadd.f32 %v16341_v39, %v4027_v3  ;;  %v9791_v26 = vpop.eup %9790  ;;  %v3702_v34 = vmul.f32 %v9789_v48, %v12925_v42  ;;  %v4030_v58 = vmul.f32 %v16355_v9, %v3698_v11  ;;  %v16357_v42 = vld [vmem:[#allocation100_spill] sm:$0xff] }
 0x4fc   : > { %9814 = vrcp.f32 %v12814_v35  ;;  %v13122_v5 = vadd.f32 %v16341_v39, %v4028_v15  ;;  %v3704_v35 = vmul.f32 %v9791_v26, %v12929_v14  ;;  %v4031_v59 = vmul.f32 %v16356_v7, %v3700_v10  ;;  %v16358_v14 = vld [vmem:[#allocation106_spill] sm:$0xff]  ;;  %v13142_v7 = vpop.permute.xlu0 %3981 }
 0x4fd   : > { %9816 = vrcp.f32 %v12817_v33  ;;  %v13128_v3 = vadd.f32 %v16341_v39, %v4029_v27  ;;  %v4032_v11 = vmul.f32 %v16357_v42, %v3702_v34  ;;  %v13134_v15 = vadd.f32 %v16341_v39, %v4030_v58  ;;  %16359 = vst [vmem:[#allocation96_spill] sm:$0xff] %v13142_v7 }
 0x4fe   : > { %v9793_v44 = vpop.eup %9792  ;;  %9818 = vrcp.f32 %v12823_v22  ;;  %v4033_v10 = vmul.f32 %v16358_v14, %v3704_v35  ;;  %v13140_v27 = vadd.f32 %v16341_v39, %v4031_v59  ;;  %v13150_v58 = vpop.permute.xlu1 %3986  ;;  %v16362_v35 = vld [vmem:[#allocation111_spill] sm:$0xff]  ;;  %v16364_v14 = vld [vmem:[#allocation120_spill] sm:$0xff] }
 0x4ff   : > { %v9795_v50 = vpop.eup %9794  ;;  %9820 = vrcp.f32 %v12825_v53  ;;  %v3706_v33 = vmul.f32 %v9793_v44, %v12933_v47  ;;  %v16360_v47 = vld [vmem:[#allocation107_spill] sm:$0xff]  ;;  %v13148_v34 = vadd.f32 %v16341_v39, %v4032_v11  ;;  %16361 = vst [vmem:[#allocation21_spill] sm:$0xff] %v13150_v58 }
 0x500   : > { %v9797_v48 = vpop.eup %9796  ;;  %9822 = vrcp.f32 %v12827_v23  ;;  %v3708_v22 = vmul.f32 %v9795_v50, %v12939_v60  ;;  %v13156_v50 = vadd.f32 %v16341_v39, %v4033_v10 }
 0x501   : > { %v9799_v26 = vpop.eup %9798  ;;  %9824 = vrcp.f32 %v12836_v31  ;;  %v3710_v53 = vmul.f32 %v9797_v48, %v12943_v16  ;;  %v4034_v44 = vmul.f32 %v16360_v47, %v3706_v33  ;;  %v16363_v33 = vld [vmem:[#allocation114_spill] sm:$0xff] }
 0x502   : > { %v9801_v23 = vpop.eup %9800  ;;  %9826 = vrcp.f32 %v12838_v4  ;;  %v3712_v60 = vmul.f32 %v9799_v26, %v12947_v40  ;;  %v4035_v59 = vmul.f32 %v16362_v35, %v3708_v22  ;;  %v16365_v40 = vld [vmem:[#allocation118_spill] sm:$0xff]  ;;  %v16366_v35 = vld [vmem:[#allocation121_spill] sm:$0xff] }
 0x503   : > { %v9803_v31 = vpop.eup %9802  ;;  %9828 = vrcp.f32 %v12840_v41  ;;  %v3714_v16 = vmul.f32 %v9801_v23, %v12955_v55  ;;  %v4036_v11 = vmul.f32 %v16363_v33, %v3710_v53  ;;  %v13162_v48 = vadd.f32 %v16341_v39, %v4034_v44  ;;  %v16367_v55 = vld [vmem:[#allocation119_spill] sm:$0xff]  ;;  %v16368_v33 = vld [vmem:[#allocation85_spill] sm:$0xff] }
 0x504   : > { %v9805_v47 = vpop.eup %9804  ;;  %9830 = vrcp.f32 %v16364_v14  ;;  %v3716_v4 = vmul.f32 %v9803_v31, %v12959_v8  ;;  %v4037_v22 = vmul.f32 %v16365_v40, %v3712_v60  ;;  %v13168_v10 = vadd.f32 %v16341_v39, %v4035_v59  ;;  %v13185_v31 = vpop.permute.xlu0 %3991 }
 0x505   : > { %v9807_v26 = vpop.eup %9806  ;;  %9832 = vrcp.f32 %v16366_v35  ;;  %v3718_v41 = vmul.f32 %v9805_v47, %v12963_v28  ;;  %v4038_v53 = vmul.f32 %v16367_v55, %v3714_v16  ;;  %v13174_v44 = vadd.f32 %v16341_v39, %v4036_v11  ;;  %16369 = vst [vmem:[#allocation97_spill] sm:$0xff] %v13185_v31  ;;  %v16370_v28 = vld [vmem:[#allocation88_spill] sm:$0xff]  ;;  %v16371_v16 = vld [vmem:[#allocation11_spill] sm:$0xff] }
 0x506   : > { %v9809_v23 = vpop.eup %9808  ;;  %v3720_v14 = vmul.f32 %v9807_v26, %v12969_v38  ;;  %v4039_v8 = vmul.f32 %v16368_v33, %v3716_v4  ;;  %v13179_v60 = vadd.f32 %v16341_v39, %v4037_v22  ;;  %v13183_v59 = vmul.f32 %v13058_v56, %v16337_v20  ;;  %v13196_v22 = vpop.permute.xlu1 %3996 }
 0x507   : > { %v9811_v35 = vpop.eup %9810  ;;  %v3722_v47 = vmul.f32 %v9809_v23, %v16370_v28  ;;  %v4040_v11 = vmul.f32 %v16371_v16, %v3718_v41  ;;  %v13190_v55 = vadd.f32 %v16341_v39, %v4038_v53  ;;  %v13194_v38 = vmul.f32 %v13067_v37, %v16338_v0  ;;  %16373 = vst [vmem:[#allocation99_spill] sm:$0xff] %v13196_v22  ;;  %v16374_v23 = vld [vmem:[#allocation13_spill] sm:$0xff] }
 0x508   : > { %v9813_v4 = vpop.eup %9812  ;;  %v3724_v56 = vmul.f32 %v9811_v35, %v12977_v43  ;;  %v4041_v26 = vmul.f32 %v12997_v49, %v3720_v14  ;;  %v13201_v20 = vadd.f32 %v16341_v39, %v4039_v8  ;;  %v13205_v41 = vmul.f32 %v13075_v54, %v16340_v51  ;;  %v16376_v35 = vld [vmem:[#allocation89_spill] sm:$0xff] }
 0x509   : > { %16372 = vst [vmem:[#allocation34_spill] sm:$0xff] %v13194_v38  ;;  %v9815_v53 = vpop.eup %9814  ;;  %v3726_v28 = vmul.f32 %v9813_v4, %v16374_v23  ;;  %v4042_v37 = vmul.f32 %v13015_v18, %v3722_v47  ;;  %v13210_v0 = vadd.f32 %v16341_v39, %v4040_v11  ;;  %v13214_v43 = vmul.f32 %v13082_v36, %v16343_v57  ;;  %v16377_v23 = vld [vmem:[#allocation14_spill] sm:$0xff] }
 0x50a   : > { %v9817_v14 = vpop.eup %9816  ;;  %v3728_v8 = vmul.f32 %v9815_v53, %v16376_v35  ;;  %v4043_v38 = vmul.f32 %v13061_v13, %v3724_v56  ;;  %v13219_v54 = vadd.f32 %v16341_v39, %v4041_v26  ;;  %v13223_v4 = vmul.f32 %v13088_v19, %v16345_v6  ;;  %v16378_v56 = vld [vmem:[#allocation15_spill] sm:$0xff] }
 0x50b   : > { %16375 = vst [vmem:[#allocation35_spill] sm:$0xff] %v13214_v43  ;;  %v9819_v47 = vpop.eup %9818  ;;  %v3730_v11 = vmul.f32 %v9817_v14, %v16377_v23  ;;  %v4044_v51 = vmul.f32 %v13069_v24, %v3726_v28  ;;  %v4082_v36 = vadd.f32 %v16341_v39, %v4042_v37  ;;  %v13230_v57 = vmul.f32 %v13094_v12, %v16346_v2  ;;  %v13239_v23 = vpop.permute.xlu0 %4001  ;;  %v16381_v28 = vld [vmem:[#allocation91_spill] sm:$0xff] }
 0x50c   : > { %v9821_v53 = vpop.eup %9820  ;;  %v3732_v35 = vmul.f32 %v9819_v47, %v16378_v56  ;;  %v4045_v26 = vmul.f32 %v13102_v21, %v3728_v8  ;;  %v4083_v43 = vadd.f32 %v16341_v39, %v4043_v38  ;;  %v13237_v19 = vmul.f32 %v13100_v1, %v16347_v25  ;;  %16380 = vst [vmem:[#allocation8_spill] sm:$0xff] %v13239_v23  ;;  %v13248_v56 = vpop.permute.xlu1 %4006  ;;  %v16384_v38 = vld [vmem:[#allocation16_spill] sm:$0xff] }
 0x50d   : > { %v9823_v14 = vpop.eup %9822  ;;  %v3734_v37 = vmul.f32 %v9821_v53, %v16381_v28  ;;  %v4046_v6 = vmul.f32 %v13110_v29, %v3730_v11  ;;  %v4084_v12 = vadd.f32 %v16341_v39, %v4044_v51  ;;  %v13246_v47 = vmul.f32 %v13108_v63, %v16348_v32  ;;  %16383 = vst [vmem:[#allocation9_spill] sm:$0xff] %v13248_v56  ;;  %v16385_v28 = vld [vmem:[#allocation17_spill] sm:$0xff] }
 0x50e   : > { %16379 = vst [vmem:[#allocation101_spill] sm:$0xff] %v13237_v19  ;;  %v9825_v8 = vpop.eup %9824  ;;  %v3736_v2 = vmul.f32 %v9823_v14, %v16384_v38  ;;  %v4047_v1 = vmul.f32 %v13142_v7, %v3732_v35  ;;  %v4085_v25 = vadd.f32 %v16341_v39, %v4045_v26  ;;  %v13255_v53 = vmul.f32 %v13116_v46, %v16350_v61  ;;  %v16394_v61 = vld [vmem:[#allocation119_spill] sm:$0xff] }
 0x50f   : > { %16382 = vst [vmem:[#allocation102_spill] sm:$0xff] %v13246_v47  ;;  %v9827_v11 = vpop.eup %9826  ;;  %v3738_v51 = vmul.f32 %v9825_v8, %v16385_v28  ;;  %v4048_v19 = vmul.f32 %v13150_v58, %v3734_v37  ;;  %v4086_v63 = vadd.f32 %v16341_v39, %v4046_v6  ;;  %v4104_v32 = vmul.f32 %v13122_v5, %v16352_v52  ;;  %v13277_v52 = vpop.permute.xlu0 %4011 }
 0x510   : > { %v9829_v47 = vpop.eup %9828  ;;  %v3740_v14 = vmul.f32 %v9827_v11, %v13023_v45  ;;  %v4049_v35 = vmul.f32 %v13185_v31, %v3736_v2  ;;  %v4087_v26 = vadd.f32 %v16341_v39, %v4047_v1  ;;  %v4105_v46 = vmul.f32 %v13128_v3, %v16354_v30  ;;  %v16386_v11 = vld [vmem:[#allocation98_spill] sm:$0xff]  ;;  %16387 = vst [vmem:[#allocation103_spill] sm:$0xff] %v13277_v52 }
 0x511   : > { %v9831_v38 = vpop.eup %9830  ;;  %v3742_v8 = vmul.f32 %v9829_v47, %v13030_v62  ;;  %v4050_v37 = vmul.f32 %v13196_v22, %v3738_v51  ;;  %v4088_v6 = vadd.f32 %v16341_v39, %v4048_v19  ;;  %v4106_v5 = vmul.f32 %v13134_v15, %v16355_v9  ;;  %v16388_v62 = vld [vmem:[#allocation93_spill] sm:$0xff]  ;;  %v13284_v9 = vpop.permute.xlu1 %4016 }
 0x512   : > { %v9833_v28 = vpop.eup %9832  ;;  %v3744_v45 = vmul.f32 %v9831_v38, %v13034_v17  ;;  %v4051_v2 = vmul.f32 %v13239_v23, %v3740_v14  ;;  %v4089_v1 = vadd.f32 %v16341_v39, %v4049_v35  ;;  %v4107_v3 = vmul.f32 %v13140_v27, %v16386_v11  ;;  %16389 = vst [vmem:[#allocation60_spill] sm:$0xff] %v13284_v9  ;;  %v16390_v35 = vld [vmem:[#allocation106_spill] sm:$0xff]  ;;  %v16391_v38 = vld [vmem:[#allocation107_spill] sm:$0xff] }
 0x513   : > { %v3746_v47 = vmul.f32 %v9833_v28, %v16388_v62  ;;  %v4052_v51 = vmul.f32 %v13248_v56, %v3742_v8  ;;  %v4090_v19 = vadd.f32 %v16341_v39, %v4050_v37  ;;  %v4108_v15 = vmul.f32 %v13148_v34, %v16357_v42  ;;  %v16392_v37 = vld [vmem:[#allocation111_spill] sm:$0xff]  ;;  %v16393_v34 = vld [vmem:[#allocation114_spill] sm:$0xff] }
 0x514   : > { %v4053_v17 = vmul.f32 %v13277_v52, %v3744_v45  ;;  %v4091_v14 = vadd.f32 %v16341_v39, %v4051_v2  ;;  %v4109_v27 = vmul.f32 %v13156_v50, %v16390_v35  ;;  %v4110_v11 = vmul.f32 %v13162_v48, %v16391_v38 }
 0x515   : > { %v4054_v28 = vmul.f32 %v13284_v9, %v3746_v47  ;;  %v4092_v8 = vadd.f32 %v16341_v39, %v4052_v51  ;;  %v4111_v62 = vmul.f32 %v13168_v10, %v16392_v37  ;;  %v4112_v42 = vmul.f32 %v13174_v44, %v16393_v34 }
 0x516   : > { %v4093_v45 = vadd.f32 %v16341_v39, %v4053_v17  ;;  %v4113_v2 = vmul.f32 %v13179_v60, %v16365_v40  ;;  %v4114_v50 = vmul.f32 %v13190_v55, %v16394_v61  ;;  %v4115_v48 = vmul.f32 %v13201_v20, %v16368_v33 }
 0x517   : > { %v4094_v47 = vadd.f32 %v16341_v39, %v4054_v28  ;;  %v4116_v51 = vmul.f32 %v13210_v0, %v16371_v16  ;;  %v4117_v10 = vmul.f32 %v13219_v54, %v12997_v49  ;;  %v4118_v44 = vmul.f32 %v4082_v36, %v13015_v18 }
 0x518   : > { %v4119_v17 = vmul.f32 %v4083_v43, %v13061_v13  ;;  %v4120_v60 = vmul.f32 %v4084_v12, %v13069_v24  ;;  %v4121_v34 = vmul.f32 %v4085_v25, %v13102_v21  ;;  %v4122_v55 = vmul.f32 %v4086_v63, %v13110_v29  ;;  %v16395_v63 = vld [vmem:[#allocation34_spill] sm:$0xff] }
 0x519   : > { %v4123_v20 = vmul.f32 %v4087_v26, %v13142_v7  ;;  %v4124_v39 = vmul.f32 %v4088_v6, %v13150_v58  ;;  %v4125_v28 = vmul.f32 %v4089_v1, %v13185_v31  ;;  %v4126_v0 = vmul.f32 %v4090_v19, %v13196_v22  ;;  %v16396_v1 = vld [vmem:[#allocation35_spill] sm:$0xff] }
 0x51a   : > { %v4127_v54 = vmul.f32 %v4091_v14, %v13239_v23  ;;  %v4128_v36 = vmul.f32 %v4092_v8, %v13248_v56  ;;  %v4129_v43 = vmul.f32 %v4093_v45, %v13277_v52  ;;  %v4130_v12 = vmul.f32 %v4094_v47, %v13284_v9  ;;  %v16397_v45 = vld [vmem:[#allocation101_spill] sm:$0xff] }
 0x51b   : > { %v8893_v25 = vpack.c.bf16 %v13183_v59, %v13183_v59  ;;  %v8894_v26 = vpack.c.bf16 %v16395_v63, %v16395_v63  ;;  %v8895_v6 = vpack.c.bf16 %v13205_v41, %v13205_v41  ;;  %v8896_v19 = vpack.c.bf16 %v16396_v1, %v16396_v1  ;;  %v16398_v59 = vld [vmem:[#allocation102_spill] sm:$0xff] }
 0x51c   : > { %v8897_v14 = vpack.c.bf16 %v13223_v4, %v13223_v4  ;;  %v13335_v8 = vpack.c.bf16 %v13230_v57, %v13230_v57  ;;  %v13339_v47 = vpack.c.bf16 %v16397_v45, %v16397_v45  ;;  %v13343_v63 = vpack.c.bf16 %v16398_v59, %v16398_v59 }
 0x51d   : > { %v13347_v41 = vpack.c.bf16 %v13255_v53, %v13255_v53  ;;  %v13349_v1 = vpack.c.bf16 %v4104_v32, %v4104_v32  ;;  %v13351_v56 = vpack.c.bf16 %v4105_v46, %v4105_v46  ;;  %v13353_v4 = vpack.c.bf16 %v4106_v5, %v4106_v5 }
 0x51e   : > { %v13355_v57 = vpack.c.bf16 %v4107_v3, %v4107_v3  ;;  %v13357_v9 = vpack.c.bf16 %v4108_v15, %v4108_v15  ;;  %v13359_v45 = vpack.c.bf16 %v4109_v27, %v4109_v27  ;;  %v13361_v23 = vpack.c.bf16 %v4110_v11, %v4110_v11 }
 0x51f   : > { %v13363_v59 = vpack.c.bf16 %v4111_v62, %v4111_v62  ;;  %v13365_v52 = vpack.c.bf16 %v4112_v42, %v4112_v42  ;;  %v13367_v53 = vpack.c.bf16 %v4113_v2, %v4113_v2  ;;  %v13369_v32 = vpack.c.bf16 %v4114_v50, %v4114_v50 }
 0x520   : > { %v13371_v46 = vpack.c.bf16 %v4115_v48, %v4115_v48  ;;  %v13373_v5 = vpack.c.bf16 %v4116_v51, %v4116_v51  ;;  %v13375_v3 = vpack.c.bf16 %v4117_v10, %v4117_v10  ;;  %v13377_v15 = vpack.c.bf16 %v4118_v44, %v4118_v44 }
 0x521   : > { %v13379_v27 = vpack.c.bf16 %v4119_v17, %v4119_v17  ;;  %v13381_v11 = vpack.c.bf16 %v4120_v60, %v4120_v60  ;;  %v13383_v62 = vpack.c.bf16 %v4121_v34, %v4121_v34  ;;  %v13385_v42 = vpack.c.bf16 %v4122_v55, %v4122_v55 }
 0x522   : > { %v13387_v2 = vpack.c.bf16 %v4123_v20, %v4123_v20  ;;  %v13389_v50 = vpack.c.bf16 %v4124_v39, %v4124_v39  ;;  %v13391_v48 = vpack.c.bf16 %v4125_v28, %v4125_v28  ;;  %v13393_v51 = vpack.c.bf16 %v4126_v0, %v4126_v0 }
 0x523   : > { %v13395_v10 = vpack.c.bf16 %v4127_v54, %v4127_v54  ;;  %v13397_v44 = vpack.c.bf16 %v4128_v36, %v4128_v36  ;;  %v13399_v17 = vpack.c.bf16 %v4129_v43, %v4129_v43  ;;  %v13401_v60 = vpack.c.bf16 %v4130_v12, %v4130_v12 }
 0x524   : > { %v4260_v34 = vshrl.u32 %v8893_v25, 16  ;;  %v4263_v58 = vshll.u32 %v8893_v25, 16  ;;  %v4269_v55 = vshrl.u32 %v8894_v26, 16  ;;  %v4272_v22 = vshll.u32 %v8894_v26, 16 }
 0x525   : > { %v4279_v20 = vshrl.u32 %v8895_v6, 16  ;;  %v4282_v7 = vshll.u32 %v8895_v6, 16  ;;  %v4289_v39 = vshrl.u32 %v8896_v19, 16  ;;  %v4292_v31 = vshll.u32 %v8896_v19, 16 }
 0x526   : > { %v4262_v28 = vrot.slane %v4260_v34, 6  ;;  %v4265_v24 = vrot.slane %v4263_v58, 7  ;;  %v4271_v0 = vrot.slane %v4269_v55, 6  ;;  %v4274_v29 = vrot.slane %v4272_v22, 7 }
 0x527   : > { %v4281_v54 = vrot.slane %v4279_v20, 6  ;;  %v4284_v13 = vrot.slane %v4282_v7, 7  ;;  %v4291_v36 = vrot.slane %v4289_v39, 6  ;;  %v4294_v21 = vrot.slane %v4292_v31, 7 }
 0x528   : > { %v13403_v43 = vor.u32 %v4265_v24, %v4262_v28  ;;  %v4275_v12 = vor.u32 %v4274_v29, %v4271_v0  ;;  %v4299_v16 = vshrl.u32 %v8897_v14, 16  ;;  %v4302_v18 = vshll.u32 %v8897_v14, 16 }
 0x529   : > { %v4285_v26 = vor.u32 %v4284_v13, %v4281_v54  ;;  %v4295_v6 = vor.u32 %v4294_v21, %v4291_v36  ;;  %v4309_v58 = vshrl.u32 %v13335_v8, 16  ;;  %v4312_v22 = vshll.u32 %v13335_v8, 16 }
 0x52a   : > { %v4267_v7 = vrot.slane %v13403_v43, 4  ;;  %v4277_v31 = vrot.slane %v4275_v12, 4  ;;  %v4301_v24 = vrot.slane %v4299_v16, 6  ;;  %v4304_v19 = vrot.slane %v4302_v18, 7 }
 0x52b   : > { %v4287_v29 = vrot.slane %v4285_v26, 4  ;;  %v4297_v34 = vrot.slane %v4295_v6, 4  ;;  %v4311_v14 = vrot.slane %v4309_v58, 6  ;;  %v4314_v55 = vrot.slane %v4312_v22, 7 }
 0x52c   : > { %v4276_v20 = vsel %vm13407_vm15, %v4267_v7, %v4275_v12  ;;  %v4286_v13 = vsel %vm13407_vm15, %v4277_v31, %v4285_v26  ;;  %v4305_v21 = vor.u32 %v4304_v19, %v4301_v24  ;;  %v4319_v39 = vshrl.u32 %v13339_v47, 16 }
 0x52d   : > { %v4296_v8 = vsel %vm13407_vm15, %v4287_v29, %v4295_v6  ;;  %v4315_v28 = vor.u32 %v4314_v55, %v4311_v14  ;;  %v4322_v16 = vshll.u32 %v13339_v47, 16  ;;  %v4329_v18 = vshrl.u32 %v13343_v63, 16  ;;  %4658 = vst [vmem:[#allocation2 + $0xc] sm:$0xf] %v4276_v20  ;;  %4659 = vst [vmem:[#allocation2 + $0x10] sm:$0xf] %v4286_v13 }
 0x52e   : > { %v4306_v0 = vsel %vm13407_vm15, %v4297_v34, %v4305_v21  ;;  %v4307_v54 = vrot.slane %v4305_v21, 4  ;;  %v4321_v36 = vrot.slane %v4319_v39, 6  ;;  %v4332_v12 = vshll.u32 %v13343_v63, 16  ;;  %4660 = vst [vmem:[#allocation2 + $0x14] sm:$0xf] %v4296_v8 }
 0x52f   : > { %v4317_v26 = vrot.slane %v4315_v28, 4  ;;  %v4324_v58 = vrot.slane %v4322_v16, 7  ;;  %v4331_v22 = vrot.slane %v4329_v18, 6  ;;  %v4339_v6 = vshrl.u32 %v13347_v41, 16  ;;  %4661 = vst [vmem:[#allocation2 + $0x18] sm:$0xf] %v4306_v0 }
 0x530   : > { %v4316_v47 = vsel %vm13407_vm15, %v4307_v54, %v4315_v28  ;;  %v4334_v7 = vrot.slane %v4332_v12, 7  ;;  %v4342_v31 = vshll.u32 %v13347_v41, 16  ;;  %v4349_v24 = vshrl.u32 %v13349_v1, 16 }
 0x531   : > { %v4325_v19 = vor.u32 %v4324_v58, %v4321_v36  ;;  %v4341_v29 = vrot.slane %v4339_v6, 6  ;;  %v4352_v34 = vshll.u32 %v13349_v1, 16  ;;  %v4359_v63 = vshrl.u32 %v13351_v56, 16  ;;  %4662 = vst [vmem:[#allocation2 + $0x1c] sm:$0xf] %v4316_v47 }
 0x532   : > { %v4335_v14 = vor.u32 %v4334_v7, %v4331_v22  ;;  %v4344_v55 = vrot.slane %v4342_v31, 7  ;;  %v4351_v20 = vrot.slane %v4349_v24, 6  ;;  %v4362_v13 = vshll.u32 %v13351_v56, 16 }
 0x533   : > { %v4326_v21 = vsel %vm13407_vm15, %v4317_v26, %v4325_v19  ;;  %v4327_v39 = vrot.slane %v4325_v19, 4  ;;  %v4354_v8 = vrot.slane %v4352_v34, 7  ;;  %v4361_v41 = vrot.slane %v4359_v63, 6 }
 0x534   : > { %v4337_v28 = vrot.slane %v4335_v14, 4  ;;  %v4345_v16 = vor.u32 %v4344_v55, %v4341_v29  ;;  %v4364_v18 = vrot.slane %v4362_v13, 7  ;;  %v4369_v0 = vshrl.u32 %v13353_v4, 16  ;;  %4663 = vst [vmem:[#allocation2 + $0x20] sm:$0xf] %v4326_v21 }
 0x535   : > { %v4336_v1 = vsel %vm13407_vm15, %v4327_v39, %v4335_v14  ;;  %v4355_v54 = vor.u32 %v4354_v8, %v4351_v20  ;;  %v4372_v36 = vshll.u32 %v13353_v4, 16  ;;  %v4379_v56 = vshrl.u32 %v13355_v57, 16 }
 0x536   : > { %v4346_v12 = vsel %vm13407_vm15, %v4337_v28, %v4345_v16  ;;  %v4347_v26 = vrot.slane %v4345_v16, 4  ;;  %v4365_v58 = vor.u32 %v4364_v18, %v4361_v41  ;;  %v4371_v22 = vrot.slane %v4369_v0, 6  ;;  %4664 = vst [vmem:[#allocation2 + $0x24] sm:$0xf] %v4336_v1 }
 0x537   : > { %v4357_v6 = vrot.slane %v4355_v54, 4  ;;  %v4374_v47 = vrot.slane %v4372_v36, 7  ;;  %v4381_v7 = vrot.slane %v4379_v56, 6  ;;  %v4382_v31 = vshll.u32 %v13355_v57, 16  ;;  %4665 = vst [vmem:[#allocation2 + $0x28] sm:$0xf] %v4346_v12 }
 0x538   : > { %v4356_v24 = vsel %vm13407_vm15, %v4347_v26, %v4355_v54  ;;  %v4367_v19 = vrot.slane %v4365_v58, 4  ;;  %v4389_v4 = vshrl.u32 %v13357_v9, 16  ;;  %v4392_v29 = vshll.u32 %v13357_v9, 16 }
 0x539   : > { %v4366_v34 = vsel %vm13407_vm15, %v4357_v6, %v4365_v58  ;;  %v4375_v63 = vor.u32 %v4374_v47, %v4371_v22  ;;  %v4384_v14 = vrot.slane %v4382_v31, 7  ;;  %v4399_v55 = vshrl.u32 %v13359_v45, 16  ;;  %4666 = vst [vmem:[#allocation2 + $0x2c] sm:$0xf] %v4356_v24 }
 0x53a   : > { %v4391_v20 = vrot.slane %v4389_v4, 6  ;;  %v4394_v13 = vrot.slane %v4392_v29, 7  ;;  %v4402_v57 = vshll.u32 %v13359_v45, 16  ;;  %v4409_v21 = vshrl.u32 %v13361_v23, 16  ;;  %4667 = vst [vmem:[#allocation2 + $0x30] sm:$0xf] %v4366_v34 }
 0x53b   : > { %v4376_v39 = vsel %vm13407_vm15, %v4367_v19, %v4375_v63  ;;  %v4377_v8 = vrot.slane %v4375_v63, 4  ;;  %v4385_v9 = vor.u32 %v4384_v14, %v4381_v7  ;;  %v4401_v41 = vrot.slane %v4399_v55, 6 }
 0x53c   : > { %v4395_v28 = vor.u32 %v4394_v13, %v4391_v20  ;;  %v4404_v16 = vrot.slane %v4402_v57, 7  ;;  %v4411_v18 = vrot.slane %v4409_v21, 6  ;;  %v4412_v0 = vshll.u32 %v13361_v23, 16  ;;  %4668 = vst [vmem:[#allocation2 + $0x34] sm:$0xf] %v4376_v39 }
 0x53d   : > { %v4386_v1 = vsel %vm13407_vm15, %v4377_v8, %v4385_v9  ;;  %v4387_v54 = vrot.slane %v4385_v9, 4  ;;  %v4419_v45 = vshrl.u32 %v13363_v59, 16  ;;  %v4422_v36 = vshll.u32 %v13363_v59, 16 }
 0x53e   : > { %v4397_v56 = vrot.slane %v4395_v28, 4  ;;  %v4405_v12 = vor.u32 %v4404_v16, %v4401_v41  ;;  %v4414_v26 = vrot.slane %v4412_v0, 7  ;;  %v4429_v58 = vshrl.u32 %v13365_v52, 16  ;;  %4669 = vst [vmem:[#allocation2 + $0x38] sm:$0xf] %v4386_v1 }
 0x53f   : > { %v4396_v22 = vsel %vm13407_vm15, %v4387_v54, %v4395_v28  ;;  %v4421_v6 = vrot.slane %v4419_v45, 6  ;;  %v4424_v23 = vrot.slane %v4422_v36, 7  ;;  %v4432_v47 = vshll.u32 %v13365_v52, 16 }
 0x540   : > { %v4406_v7 = vsel %vm13407_vm15, %v4397_v56, %v4405_v12  ;;  %v4407_v31 = vrot.slane %v4405_v12, 4  ;;  %v4415_v24 = vor.u32 %v4414_v26, %v4411_v18  ;;  %v4431_v19 = vrot.slane %v4429_v58, 6  ;;  %4670 = vst [vmem:[#allocation2 + $0x3c] sm:$0xf] %v4396_v22 }
 0x541   : > { %v4425_v59 = vor.u32 %v4424_v23, %v4421_v6  ;;  %v4434_v4 = vrot.slane %v4432_v47, 7  ;;  %v4439_v29 = vshrl.u32 %v13367_v53, 16  ;;  %v4442_v34 = vshll.u32 %v13367_v53, 16  ;;  %4671 = vst [vmem:[#allocation2 + $0x40] sm:$0xf] %v4406_v7 }
 0x542   : > { %v4416_v63 = vsel %vm13407_vm15, %v4407_v31, %v4415_v24  ;;  %v4417_v14 = vrot.slane %v4415_v24, 4  ;;  %v4449_v52 = vshrl.u32 %v13369_v32, 16  ;;  %v4452_v55 = vshll.u32 %v13369_v32, 16 }
 0x543   : > { %v4427_v20 = vrot.slane %v4425_v59, 4  ;;  %v4435_v13 = vor.u32 %v4434_v4, %v4431_v19  ;;  %v4441_v57 = vrot.slane %v4439_v29, 6  ;;  %v4444_v21 = vrot.slane %v4442_v34, 7  ;;  %4672 = vst [vmem:[#allocation2 + $0x44] sm:$0xf] %v4416_v63 }
 0x544   : > { %v4426_v39 = vsel %vm13407_vm15, %v4417_v14, %v4425_v59  ;;  %v4451_v8 = vrot.slane %v4449_v52, 6  ;;  %v4454_v9 = vrot.slane %v4452_v55, 7  ;;  %v4459_v53 = vshrl.u32 %v13371_v46, 16 }
 0x545   : > { %v4436_v41 = vsel %vm13407_vm15, %v4427_v20, %v4435_v13  ;;  %v4437_v28 = vrot.slane %v4435_v13, 4  ;;  %v4445_v16 = vor.u32 %v4444_v21, %v4441_v57  ;;  %v4462_v18 = vshll.u32 %v13371_v46, 16  ;;  %4673 = vst [vmem:[#allocation2 + $0x48] sm:$0xf] %v4426_v39 }
 0x546   : > { %v4455_v32 = vor.u32 %v4454_v9, %v4451_v8  ;;  %v4461_v0 = vrot.slane %v4459_v53, 6  ;;  %v4469_v1 = vshrl.u32 %v13373_v5, 16  ;;  %v4472_v54 = vshll.u32 %v13373_v5, 16  ;;  %4674 = vst [vmem:[#allocation2 + $0x4c] sm:$0xf] %v4436_v41 }
 0x547   : > { %v4446_v45 = vsel %vm13407_vm15, %v4437_v28, %v4445_v16  ;;  %v4447_v36 = vrot.slane %v4445_v16, 4  ;;  %v4464_v56 = vrot.slane %v4462_v18, 7  ;;  %v4479_v12 = vshrl.u32 %v13375_v3, 16 }
 0x548   : > { %v4457_v26 = vrot.slane %v4455_v32, 4  ;;  %v4471_v58 = vrot.slane %v4469_v1, 6  ;;  %v4474_v22 = vrot.slane %v4472_v54, 7  ;;  %v4482_v46 = vshll.u32 %v13375_v3, 16  ;;  %4675 = vst [vmem:[#allocation2 + $0x50] sm:$0xf] %v4446_v45 }
 0x549   : > { %v4456_v6 = vsel %vm13407_vm15, %v4447_v36, %v4455_v32  ;;  %v4465_v23 = vor.u32 %v4464_v56, %v4461_v0  ;;  %v4481_v47 = vrot.slane %v4479_v12, 6  ;;  %v4489_v5 = vshrl.u32 %v13377_v15, 16 }
 0x54a   : > { %v4475_v7 = vor.u32 %v4474_v22, %v4471_v58  ;;  %v4484_v31 = vrot.slane %v4482_v46, 7  ;;  %v4492_v24 = vshll.u32 %v13377_v15, 16  ;;  %v4499_v19 = vshrl.u32 %v13379_v27, 16  ;;  %4676 = vst [vmem:[#allocation2 + $0x54] sm:$0xf] %v4456_v6 }
 0x54b   : > { %v4466_v59 = vsel %vm13407_vm15, %v4457_v26, %v4465_v23  ;;  %v4467_v4 = vrot.slane %v4465_v23, 4  ;;  %v4491_v3 = vrot.slane %v4489_v5, 6  ;;  %v4502_v29 = vshll.u32 %v13379_v27, 16 }
 0x54c   : > { %v4477_v34 = vrot.slane %v4475_v7, 4  ;;  %v4485_v63 = vor.u32 %v4484_v31, %v4481_v47  ;;  %v4494_v14 = vrot.slane %v4492_v24, 7  ;;  %v4501_v52 = vrot.slane %v4499_v19, 6  ;;  %4677 = vst [vmem:[#allocation2 + $0x58] sm:$0xf] %v4466_v59 }
 0x54d   : > { %v4476_v55 = vsel %vm13407_vm15, %v4467_v4, %v4475_v7  ;;  %v4504_v20 = vrot.slane %v4502_v29, 7  ;;  %v4509_v15 = vshrl.u32 %v13381_v11, 16  ;;  %v4512_v13 = vshll.u32 %v13381_v11, 16 }
 0x54e   : > { %v4486_v57 = vsel %vm13407_vm15, %v4477_v34, %v4485_v63  ;;  %v4487_v21 = vrot.slane %v4485_v63, 4  ;;  %v4495_v39 = vor.u32 %v4494_v14, %v4491_v3  ;;  %v4519_v27 = vshrl.u32 %v13383_v62, 16  ;;  %4678 = vst [vmem:[#allocation2 + $0x5c] sm:$0xf] %v4476_v55 }
 0x54f   : > { %v4505_v8 = vor.u32 %v4504_v20, %v4501_v52  ;;  %v4511_v9 = vrot.slane %v4509_v15, 6  ;;  %v4514_v53 = vrot.slane %v4512_v13, 7  ;;  %v4522_v41 = vshll.u32 %v13383_v62, 16  ;;  %4679 = vst [vmem:[#allocation2 + $0x60] sm:$0xf] %v4486_v57 }
 0x550   : > { %v4496_v28 = vsel %vm13407_vm15, %v4487_v21, %v4495_v39  ;;  %v4497_v16 = vrot.slane %v4495_v39, 4  ;;  %v4521_v18 = vrot.slane %v4519_v27, 6  ;;  %v4529_v11 = vshrl.u32 %v13385_v42, 16  ;;  %v4655_v27 = vld [vmem:[#allocation2 + $0x8] sm:$0xe] }
 0x551   : > { %v4507_v32 = vrot.slane %v4505_v8, 4  ;;  %v4515_v0 = vor.u32 %v4514_v53, %v4511_v9  ;;  %v4524_v1 = vrot.slane %v4522_v41, 7  ;;  %v4532_v54 = vshll.u32 %v13385_v42, 16  ;;  %4680 = vst [vmem:[#allocation2 + $0x64] sm:$0xf] %v4496_v28 }
 0x552   : > { %v4506_v45 = vsel %vm13407_vm15, %v4497_v16, %v4505_v8  ;;  %v4531_v36 = vrot.slane %v4529_v11, 6  ;;  %v4539_v62 = vshrl.u32 %v13387_v2, 16  ;;  %v4542_v56 = vshll.u32 %v13387_v2, 16  ;;  %v13531_v11 = vld [vmem:[#allocation2 + $0x14] sm:$0xf] }
 0x553   : > { %v4516_v12 = vsel %vm13407_vm15, %v4507_v32, %v4515_v0  ;;  %v4517_v26 = vrot.slane %v4515_v0, 4  ;;  %v4525_v58 = vor.u32 %v4524_v1, %v4521_v18  ;;  %v4534_v22 = vrot.slane %v4532_v54, 7  ;;  %4681 = vst [vmem:[#allocation2 + $0x68] sm:$0xf] %v4506_v45  ;;  %v4700_v18 = vld [vmem:[#allocation2 + $0x10] sm:$0xf] }
 0x554   : > { %v4541_v46 = vrot.slane %v4539_v62, 6  ;;  %v4544_v6 = vrot.slane %v4542_v56, 7  ;;  %v4549_v42 = vshrl.u32 %v13389_v50, 16  ;;  %v4552_v23 = vshll.u32 %v13389_v50, 16  ;;  %4682 = vst [vmem:[#allocation2 + $0x6c] sm:$0xf] %v4516_v12 }
 0x555   : > { %v4526_v47 = vsel %vm13407_vm15, %v4517_v26, %v4525_v58  ;;  %v4527_v5 = vrot.slane %v4525_v58, 4  ;;  %v4535_v7 = vor.u32 %v4534_v22, %v4531_v36  ;;  %v4559_v2 = vshrl.u32 %v13391_v48, 16 }
 0x556   : > { %v4545_v31 = vor.u32 %v4544_v6, %v4541_v46  ;;  %v4551_v24 = vrot.slane %v4549_v42, 6  ;;  %v4554_v19 = vrot.slane %v4552_v23, 7  ;;  %v4562_v59 = vshll.u32 %v13391_v48, 16  ;;  %4683 = vst [vmem:[#allocation2 + $0x70] sm:$0xf] %v4526_v47 }
 0x557   : > { %v4536_v4 = vsel %vm13407_vm15, %v4527_v5, %v4535_v7  ;;  %v4537_v3 = vrot.slane %v4535_v7, 4  ;;  %v4561_v29 = vrot.slane %v4559_v2, 6  ;;  %v4569_v50 = vshrl.u32 %v13393_v51, 16 }
 0x558   : > { %v4547_v34 = vrot.slane %v4545_v31, 4  ;;  %v4555_v63 = vor.u32 %v4554_v19, %v4551_v24  ;;  %v4564_v14 = vrot.slane %v4562_v59, 7  ;;  %v4572_v52 = vshll.u32 %v13393_v51, 16  ;;  %4684 = vst [vmem:[#allocation2 + $0x74] sm:$0xf] %v4536_v4  ;;  %v16402_v59 = vld [vmem:[#allocation18_spill] sm:$0xff] }
 0x559   : > { %v4546_v55 = vsel %vm13407_vm15, %v4537_v3, %v4545_v31  ;;  %v4571_v20 = vrot.slane %v4569_v50, 6  ;;  %v4579_v48 = vshrl.u32 %v13395_v10, 16  ;;  %v4582_v15 = vshll.u32 %v13395_v10, 16  ;;  %v4693_v31 = vld [vmem:[#allocation2 + $0x98] sm:$0x3] }
 0x55a   : > { %v4556_v13 = vsel %vm13407_vm15, %v4547_v34, %v4555_v63  ;;  %v4557_v57 = vrot.slane %v4555_v63, 4  ;;  %v4565_v21 = vor.u32 %v4564_v14, %v4561_v29  ;;  %v4574_v39 = vrot.slane %v4572_v52, 7  ;;  %4685 = vst [vmem:[#allocation2 + $0x78] sm:$0xf] %v4546_v55  ;;  %v10001_v63 = vld [vmem:[#allocation2 + $0x4] sm:$0xf] }
 0x55b   : > { %v4581_v8 = vrot.slane %v4579_v48, 6  ;;  %v4584_v9 = vrot.slane %v4582_v15, 7  ;;  %v4589_v51 = vshrl.u32 %v13397_v44, 16  ;;  %v4592_v53 = vshll.u32 %v13397_v44, 16  ;;  %4686 = vst [vmem:[#allocation2 + $0x7c] sm:$0xf] %v4556_v13 }
 0x55c   : > { %v4566_v41 = vsel %vm13407_vm15, %v4557_v57, %v4565_v21  ;;  %v4567_v28 = vrot.slane %v4565_v21, 4  ;;  %v4575_v10 = vor.u32 %v4574_v39, %v4571_v20  ;;  %v4599_v16 = vshrl.u32 %v13399_v17, 16  ;;  %v13555_v52 = vld [vmem:[#allocation2 + $0xc] sm:$0xf]  ;;  %v13559_v15 = vld [vmem:[#allocation2 + $0x18] sm:$0xff]   ;;  %v13641_v20 = vld [vmem:[#allocation2 + $0x40] sm:$0xff]  }
 0x55d   : > { %v4585_v32 = vor.u32 %v4584_v9, %v4581_v8  ;;  %v4591_v0 = vrot.slane %v4589_v51, 6  ;;  %v4594_v1 = vrot.slane %v4592_v53, 7  ;;  %v4602_v54 = vshll.u32 %v13399_v17, 16  ;;  %4687 = vst [vmem:[#allocation2 + $0x80] sm:$0xf] %v4566_v41  ;;  %v9595_v17 = vld [vmem:[%s15856_s5 + $0x130] sm:$0xff]  }
 0x55e   : > { %v4576_v44 = vsel %vm13407_vm15, %v4567_v28, %v4575_v10  ;;  %v4577_v45 = vrot.slane %v4575_v10, 4  ;;  %v4601_v36 = vrot.slane %v4599_v16, 6  ;;  %v4609_v62 = vshrl.u32 %v13401_v60, 16  ;;  %v13854_v33 = vld [vmem:[#allocation2 + $0x68] sm:$0xff]  }
 0x55f   : > { %v4587_v56 = vrot.slane %v4585_v32, 4  ;;  %v4595_v12 = vor.u32 %v4594_v1, %v4591_v0  ;;  %v4604_v26 = vrot.slane %v4602_v54, 7  ;;  %v4612_v58 = vshll.u32 %v13401_v60, 16  ;;  %4688 = vst [vmem:[#allocation2 + $0x84] sm:$0xf] %v4576_v44 }
 0x560   : > { %v4586_v22 = vsel %vm13407_vm15, %v4577_v45, %v4585_v32  ;;  %v4611_v46 = vrot.slane %v4609_v62, 6  ;;  %v4656_v6 = vsel %vm11461_vm11, %v13403_v43, %v4655_v27  ;;  %v13544_v42 = vcombine.low %v4700_v18, %v13531_v11  ;;  %v4733_v60 = vld [vmem:[#allocation2] sm:$0xe]  ;;  %v9601_v18 = vld [vmem:[%s15856_s5 + $0x1b8] sm:$0xff]  }
 0x561   : > { %v4596_v23 = vsel %vm13407_vm15, %v4587_v56, %v4595_v12  ;;  %v4597_v47 = vrot.slane %v4595_v12, 4  ;;  %v4605_v5 = vor.u32 %v4604_v26, %v4601_v36  ;;  %v4614_v7 = vrot.slane %v4612_v58, 7  ;;  %4657 = vst [vmem:[#allocation2 + $0x8] sm:$0xe] %v4656_v6  ;;  %4689 = vst [vmem:[#allocation2 + $0x88] sm:$0xf] %v4586_v22 }
 0x562   : > { %4690 = vst [vmem:[#allocation2 + $0x8c] sm:$0xf] %v4596_v23  ;;  %v4873_v2 = vshll.u32 %v13544_v42, 16  ;;  %v4860_v4 = vshll.u32 %v16402_v59, 16  ;;  %v4877_v29 = vshrl.u32 %v13544_v42, 16  ;;  %v8744_v14 = vcombine.low %v4733_v60, %v10001_v63  ;;  %v9593_v45 = vld [vmem:[%s15856_s5 + $0x138] sm:$0xff]  }
 0x563   : > { %v4606_v24 = vsel %vm13407_vm15, %v4597_v47, %v4605_v5  ;;  %v4607_v43 = vrot.slane %v4605_v5, 4  ;;  %v4615_v19 = vor.u32 %v4614_v7, %v4611_v46  ;;  %v4858_v21 = vshrl.u32 %v16402_v59, 16  ;;  %v13580_v36 = vld [vmem:[#allocation2 + $0x20] sm:$0xff]   ;;  %v9604_v26 = vld [vmem:[%s15856_s5 + $0x1b0] sm:$0xff]   ;;  %v9607_v23 = vld [vmem:[%s15856_s5 + $0x1a8] sm:$0xff]  }
 0x564   : > { %4691 = vst [vmem:[#allocation2 + $0x90] sm:$0xf] %v4606_v24  ;;  %v5113_v3 = vrot.slane %v4873_v2, 2  ;;  %v5112_v55 = vrot.slane %v4877_v29, 1  ;;  %v4862_v39 = vrot.slane %v4860_v4, 1  ;;  %v5029_v8 = vrot.slane %v13544_v42, 1 }
 0x565   : > { %v4616_v50 = vsel %vm13407_vm15, %v4607_v43, %v4615_v19  ;;  %v4617_v34 = vrot.slane %v4615_v19, 4  ;;  %v5026_v51 = vrot.slane %v8744_v14, 1  ;;  %v5031_v28 = vrot.slane %v13559_v15, 1  ;;  %v13605_v60 = vld [vmem:[#allocation2 + $0x28] sm:$0xff]   ;;  %v9610_v43 = vld [vmem:[%s15856_s5 + $0x1a0] sm:$0xff]   ;;  %v13635_v63 = vld [vmem:[#allocation2 + $0x38] sm:$0xff]  }
 0x566   : > { %4692 = vst [vmem:[#allocation2 + $0x94] sm:$0xf] %v4616_v50  ;;  %v13562_v25 = vor.u32 %v5113_v3, %v5112_v55  ;;  %v4863_v10 = vor.u32 %v4862_v39, %v4858_v21  ;;  %v4875_v12 = vrot.slane %v4873_v2, 1  ;;  %v16404_v58 = vmov 0   ;;  %v9597_v2 = vld [vmem:[%s15856_s5 + $0x128] sm:$0xff]   ;;  %v9599_v4 = vld [vmem:[%s15856_s5 + $0x120] sm:$0xff]  }
 0x567   : > { %v4694_v48 = vsel %vm11450_vm10, %v4617_v34, %v4693_v31  ;;  %v5032_v44 = vsel %vm813_vm1, %v5029_v8, %v5031_v28  ;;  %v5033_v46 = vrot.slane %v13580_v36, 1  ;;  %v13594_v6 = vshll.u32 %v13559_v15, 16  ;;  %16406 = vst [vmem:[#allocation61_spill] sm:$0xff] %v13635_v63  ;;  %v9613_v14 = vld [vmem:[%s15856_s5 + $0x198] sm:$0xff]   ;;  %v13653_v21 = vld [vmem:[#allocation2 + $0x48] sm:$0xff]  }
 0x568   : > { %4695 = vst [vmem:[#allocation2 + $0x98] sm:$0x3] %v4694_v48  ;;  %v4698_v13 = vld [vmem:[#allocation2 + $0x8] sm:$0xf]  ;;  %v4879_v5 = vor.u32 %v4877_v29, %v4875_v12  ;;  %v13614_v24 = vshll.u32 %v13580_v36, 16  ;;  %v13626_v3 = vshrl.u32 %v13559_v15, 16 }
 0x569   : > { %v4734_v57 = vld [vmem:[#allocation2 + $0x8] sm:$0xe]  ;;  %v8726_v27 = vcombine.low %v4698_v13, %v13555_v52  ;;  %v13603_v7 = vsel %vm813_vm1, %v5031_v28, %v5033_v46  ;;  %v4883_v31 = vrot.slane %v13594_v6, 1  ;;  %v13628_v29 = vld [vmem:[#allocation2 + $0x30] sm:$0xff]   ;;  %v13631_v50 = vshll.u32 %v13605_v60, 16 }
 0x56a   : > { %v13567_v9 = vcombine.low %v4734_v57, %v13555_v52  ;;  %16405 = vst [vmem:[#allocation104_spill] sm:$0xff] %v13628_v29  ;;  %v4891_v34 = vrot.slane %v13614_v24, 1  ;;  %v13648_v13 = vshrl.u32 %v13580_v36, 16  ;;  %v9602_v57 = vld [vmem:[%s15856_s5 + $0x118] sm:$0xff]   ;;  %v5037_v39 = vrot.slane %v13628_v29, 1 }
 0x56b   : > { %v5027_v41 = vrot.slane %v8726_v27, 1  ;;  %v4865_v16 = vshll.u32 %v8726_v27, 16  ;;  %v4869_v54 = vshrl.u32 %v8726_v27, 16  ;;  %v4884_v19 = vsel %vm643_vm0, %v4879_v5, %v4883_v31  ;;  %v4739_v5 = vld [vmem:[#allocation2 + $0x8] sm:$0xc] }
 0x56c   : > { %v5092_v53 = vrot.slane %v13567_v9, 1  ;;  %v4887_v55 = vor.u32 %v13626_v3, %v4883_v31  ;;  %v13715_v31 = vshrl.u32 %v13635_v63, 16 }
 0x56d   : > { %v5028_v0 = vsel %vm813_vm1, %v5026_v51, %v5027_v41  ;;  %v4867_v1 = vrot.slane %v4865_v16, 1  ;;  %v5030_v47 = vsel %vm813_vm1, %v5027_v41, %v5029_v8  ;;  %v4895_v51 = vor.u32 %v13648_v13, %v4891_v34  ;;  %v9616_v41 = vld [vmem:[%s15856_s5 + $0x190] sm:$0xff]  }
 0x56e   : > { %v5093_v32 = vsel %vm813_vm1, %v5092_v53, %v5029_v8  ;;  %v13659_v8 = vshll.u32 %v13628_v29, 16  ;;  %v5039_v53 = vrot.slane %v13635_v63, 1  ;;  %v4892_v28 = vsel %vm643_vm0, %v4887_v55, %v4891_v34 }
 0x56f   : > { %6248 = vmatprep.mubr.bf16.mxu1 %v5093_v32  ;;  %v4868_v62 = vsel %vm643_vm0, %v4863_v10, %v4867_v1  ;;  %v4871_v56 = vor.u32 %v4869_v54, %v4867_v1  ;;  %v13670_v10 = vshrl.u32 %v13605_v60, 16  ;;  %v5041_v16 = vrot.slane %v13641_v20, 1  ;;  %v9605_v32 = vld [vmem:[%s15856_s5 + $0x110] sm:$0xff]  }
 0x570   : > { %6249 = vmatmul.mubr.bf16.vlgmr.msra.gmra.mxu1 %v5028_v0  ;;  %6071 = vmatprep.mubr.bf16.mxu0 %v4868_v62  ;;  %v5043_v0 = vrot.slane %v13653_v21, 1  ;;  %v5105_v1 = vshrl.u32 %v13567_v9, 16  ;;  %v5108_v62 = vshll.u32 %v13567_v9, 16  ;;  %v13728_v34 = vshll.u32 %v13641_v20, 16 }
 0x571   : > { %6256 = vmatprep.mubr.bf16.mxu1 %v5032_v44  ;;  %6571 = vmatpush1.bf16.msra.mxu1 %v9601_v18  ;;  %v4876_v22 = vsel %vm643_vm0, %v4871_v56, %v4875_v12  ;;  %v13674_v18 = vshll.u32 %v13635_v63, 16  ;;  %v13691_v12 = vsel %vm813_vm1, %v5037_v39, %v5039_v53 }
 0x572   : > { %6572 = vmatprep.subr.bf16.mxu1 %v16404_v58  ;;  %6072 = vmatmul.mubr.bf16.vlgmr.msra.gmra.mxu0 %v16402_v59  ;;  %v5035_v59 = vrot.slane %v13605_v60, 1  ;;  %v5137_v37 = vrot.slane %v13728_v34, 2 }
 0x573   : > { %6079 = vmatprep.mubr.bf16.mxu0 %v4876_v22  ;;  %6394 = vmatpush1.bf16.msra.mxu0 %v9593_v45  ;;  %v4907_v45 = vrot.slane %v13659_v8, 1  ;;  %v5301_v22 = vrot.slane %v13626_v3, 2  ;;  %v4915_v9 = vrot.slane %v13674_v18, 1 }
 0x574   : > { %6395 = vmatprep.subr.bf16.mxu0 %v16404_v58  ;;  %v13645_v48 = vsel %vm813_vm1, %v5033_v46, %v5035_v59  ;;  %v13683_v54 = vsel %vm813_vm1, %v5035_v59, %v5037_v39  ;;  %v13698_v46 = vsel %vm813_vm1, %v5039_v53, %v5041_v16  ;;  %v16042_v59 = vrot.slane %v13544_v42, 2 }
 0x575   : > { %6573 = vmatpush1.bf16.msra.mxu1 %v9604_v26  ;;  %v9620_v26 = vld [vmem:[%s15856_s5 + $0x188] sm:$0xff]   ;;  %v5306_v39 = vrot.slane %v13614_v24, 3 }
 0x576   : > { %6574 = vmatprep.subr.bf16.mxu1 %v16404_v58 }
 0x577   : > { %6396 = vmatpush1.bf16.msra.mxu0 %v9595_v17  ;;  %v13701_v17 = vshrl.u32 %v13628_v29, 16 }
 0x578   : > { %6257 = vmatmul.mubr.bf16.gmra.mxu1 %v5030_v47  ;;  %6397 = vmatprep.subr.bf16.mxu0 %v16404_v58  ;;  %v5302_v47 = vrot.slane %v13594_v6, 3 }
 0x579   : > { %6264 = vmatprep.mubr.bf16.mxu1 %v13603_v7  ;;  %6575 = vmatpush1.bf16.msra.mxu1 %v9607_v23  ;;  %v13704_v23 = vld [vmem:[#allocation2 + $0x50] sm:$0xff]  }
 0x57a   : > { %6080 = vmatmul.mubr.bf16.gmra.mxu0 %v8726_v27  ;;  %6576 = vmatprep.subr.bf16.mxu1 %v16404_v58  ;;  %v4899_v27 = vrot.slane %v13631_v50, 1  ;;  %v16043_v53 = vrot.slane %v13704_v23, 1 }
 0x57b   : > { %6087 = vmatprep.mubr.bf16.mxu0 %v4884_v19  ;;  %6398 = vmatpush1.bf16.msra.mxu0 %v9597_v2  ;;  %v13712_v2 = vsel %vm813_vm1, %v5041_v16, %v5043_v0  ;;  %v8749_v19 = vcombine.low %v4739_v5, %v13555_v52  ;;  %v9623_v52 = vld [vmem:[%s15856_s5 + $0x180] sm:$0xff]   ;;  %v13746_v16 = vshll.u32 %v13653_v21, 16  ;;  %v13765_v5 = vshrl.u32 %v13653_v21, 16 }
 0x57c   : > { %6399 = vmatprep.subr.bf16.mxu0 %v16404_v58  ;;  %v4900_v56 = vsel %vm643_vm0, %v4895_v51, %v4899_v27  ;;  %v4919_v51 = vor.u32 %v13715_v31, %v4915_v9 }
 0x57d   : > { %6577 = vmatpush1.bf16.msra.mxu1 %v9610_v43  ;;  %v9609_v43 = vld [vmem:[%s15856_s5 + $0x108] sm:$0xff]   ;;  %v5215_v55 = vrot.slane %v8749_v19, 2  ;;  %v5117_v19 = vrot.slane %v13594_v6, 2  ;;  %v9615_v6 = vld [vmem:[%s15856_s5 + $0x178] sm:$0xff]  }
 0x57e   : > { %6578 = vmatprep.subr.bf16.mxu1 %v16404_v58 }
 0x57f   : > { %6400 = vmatpush1.bf16.msra.mxu0 %v9599_v4  ;;  %v4911_v4 = vor.u32 %v13701_v17, %v4907_v45 }
 0x580   : > { %6265 = vmatmul.mubr.bf16.gmra.mxu1 %v5032_v44  ;;  %6401 = vmatprep.subr.bf16.mxu0 %v16404_v58  ;;  %v4903_v44 = vor.u32 %v13670_v10, %v4899_v27  ;;  %v5107_v27 = vrot.slane %v5105_v1, 1  ;;  %v13754_v1 = vsel %vm1004_vm2, %v5215_v55, %v16042_v59  ;;  %v5313_v55 = vrot.slane %v13701_v17, 2 }
 0x581   : > { %6272 = vmatprep.mubr.bf16.mxu1 %v13645_v48  ;;  %6579 = vmatpush1.bf16.msra.mxu1 %v9613_v14  ;;  %v13731_v14 = vor.u32 %v5302_v47, %v5301_v22  ;;  %v5116_v22 = vrot.slane %v13626_v3, 1  ;;  %v4923_v47 = vrot.slane %v13728_v34, 1 }
 0x582   : > { %6088 = vmatmul.mubr.bf16.gmra.mxu0 %v13544_v42  ;;  %6580 = vmatprep.subr.bf16.mxu1 %v16404_v58 }
 0x583   : > { %6095 = vmatprep.mubr.bf16.mxu0 %v4892_v28  ;;  %6402 = vmatpush1.bf16.msra.mxu0 %v9602_v57  ;;  %v5305_v57 = vrot.slane %v13648_v13, 2  ;;  %v5110_v28 = vrot.slane %v5108_v62, 2 }
 0x584   : > { %6403 = vmatprep.subr.bf16.mxu0 %v16404_v58 }
 0x585   : > { %6581 = vmatpush1.bf16.msra.mxu1 %v9616_v41  ;;  %v13742_v41 = vshrl.u32 %v13641_v20, 16  ;;  %v5111_v62 = vor.u32 %v5110_v28, %v5107_v27  ;;  %v5120_v27 = vrot.slane %v13648_v13, 1  ;;  %v5121_v28 = vrot.slane %v13614_v24, 2  ;;  %v9629_v24 = vld [vmem:[%s15856_s5 + $0x1f0] sm:$0xff]  }
 0x586   : > { %6582 = vmatprep.subr.bf16.mxu1 %v16404_v58 }
 0x587   : > { %6404 = vmatpush1.bf16.msra.mxu0 %v9605_v32  ;;  %v9612_v32 = vld [vmem:[%s15856_s5 + $0x100] sm:$0xff]   ;;  %v13778_v3 = vsel %vm892_vm3, %v5111_v62, %v13562_v25  ;;  %v13804_v62 = vld [vmem:[#allocation2 + $0x58] sm:$0xff]   ;;  %v5136_v61 = vrot.slane %v13742_v41, 1 }
 0x588   : > { %6273 = vmatmul.mubr.bf16.gmra.mxu1 %v13603_v7  ;;  %v13724_v7 = vsel %vm643_vm0, %v4903_v44, %v4907_v45  ;;  %6405 = vmatprep.subr.bf16.mxu0 %v16404_v58  ;;  %v5307_v44 = vor.u32 %v5306_v39, %v5305_v57  ;;  %v5309_v45 = vrot.slane %v13670_v10, 2  ;;  %v13788_v57 = vsel %vm813_vm1, %v5043_v0, %v16043_v53 }
 0x589   : > { %6280 = vmatprep.mubr.bf16.mxu1 %v13683_v54  ;;  %6583 = vmatpush1.bf16.msra.mxu1 %v9620_v26  ;;  %v13758_v26 = vsel %vm643_vm0, %v4911_v4, %v4915_v9  ;;  %v5118_v39 = vor.u32 %v5117_v19, %v5116_v22  ;;  %v5318_v22 = vrot.slane %v13674_v18, 3  ;;  %v13817_v19 = vsel %vm643_vm0, %v4919_v51, %v4923_v47 }
 0x58a   : > { %6096 = vmatmul.mubr.bf16.gmra.mxu0 %v13559_v15  ;;  %6584 = vmatprep.subr.bf16.mxu1 %v16404_v58  ;;  %v13772_v9 = vsel %vm1083_vm4, %v13731_v14, %v5307_v44  ;;  %v13845_v59 = vshrl.u32 %v13804_v62, 16  ;;  %v5325_v53 = vrot.slane %v13765_v5, 2 }
 0x58b   : > { %6103 = vmatprep.mubr.bf16.mxu0 %v4900_v56  ;;  %6406 = vmatpush1.bf16.msra.mxu0 %v9609_v43  ;;  %v5310_v56 = vrot.slane %v13631_v50, 3  ;;  %v9626_v43 = vld [vmem:[%s15856_s5 + $0x1f8] sm:$0xff]   ;;  %v13811_v13 = vsel %vm892_vm3, %v13562_v25, %v5118_v39  ;;  %v5125_v25 = vrot.slane %v13631_v50, 2 }
 0x58c   : > { %6407 = vmatprep.subr.bf16.mxu0 %v16404_v58 }
 0x58d   : > { %6585 = vmatpush1.bf16.msra.mxu1 %v9623_v52  ;;  %v5311_v4 = vor.u32 %v5310_v56, %v5309_v45  ;;  %v5314_v52 = vrot.slane %v13659_v8, 3  ;;  %v5317_v45 = vrot.slane %v13715_v31, 2  ;;  %v5122_v56 = vor.u32 %v5121_v28, %v5120_v27 }
 0x58e   : > { %6586 = vmatprep.subr.bf16.mxu1 %v16404_v58  ;;  %v5321_v27 = vrot.slane %v13742_v41, 2  ;;  %v13839_v28 = vshrl.u32 %v13704_v23, 16 }
 0x58f   : > { %6408 = vmatpush1.bf16.msra.mxu0 %v9612_v32  ;;  %v13801_v0 = vsel %vm1083_vm4, %v5307_v44, %v5311_v4  ;;  %v5315_v32 = vor.u32 %v5314_v52, %v5313_v55  ;;  %v5124_v44 = vrot.slane %v13670_v10, 1  ;;  %v13828_v52 = vld [vmem:[#allocation2 + $0x60] sm:$0xff]   ;;  %v9618_v10 = vld [vmem:[%s15856_s5 + $0x170] sm:$0xff]   ;;  %v13834_v51 = vsel %vm892_vm3, %v5118_v39, %v5122_v56  ;;  %v9632_v39 = vld [vmem:[%s15856_s5 + $0x1e8] sm:$0xff]  }
 0x590   : > { %6281 = vmatmul.mubr.bf16.gmra.mxu1 %v13645_v48  ;;  %v13797_v48 = vshll.u32 %v13704_v23, 16  ;;  %6409 = vmatprep.subr.bf16.mxu0 %v16404_v58  ;;  %16407 = vst [vmem:[#allocation105_spill] sm:$0xff] %v13834_v51  ;;  %v13886_v49 = vshrl.u32 %v13828_v52, 16  ;;  %v4931_v51 = vrot.slane %v13746_v16, 1 }
 0x591   : > { %6288 = vmatprep.mubr.bf16.mxu1 %v13691_v12  ;;  %6587 = vmatpush2.bf16.msra.mxu1 %v9626_v43  ;;  %v13820_v43 = vor.u32 %v13742_v41, %v4923_v47  ;;  %v13824_v55 = vsel %vm1083_vm4, %v5311_v4, %v5315_v32  ;;  %v5319_v47 = vor.u32 %v5318_v22, %v5317_v45  ;;  %v5322_v4 = vrot.slane %v13728_v34, 3  ;;  %v9624_v34 = vld [vmem:[%s15856_s5 + $0x160] sm:$0xff]  }
 0x592   : > { %6104 = vmatmul.mubr.bf16.gmra.mxu0 %v13580_v36  ;;  %6588 = vmatprep.subr.bf16.mxu1 %v16404_v58  ;;  %v5126_v50 = vor.u32 %v5125_v25, %v5124_v44  ;;  %v5132_v44 = vrot.slane %v13715_v31, 1  ;;  %v13867_v25 = vshll.u32 %v13828_v52, 16  ;;  %v13877_v31 = vld [vmem:[#allocation2 + $0x70] sm:$0xff]   ;;  %v5337_v35 = vrot.slane %v13886_v49, 2 }
 0x593   : > { %6111 = vmatprep.mubr.bf16.mxu0 %v13724_v7  ;;  %6410 = vmatpush2.bf16.msra.mxu0 %v9615_v6  ;;  %v5128_v7 = vrot.slane %v13701_v17, 1  ;;  %v5129_v6 = vrot.slane %v13659_v8, 2  ;;  %v13851_v45 = vsel %vm1083_vm4, %v5315_v32, %v5319_v47  ;;  %v5323_v22 = vor.u32 %v5322_v4, %v5321_v27  ;;  %v9621_v27 = vld [vmem:[%s15856_s5 + $0x168] sm:$0xff]  }
 0x594   : > { %6411 = vmatprep.subr.bf16.mxu0 %v16404_v58  ;;  %16408 = vst [vmem:[#allocation62_spill] sm:$0xff] %v13851_v45  ;;  %v13858_v8 = vsel %vm892_vm3, %v5122_v56, %v5126_v50  ;;  %v13864_v32 = vshll.u32 %v13804_v62, 16  ;;  %v5133_v4 = vrot.slane %v13674_v18, 2  ;;  %v9633_v18 = vld [vmem:[%s15856_s5 + $0x1e0] sm:$0xff]   ;;  %v5338_v30 = vrot.slane %v13867_v25, 3 }
 0x595   : > { %6589 = vmatpush2.bf16.msra.mxu1 %v9629_v24  ;;  %16409 = vst [vmem:[#allocation63_spill] sm:$0xff] %v13858_v8  ;;  %v5130_v17 = vor.u32 %v5129_v6, %v5128_v7  ;;  %v5326_v24 = vrot.slane %v13746_v16, 3  ;;  %v13873_v56 = vsel %vm1083_vm4, %v5319_v47, %v5323_v22  ;;  %v5330_v6 = vrot.slane %v13797_v48, 3 }
 0x596   : > { %6590 = vmatprep.subr.bf16.mxu1 %v16404_v58  ;;  %16410 = vst [vmem:[#allocation64_spill] sm:$0xff] %v13873_v56  ;;  %v5134_v47 = vor.u32 %v5133_v4, %v5132_v44  ;;  %v13903_v44 = vld [vmem:[#allocation2 + $0x78] sm:$0xff]   ;;  %v5138_v4 = vor.u32 %v5137_v37, %v5136_v61  ;;  %v5334_v40 = vrot.slane %v13864_v32, 3  ;;  %v5152_v8 = vrot.slane %v13886_v49, 1 }
 0x597   : > { %6412 = vmatpush2.bf16.msra.mxu0 %v9618_v10  ;;  %v5327_v7 = vor.u32 %v5326_v24, %v5325_v53  ;;  %v5329_v10 = vrot.slane %v13839_v28, 2  ;;  %v13895_v53 = vshrl.u32 %v13854_v33, 16  ;;  %v5333_v24 = vrot.slane %v13845_v59, 2  ;;  %v9636_v61 = vld [vmem:[%s15856_s5 + $0x1d8] sm:$0xff]  }
 0x598   : > { %6289 = vmatmul.mubr.bf16.gmra.mxu1 %v13683_v54  ;;  %6413 = vmatprep.subr.bf16.mxu0 %v16404_v58  ;;  %v13881_v54 = vsel %vm892_vm3, %v5126_v50, %v5130_v17  ;;  %v13909_v41 = vsel %vm892_vm3, %v5130_v17, %v5134_v47  ;;  %v13924_v17 = vld [vmem:[#allocation2 + $0x80] sm:$0xff]   ;;  %v13930_v37 = vsel %vm892_vm3, %v5134_v47, %v5138_v4  ;;  %v13945_v47 = vshrl.u32 %v13903_v44, 16 }
 0x599   : > { %6296 = vmatprep.mubr.bf16.mxu1 %v13698_v46  ;;  %16411 = vst [vmem:[#allocation108_spill] sm:$0xff] %v13881_v54  ;;  %6591 = vmatpush2.bf16.msra.mxu1 %v9632_v39  ;;  %v13899_v50 = vsel %vm1083_vm4, %v5323_v22, %v5327_v7  ;;  %v5331_v39 = vor.u32 %v5330_v6, %v5329_v10  ;;  %16413 = vst [vmem:[#allocation109_spill] sm:$0xff] %v13909_v41  ;;  %v5140_v22 = vrot.slane %v13765_v5, 1 }
 0x59a   : > { %6112 = vmatmul.mubr.bf16.gmra.mxu0 %v13605_v60  ;;  %6592 = vmatprep.subr.bf16.mxu1 %v16404_v58  ;;  %16412 = vst [vmem:[#allocation65_spill] sm:$0xff] %v13899_v50  ;;  %v13914_v10 = vshll.u32 %v13854_v33, 16  ;;  %v5141_v6 = vrot.slane %v13746_v16, 2  ;;  %16415 = vst [vmem:[#allocation67_spill] sm:$0xff] %v13930_v37  ;;  %v5335_v38 = vor.u32 %v5334_v40, %v5333_v24  ;;  %v5145_v41 = vrot.slane %v13797_v48, 2  ;;  %v9627_v40 = vld [vmem:[%s15856_s5 + $0x158] sm:$0xff]  }
 0x59b   : > { %6119 = vmatprep.mubr.bf16.mxu0 %v13758_v26  ;;  %6414 = vmatpush2.bf16.msra.mxu0 %v9621_v27  ;;  %v13917_v26 = vshll.u32 %v13877_v31, 16  ;;  %v13921_v27 = vsel %vm1083_vm4, %v5327_v7, %v5331_v39  ;;  %v13935_v7 = vshrl.u32 %v13877_v31, 16  ;;  %v5339_v37 = vor.u32 %v5338_v30, %v5337_v35  ;;  %v9638_v35 = vld [vmem:[%s15856_s5 + $0x1d0] sm:$0xff]  }
 0x59c   : > { %6415 = vmatprep.subr.bf16.mxu0 %v16404_v58  ;;  %16414 = vst [vmem:[#allocation66_spill] sm:$0xff] %v13921_v27  ;;  %v5142_v27 = vor.u32 %v5141_v6, %v5140_v22  ;;  %v13948_v24 = vsel %vm1083_vm4, %v5331_v39, %v5335_v38  ;;  %v5341_v22 = vrot.slane %v13895_v53, 2  ;;  %v13953_v6 = vld [vmem:[#allocation2 + $0x88] sm:$0xff]   ;;  %v5342_v50 = vrot.slane %v13914_v10, 3 }
 0x59d   : > { %6593 = vmatpush2.bf16.msra.mxu1 %v9633_v18  ;;  %v5144_v18 = vrot.slane %v13839_v28, 1  ;;  %16416 = vst [vmem:[#allocation110_spill] sm:$0xff] %v13948_v24  ;;  %v5148_v54 = vrot.slane %v13845_v59, 1  ;;  %v13961_v39 = vshll.u32 %v13903_v44, 16  ;;  %v13964_v30 = vshll.u32 %v13924_v17, 16 }
 0x59e   : > { %6594 = vmatprep.subr.bf16.mxu1 %v16404_v58  ;;  %v13970_v24 = vsel %vm1083_vm4, %v5335_v38, %v5339_v37  ;;  %v9630_v38 = vld [vmem:[%s15856_s5 + $0x150] sm:$0xff]  }
 0x59f   : > { %6416 = vmatpush2.bf16.msra.mxu0 %v9624_v34  ;;  %v5146_v34 = vor.u32 %v5145_v41, %v5144_v18  ;;  %16418 = vst [vmem:[#allocation112_spill] sm:$0xff] %v13970_v24  ;;  %v5149_v41 = vrot.slane %v13864_v32, 2  ;;  %v5343_v18 = vor.u32 %v5342_v50, %v5341_v22  ;;  %v13985_v24 = vshrl.u32 %v13924_v17, 16 }
 0x5a0   : > { %6297 = vmatmul.mubr.bf16.gmra.mxu1 %v13691_v12  ;;  %6417 = vmatprep.subr.bf16.mxu0 %v16404_v58  ;;  %v13956_v12 = vsel %vm892_vm3, %v5138_v4, %v5142_v27  ;;  %v13991_v50 = vshrl.u32 %v13953_v6, 16  ;;  %v5349_v22 = vrot.slane %v13945_v47, 2  ;;  %v5350_v45 = vrot.slane %v13961_v39, 3 }
 0x5a1   : > { %6304 = vmatprep.mubr.bf16.mxu1 %v13712_v2  ;;  %16417 = vst [vmem:[#allocation68_spill] sm:$0xff] %v13956_v12  ;;  %6595 = vmatpush2.bf16.msra.mxu1 %v9636_v61  ;;  %v13976_v4 = vsel %vm892_vm3, %v5142_v27, %v5146_v34  ;;  %v5345_v12 = vrot.slane %v13935_v7, 2  ;;  %v5346_v61 = vrot.slane %v13917_v26, 3  ;;  %v5150_v56 = vor.u32 %v5149_v41, %v5148_v54  ;;  %v9639_v54 = vld [vmem:[%s15856_s5 + $0x1c8] sm:$0xff]  }
 0x5a2   : > { %6120 = vmatmul.mubr.bf16.gmra.mxu0 %v13628_v29  ;;  %6596 = vmatprep.subr.bf16.mxu1 %v16404_v58  ;;  %16419 = vst [vmem:[#allocation69_spill] sm:$0xff] %v13976_v4  ;;  %v5153_v27 = vrot.slane %v13867_v25, 2  ;;  %v5156_v29 = vrot.slane %v13895_v53, 1  ;;  %v5351_v16 = vor.u32 %v5350_v45, %v5349_v22  ;;  %v9643_v45 = vld [vmem:[%s15856_s5 + $0x1c0] sm:$0xff]  }
 0x5a3   : > { %6127 = vmatprep.mubr.bf16.mxu0 %v13817_v19  ;;  %6418 = vmatpush2.bf16.msra.mxu0 %v9627_v40  ;;  %v13994_v19 = vsel %vm1083_vm4, %v5339_v37, %v5343_v18  ;;  %v5347_v40 = vor.u32 %v5346_v61, %v5345_v12  ;;  %v14001_v41 = vsel %vm892_vm3, %v5146_v34, %v5150_v56  ;;  %v14007_v37 = vshll.u32 %v13953_v6, 16 }
 0x5a4   : > { %6419 = vmatprep.subr.bf16.mxu0 %v16404_v58  ;;  %16420 = vst [vmem:[#allocation113_spill] sm:$0xff] %v13994_v19  ;;  %16421 = vst [vmem:[#allocation71_spill] sm:$0xff] %v14001_v41  ;;  %v5154_v4 = vor.u32 %v5153_v27, %v5152_v8  ;;  %v9635_v8 = vld [vmem:[%s15856_s5 + $0x148] sm:$0xff]   ;;  %v5353_v61 = vrot.slane %v13985_v24, 2  ;;  %v5354_v27 = vrot.slane %v13964_v30, 3  ;;  %v5357_v41 = vrot.slane %v13991_v50, 2 }
 0x5a5   : > { %6597 = vmatpush2.bf16.msra.mxu1 %v9638_v35  ;;  %v14011_v12 = vsel %vm1083_vm4, %v5343_v18, %v5347_v40  ;;  %v5157_v35 = vrot.slane %v13914_v10, 2  ;;  %v14024_v18 = vld [vmem:[#allocation2 + $0x90] sm:$0xff]   ;;  %v14035_v22 = vsel %vm1083_vm4, %v5347_v40, %v5351_v16  ;;  %v5164_v40 = vrot.slane %v13945_v47, 1 }
 0x5a6   : > { %6598 = vmatprep.subr.bf16.mxu1 %v16404_v58  ;;  %16422 = vst [vmem:[#allocation73_spill] sm:$0xff] %v14011_v12  ;;  %v14019_v34 = vsel %vm892_vm3, %v5150_v56, %v5154_v4  ;;  %v5161_v12 = vrot.slane %v13917_v26, 2  ;;  %v4932_v56 = vsel %vm643_vm0, %v13820_v43, %v4931_v51  ;;  %16424 = vst [vmem:[#allocation116_spill] sm:$0xff] %v14035_v22  ;;  %v5165_v19 = vrot.slane %v13961_v39, 2 }
 0x5a7   : > { %6420 = vmatpush2.bf16.msra.mxu0 %v9630_v38  ;;  %16423 = vst [vmem:[#allocation74_spill] sm:$0xff] %v14019_v34  ;;  %v5160_v38 = vrot.slane %v13935_v7, 1  ;;  %v5355_v34 = vor.u32 %v5354_v27, %v5353_v61  ;;  %v5047_v61 = vrot.slane %v13804_v62, 1  ;;  %v9641_v27 = vld [vmem:[%s15856_s5 + $0x140] sm:$0xff]  }
 0x5a8   : > { %6305 = vmatmul.mubr.bf16.gmra.mxu1 %v13698_v46  ;;  %6421 = vmatprep.subr.bf16.mxu0 %v16404_v58  ;;  %v5158_v46 = vor.u32 %v5157_v35, %v5156_v29  ;;  %v14043_v29 = vld [vmem:[%s15856_s5 + $0x238] sm:$0xff]   ;;  %v5358_v35 = vrot.slane %v14007_v37, 3 }
 0x5a9   : > { %6312 = vmatprep.mubr.bf16.mxu1 %v13788_v57  ;;  %6599 = vmatpush2.bf16.msra.mxu1 %v9639_v54  ;;  %v5162_v54 = vor.u32 %v5161_v12, %v5160_v38  ;;  %v14055_v22 = vsel %vm1083_vm4, %v5351_v16, %v5355_v34  ;;  %v5177_v38 = vshrl.u32 %v14024_v18, 16  ;;  %v4935_v16 = vor.u32 %v13765_v5, %v4931_v51 }
 0x5aa   : > { %6128 = vmatmul.mubr.bf16.gmra.mxu0 %v13635_v63  ;;  %6600 = vmatprep.subr.bf16.mxu1 %v16404_v58  ;;  %v14046_v43 = vsel %vm892_vm3, %v5154_v4, %v5158_v46  ;;  %v5359_v12 = vor.u32 %v5358_v35, %v5357_v41  ;;  %v5169_v63 = vrot.slane %v13964_v30, 2  ;;  %v16427_v41 = vrot.slane %v13704_v23, 1 }
 0x5ab   : > { %16425 = vst [vmem:[#allocation115_spill] sm:$0xff] %v14046_v43  ;;  %6135 = vmatprep.mubr.bf16.mxu0 %v4932_v56  ;;  %6422 = vmatpush2.bf16.msra.mxu0 %v9635_v8  ;;  %v14060_v4 = vsel %vm892_vm3, %v5158_v46, %v5162_v54  ;;  %v5180_v56 = vshll.u32 %v14024_v18, 16  ;;  %v5166_v8 = vor.u32 %v5165_v19, %v5164_v40  ;;  %v5168_v43 = vrot.slane %v13985_v24, 1 }
 0x5ac   : > { %6423 = vmatprep.subr.bf16.mxu0 %v16404_v58  ;;  %16426 = vst [vmem:[#allocation75_spill] sm:$0xff] %v14060_v4  ;;  %v14069_v58 = vsel %vm1083_vm4, %v5355_v34, %v5359_v12  ;;  %v5361_v46 = vrot.slane %v5177_v38, 2  ;;  %v4939_v5 = vrot.slane %v13797_v48, 1  ;;  %v5172_v34 = vrot.slane %v13991_v50, 1 }
 0x5ad   : > { %6601 = vmatpush2.bf16.msra.mxu1 %v9643_v45  ;;  %v5362_v4 = vrot.slane %v5180_v56, 3  ;;  %v5048_v45 = vsel %vm813_vm1, %v16427_v41, %v5047_v61  ;;  %v14076_v19 = vsel %vm892_vm3, %v5162_v54, %v5166_v8  ;;  %v5170_v35 = vor.u32 %v5169_v63, %v5168_v43 }
 0x5ae   : > { %9387 = vmatprep.subr.bf16.mxu1 %v14043_v29  ;;  %v5173_v40 = vrot.slane %v14007_v37, 2  ;;  %v4940_v54 = vsel %vm643_vm0, %v4935_v16, %v4939_v5  ;;  %v5049_v48 = vrot.slane %v13828_v52, 1 }
 0x5af   : > { %6424 = vmatpush2.bf16.msra.mxu0 %v9641_v27  ;;  %v14080_v51 = vor.u32 %v5362_v4, %v5361_v46  ;;  %v5179_v27 = vrot.slane %v5177_v38, 1  ;;  %v5182_v4 = vrot.slane %v5180_v56, 2 }
 0x5b0   : > { %6313 = vmatmul.mubr.bf16.gmra.mxu1 %v13712_v2  ;;  %9213 = vmatprep.subr.bf16.mxu0 %v14043_v29  ;;  %v14084_v2 = vsel %vm892_vm3, %v5166_v8, %v5170_v35  ;;  %v5174_v43 = vor.u32 %v5173_v40, %v5172_v34  ;;  %v4943_v8 = vor.u32 %v13839_v28, %v4939_v5  ;;  %v5051_v28 = vrot.slane %v13854_v33, 1 }
 0x5b1   : > { %6320 = vmatprep.mubr.bf16.mxu1 %v5048_v45  ;;  %v14091_v63 = vsel %vm1083_vm4, %v5359_v12, %v14080_v51  ;;  %v14098_v41 = vor.u32 %v5182_v4, %v5179_v27  ;;  %v5050_v16 = vsel %vm813_vm1, %v5047_v61, %v5049_v48  ;;  %v4947_v12 = vrot.slane %v13864_v32, 1 }
 0x5b2   : > { %6136 = vmatmul.mubr.bf16.gmra.mxu0 %v13641_v20  ;;  %v14095_v46 = vsel %vm892_vm3, %v5170_v35, %v5174_v43  ;;  %v4955_v61 = vrot.slane %v13867_v25, 1  ;;  %v5053_v35 = vrot.slane %v13877_v31, 1  ;;  %v5055_v25 = vrot.slane %v13903_v44, 1 }
 0x5b3   : > { %6143 = vmatprep.mubr.bf16.mxu0 %v4940_v54  ;;  %v14105_v54 = vsel %vm892_vm3, %v5174_v43, %v14098_v41  ;;  %v4948_v38 = vsel %vm643_vm0, %v4943_v8, %v4947_v12  ;;  %v4951_v56 = vor.u32 %v13845_v59, %v4947_v12  ;;  %v4963_v59 = vrot.slane %v13914_v10, 1 }
 0x5b4   : > { %v4959_v5 = vor.u32 %v13886_v49, %v4955_v61  ;;  %v5054_v34 = vsel %vm813_vm1, %v5051_v28, %v5053_v35  ;;  %v4971_v49 = vrot.slane %v13917_v26, 1  ;;  %v5057_v10 = vrot.slane %v13924_v17, 1 }
 0x5b5   : > { %v4956_v32 = vsel %vm643_vm0, %v4951_v56, %v4955_v61  ;;  %v4967_v40 = vor.u32 %v13895_v53, %v4963_v59  ;;  %v4979_v53 = vrot.slane %v13961_v39, 1  ;;  %v5059_v26 = vrot.slane %v13953_v6, 1 }
 0x5b6   : > { %v4975_v27 = vor.u32 %v13935_v7, %v4971_v49  ;;  %v5058_v4 = vsel %vm813_vm1, %v5055_v25, %v5057_v10  ;;  %v4987_v7 = vrot.slane %v13964_v30, 1  ;;  %v5094_v39 = vrot.slane %v14024_v18, 1  ;;  %v9637_v30 = vld [vmem:[#allocation2 + $0x90] ss:$0 sps:$4 sm:$0x11]  }
 0x5b7   : > { %v4972_v43 = vsel %vm643_vm0, %v4967_v40, %v4971_v49  ;;  %v5060_v12 = vsel %vm813_vm1, %v5057_v10, %v5059_v26  ;;  %v5061_v49 = vrot.slane %v9637_v30, 1 }
 0x5b8   : > { %6321 = vmatmul.mubr.bf16.gmra.mxu1 %v13788_v57  ;;  %v5052_v57 = vsel %vm813_vm1, %v5049_v48, %v5051_v28  ;;  %v5056_v48 = vsel %vm813_vm1, %v5053_v35, %v5055_v25  ;;  %v4980_v8 = vsel %vm643_vm0, %v4975_v27, %v4979_v53  ;;  %v4740_v28 = vld [vmem:[#allocation2 + $0x10] sm:$0xc]  ;;  %v4991_v56 = vor.u32 %v13985_v24, %v4987_v7 }
 0x5b9   : > { %6328 = vmatprep.mubr.bf16.mxu1 %v5050_v16  ;;  %v8750_v61 = vcombine.low %v4740_v28, %v13531_v11  ;;  %v5062_v10 = vsel %vm813_vm1, %v5059_v26, %v5061_v49  ;;  %v5218_v27 = vrot.slane %v13559_v15, 2  ;;  %v16428_v15 = vrot.slane %v13544_v42, 2  ;;  %v16433_v28 = vld [vmem:[#allocation61_spill] sm:$0xff] }
 0x5ba   : > { %6144 = vmatmul.mubr.bf16.gmra.mxu0 %v13653_v21  ;;  %v5222_v42 = vrot.slane %v13605_v60, 2  ;;  %v16429_v60 = vld [vmem:[#allocation105_spill] sm:$0xff] }
 0x5bb   : > { %6151 = vmatprep.mubr.bf16.mxu0 %v4948_v38 }
 0x5c0   : > { %6329 = vmatmul.mubr.bf16.gmra.mxu1 %v5048_v45  ;;  %v4964_v45 = vsel %vm643_vm0, %v4959_v5, %v4963_v59  ;;  %v5297_v59 = vshll.u32 %v8750_v61, 16 }
 0x5c1   : > { %6336 = vmatprep.mubr.bf16.mxu1 %v5052_v57 }
 0x5c2   : > { %6152 = vmatmul.mubr.bf16.gmra.mxu0 %v13704_v23  ;;  %v5299_v11 = vrot.slane %v5297_v59, 3  ;;  %v5230_v59 = vrot.slane %v13653_v21, 2  ;;  %v5232_v21 = vrot.slane %v13704_v23, 2 }
 0x5c3   : > { %6159 = vmatprep.mubr.bf16.mxu0 %v4956_v32  ;;  %v4995_v32 = vrot.slane %v14007_v37, 1 }
 0x5c5   : > { %v4996_v35 = vsel %vm643_vm0, %v4991_v56, %v4995_v32  ;;  %v4999_v24 = vor.u32 %v13991_v50, %v4995_v32  ;;  %v5226_v56 = vrot.slane %v16433_v28, 2  ;;  %v16436_v32 = vld [vmem:[#allocation108_spill] sm:$0xff] }
 0x5c8   : > { %6337 = vmatmul.mubr.bf16.gmra.mxu1 %v5050_v16  ;;  %v4983_v16 = vor.u32 %v13945_v47, %v4979_v53  ;;  %v9634_v47 = vld [vmem:[#allocation2 + $0x98] ss:$0 sps:$4 sm:$0x11]   ;;  %v9645_v53 = vld [vmem:[%s15856_s5 + $0x230] sm:$0xff]  }
 0x5c9   : > { %6344 = vmatprep.mubr.bf16.mxu1 %v5054_v34  ;;  %v5096_v5 = vrot.slane %v9634_v47, 1  ;;  %v16434_v47 = vmov 0.0  }
 0x5ca   : > { %6160 = vmatmul.mubr.bf16.gmra.mxu0 %v13804_v62  ;;  %v4988_v38 = vsel %vm643_vm0, %v4983_v16, %v4987_v7  ;;  %v9647_v16 = vld [vmem:[%s15856_s5 + $0x220] sm:$0xff]  }
 0x5cb   : > { %6167 = vmatprep.mubr.bf16.mxu0 %v4964_v45  ;;  %v5001_v45 = vshll.u32 %v9637_v30, 16  ;;  %v5097_v25 = vsel %vm813_vm1, %v5094_v39, %v5096_v5  ;;  %v5228_v30 = vrot.slane %v13641_v20, 2  ;;  %v16437_v5 = vld [vmem:[#allocation65_spill] sm:$0xff] }
 0x5cc   : > { %v10002_v20 = vld [vmem:[%s15858_s7] sm:$0xff] }
 0x5d0   : > { %6345 = vmatmul.mubr.bf16.gmra.mxu1 %v5052_v57  ;;  %v5095_v57 = vsel %vm813_vm1, %v5059_v26, %v5094_v39  ;;  %v5220_v26 = vrot.slane %v13580_v36, 2  ;;  %v9648_v36 = vld [vmem:[%s15856_s5 + $0x218] sm:$0xff]  }
 0x5d1   : > { %6352 = vmatprep.mubr.bf16.mxu1 %v5056_v48  ;;  %v16432_v39 = vld [vmem:[#allocation63_spill] sm:$0xff] }
 0x5d2   : > { %6168 = vmatmul.mubr.bf16.gmra.mxu0 %v13828_v52 }
 0x5d3   : > { %6175 = vmatprep.mubr.bf16.mxu0 %v4972_v43 }
 0x5d8   : > { %6353 = vmatmul.mubr.bf16.gmra.mxu1 %v5054_v34  ;;  %v5294_v34 = vshrl.u32 %v8750_v61, 16 }
 0x5d9   : > { %6360 = vmatprep.mubr.bf16.mxu1 %v5058_v4 }
 0x5da   : > { %6176 = vmatmul.mubr.bf16.gmra.mxu0 %v13854_v33  ;;  %v5296_v40 = vrot.slane %v5294_v34, 2  ;;  %v16438_v34 = vld [vmem:[#allocation109_spill] sm:$0xff] }
 0x5db   : > { %6183 = vmatprep.mubr.bf16.mxu0 %v4980_v8 }
 0x5dc   : > { %v5300_v43 = vor.u32 %v5299_v11, %v5296_v40 }
 0x5de   : > { %v5304_v50 = vsel %vm1083_vm4, %v5300_v43, %v13731_v14  ;;  %v9646_v14 = vld [vmem:[%s15856_s5 + $0x228] sm:$0xff]   ;;  %v16441_v43 = vld [vmem:[#allocation67_spill] sm:$0xff] }
 0x5e0   : > { %6361 = vmatmul.mubr.bf16.gmra.mxu1 %v5056_v48  ;;  %v5003_v48 = vrot.slane %v5001_v45, 1  ;;  %v16439_v45 = vld [vmem:[#allocation6_spill] sm:$0xff] }
 0x5e1   : > { %6368 = vmatprep.mubr.bf16.mxu1 %v5060_v12 }
 0x5e2   : > { %6184 = vmatmul.mubr.bf16.gmra.mxu0 %v13877_v31  ;;  %v5004_v37 = vsel %vm643_vm0, %v4999_v24, %v5003_v48  ;;  %v5605_v24 = vsub.s32 3, %v16439_v45  ;;  %v16440_v48 = vld [vmem:[#allocation66_spill] sm:$0xff] }
 0x5e3   : > { %6191 = vmatprep.mubr.bf16.mxu0 %v4988_v38  ;;  %v16431_v38 = vld [vmem:[#allocation62_spill] sm:$0xff] }
 0x5e4   : > { %v14212_v11 = vrot.slane %v10002_v20, %v5605_v24 }
 0x5e8   : > { %6369 = vmatmul.mubr.bf16.gmra.mxu1 %v5058_v4  ;;  %v5281_v4 = vrot.slane %v8750_v61, 2  ;;  %v16435_v61 = vld [vmem:[#allocation64_spill] sm:$0xff] }
 0x5e9   : > { %6376 = vmatprep.mubr.bf16.mxu1 %v5095_v57 }
 0x5ea   : > { %6192 = vmatmul.mubr.bf16.gmra.mxu0 %v13903_v44  ;;  %v5282_v8 = vsel %vm1004_vm2, %v5281_v4, %v5218_v27 }
 0x5eb   : > { %6199 = vmatprep.mubr.bf16.mxu0 %v4996_v35  ;;  %v5229_v35 = vsel %vm1004_vm2, %v5226_v56, %v5228_v30 }
 0x5f0   : > { %6377 = vmatmul.mubr.bf16.gmra.mxu1 %v5060_v12  ;;  %v9650_v12 = vld [vmem:[%s15856_s5 + $0x208] sm:$0xff]  }
 0x5f1   : > { %6384 = vmatprep.mubr.bf16.mxu1 %v5097_v25  ;;  %v5231_v25 = vsel %vm1004_vm2, %v5228_v30, %v5230_v59  ;;  %v5236_v30 = vrot.slane %v13828_v52, 2 }
 0x5f2   : > { %6200 = vmatmul.mubr.bf16.gmra.mxu0 %v13924_v17 }
 0x5f3   : > { %6207 = vmatprep.mubr.bf16.mxu0 %v5004_v37 }
 0x5f8   : > { %6385 = vmatmul.mubr.bf16.gmra.mxu1 %v5062_v10 }
 0x5f9   : > { %6602 = vmatprep.mubr.bf16.mxu1 %v5304_v50 }
 0x5fa   : > { %6208 = vmatmul.mubr.bf16.gmra.mxu0 %v13953_v6 }
 0x5fb   : > { %6425 = vmatprep.mubr.bf16.mxu0 %v13754_v1  ;;  %v5219_v1 = vsel %vm1004_vm2, %v16428_v15, %v5218_v27 }
 0x600   : > { %6603 = vmatmul.mubr.bf16.vlgmr.msra.gmra.mxu1 %v5282_v8 }
 0x601   : > { %6610 = vmatprep.mubr.bf16.mxu1 %v13772_v9  ;;  %9395 = vmatpush3.bf16.msra.mxu1 %v14043_v29  ;;  %v5221_v9 = vsel %vm1004_vm2, %v5218_v27, %v5220_v26 }
 0x602   : > { %9388 = vmatprep.subr.bf16.mxu1 %v9645_v53  ;;  %6426 = vmatmul.mubr.bf16.vlgmr.msra.gmra.mxu0 %v13778_v3  ;;  %v5223_v3 = vsel %vm1004_vm2, %v5220_v26, %v5222_v42 }
 0x603   : > { %6433 = vmatprep.mubr.bf16.mxu0 %v5219_v1  ;;  %9214 = vmatpush3.bf16.msra.mxu0 %v14043_v29 }
 0x604   : > { %9215 = vmatprep.subr.bf16.mxu0 %v9645_v53 }
 0x605   : > { %9396 = vmatpush3.bf16.msra.mxu1 %v9645_v53 }
 0x606   : > { %9389 = vmatprep.subr.bf16.mxu1 %v9646_v14 }
 0x607   : > { %9216 = vmatpush3.bf16.msra.mxu0 %v9645_v53 }
 0x608   : > { %6611 = vmatmul.mubr.bf16.gmra.mxu1 %v5221_v9  ;;  %9217 = vmatprep.subr.bf16.mxu0 %v9646_v14 }
 0x609   : > { %6618 = vmatprep.mubr.bf16.mxu1 %v13801_v0  ;;  %9397 = vmatpush3.bf16.msra.mxu1 %v9646_v14  ;;  %v9649_v0 = vld [vmem:[%s15856_s5 + $0x210] sm:$0xff]  }
 0x60a   : > { %6434 = vmatmul.mubr.bf16.gmra.mxu0 %v13811_v13  ;;  %9390 = vmatprep.subr.bf16.mxu1 %v9647_v16  ;;  %v16430_v13 = vld [vmem:[#allocation104_spill] sm:$0xff] }
 0x60b   : > { %6441 = vmatprep.mubr.bf16.mxu0 %v5221_v9  ;;  %9218 = vmatpush3.bf16.msra.mxu0 %v9646_v14  ;;  %v5224_v29 = vrot.slane %v16430_v13, 2  ;;  %v5233_v14 = vsel %vm1004_vm2, %v5230_v59, %v5232_v21  ;;  %v16442_v9 = vld [vmem:[#allocation110_spill] sm:$0xff] }
 0x60c   : > { %9219 = vmatprep.subr.bf16.mxu0 %v9647_v16 }
 0x60d   : > { %9398 = vmatpush3.bf16.msra.mxu1 %v9647_v16  ;;  %v5225_v7 = vsel %vm1004_vm2, %v5222_v42, %v5224_v29  ;;  %v5227_v57 = vsel %vm1004_vm2, %v5224_v29, %v5226_v56  ;;  %v16444_v56 = vld [vmem:[#allocation112_spill] sm:$0xff] }
 0x60e   : > { %9391 = vmatprep.subr.bf16.mxu1 %v9648_v36 }
 0x60f   : > { %9220 = vmatpush3.bf16.msra.mxu0 %v9647_v16 }
 0x610   : > { %6619 = vmatmul.mubr.bf16.gmra.mxu1 %v5223_v3  ;;  %9221 = vmatprep.subr.bf16.mxu0 %v9648_v36 }
 0x611   : > { %6626 = vmatprep.mubr.bf16.mxu1 %v13824_v55  ;;  %9399 = vmatpush3.bf16.msra.mxu1 %v9648_v36  ;;  %v9652_v55 = vld [vmem:[%s15856_s5 + $0x200] sm:$0xff]  }
 0x612   : > { %6442 = vmatmul.mubr.bf16.gmra.mxu0 %v16429_v60  ;;  %9392 = vmatprep.subr.bf16.mxu1 %v9649_v0 }
 0x613   : > { %6449 = vmatprep.mubr.bf16.mxu0 %v5223_v3  ;;  %9222 = vmatpush3.bf16.msra.mxu0 %v9648_v36  ;;  %v16443_v36 = vld [vmem:[#allocation68_spill] sm:$0xff]  ;;  %v5234_v3 = vrot.slane %v13804_v62, 2 }
 0x614   : > { %9223 = vmatprep.subr.bf16.mxu0 %v9649_v0 }
 0x615   : > { %9400 = vmatpush3.bf16.msra.mxu1 %v9649_v0 }
 0x616   : > { %9393 = vmatprep.subr.bf16.mxu1 %v9650_v12 }
 0x617   : > { %9224 = vmatpush3.bf16.msra.mxu0 %v9649_v0 }
 0x618   : > { %6627 = vmatmul.mubr.bf16.gmra.mxu1 %v5225_v7  ;;  %9225 = vmatprep.subr.bf16.mxu0 %v9650_v12 }
 0x619   : > { %6634 = vmatprep.mubr.bf16.mxu1 %v16431_v38  ;;  %9401 = vmatpush3.bf16.msra.mxu1 %v9650_v12 }
 0x61a   : > { %6450 = vmatmul.mubr.bf16.gmra.mxu0 %v16432_v39  ;;  %9394 = vmatprep.subr.bf16.mxu1 %v9652_v55 }
 0x61b   : > { %6457 = vmatprep.mubr.bf16.mxu0 %v5225_v7  ;;  %9226 = vmatpush3.bf16.msra.mxu0 %v9650_v12 }
 0x61c   : > { %9227 = vmatprep.subr.bf16.mxu0 %v9652_v55 }
 0x61d   : > { %9402 = vmatpush3.bf16.msra.mxu1 %v9652_v55 }
 0x61e   : > { %9265 = vmatprep.subr.mxu1 %v16434_v47 }
 0x61f   : > { %9228 = vmatpush3.bf16.msra.mxu0 %v9652_v55  ;;  %v5235_v55 = vsel %vm1004_vm2, %v5232_v21, %v5234_v3 }
 0x620   : > { %6635 = vmatmul.mubr.bf16.gmra.mxu1 %v5227_v57 }
 0x621   : > { %6642 = vmatprep.mubr.bf16.mxu1 %v16435_v61 }
 0x622   : > { %6458 = vmatmul.mubr.bf16.gmra.mxu0 %v16436_v32  ;;  %v16445_v32 = vld [vmem:[#allocation69_spill] sm:$0xff] }
 0x623   : > { %6465 = vmatprep.mubr.bf16.mxu0 %v5227_v57 }
 0x628   : > { %6643 = vmatmul.mubr.bf16.gmra.mxu1 %v5229_v35 }
 0x629   : > { %6650 = vmatprep.mubr.bf16.mxu1 %v16437_v5 }
 0x62a   : > { %6466 = vmatmul.mubr.bf16.gmra.mxu0 %v16438_v34 }
 0x62b   : > { %6473 = vmatprep.mubr.bf16.mxu0 %v5229_v35 }
 0x630   : > { %v6250_v40 = vpop.f32.mrf.mxu1  ;;  %6651 = vmatmul.mubr.bf16.gmra.mxu1 %v5231_v25 }
 0x631   : > { %6658 = vmatprep.mubr.bf16.mxu1 %v16440_v48 }
 0x632   : > { %v6252_v37 = vpop.f32.mrf.mxu1  ;;  %v6073_v49 = vpop.f32.mrf.mxu0  ;;  %6474 = vmatmul.mubr.bf16.gmra.mxu0 %v16441_v43 }
 0x633   : > { %v6074_v10 = vadd.f32 %v6073_v49, %v14212_v11  ;;  %6481 = vmatprep.mubr.bf16.mxu0 %v5231_v25  ;;  %v16446_v49 = vld [vmem:[#allocation113_spill] sm:$0xff] }
 0x634   : > { %v6253_v50 = vpop.f32.mrf.mxu1  ;;  %v6075_v27 = vpop.f32.mrf.mxu0 }
 0x635   : > { %v14218_v53 = vadd.f32 %v6250_v40, %v6074_v10  ;;  %v5237_v40 = vsel %vm1004_vm2, %v5234_v3, %v5236_v30  ;;  %v16447_v10 = vld [vmem:[#allocation71_spill] sm:$0xff] }
 0x636   : > { %v6255_v4 = vpop.f32.mrf.mxu1  ;;  %v6076_v8 = vpop.f32.mrf.mxu0 }
 0x637   : > { %v6077_v15 = vadd.f32 %v6076_v8, %v14212_v11 }
 0x638   : > { %v6258_v1 = vpop.f32.mrf.mxu1  ;;  %6659 = vmatmul.mubr.bf16.gmra.mxu1 %v5233_v14  ;;  %v6078_v26 = vpop.f32.mrf.mxu0 }
 0x639   : > { %6666 = vmatprep.mubr.bf16.mxu1 %v16442_v9  ;;  %v14223_v23 = vadd.f32 %v6253_v50, %v6077_v15  ;;  %v5238_v50 = vrot.slane %v13854_v33, 2 }
 0x63a   : > { %v6260_v16 = vpop.f32.mrf.mxu1  ;;  %v6081_v42 = vpop.f32.mrf.mxu0  ;;  %6482 = vmatmul.mubr.bf16.gmra.mxu0 %v16443_v36  ;;  %v16448_v36 = vld [vmem:[#allocation73_spill] sm:$0xff] }
 0x63b   : > { %v6082_v0 = vadd.f32 %v6081_v42, %v14212_v11  ;;  %6489 = vmatprep.mubr.bf16.mxu0 %v5233_v14  ;;  %v5239_v26 = vsel %vm1004_vm2, %v5236_v30, %v5238_v50  ;;  %v16450_v30 = vld [vmem:[#allocation116_spill] sm:$0xff] }
 0x63c   : > { %v6261_v60 = vpop.f32.mrf.mxu1  ;;  %v6083_v13 = vpop.f32.mrf.mxu0 }
 0x63d   : > { %v14228_v12 = vadd.f32 %v6258_v1, %v6082_v0  ;;  %v5240_v13 = vrot.slane %v13877_v31, 2 }
 0x63e   : > { %v6263_v29 = vpop.f32.mrf.mxu1  ;;  %v6084_v7 = vpop.f32.mrf.mxu0 }
 0x63f   : > { %v6085_v38 = vadd.f32 %v6084_v7, %v14212_v11 }
 0x640   : > { %v6266_v39 = vpop.f32.mrf.mxu1  ;;  %6667 = vmatmul.mubr.bf16.gmra.mxu1 %v5235_v55  ;;  %v6086_v28 = vpop.f32.mrf.mxu0 }
 0x641   : > { %6674 = vmatprep.mubr.bf16.mxu1 %v16444_v56  ;;  %v14233_v62 = vadd.f32 %v6261_v60, %v6085_v38  ;;  %v16449_v60 = vld [vmem:[#allocation74_spill] sm:$0xff]  ;;  %v5241_v56 = vsel %vm1004_vm2, %v5238_v50, %v5240_v13 }
 0x642   : > { %v6268_v57 = vpop.f32.mrf.mxu1  ;;  %v6089_v61 = vpop.f32.mrf.mxu0  ;;  %6490 = vmatmul.mubr.bf16.gmra.mxu0 %v16445_v32 }
 0x643   : > { %v6090_v35 = vadd.f32 %v6089_v61, %v14212_v11  ;;  %6497 = vmatprep.mubr.bf16.mxu0 %v5235_v55 }
 0x644   : > { %v6269_v5 = vpop.f32.mrf.mxu1  ;;  %v6091_v34 = vpop.f32.mrf.mxu0 }
 0x645   : > { %v14238_v24 = vadd.f32 %v6266_v39, %v6090_v35  ;;  %v16451_v34 = vld [vmem:[#allocation115_spill] sm:$0xff] }
 0x646   : > { %v6271_v59 = vpop.f32.mrf.mxu1  ;;  %v6092_v25 = vpop.f32.mrf.mxu0 }
 0x647   : > { %v6093_v20 = vadd.f32 %v6092_v25, %v14212_v11  ;;  %v5242_v59 = vrot.slane %v13903_v44, 2 }
 0x648   : > { %v6274_v48 = vpop.f32.mrf.mxu1  ;;  %6675 = vmatmul.mubr.bf16.gmra.mxu1 %v5237_v40  ;;  %v6094_v37 = vpop.f32.mrf.mxu0 }
 0x649   : > { %6682 = vmatprep.mubr.bf16.mxu1 %v16446_v49  ;;  %v14243_v52 = vadd.f32 %v6269_v5, %v6093_v20 }
 0x64a   : > { %v6276_v43 = vpop.f32.mrf.mxu1  ;;  %v6097_v21 = vpop.f32.mrf.mxu0  ;;  %6498 = vmatmul.mubr.bf16.gmra.mxu0 %v16447_v10 }
 0x64b   : > { %v6098_v27 = vadd.f32 %v6097_v21, %v14212_v11  ;;  %6505 = vmatprep.mubr.bf16.mxu0 %v5237_v40  ;;  %v5243_v43 = vsel %vm1004_vm2, %v5240_v13, %v5242_v59 }
 0x64c   : > { %v6277_v4 = vpop.f32.mrf.mxu1  ;;  %v6099_v8 = vpop.f32.mrf.mxu0 }
 0x64d   : > { %v14248_v15 = vadd.f32 %v6274_v48, %v6098_v27  ;;  %v16452_v8 = vld [vmem:[#allocation75_spill] sm:$0xff] }
 0x64e   : > { %v6279_v14 = vpop.f32.mrf.mxu1  ;;  %v6100_v1 = vpop.f32.mrf.mxu0 }
 0x64f   : > { %v6101_v9 = vadd.f32 %v6100_v1, %v14212_v11  ;;  %v5244_v14 = vrot.slane %v13924_v17, 2 }
 0x650   : > { %v6282_v16 = vpop.f32.mrf.mxu1  ;;  %6683 = vmatmul.mubr.bf16.gmra.mxu1 %v5239_v26  ;;  %v6102_v42 = vpop.f32.mrf.mxu0 }
 0x651   : > { %6690 = vmatprep.mubr.bf16.mxu1 %v16448_v36  ;;  %v14253_v33 = vadd.f32 %v6277_v4, %v6101_v9 }
 0x652   : > { %v6284_v3 = vpop.f32.mrf.mxu1  ;;  %v6105_v0 = vpop.f32.mrf.mxu0  ;;  %6506 = vmatmul.mubr.bf16.gmra.mxu0 %v16449_v60  ;;  %v14282_v60 = vld [vmem:[#allocation2 + $0x98] sm:$0xff]  }
 0x653   : > { %v6106_v29 = vadd.f32 %v6105_v0, %v14212_v11  ;;  %6513 = vmatprep.mubr.bf16.mxu0 %v5239_v26  ;;  %v5245_v3 = vsel %vm1004_vm2, %v5242_v59, %v5244_v14  ;;  %v14296_v59 = vld [vmem:[#allocation2 + $0xa0] ss:$0 sps:$4 sm:$0x77]  }
 0x654   : > { %v6285_v7 = vpop.f32.mrf.mxu1  ;;  %v6107_v55 = vpop.f32.mrf.mxu0 }
 0x655   : > { %v14258_v39 = vadd.f32 %v6282_v16, %v6106_v29  ;;  %v5246_v55 = vrot.slane %v13953_v6, 2 }
 0x656   : > { %v6287_v38 = vpop.f32.mrf.mxu1  ;;  %v6108_v28 = vpop.f32.mrf.mxu0 }
 0x657   : > { %v6109_v57 = vadd.f32 %v6108_v28, %v14212_v11 }
 0x658   : > { %v6290_v61 = vpop.f32.mrf.mxu1  ;;  %6691 = vmatmul.mubr.bf16.gmra.mxu1 %v5241_v56  ;;  %v6110_v32 = vpop.f32.mrf.mxu0 }
 0x659   : > { %6698 = vmatprep.mubr.bf16.mxu1 %v16450_v30  ;;  %v14263_v31 = vadd.f32 %v6285_v7, %v6109_v57  ;;  %v5369_v57 = vshll.u32 %v14282_v60, 16 }
 0x65a   : > { %v6292_v35 = vpop.f32.mrf.mxu1  ;;  %v6113_v5 = vpop.f32.mrf.mxu0  ;;  %6514 = vmatmul.mubr.bf16.gmra.mxu0 %v16451_v34 }
 0x65b   : > { %v6114_v25 = vadd.f32 %v6113_v5, %v14212_v11  ;;  %6521 = vmatprep.mubr.bf16.mxu0 %v5241_v56  ;;  %v5366_v56 = vshrl.u32 %v14282_v60, 16  ;;  %v5247_v35 = vsel %vm1004_vm2, %v5244_v14, %v5246_v55  ;;  %v5371_v34 = vrot.slane %v5369_v57, 3 }
 0x65c   : > { %v6293_v40 = vpop.f32.mrf.mxu1  ;;  %v6115_v20 = vpop.f32.mrf.mxu0 }
 0x65d   : > { %v14268_v37 = vadd.f32 %v6290_v61, %v6114_v25  ;;  %v5368_v6 = vrot.slane %v5366_v56, 2 }
 0x65e   : > { %v6295_v48 = vpop.f32.mrf.mxu1  ;;  %v6116_v49 = vpop.f32.mrf.mxu0 }
 0x65f   : > { %v6117_v21 = vadd.f32 %v6116_v49, %v14212_v11  ;;  %v5248_v49 = vrot.slane %v14024_v18, 2 }
 0x660   : > { %v6298_v10 = vpop.f32.mrf.mxu1  ;;  %6699 = vmatmul.mubr.bf16.gmra.mxu1 %v5243_v43  ;;  %v6118_v50 = vpop.f32.mrf.mxu0 }
 0x661   : > { %6706 = vmatprep.mubr.bf16.mxu1 %v14055_v22  ;;  %v14273_v44 = vadd.f32 %v6293_v40, %v6117_v21  ;;  %v5375_v50 = vshrl.u32 %v14296_v59, 16 }
 0x662   : > { %v6300_v27 = vpop.f32.mrf.mxu1  ;;  %v6121_v4 = vpop.f32.mrf.mxu0  ;;  %6522 = vmatmul.mubr.bf16.gmra.mxu0 %v16452_v8 }
 0x663   : > { %v6122_v1 = vadd.f32 %v6121_v4, %v14212_v11  ;;  %6529 = vmatprep.mubr.bf16.mxu0 %v5243_v43  ;;  %v5378_v27 = vshll.u32 %v14296_v59, 16 }
 0x664   : > { %v6301_v26 = vpop.f32.mrf.mxu1  ;;  %v6123_v9 = vpop.f32.mrf.mxu0 }
 0x665   : > { %v14278_v42 = vadd.f32 %v6298_v10, %v6122_v1  ;;  %v5372_v10 = vor.u32 %v5371_v34, %v5368_v6  ;;  %v5249_v1 = vsel %vm1004_vm2, %v5246_v55, %v5248_v49  ;;  %v5377_v9 = vrot.slane %v5375_v50, 2  ;;  %v4745_v34 = vld [vmem:[#allocation2 + $0x10] sm:$0x8] }
 0x666   : > { %v6303_v16 = vpop.f32.mrf.mxu1  ;;  %v6124_v36 = vpop.f32.mrf.mxu0 }
 0x667   : > { %v6125_v22 = vadd.f32 %v6124_v36, %v14212_v11  ;;  %v5373_v18 = vsel %vm1083_vm4, %v14080_v51, %v5372_v10  ;;  %v5380_v16 = vrot.slane %v5378_v27, 3 }
 0x668   : > { %v6306_v0 = vpop.f32.mrf.mxu1  ;;  %6707 = vmatmul.mubr.bf16.gmra.mxu1 %v5245_v3  ;;  %v6126_v13 = vpop.f32.mrf.mxu0 }
 0x669   : > { %6714 = vmatprep.mubr.bf16.mxu1 %v14069_v58  ;;  %v14285_v29 = vadd.f32 %v6301_v26, %v6125_v22  ;;  %v9654_v22 = vld [vmem:[#allocation2 + $0x98] ss:$0 sps:$4 sm:$0x33]  }
 0x66a   : > { %v6308_v17 = vpop.f32.mrf.mxu1  ;;  %v6129_v7 = vpop.f32.mrf.mxu0  ;;  %6530 = vmatmul.mubr.bf16.gmra.mxu0 %v14076_v19  ;;  %v5186_v56 = vshrl.u32 %v9654_v22, 16  ;;  %v5189_v57 = vshll.u32 %v9654_v22, 16 }
 0x66b   : > { %v6130_v38 = vadd.f32 %v6129_v7, %v14212_v11  ;;  %6537 = vmatprep.mubr.bf16.mxu0 %v5245_v3  ;;  %v5283_v17 = vrot.slane %v14282_v60, 2 }
 0x66c   : > { %v6309_v28 = vpop.f32.mrf.mxu1  ;;  %v6131_v61 = vpop.f32.mrf.mxu0 }
 0x66d   : > { %v14292_v30 = vadd.f32 %v6306_v0, %v6130_v38  ;;  %v5381_v38 = vor.u32 %v5380_v16, %v5377_v9 }
 0x66e   : > { %v6311_v32 = vpop.f32.mrf.mxu1  ;;  %v6132_v58 = vpop.f32.mrf.mxu0 }
 0x66f   : > { %v6133_v5 = vadd.f32 %v6132_v58, %v14212_v11  ;;  %v5284_v58 = vsel %vm1004_vm2, %v5248_v49, %v5283_v17  ;;  %v5382_v6 = vsel %vm1083_vm4, %v5372_v10, %v5381_v38 }
 0x670   : > { %v6314_v19 = vpop.f32.mrf.mxu1  ;;  %6715 = vmatmul.mubr.bf16.gmra.mxu1 %v5247_v35  ;;  %v6134_v25 = vpop.f32.mrf.mxu0 }
 0x671   : > { %6722 = vmatprep.mubr.bf16.mxu1 %v14091_v63  ;;  %v14299_v20 = vadd.f32 %v6309_v28, %v6133_v5  ;;  %v9655_v5 = vld [vmem:[#allocation2 + $0xa0] ss:$0 sps:$4 sm:$0x33]  }
 0x672   : > { %v6316_v40 = vpop.f32.mrf.mxu1  ;;  %v6137_v48 = vpop.f32.mrf.mxu0  ;;  %6538 = vmatmul.mubr.bf16.gmra.mxu0 %v14084_v2 }
 0x673   : > { %v6138_v43 = vadd.f32 %v6137_v48, %v14212_v11  ;;  %6545 = vmatprep.mubr.bf16.mxu0 %v5247_v35  ;;  %v5250_v35 = vrot.slane %v9654_v22, 2  ;;  %v5188_v48 = vrot.slane %v5186_v56, 1 }
 0x674   : > { %v6317_v21 = vpop.f32.mrf.mxu1  ;;  %v6139_v4 = vpop.f32.mrf.mxu0 }
 0x675   : > { %v14306_v63 = vadd.f32 %v6314_v19, %v6138_v43  ;;  %v5191_v43 = vrot.slane %v5189_v57, 2  ;;  %v5251_v27 = vsel %vm1004_vm2, %v5248_v49, %v5250_v35  ;;  %v5285_v4 = vrot.slane %v9655_v5, 2  ;;  %v10007_v5 = vld [vmem:[#allocation2 + $0x60] sm:$0xff]  }
 0x676   : > { %v6319_v8 = vpop.f32.mrf.mxu1  ;;  %v6140_v14 = vpop.f32.mrf.mxu0 }
 0x677   : > { %v6141_v2 = vadd.f32 %v6140_v14, %v14212_v11  ;;  %v10003_v8 = vld [vmem:[#allocation2 + $0x14] sm:$0xf]  ;;  %v5286_v49 = vsel %vm1004_vm2, %v5283_v17, %v5285_v4 }
 0x678   : > { %v6322_v26 = vpop.f32.mrf.mxu1  ;;  %6723 = vmatmul.mubr.bf16.gmra.mxu1 %v5249_v1  ;;  %v6142_v36 = vpop.f32.mrf.mxu0  ;;  %v8754_v14 = vcombine.low %v4745_v34, %v10003_v8  ;;  %v10008_v34 = vld [vmem:[#allocation2 + $0x68] sm:$0xff]  }
 0x679   : > { %6730 = vmatprep.mubr.bf16.mxu1 %v5373_v18  ;;  %v14312_v0 = vadd.f32 %v6317_v21, %v6141_v2  ;;  %v14327_v2 = vld [vmem:[#allocation2 + $0x50] sm:$0xff]   ;;  %v10005_v18 = vld [vmem:[#allocation2 + $0x58] sm:$0xff]   ;;  %v10010_v8 = vld [vmem:[#allocation2 + $0x28] sm:$0xff]  }
 0x67a   : > { %v6324_v3 = vpop.f32.mrf.mxu1  ;;  %v6145_v13 = vpop.f32.mrf.mxu0  ;;  %6546 = vmatmul.mubr.bf16.gmra.mxu0 %v14095_v46  ;;  %v5421_v9 = vrot.slane %v10005_v18, 3 }
 0x67b   : > { %v6146_v7 = vadd.f32 %v6145_v13, %v14212_v11  ;;  %6553 = vmatprep.mubr.bf16.mxu0 %v5249_v1  ;;  %v5192_v3 = vor.u32 %v5191_v43, %v5188_v48  ;;  %v5404_v13 = vrot.slane %v8754_v14, 3  ;;  %v10009_v43 = vld [vmem:[#allocation2 + $0x20] sm:$0xff]   ;;  %v5409_v14 = vrot.slane %v10010_v8, 3 }
 0x67c   : > { %v6325_v55 = vpop.f32.mrf.mxu1  ;;  %v6147_v28 = vpop.f32.mrf.mxu0 }
 0x67d   : > { %v14317_v61 = vadd.f32 %v6322_v26, %v6146_v7  ;;  %v5419_v26 = vrot.slane %v14327_v2, 3  ;;  %v10006_v7 = vld [vmem:[#allocation2 + $0x18] sm:$0xff]  }
 0x67e   : > { %v6327_v51 = vpop.f32.mrf.mxu1  ;;  %v6148_v32 = vpop.f32.mrf.mxu0 }
 0x67f   : > { %v6149_v46 = vadd.f32 %v6148_v32, %v14212_v11  ;;  %v5422_v51 = vsel %vm1195_vm5, %v5419_v26, %v5421_v9  ;;  %v5193_v32 = vsel %vm892_vm3, %v14098_v41, %v5192_v3 }
 0x680   : > { %v6330_v19 = vpop.f32.mrf.mxu1  ;;  %6731 = vmatmul.mubr.bf16.gmra.mxu1 %v5284_v58  ;;  %v6150_v25 = vpop.f32.mrf.mxu0 }
 0x681   : > { %6738 = vmatprep.mubr.bf16.mxu1 %v5382_v6  ;;  %v14322_v21 = vadd.f32 %v6325_v55, %v6149_v46  ;;  %v5405_v55 = vrot.slane %v10006_v7, 3  ;;  %v5423_v46 = vrot.slane %v10007_v5, 3  ;;  %v5425_v25 = vrot.slane %v10008_v34, 3  ;;  %v10012_v7 = vld [vmem:[#allocation2 + $0x70] sm:$0xff]  }
 0x682   : > { %v6332_v40 = vpop.f32.mrf.mxu1  ;;  %v6153_v50 = vpop.f32.mrf.mxu0  ;;  %6554 = vmatmul.mubr.bf16.gmra.mxu0 %v14105_v54  ;;  %v10016_v5 = vld [vmem:[#allocation2 + $0x30] sm:$0xff]  }
 0x683   : > { %v6154_v1 = vadd.f32 %v6153_v50, %v14212_v11  ;;  %6561 = vmatprep.mubr.bf16.mxu0 %v5251_v27  ;;  %v5406_v35 = vsel %vm1195_vm5, %v5404_v13, %v5405_v55  ;;  %v5407_v50 = vrot.slane %v10009_v43, 3  ;;  %v5424_v4 = vsel %vm1195_vm5, %v5421_v9, %v5423_v46  ;;  %v14380_v43 = vld [vmem:[%s15859_s8 + $0x60] sm:$0xff] }
 0x684   : > { %v6333_v10 = vpop.f32.mrf.mxu1  ;;  %v6155_v16 = vpop.f32.mrf.mxu0  ;;  %v5426_v18 = vsel %vm1195_vm5, %v5423_v46, %v5425_v25  ;;  %v5411_v46 = vrot.slane %v10016_v5, 3 }
 0x685   : > { %v14330_v22 = vadd.f32 %v6330_v19, %v6154_v1  ;;  %v5408_v9 = vsel %vm1195_vm5, %v5405_v55, %v5407_v50  ;;  %v5410_v13 = vsel %vm1195_vm5, %v5407_v50, %v5409_v14 }
 0x686   : > { %v6335_v36 = vpop.f32.mrf.mxu1  ;;  %v6156_v54 = vpop.f32.mrf.mxu0 }
 0x687   : > { %v6157_v38 = vadd.f32 %v6156_v54, %v14212_v11  ;;  %v14351_v36 = vld [vmem:[%s15859_s8 + $0x78] sm:$0xff] }
 0x688   : > { %v6338_v28 = vpop.f32.mrf.mxu1  ;;  %6739 = vmatmul.mubr.bf16.gmra.mxu1 %v5286_v49  ;;  %v6158_v56 = vpop.f32.mrf.mxu0 }
 0x689   : > { %9245 = vmatprep.mubr.bf16.mxu1 %v5422_v51  ;;  %v14339_v58 = vadd.f32 %v6333_v10, %v6157_v38  ;;  %v5427_v38 = vrot.slane %v10012_v7, 3  ;;  %v10014_v56 = vld [vmem:[#allocation2 + $0x78] sm:$0xff]  }
 0x68a   : > { %v6340_v57 = vpop.f32.mrf.mxu1  ;;  %v6161_v17 = vpop.f32.mrf.mxu0  ;;  %6562 = vmatmul.mubr.bf16.gmra.mxu0 %v5193_v32 }
 0x68b   : > { %v6162_v19 = vadd.f32 %v6161_v17, %v14212_v11  ;;  %9229 = vmatprep.mubr.bf16.mxu0 %v5406_v35  ;;  %v5429_v57 = vrot.slane %v10014_v56, 3  ;;  %v14370_v17 = vld [vmem:[%s15859_s8 + $0x68] sm:$0xff]  ;;  %v5428_v34 = vsel %vm1195_vm5, %v5425_v25, %v5427_v38  ;;  %v14389_v25 = vld [vmem:[%s15859_s8 + $0x58] sm:$0xff] }
 0x68c   : > { %v6341_v6 = vpop.f32.mrf.mxu1  ;;  %v6163_v40 = vpop.f32.mrf.mxu0  ;;  %v14408_v56 = vld [vmem:[%s15859_s8 + $0x48] sm:$0xff] }
 0x68d   : > { %v14343_v27 = vadd.f32 %v6338_v28, %v6162_v19  ;;  %v14362_v28 = vld [vmem:[%s15859_s8 + $0x70] sm:$0xff]  ;;  %v10017_v40 = vld [vmem:[#allocation2 + $0x38] sm:$0xff]   ;;  %16454 = vst [vmem:[#allocation117_spill] sm:$0xff] %v14408_v56 }
 0x68e   : > { %v6343_v48 = vpop.f32.mrf.mxu1  ;;  %v6164_v41 = vpop.f32.mrf.mxu0 }
 0x68f   : > { %v6165_v1 = vadd.f32 %v6164_v41, %v14212_v11  ;;  %v5413_v48 = vrot.slane %v10017_v40, 3  ;;  %v10025_v40 = vld [vmem:[#allocation2 + $0x48] sm:$0xff]  }
 0x690   : > { %v6346_v10 = vpop.f32.mrf.mxu1  ;;  %9246 = vmatmul.mubr.bf16.vlgmr.msra.gmra.mxu1 %v5424_v4  ;;  %v6166_v16 = vpop.f32.mrf.mxu0  ;;  %v5430_v4 = vsel %vm1195_vm5, %v5427_v38, %v5429_v57  ;;  %v10022_v38 = vld [vmem:[#allocation2 + $0x88] sm:$0xff]  }
 0x691   : > { %9249 = vmatprep.mubr.bf16.mxu1 %v5426_v18  ;;  %9266 = vmatpush3.msra.mxu1 %v14351_v36  ;;  %v14355_v54 = vadd.f32 %v6341_v6, %v6165_v1 }
 0x692   : > { %v6348_v3 = vpop.f32.mrf.mxu1  ;;  %9267 = vmatprep.subr.mxu1 %v16434_v47  ;;  %v6169_v49 = vpop.f32.mrf.mxu0  ;;  %9230 = vmatmul.mubr.bf16.vlgmr.msra.gmra.mxu0 %v5408_v9  ;;  %v10020_v9 = vld [vmem:[#allocation2 + $0x80] sm:$0xff]  }
 0x693   : > { %9268 = vmatpush3.msra.mxu1 %v14362_v28  ;;  %v6170_v51 = vadd.f32 %v6169_v49, %v14212_v11  ;;  %9233 = vmatprep.mubr.bf16.mxu0 %v5410_v13  ;;  %v5414_v3 = vsel %vm1195_vm5, %v5411_v46, %v5413_v48  ;;  %v5431_v49 = vrot.slane %v10020_v9, 3  ;;  %v14400_v13 = vld [vmem:[%s15859_s8 + $0x50] sm:$0xff] }
 0x694   : > { %v6349_v55 = vpop.f32.mrf.mxu1  ;;  %9269 = vmatprep.subr.mxu1 %v16434_v47  ;;  %v6171_v32 = vpop.f32.mrf.mxu0  ;;  %16453 = vst [vmem:[#allocation82_spill] sm:$0xff] %v14400_v13 }
 0x695   : > { %9270 = vmatpush3.msra.mxu1 %v14370_v17  ;;  %v14373_v19 = vadd.f32 %v6346_v10, %v6170_v51  ;;  %v5412_v10 = vsel %vm1195_vm5, %v5409_v14, %v5411_v46  ;;  %v5433_v51 = vrot.slane %v10022_v38, 3  ;;  %v10028_v38 = vld [vmem:[#allocation2 + $0x90] sm:$0xff]  }
 0x696   : > { %v6351_v35 = vpop.f32.mrf.mxu1  ;;  %9271 = vmatprep.subr.mxu1 %v16434_v47  ;;  %v6172_v6 = vpop.f32.mrf.mxu0 }
 0x697   : > { %9272 = vmatpush3.msra.mxu1 %v14380_v43  ;;  %v6173_v50 = vadd.f32 %v6172_v6, %v14212_v11  ;;  %v10024_v35 = vld [vmem:[#allocation2 + $0x40] sm:$0xff]  }
 0x698   : > { %v6354_v41 = vpop.f32.mrf.mxu1  ;;  %9250 = vmatmul.mubr.bf16.gmra.mxu1 %v5428_v34  ;;  %9273 = vmatprep.subr.mxu1 %v16434_v47  ;;  %v6174_v8 = vpop.f32.mrf.mxu0  ;;  %v5415_v5 = vrot.slane %v10024_v35, 3  ;;  %v5432_v34 = vsel %vm1195_vm5, %v5429_v57, %v5431_v49  ;;  %v14427_v57 = vld [vmem:[%s15859_s8 + $0x38] sm:$0xff] }
 0x699   : > { %9253 = vmatprep.mubr.bf16.mxu1 %v5430_v4  ;;  %9274 = vmatpush3.msra.mxu1 %v14389_v25  ;;  %v14393_v18 = vadd.f32 %v6349_v55, %v6173_v50  ;;  %v5417_v50 = vrot.slane %v10025_v40, 3  ;;  %v14418_v4 = vld [vmem:[%s15859_s8 + $0x40] sm:$0xff]  ;;  %16456 = vst [vmem:[#allocation121_spill] sm:$0xff] %v14427_v57 }
 0x69a   : > { %v6356_v1 = vpop.f32.mrf.mxu1  ;;  %9275 = vmatprep.subr.mxu1 %v16434_v47  ;;  %v6177_v16 = vpop.f32.mrf.mxu0  ;;  %9234 = vmatmul.mubr.bf16.gmra.mxu0 %v5412_v10  ;;  %16455 = vst [vmem:[#allocation120_spill] sm:$0xff] %v14418_v4 }
 0x69b   : > { %9276 = vmatpush3.msra.mxu1 %v14400_v13  ;;  %v6178_v7 = vadd.f32 %v6177_v16, %v14212_v11  ;;  %9237 = vmatprep.mubr.bf16.mxu0 %v5414_v3  ;;  %v5416_v3 = vsel %vm1195_vm5, %v5413_v48, %v5415_v5 }
 0x69c   : > { %v6357_v14 = vpop.f32.mrf.mxu1  ;;  %9277 = vmatprep.subr.mxu1 %v16434_v47  ;;  %v6179_v55 = vpop.f32.mrf.mxu0 }
 0x69d   : > { %9278 = vmatpush3.msra.mxu1 %v14408_v56  ;;  %v14411_v46 = vadd.f32 %v6354_v41, %v6178_v7  ;;  %v5434_v41 = vsel %vm1195_vm5, %v5431_v49, %v5433_v51  ;;  %v5418_v49 = vsel %vm1195_vm5, %v5415_v5, %v5417_v50  ;;  %v5435_v55 = vrot.slane %v10028_v38, 3  ;;  %v14447_v5 = vld [vmem:[%s15859_s8 + $0x28] sm:$0xff] }
 0x69e   : > { %v6359_v32 = vpop.f32.mrf.mxu1  ;;  %9279 = vmatprep.subr.mxu1 %v16434_v47  ;;  %v6180_v6 = vpop.f32.mrf.mxu0  ;;  %16458 = vst [vmem:[#allocation13_spill] sm:$0xff] %v14447_v5 }
 0x69f   : > { %9280 = vmatpush3.msra.mxu1 %v14418_v4  ;;  %v6181_v8 = vadd.f32 %v6180_v6, %v14212_v11  ;;  %v14438_v32 = vld [vmem:[%s15859_s8 + $0x30] sm:$0xff]  ;;  %v16470_v4 = vld [vmem:[#allocation25_spill] sm:$0xff] }
 0x6a0   : > { %v6362_v1 = vpop.f32.mrf.mxu1  ;;  %9254 = vmatmul.mubr.bf16.gmra.mxu1 %v5432_v34  ;;  %9281 = vmatprep.subr.mxu1 %v16434_v47  ;;  %v6182_v10 = vpop.f32.mrf.mxu0  ;;  %16457 = vst [vmem:[#allocation88_spill] sm:$0xff] %v14438_v32 }
 0x6a1   : > { %9257 = vmatprep.mubr.bf16.mxu1 %v5434_v41  ;;  %9282 = vmatpush3.msra.mxu1 %v14427_v57  ;;  %v14431_v9 = vadd.f32 %v6357_v14, %v6181_v8  ;;  %v5437_v14 = vrot.slane %v14282_v60, 3  ;;  %v5436_v41 = vsel %vm1195_vm5, %v5433_v51, %v5435_v55  ;;  %v14457_v60 = vld [vmem:[%s15859_s8 + $0x20] sm:$0xff]  ;;  %v14466_v51 = vld [vmem:[%s15859_s8 + $0x18] sm:$0xff] }
 0x6a2   : > { %v6364_v16 = vpop.f32.mrf.mxu1  ;;  %9283 = vmatprep.subr.mxu1 %v16434_v47  ;;  %v6185_v7 = vpop.f32.mrf.mxu0  ;;  %9238 = vmatmul.mubr.bf16.gmra.mxu0 %v5416_v3  ;;  %16459 = vst [vmem:[#allocation89_spill] sm:$0xff] %v14457_v60  ;;  %16460 = vst [vmem:[#allocation14_spill] sm:$0xff] %v14466_v51  ;;  %v16469_v57 = vld [vmem:[#allocation23_spill] sm:$0xff] }
 0x6a3   : > { %9284 = vmatpush3.msra.mxu1 %v14438_v32  ;;  %v6186_v35 = vadd.f32 %v6185_v7, %v14212_v11  ;;  %9241 = vmatprep.mubr.bf16.mxu0 %v5418_v49  ;;  %v5438_v3 = vsel %vm1195_vm5, %v5435_v55, %v5437_v14  ;;  %v5420_v49 = vsel %vm1195_vm5, %v5417_v50, %v5419_v26  ;;  %v14487_v50 = vld [vmem:[%s15859_s8 + $0x8] sm:$0xff] }
 0x6a4   : > { %v6365_v48 = vpop.f32.mrf.mxu1  ;;  %9285 = vmatprep.subr.mxu1 %v16434_v47  ;;  %v6187_v6 = vpop.f32.mrf.mxu0  ;;  %16462 = vst [vmem:[#allocation91_spill] sm:$0xff] %v14487_v50 }
 0x6a5   : > { %9286 = vmatpush3.msra.mxu1 %v14447_v5  ;;  %v14450_v40 = vadd.f32 %v6362_v1, %v6186_v35  ;;  %v5439_v35 = vrot.slane %v14296_v59, 3  ;;  %v14479_v6 = vld [vmem:[%s15859_s8 + $0x10] sm:$0xff] }
 0x6a6   : > { %v6367_v34 = vpop.f32.mrf.mxu1  ;;  %9287 = vmatprep.subr.mxu1 %v16434_v47  ;;  %v6188_v8 = vpop.f32.mrf.mxu0  ;;  %16461 = vst [vmem:[#allocation15_spill] sm:$0xff] %v14479_v6 }
 0x6a7   : > { %9288 = vmatpush3.msra.mxu1 %v14457_v60  ;;  %v6189_v10 = vadd.f32 %v6188_v8, %v14212_v11 }
 0x6a8   : > { %v6370_v16 = vpop.f32.mrf.mxu1  ;;  %9258 = vmatmul.mubr.bf16.gmra.mxu1 %v5436_v41  ;;  %9289 = vmatprep.subr.mxu1 %v16434_v47  ;;  %v6190_v1 = vpop.f32.mrf.mxu0  ;;  %v5440_v41 = vsel %vm1195_vm5, %v5437_v14, %v5439_v35 }
 0x6a9   : > { %9261 = vmatprep.mubr.bf16.mxu1 %v5438_v3  ;;  %9290 = vmatpush3.msra.mxu1 %v14466_v51  ;;  %v14472_v38 = vadd.f32 %v6365_v48, %v6189_v10  ;;  %v14497_v10 = vld [vmem:[%s15859_s8] sm:$0xff] }
 0x6aa   : > { %v6372_v7 = vpop.f32.mrf.mxu1  ;;  %9291 = vmatprep.subr.mxu1 %v16434_v47  ;;  %v6193_v55 = vpop.f32.mrf.mxu0  ;;  %9242 = vmatmul.mubr.bf16.gmra.mxu0 %v5420_v49  ;;  %16463 = vst [vmem:[#allocation16_spill] sm:$0xff] %v14497_v10 }
 0x6ab   : > { %9292 = vmatpush3.msra.mxu1 %v14479_v6  ;;  %v6194_v34 = vadd.f32 %v6193_v55, %v14212_v11 }
 0x6ac   : > { %v6373_v2 = vpop.f32.mrf.mxu1  ;;  %9293 = vmatprep.subr.mxu1 %v16434_v47  ;;  %v6195_v26 = vpop.f32.mrf.mxu0 }
 0x6ad   : > { %9294 = vmatpush3.msra.mxu1 %v14487_v50  ;;  %v14490_v48 = vadd.f32 %v6370_v16, %v6194_v34 }
 0x6ae   : > { %v6375_v59 = vpop.f32.mrf.mxu1  ;;  %9295 = vmatprep.subr.mxu1 %v16434_v47  ;;  %v6196_v8 = vpop.f32.mrf.mxu0 }
 0x6af   : > { %9296 = vmatpush3.msra.mxu1 %v14497_v10  ;;  %v6197_v3 = vadd.f32 %v6196_v8, %v14212_v11 }
 0x6b0   : > { %v6378_v1 = vpop.f32.mrf.mxu1  ;;  %9262 = vmatmul.mubr.bf16.gmra.mxu1 %v5440_v41  ;;  %9300 = vmatprep.subr.mxu1 %v16434_v47  ;;  %v6198_v16 = vpop.f32.mrf.mxu0 }
 0x6b1   : > { %9297 = vmatprep.mubr.msk.f32.mxu1 %vm10101_vm12, %v16434_v47  ;;  %v14504_v49 = vadd.f32 %v6373_v2, %v6197_v3 }
 0x6b2   : > { %v6380_v7 = vpop.f32.mrf.mxu1  ;;  %v6201_v14 = vpop.f32.mrf.mxu0 }
 0x6b3   : > { %v6202_v55 = vadd.f32 %v6201_v14, %v14212_v11 }
 0x6b4   : > { %v6381_v35 = vpop.f32.mrf.mxu1  ;;  %v6203_v34 = vpop.f32.mrf.mxu0 }
 0x6b5   : > { %v14507_v59 = vadd.f32 %v6378_v1, %v6202_v55 }
 0x6b6   : > { %v6383_v26 = vpop.f32.mrf.mxu1  ;;  %v6204_v8 = vpop.f32.mrf.mxu0 }
 0x6b7   : > { %v6205_v41 = vadd.f32 %v6204_v8, %v14212_v11 }
 0x6b8   : > { %v6386_v45 = vpop.f32.mrf.mxu1  ;;  %v6206_v10 = vpop.f32.mrf.mxu0 }
 0x6b9   : > { %v14510_v50 = vadd.f32 %v6381_v35, %v6205_v41 }
 0x6ba   : > { %v6388_v16 = vpop.f32.mrf.mxu1  ;;  %v6209_v6 = vpop.f32.mrf.mxu0 }
 0x6bb   : > { %v6210_v2 = vadd.f32 %v6209_v6, %v14212_v11 }
 0x6bc   : > { %v6389_v3 = vpop.f32.mrf.mxu1  ;;  %v6211_v7 = vpop.f32.mrf.mxu0 }
 0x6bd   : > { %v14513_v14 = vadd.f32 %v6386_v45, %v6210_v2 }
 0x6be   : > { %v6391_v51 = vpop.f32.mrf.mxu1  ;;  %v6212_v34 = vpop.f32.mrf.mxu0 }
 0x6bf   : > { %v6213_v1 = vadd.f32 %v6212_v34, %v14212_v11 }
 0x6c0   : > { %v6604_v55 = vpop.f32.mrf.mxu1  ;;  %v6214_v26 = vpop.f32.mrf.mxu0 }
 0x6c1   : > { %v14516_v8 = vadd.f32 %v6389_v3, %v6213_v1 }
 0x6c2   : > { %v6606_v60 = vpop.f32.mrf.mxu1  ;;  %v6427_v10 = vpop.f32.mrf.mxu0 }
 0x6c3   : > { %v6428_v35 = vadd.f32 %v6427_v10, %v14218_v53 }
 0x6c4   : > { %v6607_v41 = vpop.f32.mrf.mxu1  ;;  %v6429_v16 = vpop.f32.mrf.mxu0 }
 0x6c5   : > { %v14519_v6 = vadd.f32 %v6604_v55, %v6428_v35 }
 0x6c6   : > { %v6609_v5 = vpop.f32.mrf.mxu1  ;;  %v6430_v7 = vpop.f32.mrf.mxu0 }
 0x6c7   : > { %v6431_v45 = vadd.f32 %v6430_v7, %v14223_v23 }
 0x6c8   : > { %v6612_v51 = vpop.f32.mrf.mxu1  ;;  %v6432_v2 = vpop.f32.mrf.mxu0 }
 0x6c9   : > { %v14522_v11 = vadd.f32 %v6607_v41, %v6431_v45 }
 0x6ca   : > { %v6614_v32 = vpop.f32.mrf.mxu1  ;;  %v6435_v34 = vpop.f32.mrf.mxu0 }
 0x6cb   : > { %v6436_v60 = vadd.f32 %v6435_v34, %v14228_v12 }
 0x6cc   : > { %v6615_v3 = vpop.f32.mrf.mxu1  ;;  %v6437_v1 = vpop.f32.mrf.mxu0 }
 0x6cd   : > { %v14525_v53 = vadd.f32 %v6612_v51, %v6436_v60 }
 0x6ce   : > { %v6617_v26 = vpop.f32.mrf.mxu1  ;;  %v6438_v10 = vpop.f32.mrf.mxu0 }
 0x6cf   : > { %v6439_v5 = vadd.f32 %v6438_v10, %v14233_v62 }
 0x6d0   : > { %v6620_v55 = vpop.f32.mrf.mxu1  ;;  %v6440_v35 = vpop.f32.mrf.mxu0 }
 0x6d1   : > { %v14528_v23 = vadd.f32 %v6615_v3, %v6439_v5 }
 0x6d2   : > { %v6622_v16 = vpop.f32.mrf.mxu1  ;;  %v6443_v7 = vpop.f32.mrf.mxu0 }
 0x6d3   : > { %v6444_v32 = vadd.f32 %v6443_v7, %v14238_v24 }
 0x6d4   : > { %v6623_v41 = vpop.f32.mrf.mxu1  ;;  %v6445_v45 = vpop.f32.mrf.mxu0 }
 0x6d5   : > { %v14531_v12 = vadd.f32 %v6620_v55, %v6444_v32 }
 0x6d6   : > { %v6625_v2 = vpop.f32.mrf.mxu1  ;;  %v6446_v34 = vpop.f32.mrf.mxu0 }
 0x6d7   : > { %v6447_v51 = vadd.f32 %v6446_v34, %v14243_v52 }
 0x6d8   : > { %v6628_v60 = vpop.f32.mrf.mxu1  ;;  %v6448_v1 = vpop.f32.mrf.mxu0 }
 0x6d9   : > { %v14534_v62 = vadd.f32 %v6623_v41, %v6447_v51 }
 0x6da   : > { %v6630_v26 = vpop.f32.mrf.mxu1  ;;  %v6451_v10 = vpop.f32.mrf.mxu0 }
 0x6db   : > { %v6452_v3 = vadd.f32 %v6451_v10, %v14248_v15 }
 0x6dc   : > { %v6631_v5 = vpop.f32.mrf.mxu1  ;;  %v6453_v35 = vpop.f32.mrf.mxu0 }
 0x6dd   : > { %v14537_v24 = vadd.f32 %v6628_v60, %v6452_v3 }
 0x6de   : > { %v6633_v16 = vpop.f32.mrf.mxu1  ;;  %v6454_v7 = vpop.f32.mrf.mxu0 }
 0x6df   : > { %v6455_v55 = vadd.f32 %v6454_v7, %v14253_v33 }
 0x6e0   : > { %v6636_v32 = vpop.f32.mrf.mxu1  ;;  %v6456_v45 = vpop.f32.mrf.mxu0 }
 0x6e1   : > { %v14540_v52 = vadd.f32 %v6631_v5, %v6455_v55 }
 0x6e2   : > { %v6638_v2 = vpop.f32.mrf.mxu1  ;;  %v6459_v34 = vpop.f32.mrf.mxu0 }
 0x6e3   : > { %v6460_v41 = vadd.f32 %v6459_v34, %v14258_v39 }
 0x6e4   : > { %v6639_v51 = vpop.f32.mrf.mxu1  ;;  %v6461_v1 = vpop.f32.mrf.mxu0 }
 0x6e5   : > { %v14543_v15 = vadd.f32 %v6636_v32, %v6460_v41 }
 0x6e6   : > { %v6641_v26 = vpop.f32.mrf.mxu1  ;;  %v6462_v10 = vpop.f32.mrf.mxu0 }
 0x6e7   : > { %v6463_v60 = vadd.f32 %v6462_v10, %v14263_v31 }
 0x6e8   : > { %v6644_v3 = vpop.f32.mrf.mxu1  ;;  %v6464_v35 = vpop.f32.mrf.mxu0 }
 0x6e9   : > { %v14546_v33 = vadd.f32 %v6639_v51, %v6463_v60 }
 0x6ea   : > { %v6646_v16 = vpop.f32.mrf.mxu1  ;;  %v6467_v7 = vpop.f32.mrf.mxu0 }
 0x6eb   : > { %v6468_v5 = vadd.f32 %v6467_v7, %v14268_v37 }
 0x6ec   : > { %v6647_v55 = vpop.f32.mrf.mxu1  ;;  %v6469_v45 = vpop.f32.mrf.mxu0 }
 0x6ed   : > { %v14549_v39 = vadd.f32 %v6644_v3, %v6468_v5 }
 0x6ee   : > { %v6649_v2 = vpop.f32.mrf.mxu1  ;;  %v6470_v34 = vpop.f32.mrf.mxu0 }
 0x6ef   : > { %v6471_v32 = vadd.f32 %v6470_v34, %v14273_v44 }
 0x6f0   : > { %v6652_v41 = vpop.f32.mrf.mxu1  ;;  %v6472_v1 = vpop.f32.mrf.mxu0 }
 0x6f1   : > { %v14552_v31 = vadd.f32 %v6647_v55, %v6471_v32 }
 0x6f2   : > { %v6654_v26 = vpop.f32.mrf.mxu1  ;;  %v6475_v10 = vpop.f32.mrf.mxu0 }
 0x6f3   : > { %v6476_v51 = vadd.f32 %v6475_v10, %v14278_v42 }
 0x6f4   : > { %v6655_v60 = vpop.f32.mrf.mxu1  ;;  %v6477_v35 = vpop.f32.mrf.mxu0 }
 0x6f5   : > { %v14555_v37 = vadd.f32 %v6652_v41, %v6476_v51 }
 0x6f6   : > { %v6657_v16 = vpop.f32.mrf.mxu1  ;;  %v6478_v7 = vpop.f32.mrf.mxu0 }
 0x6f7   : > { %v6479_v3 = vadd.f32 %v6478_v7, %v14285_v29 }
 0x6f8   : > { %v6660_v5 = vpop.f32.mrf.mxu1  ;;  %v6480_v45 = vpop.f32.mrf.mxu0 }
 0x6f9   : > { %v14558_v44 = vadd.f32 %v6655_v60, %v6479_v3 }
 0x6fa   : > { %v6662_v2 = vpop.f32.mrf.mxu1  ;;  %v6483_v34 = vpop.f32.mrf.mxu0 }
 0x6fb   : > { %v6484_v55 = vadd.f32 %v6483_v34, %v14292_v30 }
 0x6fc   : > { %v6663_v32 = vpop.f32.mrf.mxu1  ;;  %v6485_v1 = vpop.f32.mrf.mxu0 }
 0x6fd   : > { %v14561_v42 = vadd.f32 %v6660_v5, %v6484_v55 }
 0x6fe   : > { %v6665_v26 = vpop.f32.mrf.mxu1  ;;  %v6486_v10 = vpop.f32.mrf.mxu0 }
 0x6ff   : > { %v6487_v41 = vadd.f32 %v6486_v10, %v14299_v20 }
 0x700   : > { %v6668_v51 = vpop.f32.mrf.mxu1  ;;  %v6488_v35 = vpop.f32.mrf.mxu0 }
 0x701   : > { %v14564_v29 = vadd.f32 %v6663_v32, %v6487_v41 }
 0x702   : > { %v6670_v16 = vpop.f32.mrf.mxu1  ;;  %v6491_v7 = vpop.f32.mrf.mxu0 }
 0x703   : > { %v6492_v60 = vadd.f32 %v6491_v7, %v14306_v63 }
 0x704   : > { %v6671_v3 = vpop.f32.mrf.mxu1  ;;  %v6493_v45 = vpop.f32.mrf.mxu0 }
 0x705   : > { %v14567_v30 = vadd.f32 %v6668_v51, %v6492_v60 }
 0x706   : > { %v6673_v2 = vpop.f32.mrf.mxu1  ;;  %v6494_v34 = vpop.f32.mrf.mxu0 }
 0x707   : > { %v6495_v5 = vadd.f32 %v6494_v34, %v14312_v0 }
 0x708   : > { %v6676_v55 = vpop.f32.mrf.mxu1  ;;  %v6496_v1 = vpop.f32.mrf.mxu0 }
 0x709   : > { %v14570_v20 = vadd.f32 %v6671_v3, %v6495_v5 }
 0x70a   : > { %v6678_v26 = vpop.f32.mrf.mxu1  ;;  %v6499_v10 = vpop.f32.mrf.mxu0 }
 0x70b   : > { %v6500_v32 = vadd.f32 %v6499_v10, %v14317_v61 }
 0x70c   : > { %v6679_v41 = vpop.f32.mrf.mxu1  ;;  %v6501_v35 = vpop.f32.mrf.mxu0 }
 0x70d   : > { %v14573_v63 = vadd.f32 %v6676_v55, %v6500_v32 }
 0x70e   : > { %v6681_v16 = vpop.f32.mrf.mxu1  ;;  %v6502_v7 = vpop.f32.mrf.mxu0 }
 0x70f   : > { %v6503_v51 = vadd.f32 %v6502_v7, %v14322_v21 }
 0x710   : > { %v6684_v60 = vpop.f32.mrf.mxu1  ;;  %v6504_v45 = vpop.f32.mrf.mxu0 }
 0x711   : > { %v14576_v0 = vadd.f32 %v6679_v41, %v6503_v51 }
 0x712   : > { %v6686_v2 = vpop.f32.mrf.mxu1  ;;  %v6507_v34 = vpop.f32.mrf.mxu0 }
 0x713   : > { %v6508_v3 = vadd.f32 %v6507_v34, %v14330_v22 }
 0x714   : > { %v6687_v5 = vpop.f32.mrf.mxu1  ;;  %v6509_v1 = vpop.f32.mrf.mxu0 }
 0x715   : > { %v14579_v61 = vadd.f32 %v6684_v60, %v6508_v3 }
 0x716   : > { %v6689_v26 = vpop.f32.mrf.mxu1  ;;  %v6510_v10 = vpop.f32.mrf.mxu0 }
 0x717   : > { %v6511_v55 = vadd.f32 %v6510_v10, %v14339_v58 }
 0x718   : > { %v6692_v32 = vpop.f32.mrf.mxu1  ;;  %v6512_v35 = vpop.f32.mrf.mxu0 }
 0x719   : > { %v14582_v21 = vadd.f32 %v6687_v5, %v6511_v55 }
 0x71a   : > { %v6694_v16 = vpop.f32.mrf.mxu1  ;;  %v6515_v7 = vpop.f32.mrf.mxu0 }
 0x71b   : > { %v6516_v41 = vadd.f32 %v6515_v7, %v14343_v27 }
 0x71c   : > { %v6695_v51 = vpop.f32.mrf.mxu1  ;;  %v6517_v45 = vpop.f32.mrf.mxu0 }
 0x71d   : > { %v14585_v22 = vadd.f32 %v6692_v32, %v6516_v41 }
 0x71e   : > { %v6697_v2 = vpop.f32.mrf.mxu1  ;;  %v6518_v34 = vpop.f32.mrf.mxu0 }
 0x71f   : > { %v6519_v60 = vadd.f32 %v6518_v34, %v14355_v54 }
 0x720   : > { %v6700_v3 = vpop.f32.mrf.mxu1  ;;  %v6520_v1 = vpop.f32.mrf.mxu0 }
 0x721   : > { %v14588_v58 = vadd.f32 %v6695_v51, %v6519_v60 }
 0x722   : > { %v6702_v26 = vpop.f32.mrf.mxu1  ;;  %v6523_v10 = vpop.f32.mrf.mxu0 }
 0x723   : > { %v6524_v5 = vadd.f32 %v6523_v10, %v14373_v19 }
 0x724   : > { %v6703_v55 = vpop.f32.mrf.mxu1  ;;  %v6525_v35 = vpop.f32.mrf.mxu0 }
 0x725   : > { %v14591_v27 = vadd.f32 %v6700_v3, %v6524_v5 }
 0x726   : > { %v6705_v16 = vpop.f32.mrf.mxu1  ;;  %v6526_v7 = vpop.f32.mrf.mxu0 }
 0x727   : > { %v6527_v32 = vadd.f32 %v6526_v7, %v14393_v18 }
 0x728   : > { %v6708_v41 = vpop.f32.mrf.mxu1  ;;  %v6528_v45 = vpop.f32.mrf.mxu0 }
 0x729   : > { %v14594_v54 = vadd.f32 %v6703_v55, %v6527_v32 }
 0x72a   : > { %v6710_v2 = vpop.f32.mrf.mxu1  ;;  %v6531_v34 = vpop.f32.mrf.mxu0 }
 0x72b   : > { %v6532_v51 = vadd.f32 %v6531_v34, %v14411_v46 }
 0x72c   : > { %v6711_v60 = vpop.f32.mrf.mxu1  ;;  %v6533_v1 = vpop.f32.mrf.mxu0 }
 0x72d   : > { %v14597_v19 = vadd.f32 %v6708_v41, %v6532_v51 }
 0x72e   : > { %v6713_v26 = vpop.f32.mrf.mxu1  ;;  %v6534_v10 = vpop.f32.mrf.mxu0 }
 0x72f   : > { %v6535_v3 = vadd.f32 %v6534_v10, %v14431_v9 }
 0x730   : > { %v6716_v5 = vpop.f32.mrf.mxu1  ;;  %v6536_v35 = vpop.f32.mrf.mxu0 }
 0x731   : > { %v14600_v18 = vadd.f32 %v6711_v60, %v6535_v3 }
 0x732   : > { %v6718_v16 = vpop.f32.mrf.mxu1  ;;  %v6539_v7 = vpop.f32.mrf.mxu0 }
 0x733   : > { %v6540_v55 = vadd.f32 %v6539_v7, %v14450_v40 }
 0x734   : > { %v6719_v32 = vpop.f32.mrf.mxu1  ;;  %v6541_v45 = vpop.f32.mrf.mxu0 }
 0x735   : > { %v14603_v46 = vadd.f32 %v6716_v5, %v6540_v55 }
 0x736   : > { %v6721_v2 = vpop.f32.mrf.mxu1  ;;  %v6542_v34 = vpop.f32.mrf.mxu0 }
 0x737   : > { %v6543_v41 = vadd.f32 %v6542_v34, %v14472_v38 }
 0x738   : > { %v6724_v51 = vpop.f32.mrf.mxu1  ;;  %v6544_v1 = vpop.f32.mrf.mxu0 }
 0x739   : > { %v14606_v9 = vadd.f32 %v6719_v32, %v6543_v41 }
 0x73a   : > { %v6726_v26 = vpop.f32.mrf.mxu1  ;;  %v6547_v10 = vpop.f32.mrf.mxu0 }
 0x73b   : > { %v6548_v60 = vadd.f32 %v6547_v10, %v14490_v48 }
 0x73c   : > { %v6727_v3 = vpop.f32.mrf.mxu1  ;;  %v6549_v35 = vpop.f32.mrf.mxu0 }
 0x73d   : > { %v14609_v40 = vadd.f32 %v6724_v51, %v6548_v60 }
 0x73e   : > { %v6729_v16 = vpop.f32.mrf.mxu1  ;;  %v6550_v7 = vpop.f32.mrf.mxu0 }
 0x73f   : > { %v6551_v5 = vadd.f32 %v6550_v7, %v14504_v49 }
 0x740   : > { %v6732_v55 = vpop.f32.mrf.mxu1  ;;  %v6552_v45 = vpop.f32.mrf.mxu0 }
 0x741   : > { %v14612_v38 = vadd.f32 %v6727_v3, %v6551_v5 }
 0x742   : > { %v6734_v2 = vpop.f32.mrf.mxu1  ;;  %v6555_v34 = vpop.f32.mrf.mxu0 }
 0x743   : > { %v6556_v32 = vadd.f32 %v6555_v34, %v14507_v59 }
 0x744   : > { %v6735_v41 = vpop.f32.mrf.mxu1  ;;  %v6557_v1 = vpop.f32.mrf.mxu0 }
 0x745   : > { %v14615_v48 = vadd.f32 %v6732_v55, %v6556_v32 }
 0x746   : > { %v6737_v26 = vpop.f32.mrf.mxu1  ;;  %v6558_v10 = vpop.f32.mrf.mxu0 }
 0x747   : > { %v6559_v51 = vadd.f32 %v6558_v10, %v14510_v50 }
 0x748   : > { %v6740_v60 = vpop.f32.mrf.mxu1  ;;  %v6560_v35 = vpop.f32.mrf.mxu0 }
 0x749   : > { %v14618_v49 = vadd.f32 %v6735_v41, %v6559_v51 }
 0x74a   : > { %v6742_v16 = vpop.f32.mrf.mxu1  ;;  %v6563_v7 = vpop.f32.mrf.mxu0 }
 0x74b   : > { %v6564_v3 = vadd.f32 %v6563_v7, %v14513_v14 }
 0x74c   : > { %v6743_v5 = vpop.f32.mrf.mxu1  ;;  %v6565_v45 = vpop.f32.mrf.mxu0 }
 0x74d   : > { %v14621_v59 = vadd.f32 %v6740_v60, %v6564_v3  ;;  %v16466_v45 = vld [vmem:[#allocation22_spill] sm:$0xff] }
 0x74e   : > { %v6745_v2 = vpop.f32.mrf.mxu1  ;;  %v6566_v34 = vpop.f32.mrf.mxu0 }
 0x74f   : > { %v6567_v55 = vadd.f32 %v6566_v34, %v14516_v8 }
 0x750   : > { %v14624_v32 = vpop.f32.mrf.mxu1  ;;  %v6568_v1 = vpop.f32.mrf.mxu0 }
 0x751   : > { %v14628_v26 = vadd.f32 %v6743_v5, %v6567_v55  ;;  %v16468_v55 = vld [vmem:[#allocation24_spill] sm:$0xff] }
 0x752   : > { %v14626_v50 = vpop.f32.mrf.mxu1  ;;  %v9231_v41 = vpop.f32.mrf.mxu0 }
 0x753   : > { %v14640_v8 = vadd.f32 %v9231_v41, %v14525_v53 }
 0x754   : > { %v14630_v10 = vpop.f32.mrf.mxu1  ;;  %v6781_v51 = vpop.f32.mrf.mxu0 }
 0x755   : > { %v14635_v60 = vadd.f32 %v6781_v51, %v14519_v6  ;;  %v6926_v53 = vmul.f32 %v14640_v8, %v16469_v57 }
 0x756   : > { %v14632_v14 = vpop.f32.mrf.mxu1  ;;  %v9232_v35 = vpop.f32.mrf.mxu0 }
 0x757   : > { %16464 = vst [vmem:[#allocation17_spill] sm:$0xff] %v14635_v60  ;;  %v6924_v2 = vmul.f32 %v14635_v60, %v16466_v45  ;;  %v14648_v34 = vadd.f32 %v9232_v35, %v14528_v23 }
 0x758   : > { %v6784_v16 = vpop.f32.mrf.mxu0  ;;  %v14637_v7 = vpop.f32.mrf.mxu1 }
 0x759   : > { %v14643_v3 = vadd.f32 %v6784_v16, %v14522_v11  ;;  %16467 = vst [vmem:[#allocation34_spill] sm:$0xff] %v14648_v34  ;;  %v6927_v45 = vmul.f32 %v14648_v34, %v16470_v4  ;;  %v16474_v4 = vld [vmem:[#allocation27_spill] sm:$0xff]  ;;  %v16475_v34 = vld [vmem:[#allocation28_spill] sm:$0xff] }
 0x75a   : > { %v9235_v5 = vpop.f32.mrf.mxu0  ;;  %v14652_v1 = vpop.f32.mrf.mxu1 }
 0x75b   : > { %16465 = vst [vmem:[#allocation93_spill] sm:$0xff] %v14643_v3  ;;  %v6925_v6 = vmul.f32 %v14643_v3, %v16468_v55  ;;  %v14664_v55 = vadd.f32 %v9235_v5, %v14537_v24  ;;  %v16471_v3 = vld [vmem:[#allocation26_spill] sm:$0xff] }
 0x75c   : > { %v6797_v51 = vpop.f32.mrf.mxu0  ;;  %v14661_v23 = vpop.f32.mrf.mxu1 }
 0x75d   : > { %v6960_v41 = vadd.f32 %v6925_v6, %v6924_v2  ;;  %v14657_v11 = vadd.f32 %v6797_v51, %v14531_v12  ;;  %v6930_v24 = vmul.f32 %v14664_v55, %v16475_v34 }
 0x75e   : > { %v9236_v16 = vpop.f32.mrf.mxu0 }
 0x75f   : > { %v6961_v60 = vadd.f32 %v6960_v41, %v6926_v53  ;;  %v6928_v56 = vmul.f32 %v14657_v11, %v16471_v3  ;;  %v14672_v51 = vadd.f32 %v9236_v16, %v14540_v52  ;;  %v6864_v41 = vpop.f32.mrf.mxu1 }
 0x760   : > { %v6800_v35 = vpop.f32.mrf.mxu0 }
 0x761   : > { %v6962_v13 = vadd.f32 %v6961_v60, %v6927_v45  ;;  %v14669_v2 = vadd.f32 %v6800_v35, %v14534_v62  ;;  %16473 = vst [vmem:[#allocation101_spill] sm:$0xff] %v14672_v51  ;;  %v16476_v62 = vld [vmem:[#allocation29_spill] sm:$0xff]  ;;  %v16477_v35 = vld [vmem:[#allocation30_spill] sm:$0xff] }
 0x762   : > { %v9239_v12 = vpop.f32.mrf.mxu0  ;;  %v6931_v45 = vmul.f32 %v14672_v51, %v16476_v62  ;;  %v16479_v62 = vld [vmem:[#allocation31_spill] sm:$0xff]  ;;  %v16480_v51 = vld [vmem:[#allocation32_spill] sm:$0xff] }
 0x763   : > { %16472 = vst [vmem:[#allocation35_spill] sm:$0xff] %v14669_v2  ;;  %v6963_v6 = vadd.f32 %v6962_v13, %v6928_v56  ;;  %v6929_v53 = vmul.f32 %v14669_v2, %v16474_v4  ;;  %v14683_v56 = vpop.f32.mrf.mxu1  ;;  %v14686_v16 = vadd.f32 %v9239_v12, %v14549_v39 }
 0x764   : > { %v6813_v57 = vpop.f32.mrf.mxu0 }
 0x765   : > { %v6964_v5 = vadd.f32 %v6963_v6, %v6929_v53  ;;  %v14679_v3 = vadd.f32 %v6813_v57, %v14543_v15  ;;  %v6934_v39 = vmul.f32 %v14686_v16, %v16480_v51 }
 0x766   : > { %v9240_v60 = vpop.f32.mrf.mxu0 }
 0x767   : > { %v6965_v13 = vadd.f32 %v6964_v5, %v6930_v24  ;;  %v6932_v4 = vmul.f32 %v14679_v3, %v16477_v35  ;;  %v14694_v53 = vadd.f32 %v9240_v60, %v14552_v31  ;;  %v6877_v5 = vpop.f32.mrf.mxu1 }
 0x768   : > { %v6816_v52 = vpop.f32.mrf.mxu0 }
 0x769   : > { %v6966_v2 = vadd.f32 %v6965_v13, %v6931_v45  ;;  %v14691_v6 = vadd.f32 %v6816_v52, %v14546_v33  ;;  %v16481_v33 = vld [vmem:[#allocation33_spill] sm:$0xff]  ;;  %v16482_v52 = vld [vmem:[#allocation36_spill] sm:$0xff] }
 0x76a   : > { %v9243_v57 = vpop.f32.mrf.mxu0  ;;  %v6935_v13 = vmul.f32 %v14694_v53, %v16481_v33 }
 0x76b   : > { %16478 = vst [vmem:[#allocation102_spill] sm:$0xff] %v14691_v6  ;;  %v6967_v15 = vadd.f32 %v6966_v2, %v6932_v4  ;;  %v6933_v24 = vmul.f32 %v14691_v6, %v16479_v62  ;;  %v9256_v2 = vpop.f32.mrf.mxu1  ;;  %v14706_v60 = vadd.f32 %v9243_v57, %v14561_v42  ;;  %v16484_v42 = vld [vmem:[#allocation38_spill] sm:$0xff] }
 0x76c   : > { %v6829_v34 = vpop.f32.mrf.mxu0 }
 0x76d   : > { %v6968_v12 = vadd.f32 %v6967_v15, %v6933_v24  ;;  %v14701_v35 = vadd.f32 %v6829_v34, %v14555_v37  ;;  %v16483_v34 = vld [vmem:[#allocation37_spill] sm:$0xff]  ;;  %v6938_v57 = vmul.f32 %v14706_v60, %v16484_v42 }
 0x76e   : > { %v9244_v45 = vpop.f32.mrf.mxu0 }
 0x76f   : > { %v6969_v4 = vadd.f32 %v6968_v12, %v6934_v39  ;;  %v6936_v62 = vmul.f32 %v14701_v35, %v16482_v52  ;;  %v14714_v37 = vadd.f32 %v9244_v45, %v14564_v29  ;;  %v6880_v39 = vpop.f32.mrf.mxu1  ;;  %v14720_v12 = vadd.f32 %v14626_v50, %v14567_v30 }
 0x770   : > { %v6832_v31 = vpop.f32.mrf.mxu0 }
 0x771   : > { %v6970_v6 = vadd.f32 %v6969_v4, %v6935_v13  ;;  %v14711_v51 = vadd.f32 %v6832_v31, %v14558_v44  ;;  %v14726_v44 = vadd.f32 %v14632_v14, %v14570_v20  ;;  %v9259_v45 = vpop.f32.mrf.mxu1  ;;  %v14732_v13 = vadd.f32 %v14624_v32, %v14573_v63  ;;  %v16486_v4 = vld [vmem:[#allocation40_spill] sm:$0xff] }
 0x772   : > { %v6940_v30 = vmul.f32 %v14720_v12, %v16486_v4  ;;  %v14738_v31 = vadd.f32 %v14630_v10, %v14576_v0  ;;  %v14746_v63 = vadd.f32 %v14652_v1, %v14579_v61  ;;  %v14761_v61 = vadd.f32 %v14661_v23, %v14588_v58  ;;  %v16491_v1 = vld [vmem:[#allocation45_spill] sm:$0xff] }
 0x773   : > { %v6971_v15 = vadd.f32 %v6970_v6, %v6936_v62  ;;  %v6937_v24 = vmul.f32 %v14711_v51, %v16483_v34  ;;  %v16485_v62 = vld [vmem:[#allocation39_spill] sm:$0xff] }
 0x774   : > { %v6939_v29 = vmul.f32 %v14714_v37, %v16485_v62  ;;  %v16488_v62 = vld [vmem:[#allocation42_spill] sm:$0xff] }
 0x775   : > { %v6972_v52 = vadd.f32 %v6971_v15, %v6937_v24  ;;  %v16487_v15 = vld [vmem:[#allocation41_spill] sm:$0xff]  ;;  %v6893_v24 = vpop.f32.mrf.mxu1 }
 0x776   : > { %v6941_v20 = vmul.f32 %v14726_v44, %v16487_v15 }
 0x777   : > { %v6973_v6 = vadd.f32 %v6972_v52, %v6938_v57  ;;  %v6942_v52 = vmul.f32 %v14732_v13, %v16488_v62  ;;  %v16489_v57 = vld [vmem:[#allocation43_spill] sm:$0xff]  ;;  %v9260_v10 = vpop.f32.mrf.mxu1 }
 0x779   : > { %v6974_v50 = vadd.f32 %v6973_v6, %v6939_v29  ;;  %v6943_v29 = vmul.f32 %v14738_v31, %v16489_v57  ;;  %v14751_v6 = vadd.f32 %v6864_v41, %v14582_v21  ;;  %v6896_v21 = vpop.f32.mrf.mxu1  ;;  %v16492_v41 = vld [vmem:[#allocation46_spill] sm:$0xff] }
 0x77b   : > { %v6975_v14 = vadd.f32 %v6974_v50, %v6940_v30  ;;  %v14755_v30 = vadd.f32 %v14637_v7, %v14585_v22  ;;  %v16490_v50 = vld [vmem:[#allocation44_spill] sm:$0xff]  ;;  %v16493_v7 = vld [vmem:[#allocation47_spill] sm:$0xff]  ;;  %v9263_v23 = vpop.f32.mrf.mxu1 }
 0x77c   : > { %v6944_v62 = vmul.f32 %v14746_v63, %v16490_v50  ;;  %v6947_v50 = vmul.f32 %v14761_v61, %v16493_v7 }
 0x77d   : > { %v6976_v32 = vadd.f32 %v6975_v14, %v6941_v20  ;;  %v6945_v20 = vmul.f32 %v14751_v6, %v16491_v1  ;;  %v6909_v7 = vpop.f32.mrf.mxu1 }
 0x77f   : > { %v6977_v0 = vadd.f32 %v6976_v32, %v6942_v52  ;;  %v6946_v52 = vmul.f32 %v14755_v30, %v16492_v41  ;;  %v14768_v32 = vadd.f32 %v6877_v5, %v14591_v27  ;;  %v14782_v27 = vadd.f32 %v9256_v2, %v14600_v18  ;;  %v16495_v5 = vld [vmem:[#allocation49_spill] sm:$0xff]  ;;  %v9264_v2 = vpop.f32.mrf.mxu1 }
 0x781   : > { %v6978_v15 = vadd.f32 %v6977_v0, %v6943_v29  ;;  %v14773_v29 = vadd.f32 %v6880_v39, %v14594_v54  ;;  %v14777_v0 = vadd.f32 %v14683_v56, %v14597_v19  ;;  %v16496_v54 = vld [vmem:[#allocation50_spill] sm:$0xff]  ;;  %v16497_v56 = vld [vmem:[#allocation51_spill] sm:$0xff] }
 0x783   : > { %v6979_v14 = vadd.f32 %v6978_v15, %v6944_v62  ;;  %v16494_v62 = vld [vmem:[#allocation48_spill] sm:$0xff]  ;;  %v6950_v39 = vmul.f32 %v14777_v0, %v16496_v54  ;;  %v14802_v54 = vadd.f32 %v9260_v10, %v14612_v38  ;;  %v14817_v38 = vadd.f32 %v9263_v23, %v14621_v59 }
 0x784   : > { %v6948_v15 = vmul.f32 %v14768_v32, %v16494_v62  ;;  %v16503_v10 = vld [vmem:[#allocation56_spill] sm:$0xff] }
 0x785   : > { %v6980_v22 = vadd.f32 %v6979_v14, %v6945_v20  ;;  %v6949_v20 = vmul.f32 %v14773_v29, %v16495_v5  ;;  %16502 = vst [vmem:[#allocation12_spill] sm:$0xff] %v14817_v38 }
 0x787   : > { %v6981_v58 = vadd.f32 %v6980_v22, %v6946_v52  ;;  %v14789_v52 = vadd.f32 %v6893_v24, %v14603_v46  ;;  %v6951_v22 = vmul.f32 %v14782_v27, %v16497_v56  ;;  %v16499_v46 = vld [vmem:[#allocation53_spill] sm:$0xff]  ;;  %v16500_v56 = vld [vmem:[#allocation54_spill] sm:$0xff] }
 0x789   : > { %v6982_v41 = vadd.f32 %v6981_v58, %v6947_v50  ;;  %v14794_v50 = vadd.f32 %v6896_v21, %v14606_v9  ;;  %v14797_v58 = vadd.f32 %v9259_v45, %v14609_v40  ;;  %v14809_v21 = vadd.f32 %v6909_v7, %v14615_v48  ;;  %v16501_v45 = vld [vmem:[#allocation55_spill] sm:$0xff]  ;;  %v16505_v48 = vld [vmem:[#allocation57_spill] sm:$0xff] }
 0x78b   : > { %v6983_v14 = vadd.f32 %v6982_v41, %v6948_v15  ;;  %v16498_v41 = vld [vmem:[#allocation52_spill] sm:$0xff]  ;;  %v6953_v24 = vmul.f32 %v14794_v50, %v16499_v46  ;;  %v6954_v9 = vmul.f32 %v14797_v58, %v16500_v56  ;;  %v14822_v56 = vadd.f32 %v9264_v2, %v14628_v26  ;;  %v16509_v26 = vld [vmem:[#allocation117_spill] sm:$0xff] }
 0x78c   : > { %v6952_v15 = vmul.f32 %v14789_v52, %v16498_v41  ;;  %v16514_v2 = vld [vmem:[#allocation89_spill] sm:$0xff] }
 0x78d   : > { %v6984_v19 = vadd.f32 %v6983_v14, %v6949_v20  ;;  %v6912_v14 = vpop.f32.mrf.mxu1  ;;  %16504 = vst [vmem:[#allocation18_spill] sm:$0xff] %v14822_v56 }
 0x78f   : > { %v6985_v18 = vadd.f32 %v6984_v19, %v6950_v39  ;;  %v6955_v39 = vmul.f32 %v14802_v54, %v16501_v45 }
 0x791   : > { %v6986_v5 = vadd.f32 %v6985_v18, %v6951_v22  ;;  %v14814_v22 = vadd.f32 %v6912_v14, %v14618_v49  ;;  %v16507_v49 = vld [vmem:[#allocation59_spill] sm:$0xff] }
 0x792   : > { %v6959_v14 = vmul.f32 %v14822_v56, %v16507_v49 }
 0x793   : > { %v6987_v20 = vadd.f32 %v6986_v5, %v6952_v15  ;;  %v6956_v5 = vmul.f32 %v14809_v21, %v16503_v10  ;;  %v6957_v7 = vmul.f32 %v14814_v22, %v16505_v48 }
 0x795   : > { %v6988_v40 = vadd.f32 %v6987_v20, %v6953_v24  ;;  %v16506_v24 = vld [vmem:[#allocation58_spill] sm:$0xff] }
 0x796   : > { %v6958_v20 = vmul.f32 %v14817_v38, %v16506_v24 }
 0x797   : > { %v6989_v19 = vadd.f32 %v6988_v40, %v6954_v9 }
 0x799   : > { %v6990_v18 = vadd.f32 %v6989_v19, %v6955_v39 }
 0x79b   : > { %v6991_v15 = vadd.f32 %v6990_v18, %v6956_v5  ;;  %v16517_v18 = vld [vmem:[#allocation91_spill] sm:$0xff] }
 0x79d   : > { %v6992_v9 = vadd.f32 %v6991_v15, %v6957_v7  ;;  %v16518_v15 = vld [vmem:[#allocation16_spill] sm:$0xff] }
 0x79e   : > { %v9657_v7 = vld [vmem:[%s15860_s9 + $0x38] sm:$0xff]  }
 0x79f   : > { %v6993_v59 = vadd.f32 %v6992_v9, %v6958_v20  ;;  %9335 = vmatprep.subr.bf16.mxu0 %v9657_v7  ;;  %v9658_v20 = vld [vmem:[%s15860_s9 + $0x30] sm:$0xff]   ;;  %v9659_v9 = vld [vmem:[%s15860_s9 + $0x28] sm:$0xff]  }
 0x7a0   : > { %9336 = vmatpush3.bf16.msra.mxu0 %v9657_v7 }
 0x7a1   : > { %v6994_v23 = vadd.f32 %v6993_v59, %v6959_v14  ;;  %9337 = vmatprep.subr.bf16.mxu0 %v9658_v20  ;;  %v9661_v14 = vld [vmem:[%s15860_s9 + $0x18] sm:$0xff]   ;;  %v9665_v59 = vld [vmem:[%s10286_s29 + $0x8] sm:$0xfe]  }
 0x7a3   : > { %v6995_v40 = vrot.slane %v6994_v23, 4 }
 0x7a4   : > { %9338 = vmatpush3.bf16.msra.mxu0 %v9658_v20 }
 0x7a5   : > { %v6996_v45 = vadd.f32 %v6995_v40, %v6994_v23  ;;  %9339 = vmatprep.subr.bf16.mxu0 %v9659_v9  ;;  %v9666_v23 = vld [vmem:[%s10286_s29 + $0x10] sm:$0xff]   ;;  %v7926_v40 = vshrl.u32 %v9665_v59, 16 }
 0x7a7   : > { %v6997_v10 = vrot.slane %v6996_v45, 2 }
 0x7a8   : > { %9340 = vmatpush3.bf16.msra.mxu0 %v9659_v9 }
 0x7a9   : > { %v6998_v39 = vadd.f32 %v6997_v10, %v6996_v45  ;;  %v16515_v45 = vld [vmem:[#allocation14_spill] sm:$0xff]  ;;  %v16516_v10 = vld [vmem:[#allocation15_spill] sm:$0xff] }
 0x7ab   : > { %v6999_v19 = vrot.slane %v6998_v39, 1 }
 0x7ad   : > { %v7000_v5 = vadd.f32 %v6999_v19, %v6998_v39  ;;  %v7929_v39 = vshll.u32 %v9665_v59, 16  ;;  %v9667_v19 = vld [vmem:[%s10286_s29 + $0x18] sm:$0xff]  }
 0x7af   : > { %9298 = vmatmul.mubr.f32.vlgmr.msra.gmra.mxu1 %v7000_v5  ;;  %v9662_v5 = vld [vmem:[%s15860_s9 + $0x10] sm:$0xff]  }
 0x7b0   : > { %9301 = vmatpush3.msra.mxu1 %v14351_v36  ;;  %9332 = vmatprep.mubr.msk.f32.mxu1 %vm10101_vm12, %v16434_v47  ;;  %v16508_v36 = vld [vmem:[#allocation82_spill] sm:$0xff] }
 0x7b1   : > { %9302 = vmatprep.subr.mxu1 %v16434_v47 }
 0x7b2   : > { %9303 = vmatpush3.msra.mxu1 %v14362_v28  ;;  %v16510_v28 = vld [vmem:[#allocation120_spill] sm:$0xff] }
 0x7b3   : > { %9304 = vmatprep.subr.mxu1 %v16434_v47 }
 0x7b4   : > { %9305 = vmatpush3.msra.mxu1 %v14370_v17  ;;  %v16511_v17 = vld [vmem:[#allocation121_spill] sm:$0xff] }
 0x7b5   : > { %9306 = vmatprep.subr.mxu1 %v16434_v47 }
 0x7b6   : > { %9307 = vmatpush3.msra.mxu1 %v14380_v43  ;;  %v16512_v43 = vld [vmem:[#allocation88_spill] sm:$0xff] }
 0x7b7   : > { %9308 = vmatprep.subr.mxu1 %v16434_v47 }
 0x7b8   : > { %9309 = vmatpush3.msra.mxu1 %v14389_v25  ;;  %v16513_v25 = vld [vmem:[#allocation13_spill] sm:$0xff] }
 0x7b9   : > { %9310 = vmatprep.subr.mxu1 %v16434_v47 }
 0x7ba   : > { %9311 = vmatpush3.msra.mxu1 %v16508_v36  ;;  %v7934_v36 = vshrl.u32 %v9666_v23, 16 }
 0x7bb   : > { %9312 = vmatprep.subr.mxu1 %v16434_v47 }
 0x7bc   : > { %9313 = vmatpush3.msra.mxu1 %v16509_v26  ;;  %v7937_v26 = vshll.u32 %v9666_v23, 16 }
 0x7bd   : > { %9314 = vmatprep.subr.mxu1 %v16434_v47 }
 0x7be   : > { %9315 = vmatpush3.msra.mxu1 %v16510_v28  ;;  %v9668_v28 = vld [vmem:[%s10286_s29 + $0x20] sm:$0xff]  }
 0x7bf   : > { %9316 = vmatprep.subr.mxu1 %v16434_v47  ;;  %v7952_v20 = vshrl.u32 %v9668_v28, 16  ;;  %v7955_v9 = vshll.u32 %v9668_v28, 16 }
 0x7c0   : > { %9317 = vmatpush3.msra.mxu1 %v16511_v17  ;;  %v7928_v17 = vrot.slane %v7926_v40, 1  ;;  %v9669_v40 = vld [vmem:[%s10286_s29 + $0x28] sm:$0xff]  }
 0x7c1   : > { %9318 = vmatprep.subr.mxu1 %v16434_v47  ;;  %v7961_v28 = vshrl.u32 %v9669_v40, 16 }
 0x7c2   : > { %9319 = vmatpush3.msra.mxu1 %v16512_v43  ;;  %v7931_v43 = vrot.slane %v7929_v39, 2  ;;  %v7954_v39 = vrot.slane %v7952_v20, 1 }
 0x7c3   : > { %9320 = vmatprep.subr.mxu1 %v16434_v47 }
 0x7c4   : > { %9321 = vmatpush3.msra.mxu1 %v16513_v25  ;;  %v7936_v25 = vrot.slane %v7934_v36, 1  ;;  %v9670_v36 = vld [vmem:[%s10286_s29 + $0x30] sm:$0xff]  }
 0x7c5   : > { %9322 = vmatprep.subr.mxu1 %v16434_v47 }
 0x7c6   : > { %9323 = vmatpush3.msra.mxu1 %v16514_v2  ;;  %v7939_v2 = vrot.slane %v7937_v26, 2 }
 0x7c7   : > { %9324 = vmatprep.subr.mxu1 %v16434_v47 }
 0x7c8   : > { %9325 = vmatpush3.msra.mxu1 %v16515_v45  ;;  %v7932_v45 = vor.u32 %v7931_v43, %v7928_v17  ;;  %v7940_v7 = vor.u32 %v7939_v2, %v7936_v25  ;;  %v7964_v17 = vshll.u32 %v9669_v40, 16  ;;  %v7970_v43 = vshrl.u32 %v9670_v36, 16 }
 0x7c9   : > { %9326 = vmatprep.subr.mxu1 %v16434_v47  ;;  %v7973_v25 = vshll.u32 %v9670_v36, 16 }
 0x7ca   : > { %9327 = vmatpush3.msra.mxu1 %v16516_v10  ;;  %v7943_v10 = vshrl.u32 %v9667_v19, 16  ;;  %v7972_v20 = vrot.slane %v7970_v43, 1 }
 0x7cb   : > { %9328 = vmatprep.subr.mxu1 %v16434_v47 }
 0x7cc   : > { %9329 = vmatpush3.msra.mxu1 %v16517_v18  ;;  %v7946_v18 = vshll.u32 %v9667_v19, 16  ;;  %v7945_v59 = vrot.slane %v7943_v10, 1  ;;  %v7957_v19 = vrot.slane %v7955_v9, 2  ;;  %v7966_v10 = vrot.slane %v7964_v17, 2 }
 0x7cd   : > { %9330 = vmatprep.subr.mxu1 %v16434_v47  ;;  %v9660_v47 = vld [vmem:[%s15860_s9 + $0x20] sm:$0xff]   ;;  %v7975_v9 = vrot.slane %v7973_v25, 2 }
 0x7ce   : > { %9331 = vmatpush3.msra.mxu1 %v16518_v15  ;;  %9341 = vmatprep.subr.bf16.mxu0 %v9660_v47  ;;  %v9663_v15 = vld [vmem:[%s15860_s9 + $0x8] sm:$0xff]   ;;  %v7948_v23 = vrot.slane %v7946_v18, 2  ;;  %v9671_v18 = vld [vmem:[%s10286_s29 + $0x38] sm:$0xff]  }
 0x7cf   : > { %9342 = vmatpush3.bf16.msra.mxu0 %v9660_v47  ;;  %v7941_v47 = vsel %vm892_vm3, %v7932_v45, %v7940_v7  ;;  %v7963_v45 = vrot.slane %v7961_v28, 1  ;;  %v7982_v40 = vshll.u32 %v9671_v18, 16 }
 0x7d0   : > { %9343 = vmatprep.subr.bf16.mxu0 %v9661_v14  ;;  %9351 = vmatprep.mubr.bf16.mxu0 %v7941_v47  ;;  %v7949_v26 = vor.u32 %v7948_v23, %v7945_v59  ;;  %v7979_v23 = vshrl.u32 %v9671_v18, 16 }
 0x7d1   : > { %v7967_v59 = vor.u32 %v7966_v10, %v7963_v45  ;;  %v7984_v17 = vrot.slane %v7982_v40, 2 }
 0x7d2   : > { %v7950_v2 = vsel %vm892_vm3, %v7940_v7, %v7949_v26  ;;  %v7981_v28 = vrot.slane %v7979_v23, 1 }
 0x7d3   : > { %9344 = vmatpush3.bf16.msra.mxu0 %v9661_v14  ;;  %v9664_v14 = vld [vmem:[%s15860_s9] sm:$0xff]  }
 0x7d4   : > { %9345 = vmatprep.subr.bf16.mxu0 %v9662_v5  ;;  %v7985_v45 = vor.u32 %v7984_v17, %v7981_v28 }
 0x7d7   : > { %9346 = vmatpush3.bf16.msra.mxu0 %v9662_v5  ;;  %v7958_v5 = vor.u32 %v7957_v19, %v7954_v39  ;;  %v7976_v39 = vor.u32 %v7975_v9, %v7972_v20 }
 0x7d8   : > { %9347 = vmatprep.subr.bf16.mxu0 %v9663_v15 }
 0x7d9   : > { %v7959_v47 = vsel %vm892_vm3, %v7949_v26, %v7958_v5  ;;  %v7968_v7 = vsel %vm892_vm3, %v7958_v5, %v7967_v59  ;;  %v9673_v26 = vld [vmem:[%s10286_s29 + $0x48] sm:$0xff]   ;;  %v7977_v43 = vsel %vm892_vm3, %v7967_v59, %v7976_v39  ;;  %v9675_v5 = vld [vmem:[%s10286_s29 + $0x58] sm:$0xff]   ;;  %v7986_v23 = vsel %vm892_vm3, %v7976_v39, %v7985_v45 }
 0x7da   : > { %v7997_v10 = vshrl.u32 %v9673_v26, 16  ;;  %v8000_v18 = vshll.u32 %v9673_v26, 16  ;;  %v8018_v28 = vshll.u32 %v9675_v5, 16 }
 0x7db   : > { %9348 = vmatpush3.bf16.msra.mxu0 %v9663_v15  ;;  %v9672_v15 = vld [vmem:[%s10286_s29 + $0x40] sm:$0xff]  }
 0x7dc   : > { %9349 = vmatprep.subr.bf16.mxu0 %v9664_v14  ;;  %v7988_v19 = vshrl.u32 %v9672_v15, 16  ;;  %v7999_v40 = vrot.slane %v7997_v10, 1  ;;  %v8002_v24 = vrot.slane %v8000_v18, 2  ;;  %v8020_v10 = vrot.slane %v8018_v28, 2  ;;  %v9677_v18 = vld [vmem:[%s10286_s29 + $0x68] sm:$0xff]  }
 0x7de   : > { %v7990_v25 = vrot.slane %v7988_v19, 1  ;;  %v8003_v17 = vor.u32 %v8002_v24, %v7999_v40  ;;  %v16522_v24 = vld [vmem:[#allocation93_spill] sm:$0xff] }
 0x7df   : > { %9350 = vmatpush3.bf16.msra.mxu0 %v9664_v14  ;;  %v7991_v14 = vshll.u32 %v9672_v15, 16 }
 0x7e2   : > { %9352 = vmatmul.mubr.bf16.vlgmr.msra.gmra.mxu0 %v7950_v2  ;;  %v7993_v2 = vrot.slane %v7991_v14, 2 }
 0x7e3   : > { %9355 = vmatprep.mubr.bf16.mxu0 %v7959_v47  ;;  %v9674_v47 = vld [vmem:[%s10286_s29 + $0x50] sm:$0xff]  }
 0x7e4   : > { %v7994_v20 = vor.u32 %v7993_v2, %v7990_v25  ;;  %v8006_v9 = vshrl.u32 %v9674_v47, 16  ;;  %v8009_v15 = vshll.u32 %v9674_v47, 16  ;;  %v16519_v25 = vld [vmem:[#allocation7_spill] sm:$0xff] }
 0x7e6   : > { %v7995_v59 = vsel %vm892_vm3, %v7985_v45, %v7994_v20  ;;  %v8008_v19 = vrot.slane %v8006_v9, 1  ;;  %v8011_v14 = vrot.slane %v8009_v15, 2  ;;  %v8004_v48 = vsel %vm892_vm3, %v7994_v20, %v8003_v17  ;;  %v9678_v15 = vld [vmem:[%s10286_s29 + $0x70] sm:$0xff]  }
 0x7e8   : > { %v8012_v39 = vor.u32 %v8011_v14, %v8008_v19  ;;  %v8036_v19 = vshll.u32 %v9677_v18, 16  ;;  %v8042_v14 = vshrl.u32 %v9678_v15, 16 }
 0x7ea   : > { %9356 = vmatmul.mubr.bf16.gmra.mxu0 %v7968_v7  ;;  %v8015_v7 = vshrl.u32 %v9675_v5, 16 }
 0x7eb   : > { %9359 = vmatprep.mubr.bf16.mxu0 %v7977_v43 }
 0x7ec   : > { %v8017_v47 = vrot.slane %v8015_v7, 1  ;;  %v8045_v7 = vshll.u32 %v9678_v15, 16  ;;  %v8044_v15 = vrot.slane %v8042_v14, 1 }
 0x7f2   : > { %9360 = vmatmul.mubr.bf16.gmra.mxu0 %v7986_v23  ;;  %v16520_v23 = vld [vmem:[#allocation17_spill] sm:$0xff] }
 0x7f3   : > { %9363 = vmatprep.mubr.bf16.mxu0 %v7995_v59  ;;  %v8033_v59 = vshrl.u32 %v9677_v18, 16 }
 0x7f5   : > { %v8035_v18 = vrot.slane %v8033_v59, 1 }
 0x7fa   : > { %9364 = vmatmul.mubr.bf16.gmra.mxu0 %v8004_v48  ;;  %v16525_v48 = vld [vmem:[#allocation34_spill] sm:$0xff] }
 0x86f   : > { %v7067_v36 = vpop.f32.mrf.mxu1 }
 0x870   : > { %v14907_v2 = vrot.slane %v7067_v36, %v16519_v25  ;;  %v8013_v36 = vsel %vm892_vm3, %v8003_v17, %v8012_v39  ;;  %v9679_v17 = vld [vmem:[%s10286_s29 + $0x78] sm:$0xff]  }
 0x871   : > { %v9299_v49 = vpop.f32.mrf.mxu1  ;;  %9367 = vmatprep.mubr.bf16.mxu0 %v8013_v36  ;;  %v8051_v56 = vshrl.u32 %v9679_v17, 16 }
 0x872   : > { %v9676_v49 = vld [vmem:[%s10286_s29 + $0x60] sm:$0xff]   ;;  %v14914_v5 = vsub.f32 %v16520_v23, %v14907_v2  ;;  %v14918_v40 = vsub.f32 %v16522_v24, %v14907_v2  ;;  %v14923_v28 = vsub.f32 %v14640_v8, %v14907_v2  ;;  %v8047_v8 = vrot.slane %v8045_v7, 2 }
 0x873   : > { %v8024_v26 = vshrl.u32 %v9676_v49, 16  ;;  %v8027_v43 = vshll.u32 %v9676_v49, 16  ;;  %v8021_v49 = vor.u32 %v8020_v10, %v8017_v47  ;;  %v14932_v47 = vsub.f32 %v16525_v48, %v14907_v2  ;;  %v9680_v23 = vld [vmem:[%s10286_s29 + $0x80] sm:$0xff]  }
 0x874   : > { %16521 = vst [vmem:[#allocation10_spill] sm:$0xff] %v14914_v5  ;;  %16523 = vst [vmem:[#allocation105_spill] sm:$0xff] %v14918_v40  ;;  %v14939_v24 = vsub.f32 %v14657_v11, %v14907_v2  ;;  %v7113_v36 = vmul.f32 %v14923_v28, %v14923_v28  ;;  %v16528_v48 = vld [vmem:[#allocation24_spill] sm:$0xff]  ;;  %v14953_v11 = vsub.f32 %v14664_v55, %v14907_v2  ;;  %v8063_v7 = vshll.u32 %v9680_v23, 16 }
 0x875   : > { %v8026_v45 = vrot.slane %v8024_v26, 1  ;;  %v8029_v9 = vrot.slane %v8027_v43, 2  ;;  %16524 = vst [vmem:[#allocation104_spill] sm:$0xff] %v14923_v28  ;;  %v7111_v26 = vmul.f32 %v14914_v5, %v14914_v5  ;;  %v7112_v43 = vmul.f32 %v14918_v40, %v14918_v40  ;;  %16526 = vst [vmem:[#allocation62_spill] sm:$0xff] %v14932_v47  ;;  %v16527_v40 = vld [vmem:[#allocation22_spill] sm:$0xff] }
 0x876   : > { %v8022_v10 = vsel %vm892_vm3, %v8012_v39, %v8021_v49  ;;  %v8054_v39 = vshll.u32 %v9679_v17, 16  ;;  %16531 = vst [vmem:[#allocation61_spill] sm:$0xff] %v14953_v11  ;;  %v8053_v28 = vrot.slane %v8051_v56, 1 }
 0x877   : > { %v8030_v20 = vor.u32 %v8029_v9, %v8026_v45  ;;  %v8038_v9 = vrot.slane %v8036_v19, 2  ;;  %v7147_v5 = vmul.f32 %v7111_v26, %v16527_v40  ;;  %v7148_v25 = vmul.f32 %v7112_v43, %v16528_v48  ;;  %9368 = vmatmul.mubr.bf16.gmra.mxu0 %v8022_v10  ;;  %v16532_v43 = vld [vmem:[#allocation23_spill] sm:$0xff]  ;;  %v16533_v10 = vld [vmem:[#allocation101_spill] sm:$0xff] }
 0x878   : > { %v7114_v19 = vmul.f32 %v14932_v47, %v14932_v47  ;;  %v8060_v40 = vshrl.u32 %v9680_v23, 16  ;;  %v7115_v26 = vmul.f32 %v14939_v24, %v14939_v24  ;;  %v7149_v17 = vmul.f32 %v7113_v36, %v16532_v43  ;;  %v9681_v47 = vld [vmem:[%s10286_s29 + $0x88] sm:$0xff]  }
 0x879   : > { %v8031_v45 = vsel %vm892_vm3, %v8021_v49, %v8030_v20  ;;  %v16529_v49 = vld [vmem:[#allocation35_spill] sm:$0xff]  ;;  %v8039_v14 = vor.u32 %v8038_v9, %v8035_v18  ;;  %v7183_v48 = vadd.f32 %v7148_v25, %v7147_v5  ;;  %v8056_v38 = vrot.slane %v8054_v39, 2  ;;  %v16534_v18 = vld [vmem:[#allocation25_spill] sm:$0xff] }
 0x87a   : > { %v14947_v59 = vsub.f32 %v16529_v49, %v14907_v2  ;;  %9371 = vmatprep.mubr.bf16.mxu0 %v8031_v45  ;;  %v8048_v49 = vor.u32 %v8047_v8, %v8044_v15  ;;  %v14961_v46 = vsub.f32 %v16533_v10, %v14907_v2  ;;  %v7150_v45 = vmul.f32 %v7114_v19, %v16534_v18  ;;  %v16535_v15 = vld [vmem:[#allocation26_spill] sm:$0xff]  ;;  %v16537_v18 = vld [vmem:[#allocation27_spill] sm:$0xff] }
 0x87b   : > { %v7184_v9 = vadd.f32 %v7183_v48, %v7149_v17  ;;  %v14968_v23 = vsub.f32 %v14679_v3, %v14907_v2  ;;  %v7117_v25 = vmul.f32 %v14953_v11, %v14953_v11  ;;  %v8040_v56 = vsel %vm892_vm3, %v8030_v20, %v8039_v14  ;;  %v9682_v10 = vld [vmem:[%s10286_s29 + $0x90] sm:$0xff]  }
 0x87c   : > { %16530 = vst [vmem:[#allocation63_spill] sm:$0xff] %v14947_v59  ;;  %v7116_v55 = vmul.f32 %v14947_v59, %v14947_v59  ;;  %v8062_v5 = vrot.slane %v8060_v40, 1  ;;  %v7151_v8 = vmul.f32 %v7115_v26, %v16535_v15  ;;  %v8049_v39 = vsel %vm892_vm3, %v8039_v14, %v8048_v49  ;;  %v16536_v17 = vld [vmem:[#allocation102_spill] sm:$0xff] }
 0x87d   : > { %v7185_v36 = vadd.f32 %v7184_v9, %v7150_v45  ;;  %v8065_v43 = vrot.slane %v8063_v7, 2  ;;  %v8057_v59 = vor.u32 %v8056_v38, %v8053_v28  ;;  %v8069_v19 = vshrl.u32 %v9681_v47, 16  ;;  %v16538_v38 = vld [vmem:[#allocation28_spill] sm:$0xff] }
 0x87e   : > { %v14978_v48 = vsub.f32 %v16536_v17, %v14907_v2  ;;  %v7118_v3 = vmul.f32 %v14961_v46, %v14961_v46  ;;  %v7152_v11 = vmul.f32 %v7116_v55, %v16537_v18  ;;  %v14985_v40 = vsub.f32 %v14686_v16, %v14907_v2 }
 0x87f   : > { %v7186_v20 = vadd.f32 %v7185_v36, %v7151_v8  ;;  %9372 = vmatmul.mubr.bf16.gmra.mxu0 %v8040_v56  ;;  %v7119_v14 = vmul.f32 %v14968_v23, %v14968_v23  ;;  %v7153_v28 = vmul.f32 %v7117_v25, %v16538_v38  ;;  %v8072_v7 = vshll.u32 %v9681_v47, 16  ;;  %v16539_v25 = vld [vmem:[#allocation29_spill] sm:$0xff]  ;;  %v16541_v38 = vld [vmem:[#allocation31_spill] sm:$0xff] }
 0x880   : > { %9375 = vmatprep.mubr.bf16.mxu0 %v8049_v39  ;;  %v8066_v45 = vor.u32 %v8065_v43, %v8062_v5  ;;  %v8078_v9 = vshrl.u32 %v9682_v10, 16  ;;  %v8081_v15 = vshll.u32 %v9682_v10, 16  ;;  %v14992_v55 = vsub.f32 %v14694_v53, %v14907_v2  ;;  %v9683_v10 = vld [vmem:[%s10286_s29 + $0x98] ss:$0 sps:$4 sm:$0x33]   ;;  %s10102_s29 = smov [#allocation3]  }
 0x881   : > { %v7187_v26 = vadd.f32 %v7186_v20, %v7152_v11  ;;  %v8071_v56 = vrot.slane %v8069_v19, 1  ;;  %v14996_v16 = vsub.f32 %v14701_v35, %v14907_v2  ;;  %v7120_v8 = vmul.f32 %v14978_v48, %v14978_v48  ;;  %v16540_v11 = vld [vmem:[#allocation30_spill] sm:$0xff]  ;;  %s10041_s26 = sshll.u32 %s10102_s29, 4  ;;  %s10042_s26 = int_to_ptr.vmem [resolvable:$false] %s10041_s26 }
 0x882   : > { %v7154_v36 = vmul.f32 %v7118_v3, %v16539_v25  ;;  %v7121_v47 = vmul.f32 %v14985_v40, %v14985_v40  ;;  %v7155_v5 = vmul.f32 %v7119_v14, %v16540_v11  ;;  %v8058_v43 = vsel %vm892_vm3, %v8048_v49, %v8057_v59  ;;  %s10043_s30 = scalar_lea.vmem %s10042_s26, 9216  ;;  %p10044_p0 = scmp.lt.s32.totalorder %s15806_s20, %s10042_s26 }
 0x883   : > { %v7188_v39 = vadd.f32 %v7187_v26, %v7153_v28  ;;  %v8074_v53 = vrot.slane %v8072_v7, 2  ;;  %v8067_v17 = vsel %vm892_vm3, %v8057_v59, %v8066_v45  ;;  %v8080_v35 = vrot.slane %v8078_v9, 1  ;;  %p10045_p1 = scmp.lt.s32.totalorder %s10043_s30, %s10037_s25 }
 0x884   : > { %v8083_v18 = vrot.slane %v8081_v15, 2  ;;  %v15009_v20 = vsub.f32 %v14711_v51, %v14907_v2  ;;  %v7122_v3 = vmul.f32 %v14992_v55, %v14992_v55  ;;  %v7156_v28 = vmul.f32 %v7120_v8, %v16541_v38  ;;  %v16542_v51 = vld [vmem:[#allocation32_spill] sm:$0xff] }
 0x885   : > { %v7189_v19 = vadd.f32 %v7188_v39, %v7154_v36  ;;  %v15016_v49 = vsub.f32 %v14706_v60, %v14907_v2  ;;  %v8075_v14 = vor.u32 %v8074_v53, %v8071_v56  ;;  %v8087_v59 = vshrl.u32 %v9683_v10, 16  ;;  %p10046_p2 = por %p10045_p1, %p10044_p0 }
 0x886   : > { %v8090_v7 = vshll.u32 %v9683_v10, 16  ;;  %v7123_v9 = vmul.f32 %v14996_v16, %v14996_v16  ;;  %v7157_v15 = vmul.f32 %v7121_v47, %v16542_v51  ;;  %v8084_v36 = vor.u32 %v8083_v18, %v8080_v35  ;;  %v16543_v10 = vld [vmem:[#allocation36_spill] sm:$0xff] }
 0x887   : > { %v7190_v26 = vadd.f32 %v7189_v19, %v7155_v5  ;;  %9376 = vmatmul.mubr.bf16.gmra.mxu0 %v8058_v43  ;;  %v15023_v8 = vsub.f32 %v14714_v37, %v14907_v2  ;;  %v7124_v39 = vmul.f32 %v15009_v20, %v15009_v20  ;;  %v7158_v60 = vmul.f32 %v7122_v3, %v16481_v33  ;;  %p10047_p3 = pnand %p10046_p2, %p10040_p13 }
 0x888   : > { %9379 = vmatprep.mubr.bf16.mxu0 %v8067_v17  ;;  %v15030_v56 = vsub.f32 %v14720_v12, %v14907_v2  ;;  %v8076_v5 = vsel %vm892_vm3, %v8066_v45, %v8075_v14  ;;  %v8089_v43 = vrot.slane %v8087_v59, 1  ;;  %v8092_v47 = vrot.slane %v8090_v7, 2 }
 0x889   : > { %v7191_v25 = vadd.f32 %v7190_v26, %v7156_v28  ;;  %v7125_v53 = vmul.f32 %v15016_v49, %v15016_v49  ;;  %v7159_v37 = vmul.f32 %v7123_v9, %v16543_v10  ;;  %v8085_v17 = vsel %vm892_vm3, %v8075_v14, %v8084_v36  ;;  %v16544_v14 = vld [vmem:[#allocation39_spill] sm:$0xff] }
 0x88a   : > { %v15039_v33 = vsub.f32 %v14726_v44, %v14907_v2  ;;  %v7126_v12 = vmul.f32 %v15023_v8, %v15023_v8  ;;  %v7160_v35 = vmul.f32 %v7124_v39, %v16483_v34  ;;  %v8093_v18 = vor.u32 %v8092_v47, %v8089_v43  ;;  %v16545_v39 = vld [vmem:[#allocation41_spill] sm:$0xff] }
 0x88b   : > { %v7192_v11 = vadd.f32 %v7191_v25, %v7157_v15  ;;  %v15046_v3 = vsub.f32 %v14732_v13, %v14907_v2  ;;  %v7127_v38 = vmul.f32 %v15030_v56, %v15030_v56  ;;  %v7161_v28 = vmul.f32 %v7125_v53, %v16484_v42 }
 0x88c   : > { %v15053_v26 = vsub.f32 %v14738_v31, %v14907_v2  ;;  %v7128_v34 = vmul.f32 %v15039_v33, %v15039_v33  ;;  %v7162_v59 = vmul.f32 %v7126_v12, %v16544_v14  ;;  %v8094_v9 = vsel %vm892_vm3, %v8084_v36, %v8093_v18  ;;  %v16549_v14 = vld [vmem:[#allocation47_spill] sm:$0xff] }
 0x88d   : > { %v7193_v19 = vadd.f32 %v7192_v11, %v7158_v60  ;;  %v15061_v13 = vsub.f32 %v14746_v63, %v14907_v2  ;;  %v7129_v42 = vmul.f32 %v15046_v3, %v15046_v3  ;;  %v7163_v51 = vmul.f32 %v7127_v38, %v16486_v4  ;;  %v16546_v4 = vld [vmem:[#allocation42_spill] sm:$0xff] }
 0x88e   : > { %v15068_v31 = vsub.f32 %v14751_v6, %v14907_v2  ;;  %v7130_v25 = vmul.f32 %v15053_v26, %v15053_v26  ;;  %v7164_v60 = vmul.f32 %v7128_v34, %v16545_v39  ;;  %v15075_v63 = vsub.f32 %v14755_v30, %v14907_v2  ;;  %v16548_v38 = vld [vmem:[#allocation46_spill] sm:$0xff] }
 0x88f   : > { %v7194_v45 = vadd.f32 %v7193_v19, %v7159_v37  ;;  %9380 = vmatmul.mubr.bf16.gmra.mxu0 %v8076_v5  ;;  %v7131_v11 = vmul.f32 %v15061_v13, %v15061_v13  ;;  %v7165_v5 = vmul.f32 %v7129_v42, %v16546_v4  ;;  %v15082_v6 = vsub.f32 %v14761_v61, %v14907_v2  ;;  %v16547_v19 = vld [vmem:[#allocation44_spill] sm:$0xff] }
 0x890   : > { %9383 = vmatprep.mubr.bf16.mxu0 %v8085_v17  ;;  %v7132_v47 = vmul.f32 %v15068_v31, %v15068_v31  ;;  %v7166_v53 = vmul.f32 %v7130_v25, %v16489_v57  ;;  %v15089_v30 = vsub.f32 %v14768_v32, %v14907_v2  ;;  %v7133_v37 = vmul.f32 %v15075_v63, %v15075_v63 }
 0x891   : > { %v7195_v44 = vadd.f32 %v7194_v45, %v7160_v35  ;;  %v7167_v17 = vmul.f32 %v7131_v11, %v16547_v19  ;;  %v15096_v61 = vsub.f32 %v14773_v29, %v14907_v2  ;;  %v7134_v35 = vmul.f32 %v15082_v6, %v15082_v6 }
 0x892   : > { %v7168_v57 = vmul.f32 %v7132_v47, %v16491_v1  ;;  %v15103_v32 = vsub.f32 %v14777_v0, %v14907_v2  ;;  %v7135_v18 = vmul.f32 %v15089_v30, %v15089_v30  ;;  %v15110_v29 = vsub.f32 %v14782_v27, %v14907_v2 }
 0x893   : > { %v7196_v7 = vadd.f32 %v7195_v44, %v7161_v28  ;;  %v7169_v28 = vmul.f32 %v7133_v37, %v16548_v38  ;;  %v7136_v34 = vmul.f32 %v15096_v61, %v15096_v61  ;;  %v7170_v1 = vmul.f32 %v7134_v35, %v16549_v14 }
 0x894   : > { %v15117_v0 = vsub.f32 %v14789_v52, %v14907_v2  ;;  %v15124_v27 = vsub.f32 %v14794_v50, %v14907_v2  ;;  %v15131_v52 = vsub.f32 %v14797_v58, %v14907_v2  ;;  %v15138_v50 = vsub.f32 %v14802_v54, %v14907_v2 }
 0x895   : > { %v7197_v15 = vadd.f32 %v7196_v7, %v7162_v59  ;;  %v7137_v7 = vmul.f32 %v15103_v32, %v15103_v32  ;;  %v15145_v58 = vsub.f32 %v14809_v21, %v14907_v2  ;;  %v15152_v54 = vsub.f32 %v14814_v22, %v14907_v2 }
 0x896   : > { %v7140_v4 = vmul.f32 %v15124_v27, %v15124_v27  ;;  %v7142_v19 = vmul.f32 %v15138_v50, %v15138_v50 }
 0x897   : > { %v7198_v36 = vadd.f32 %v7197_v15, %v7163_v51  ;;  %9384 = vmatmul.mubr.bf16.gmra.mxu0 %v8094_v9  ;;  %v7171_v9 = vmul.f32 %v7135_v18, %v16494_v62  ;;  %v7138_v51 = vmul.f32 %v15110_v29, %v15110_v29  ;;  %v16550_v15 = vld [vmem:[#allocation49_spill] sm:$0xff]  ;;  %v16555_v18 = vld [vmem:[#allocation54_spill] sm:$0xff] }
 0x898   : > { %v7172_v25 = vmul.f32 %v7136_v34, %v16550_v15  ;;  %v16557_v34 = vld [vmem:[#allocation55_spill] sm:$0xff]  ;;  %v16559_v15 = vld [vmem:[#allocation57_spill] sm:$0xff] }
 0x899   : > { %v7199_v43 = vadd.f32 %v7198_v36, %v7164_v60  ;;  %v7139_v60 = vmul.f32 %v15117_v0, %v15117_v0  ;;  %v16551_v36 = vld [vmem:[#allocation50_spill] sm:$0xff]  ;;  %v7178_v14 = vmul.f32 %v7142_v19, %v16557_v34 }
 0x89a   : > { %v7173_v62 = vmul.f32 %v7137_v7, %v16551_v36  ;;  %v16558_v7 = vld [vmem:[#allocation56_spill] sm:$0xff] }
 0x89b   : > { %v7200_v10 = vadd.f32 %v7199_v43, %v7165_v5  ;;  %v16552_v5 = vld [vmem:[#allocation51_spill] sm:$0xff] }
 0x89c   : > { %v7174_v43 = vmul.f32 %v7138_v51, %v16552_v5 }
 0x89d   : > { %v7201_v12 = vadd.f32 %v7200_v10, %v7166_v53  ;;  %v7141_v53 = vmul.f32 %v15131_v52, %v15131_v52  ;;  %v7175_v10 = vmul.f32 %v7139_v60, %v16498_v41 }
 0x89f   : > { %v7202_v45 = vadd.f32 %v7201_v12, %v7167_v17  ;;  %v16553_v17 = vld [vmem:[#allocation53_spill] sm:$0xff]  ;;  %v7177_v41 = vmul.f32 %v7141_v53, %v16555_v18 }
 0x8a0   : > { %v7176_v12 = vmul.f32 %v7140_v4, %v16553_v17 }
 0x8a1   : > { %v7203_v44 = vadd.f32 %v7202_v45, %v7168_v57  ;;  %v16554_v57 = vld [vmem:[#allocation12_spill] sm:$0xff]  ;;  %v7143_v45 = vmul.f32 %v15145_v58, %v15145_v58 }
 0x8a2   : > { %v15159_v21 = vsub.f32 %v16554_v57, %v14907_v2  ;;  %v9353_v17 = vpop.f32.mrf.mxu0 }
 0x8a3   : > { %v7204_v59 = vadd.f32 %v7203_v44, %v7169_v28  ;;  %v16556_v28 = vld [vmem:[#allocation18_spill] sm:$0xff]  ;;  %v7144_v44 = vmul.f32 %v15152_v54, %v15152_v54 }
 0x8a4   : > { %v15166_v22 = vsub.f32 %v16556_v28, %v14907_v2  ;;  %v16560_v2 = vld [vmem:[#allocation58_spill] sm:$0xff] }
 0x8a5   : > { %v7205_v42 = vadd.f32 %v7204_v59, %v7170_v1  ;;  %v7145_v59 = vmul.f32 %v15159_v21, %v15159_v21 }
 0x8a6   : > { %v7146_v51 = vmul.f32 %v15166_v22, %v15166_v22 }
 0x8a7   : > { %v7206_v39 = vadd.f32 %v7205_v42, %v7171_v9  ;;  %v7179_v9 = vmul.f32 %v7143_v45, %v16558_v7  ;;  %v7181_v60 = vmul.f32 %v7145_v59, %v16560_v2 }
 0x8a9   : > { %v7207_v11 = vadd.f32 %v7206_v39, %v7172_v25  ;;  %v7180_v25 = vmul.f32 %v7144_v44, %v16559_v15 }
 0x8ab   : > { %v7208_v47 = vadd.f32 %v7207_v11, %v7173_v62  ;;  %v16561_v62 = vld [vmem:[#allocation59_spill] sm:$0xff] }
 0x8ac   : > { %v7182_v11 = vmul.f32 %v7146_v51, %v16561_v62 }
 0x8ad   : > { %v7209_v37 = vadd.f32 %v7208_v47, %v7174_v43 }
 0x8af   : > { %v7210_v35 = vadd.f32 %v7209_v37, %v7175_v10 }
 0x8b1   : > { %v7211_v38 = vadd.f32 %v7210_v35, %v7176_v12  ;;  %v8195_v12 = vpop.f32.mrf.mxu0 }
 0x8b3   : > { %v7212_v1 = vadd.f32 %v7211_v38, %v7177_v41  ;;  %v9354_v35 = vpop.f32.mrf.mxu0 }
 0x8b5   : > { %v7213_v42 = vadd.f32 %v7212_v1, %v7178_v14  ;;  %v8198_v57 = vpop.f32.mrf.mxu0 }
 0x8b7   : > { %v7214_v39 = vadd.f32 %v7213_v42, %v7179_v9  ;;  %v9357_v45 = vpop.f32.mrf.mxu0 }
 0x8b9   : > { %v7215_v36 = vadd.f32 %v7214_v39, %v7180_v25  ;;  %v8211_v18 = vpop.f32.mrf.mxu0  ;;  %v16562_v39 = vld [vmem:[#allocation6_spill] sm:$0xff] }
 0x8ba   : > { %v7830_v2 = vsub.s32 7, %v16562_v39  ;;  %v7377_v62 = vsub.s32 5, %v16562_v39 }
 0x8bb   : > { %v7216_v4 = vadd.f32 %v7215_v36, %v7181_v60  ;;  %v9358_v41 = vpop.f32.mrf.mxu0  ;;  %v7337_v36 = vsub.s32 4, %v16562_v39 }
 0x8bd   : > { %v7217_v5 = vadd.f32 %v7216_v4, %v7182_v11  ;;  %v8214_v38 = vpop.f32.mrf.mxu0  ;;  %v10036_v11 = vld [vmem:[%s15858_s7] sm:$0xff] }
 0x8be   : > { %v15185_v4 = vrot.slane %v10036_v11, %v7830_v2  ;;  %v16570_v2 = vld [vmem:[#allocation7_spill] sm:$0xff] }
 0x8bf   : > { %v7218_v43 = vrot.slane %v7217_v5, 4  ;;  %v9361_v28 = vpop.f32.mrf.mxu0 }
 0x8c0   : > { %16563 = vst [vmem:[#allocation64_spill] sm:$0xff] %v15185_v4  ;;  %v15207_v39 = vadd.f32 %v8211_v18, %v15185_v4 }
 0x8c1   : > { %v7219_v47 = vadd.f32 %v7218_v43, %v7217_v5  ;;  %v8227_v44 = vpop.f32.mrf.mxu0 }
 0x8c2   : > { %16569 = vst [vmem:[#allocation110_spill] sm:$0xff] %v15207_v39 }
 0x8c3   : > { %v7220_v53 = vrot.slane %v7219_v47, 2  ;;  %v9362_v34 = vpop.f32.mrf.mxu0 }
 0x8c5   : > { %v7221_v10 = vadd.f32 %v7220_v53, %v7219_v47  ;;  %v8230_v14 = vpop.f32.mrf.mxu0  ;;  %v15187_v47 = vrot.slane %v10036_v11, %v7337_v36  ;;  %v15189_v53 = vrot.slane %v10036_v11, %v7377_v62 }
 0x8c6   : > { %v15226_v18 = vadd.f32 %v8230_v14, %v15185_v4 }
 0x8c7   : > { %v7222_v37 = vrot.slane %v7221_v10, 1  ;;  %v9365_v1 = vpop.f32.mrf.mxu0 }
 0x8c8   : > { %16576 = vst [vmem:[#allocation73_spill] sm:$0xff] %v15226_v18  ;;  %v15229_v62 = vadd.f32 %v9365_v1, %v15185_v4 }
 0x8c9   : > { %v7223_v19 = vadd.f32 %v7222_v37, %v7221_v10  ;;  %v8243_v59 = vpop.f32.mrf.mxu0  ;;  %v15192_v10 = vadd.f32 %v9353_v17, %v15185_v4  ;;  %v15195_v37 = vadd.f32 %v8195_v12, %v15185_v4  ;;  %v15211_v17 = vadd.f32 %v9358_v41, %v15185_v4 }
 0x8ca   : > { %v15214_v12 = vadd.f32 %v8214_v38, %v15185_v4  ;;  %16577 = vst [vmem:[#allocation74_spill] sm:$0xff] %v15229_v62  ;;  %v15232_v41 = vadd.f32 %v8243_v59, %v15185_v4 }
 0x8cb   : > { %9333 = vmatmul.mubr.f32.vlgmr.msra.gmra.mxu1 %v7223_v19  ;;  %v9366_v7 = vpop.f32.mrf.mxu0  ;;  %16564 = vst [vmem:[#allocation108_spill] sm:$0xff] %v15192_v10  ;;  %16565 = vst [vmem:[#allocation65_spill] sm:$0xff] %v15195_v37 }
 0x8cc   : > { %16571 = vst [vmem:[#allocation68_spill] sm:$0xff] %v15211_v17  ;;  %16572 = vst [vmem:[#allocation112_spill] sm:$0xff] %v15214_v12  ;;  %v15235_v38 = vadd.f32 %v9366_v7, %v15185_v4  ;;  %v16586_v7 = vld [vmem:[#allocation10_spill] sm:$0xff] }
 0x8cd   : > { %v8246_v15 = vpop.f32.mrf.mxu0  ;;  %16578 = vst [vmem:[#allocation116_spill] sm:$0xff] %v15232_v41 }
 0x8ce   : > { %16579 = vst [vmem:[#allocation115_spill] sm:$0xff] %v15235_v38 }
 0x937   : > { %v9369_v25 = vpop.f32.mrf.mxu0 }
 0x939   : > { %v8259_v60 = vpop.f32.mrf.mxu0 }
 0x93a   : > { %v15244_v11 = vadd.f32 %v8259_v60, %v15185_v4 }
 0x93b   : > { %v9370_v5 = vpop.f32.mrf.mxu0 }
 0x93c   : > { %16582 = vst [vmem:[#allocation37_spill] sm:$0xff] %v15244_v11  ;;  %v15247_v14 = vadd.f32 %v9370_v5, %v15185_v4  ;;  %v16590_v11 = vld [vmem:[#allocation63_spill] sm:$0xff]  ;;  %v16591_v5 = vld [vmem:[#allocation61_spill] sm:$0xff] }
 0x93d   : > { %v8262_v19 = vpop.f32.mrf.mxu0 }
 0x93e   : > { %16583 = vst [vmem:[#allocation38_spill] sm:$0xff] %v15247_v14  ;;  %v15250_v1 = vadd.f32 %v8262_v19, %v15185_v4 }
 0x940   : > { %16584 = vst [vmem:[#allocation40_spill] sm:$0xff] %v15250_v1 }
 0x98b   : > { %v7290_v9 = vpop.f32.mrf.mxu1 }
 0x98c   : > { %v7291_v42 = vadd.f32 1e-05, %v7290_v9  ;;  %v15198_v9 = vadd.f32 %v9354_v35, %v15185_v4  ;;  %v15217_v35 = vadd.f32 %v9361_v28, %v15185_v4  ;;  %v15238_v28 = vadd.f32 %v8246_v15, %v15185_v4  ;;  %v16587_v15 = vld [vmem:[#allocation105_spill] sm:$0xff] }
 0x98d   : > { %v9334_v51 = vpop.f32.mrf.mxu1 }
 0x98e   : > { %9834 = vrsqrt.f32 %v7291_v42  ;;  %16566 = vst [vmem:[#allocation109_spill] sm:$0xff] %v15198_v9  ;;  %v15201_v42 = vadd.f32 %v8198_v57, %v15185_v4  ;;  %v15204_v51 = vadd.f32 %v9357_v45, %v15185_v4  ;;  %16573 = vst [vmem:[#allocation69_spill] sm:$0xff] %v15217_v35  ;;  %v15220_v57 = vadd.f32 %v8227_v44, %v15185_v4 }
 0x98f   : > { %v15223_v45 = vadd.f32 %v9362_v34, %v15185_v4  ;;  %16580 = vst [vmem:[#allocation75_spill] sm:$0xff] %v15238_v28  ;;  %v15241_v44 = vadd.f32 %v9369_v25, %v15185_v4  ;;  %v9373_v34 = vpop.f32.mrf.mxu0  ;;  %v16588_v28 = vld [vmem:[#allocation104_spill] sm:$0xff] }
 0x990   : > { %16567 = vst [vmem:[#allocation66_spill] sm:$0xff] %v15201_v42  ;;  %16568 = vst [vmem:[#allocation67_spill] sm:$0xff] %v15204_v51  ;;  %v15253_v59 = vadd.f32 %v9373_v34, %v15185_v4 }
 0x991   : > { %16574 = vst [vmem:[#allocation113_spill] sm:$0xff] %v15220_v57  ;;  %16575 = vst [vmem:[#allocation71_spill] sm:$0xff] %v15223_v45 }
 0x992   : > { %16581 = vst [vmem:[#allocation33_spill] sm:$0xff] %v15241_v44  ;;  %16585 = vst [vmem:[#allocation43_spill] sm:$0xff] %v15253_v59  ;;  %v16589_v44 = vld [vmem:[#allocation62_spill] sm:$0xff] }
 0x99b   : > { %v9835_v43 = vpop.eup %9834 }
 0x99c   : > { %v7298_v36 = vrot.slane %v9835_v43, %v16570_v2 }
 0x99e   : > { %v7299_v43 = vmul.f32 %v7298_v36, %v16586_v7  ;;  %v7300_v2 = vmul.f32 %v7298_v36, %v16587_v15  ;;  %v7301_v25 = vmul.f32 %v7298_v36, %v16588_v28  ;;  %v7302_v38 = vmul.f32 %v7298_v36, %v16589_v44 }
 0x99f   : > { %v7303_v60 = vmul.f32 %v7298_v36, %v14939_v24  ;;  %v7304_v41 = vmul.f32 %v7298_v36, %v16590_v11  ;;  %v7305_v14 = vmul.f32 %v7298_v36, %v16591_v5  ;;  %v7306_v19 = vmul.f32 %v7298_v36, %v14961_v46 }
 0x9a0   : > { %v7307_v1 = vmul.f32 %v7298_v36, %v14968_v23  ;;  %v7308_v34 = vmul.f32 %v7298_v36, %v14978_v48  ;;  %v7309_v7 = vmul.f32 %v7298_v36, %v14985_v40  ;;  %v7310_v15 = vmul.f32 %v7298_v36, %v14992_v55 }
 0x9a1   : > { %v7311_v28 = vmul.f32 %v7298_v36, %v14996_v16  ;;  %v7312_v44 = vmul.f32 %v7298_v36, %v15009_v20  ;;  %v7313_v24 = vmul.f32 %v7298_v36, %v15016_v49  ;;  %v7314_v11 = vmul.f32 %v7298_v36, %v15023_v8 }
 0x9a2   : > { %v7315_v5 = vmul.f32 %v7298_v36, %v15030_v56  ;;  %v7316_v46 = vmul.f32 %v7298_v36, %v15039_v33  ;;  %v7317_v23 = vmul.f32 %v7298_v36, %v15046_v3  ;;  %v7318_v48 = vmul.f32 %v7298_v36, %v15053_v26 }
 0x9a3   : > { %v7319_v40 = vmul.f32 %v7298_v36, %v15061_v13  ;;  %v7320_v55 = vmul.f32 %v7298_v36, %v15068_v31  ;;  %v7321_v16 = vmul.f32 %v7298_v36, %v15075_v63  ;;  %v7322_v20 = vmul.f32 %v7298_v36, %v15082_v6 }
 0x9a4   : > { %v7323_v49 = vmul.f32 %v7298_v36, %v15089_v30  ;;  %v7324_v8 = vmul.f32 %v7298_v36, %v15096_v61  ;;  %v7325_v56 = vmul.f32 %v7298_v36, %v15103_v32  ;;  %v7326_v33 = vmul.f32 %v7298_v36, %v15110_v29 }
 0x9a5   : > { %v7327_v3 = vmul.f32 %v7298_v36, %v15117_v0  ;;  %v7328_v26 = vmul.f32 %v7298_v36, %v15124_v27  ;;  %v7329_v13 = vmul.f32 %v7298_v36, %v15131_v52  ;;  %v7330_v31 = vmul.f32 %v7298_v36, %v15138_v50 }
 0x9a6   : > { %v7331_v63 = vmul.f32 %v7298_v36, %v15145_v58  ;;  %v7332_v6 = vmul.f32 %v7298_v36, %v15152_v54  ;;  %v7333_v30 = vmul.f32 %v7298_v36, %v15159_v21  ;;  %v7334_v61 = vmul.f32 %v7298_v36, %v15166_v22 }
 0x9a7   : > { %v7339_v32 = vmul.f32 %v15187_v47, %v7299_v43  ;;  %v7340_v29 = vmul.f32 %v15187_v47, %v7300_v2  ;;  %v7341_v0 = vmul.f32 %v15187_v47, %v7301_v25  ;;  %v7342_v27 = vmul.f32 %v15187_v47, %v7302_v38 }
 0x9a8   : > { %v7343_v52 = vmul.f32 %v15187_v47, %v7303_v60  ;;  %v7344_v50 = vmul.f32 %v15187_v47, %v7304_v41  ;;  %v7345_v58 = vmul.f32 %v15187_v47, %v7305_v14  ;;  %v7346_v54 = vmul.f32 %v15187_v47, %v7306_v19 }
 0x9a9   : > { %v7347_v21 = vmul.f32 %v15187_v47, %v7307_v1  ;;  %v7348_v22 = vmul.f32 %v15187_v47, %v7308_v34  ;;  %v7349_v36 = vmul.f32 %v15187_v47, %v7309_v7  ;;  %v7350_v43 = vmul.f32 %v15187_v47, %v7310_v15 }
 0x9aa   : > { %v7351_v2 = vmul.f32 %v15187_v47, %v7311_v28  ;;  %v7352_v38 = vmul.f32 %v15187_v47, %v7312_v44  ;;  %v7353_v25 = vmul.f32 %v15187_v47, %v7313_v24  ;;  %v7354_v41 = vmul.f32 %v15187_v47, %v7314_v11 }
 0x9ab   : > { %v7355_v14 = vmul.f32 %v15187_v47, %v7315_v5  ;;  %v7356_v60 = vmul.f32 %v15187_v47, %v7316_v46  ;;  %v7357_v1 = vmul.f32 %v15187_v47, %v7317_v23  ;;  %v7358_v19 = vmul.f32 %v15187_v47, %v7318_v48 }
 0x9ac   : > { %v7359_v34 = vmul.f32 %v15187_v47, %v7319_v40  ;;  %v7360_v7 = vmul.f32 %v15187_v47, %v7320_v55  ;;  %v7361_v15 = vmul.f32 %v15187_v47, %v7321_v16  ;;  %v7362_v28 = vmul.f32 %v15187_v47, %v7322_v20 }
 0x9ad   : > { %v7363_v44 = vmul.f32 %v15187_v47, %v7323_v49  ;;  %v7364_v24 = vmul.f32 %v15187_v47, %v7324_v8  ;;  %v7365_v11 = vmul.f32 %v15187_v47, %v7325_v56  ;;  %v7366_v5 = vmul.f32 %v15187_v47, %v7326_v33 }
 0x9ae   : > { %v7367_v46 = vmul.f32 %v15187_v47, %v7327_v3  ;;  %v7368_v23 = vmul.f32 %v15187_v47, %v7328_v26  ;;  %v7369_v48 = vmul.f32 %v15187_v47, %v7329_v13  ;;  %v7370_v40 = vmul.f32 %v15187_v47, %v7330_v31 }
 0x9af   : > { %v7371_v55 = vmul.f32 %v15187_v47, %v7331_v63  ;;  %v7372_v16 = vmul.f32 %v15187_v47, %v7332_v6  ;;  %v7373_v20 = vmul.f32 %v15187_v47, %v7333_v30  ;;  %v7374_v49 = vmul.f32 %v15187_v47, %v7334_v61 }
 0x9b0   : > { %v15328_v8 = vadd.f32 %v15189_v53, %v7339_v32  ;;  %v15331_v56 = vadd.f32 %v15189_v53, %v7340_v29  ;;  %v15334_v33 = vadd.f32 %v15189_v53, %v7341_v0  ;;  %v15337_v3 = vadd.f32 %v15189_v53, %v7342_v27 }
 0x9b1   : > { %v15340_v26 = vadd.f32 %v15189_v53, %v7343_v52  ;;  %v15343_v13 = vadd.f32 %v15189_v53, %v7344_v50  ;;  %v15346_v47 = vadd.f32 %v15189_v53, %v7345_v58  ;;  %v15349_v31 = vadd.f32 %v15189_v53, %v7346_v54 }
 0x9b2   : > { %v15352_v63 = vadd.f32 %v15189_v53, %v7347_v21  ;;  %v15355_v6 = vadd.f32 %v15189_v53, %v7348_v22  ;;  %v15358_v30 = vadd.f32 %v15189_v53, %v7349_v36  ;;  %v15361_v61 = vadd.f32 %v15189_v53, %v7350_v43 }
 0x9b3   : > { %v15364_v32 = vadd.f32 %v15189_v53, %v7351_v2  ;;  %v15367_v29 = vadd.f32 %v15189_v53, %v7352_v38  ;;  %v15370_v0 = vadd.f32 %v15189_v53, %v7353_v25  ;;  %v15373_v27 = vadd.f32 %v15189_v53, %v7354_v41 }
 0x9b4   : > { %v15376_v52 = vadd.f32 %v15189_v53, %v7355_v14  ;;  %v15379_v50 = vadd.f32 %v15189_v53, %v7356_v60  ;;  %v15382_v58 = vadd.f32 %v15189_v53, %v7357_v1  ;;  %v15385_v54 = vadd.f32 %v15189_v53, %v7358_v19 }
 0x9b5   : > { %v15388_v21 = vadd.f32 %v15189_v53, %v7359_v34  ;;  %v15391_v22 = vadd.f32 %v15189_v53, %v7360_v7  ;;  %v15394_v36 = vadd.f32 %v15189_v53, %v7361_v15  ;;  %v15397_v43 = vadd.f32 %v15189_v53, %v7362_v28 }
 0x9b6   : > { %16592 = vst [vmem:[#allocation45_spill] sm:$0xff] %v15379_v50  ;;  %v15400_v2 = vadd.f32 %v15189_v53, %v7363_v44  ;;  %v15403_v38 = vadd.f32 %v15189_v53, %v7364_v24  ;;  %v15406_v25 = vadd.f32 %v15189_v53, %v7365_v11  ;;  %v15409_v41 = vadd.f32 %v15189_v53, %v7366_v5 }
 0x9b7   : > { %16593 = vst [vmem:[#allocation48_spill] sm:$0xff] %v15391_v22  ;;  %16594 = vst [vmem:[#allocation52_spill] sm:$0xff] %v15397_v43  ;;  %v15412_v14 = vadd.f32 %v15189_v53, %v7367_v46  ;;  %v15415_v60 = vadd.f32 %v15189_v53, %v7368_v23  ;;  %v15418_v1 = vadd.f32 %v15189_v53, %v7369_v48  ;;  %v7415_v7 = vmin.f32 %v15328_v8, 20.0 }
 0x9b8   : > { %16595 = vst [vmem:[#allocation82_spill] sm:$0xff] %v15400_v2  ;;  %16596 = vst [vmem:[#allocation117_spill] sm:$0xff] %v15403_v38  ;;  %v15421_v19 = vadd.f32 %v15189_v53, %v7370_v40  ;;  %v15424_v34 = vadd.f32 %v15189_v53, %v7371_v55  ;;  %v7416_v15 = vmin.f32 %v15331_v56, 20.0  ;;  %v7417_v28 = vmin.f32 %v15334_v33, 20.0 }
 0x9b9   : > { %16597 = vst [vmem:[#allocation120_spill] sm:$0xff] %v15409_v41  ;;  %16598 = vst [vmem:[#allocation121_spill] sm:$0xff] %v15412_v14  ;;  %v15430_v44 = vadd.f32 %v15189_v53, %v7372_v16  ;;  %v15433_v24 = vadd.f32 %v15189_v53, %v7373_v20  ;;  %v7418_v11 = vmin.f32 %v15337_v3, 20.0  ;;  %v7419_v5 = vmin.f32 %v15340_v26, 20.0 }
 0x9ba   : > { %16599 = vst [vmem:[#allocation88_spill] sm:$0xff] %v15415_v60  ;;  %16600 = vst [vmem:[#allocation13_spill] sm:$0xff] %v15418_v1  ;;  %v7420_v46 = vmin.f32 %v15343_v13, 20.0  ;;  %v7421_v23 = vmin.f32 %v15346_v47, 20.0  ;;  %v7422_v48 = vmin.f32 %v15349_v31, 20.0  ;;  %v7423_v40 = vmin.f32 %v15352_v63, 20.0 }
 0x9bb   : > { %16601 = vst [vmem:[#allocation89_spill] sm:$0xff] %v15421_v19  ;;  %16602 = vst [vmem:[#allocation14_spill] sm:$0xff] %v15424_v34  ;;  %v7424_v55 = vmin.f32 %v15355_v6, 20.0  ;;  %v7425_v16 = vmin.f32 %v15358_v30, 20.0  ;;  %v7426_v4 = vmin.f32 %v15361_v61, 20.0  ;;  %v7427_v20 = vmin.f32 %v15364_v32, 20.0 }
 0x9bc   : > { %16603 = vst [vmem:[#allocation15_spill] sm:$0xff] %v15430_v44  ;;  %16604 = vst [vmem:[#allocation91_spill] sm:$0xff] %v15433_v24  ;;  %v15446_v59 = vadd.f32 %v15189_v53, %v7374_v49  ;;  %v7451_v62 = vmul.f32 1.442695, %v7415_v7  ;;  %v7453_v18 = vmul.f32 1.442695, %v7416_v15 }
 0x9bd   : > { %v7455_v45 = vmul.f32 1.442695, %v7417_v28  ;;  %v7428_v57 = vmin.f32 %v15367_v29, 20.0  ;;  %v7429_v35 = vmin.f32 %v15370_v0, 20.0  ;;  %v7430_v12 = vmin.f32 %v15373_v27, 20.0 }
 0x9be   : > { %16605 = vst [vmem:[#allocation16_spill] sm:$0xff] %v15446_v59  ;;  %v7457_v17 = vmul.f32 1.442695, %v7418_v11  ;;  %v7431_v51 = vmin.f32 %v15376_v52, 20.0  ;;  %v7432_v39 = vmin.f32 %v15379_v50, 20.0  ;;  %9836 = vpow2.f32 %v7451_v62 }
 0x9bf   : > { %v7459_v9 = vmul.f32 1.442695, %v7419_v5  ;;  %v7433_v10 = vmin.f32 %v15382_v58, 20.0  ;;  %v7434_v53 = vmin.f32 %v15385_v54, 20.0  ;;  %9838 = vpow2.f32 %v7453_v18 }
 0x9c0   : > { %v7461_v49 = vmul.f32 1.442695, %v7420_v46  ;;  %v7435_v7 = vmin.f32 %v15388_v21, 20.0  ;;  %v7436_v15 = vmin.f32 %v15391_v22, 20.0  ;;  %9840 = vpow2.f32 %v7455_v45 }
 0x9c1   : > { %v7463_v28 = vmul.f32 1.442695, %v7421_v23  ;;  %v7437_v11 = vmin.f32 %v15394_v36, 20.0  ;;  %v7438_v42 = vmin.f32 %v15397_v43, 20.0  ;;  %9842 = vpow2.f32 %v7457_v17 }
 0x9c2   : > { %v7465_v50 = vmul.f32 1.442695, %v7422_v48  ;;  %v7439_v62 = vmin.f32 %v15400_v2, 20.0  ;;  %v7440_v5 = vmin.f32 %v15403_v38, 20.0  ;;  %9844 = vpow2.f32 %v7459_v9 }
 0x9c3   : > { %v7467_v37 = vmul.f32 1.442695, %v7423_v40  ;;  %v7441_v18 = vmin.f32 %v15406_v25, 20.0  ;;  %v7442_v46 = vmin.f32 %v15409_v41, 20.0  ;;  %9846 = vpow2.f32 %v7461_v49 }
 0x9c4   : > { %v7469_v22 = vmul.f32 1.442695, %v7424_v55  ;;  %v7443_v45 = vmin.f32 %v15412_v14, 20.0  ;;  %v7444_v23 = vmin.f32 %v15415_v60, 20.0  ;;  %9848 = vpow2.f32 %v7463_v28 }
 0x9c5   : > { %v7471_v43 = vmul.f32 1.442695, %v7425_v16  ;;  %v7445_v17 = vmin.f32 %v15418_v1, 20.0  ;;  %v7446_v48 = vmin.f32 %v15421_v19, 20.0  ;;  %9850 = vpow2.f32 %v7465_v50 }
 0x9c6   : > { %v7473_v38 = vmul.f32 1.442695, %v7426_v4  ;;  %v7447_v9 = vmin.f32 %v15424_v34, 20.0  ;;  %v7448_v40 = vmin.f32 %v15430_v44, 20.0  ;;  %9852 = vpow2.f32 %v7467_v37 }
 0x9c7   : > { %v7475_v41 = vmul.f32 1.442695, %v7427_v20  ;;  %v7449_v55 = vmin.f32 %v15433_v24, 20.0  ;;  %v7450_v49 = vmin.f32 %v15446_v59, 20.0  ;;  %9854 = vpow2.f32 %v7469_v22 }
 0x9c8   : > { %v7477_v60 = vmul.f32 1.442695, %v7428_v57  ;;  %9856 = vpow2.f32 %v7471_v43  ;;  %v7479_v16 = vmul.f32 1.442695, %v7429_v35  ;;  %v7481_v28 = vmul.f32 1.442695, %v7430_v12 }
 0x9c9   : > { %v7483_v14 = vmul.f32 1.442695, %v7431_v51  ;;  %9858 = vpow2.f32 %v7473_v38  ;;  %v7485_v19 = vmul.f32 1.442695, %v7432_v39  ;;  %v7487_v50 = vmul.f32 1.442695, %v7433_v10 }
 0x9ca   : > { %v7489_v4 = vmul.f32 1.442695, %v7434_v53  ;;  %9860 = vpow2.f32 %v7475_v41  ;;  %v7491_v34 = vmul.f32 1.442695, %v7435_v7  ;;  %v7493_v1 = vmul.f32 1.442695, %v7436_v15 }
 0x9cb   : > { %v7495_v44 = vmul.f32 1.442695, %v7437_v11  ;;  %v9837_v37 = vpop.eup %9836  ;;  %9862 = vpow2.f32 %v7477_v60  ;;  %v7497_v20 = vmul.f32 1.442695, %v7438_v42  ;;  %v7499_v24 = vmul.f32 1.442695, %v7439_v62 }
 0x9cc   : > { %v7501_v2 = vmul.f32 1.442695, %v7440_v5  ;;  %v9839_v59 = vpop.eup %9838  ;;  %9864 = vpow2.f32 %v7479_v16  ;;  %v15471_v57 = vmul.f32 1.442695, %v7441_v18  ;;  %v15473_v35 = vmul.f32 1.442695, %v7442_v46 }
 0x9cd   : > { %v7523_v51 = vadd.f32 1.0, %v9837_v37  ;;  %v9841_v12 = vpop.eup %9840  ;;  %9866 = vpow2.f32 %v7481_v28  ;;  %v15475_v10 = vmul.f32 1.442695, %v7443_v45  ;;  %v15477_v39 = vmul.f32 1.442695, %v7444_v23 }
 0x9ce   : > { %v7524_v22 = vadd.f32 1.0, %v9839_v59  ;;  %v9843_v43 = vpop.eup %9842  ;;  %9868 = vpow2.f32 %v7483_v14  ;;  %v15479_v38 = vmul.f32 1.442695, %v7445_v17  ;;  %v7525_v42 = vadd.f32 1.0, %v9841_v12 }
 0x9cf   : > { %v7559_v41 = vmul.f32 %v7523_v51, %v7523_v51  ;;  %v9845_v60 = vpop.eup %9844  ;;  %9870 = vpow2.f32 %v7485_v19  ;;  %v15481_v53 = vmul.f32 1.442695, %v7446_v48  ;;  %v7526_v7 = vadd.f32 1.0, %v9843_v43 }
 0x9d0   : > { %v7560_v15 = vmul.f32 %v7524_v22, %v7524_v22  ;;  %v9847_v11 = vpop.eup %9846  ;;  %9872 = vpow2.f32 %v7487_v50  ;;  %v15483_v62 = vmul.f32 1.442695, %v7447_v9  ;;  %v7527_v5 = vadd.f32 1.0, %v9845_v60 }
 0x9d1   : > { %v7561_v18 = vmul.f32 %v7525_v42, %v7525_v42  ;;  %v9849_v46 = vpop.eup %9848  ;;  %9874 = vpow2.f32 %v7489_v4  ;;  %v15485_v59 = vmul.f32 1.442695, %v7448_v40  ;;  %v7562_v14 = vmul.f32 %v7526_v7, %v7526_v7 }
 0x9d2   : > { %v8827_v45 = vadd.f32 -1.0, %v7559_v41  ;;  %v9851_v23 = vpop.eup %9850  ;;  %v7529_v17 = vadd.f32 1.0, %v9849_v46  ;;  %v7563_v16 = vmul.f32 %v7527_v5, %v7527_v5  ;;  %v8828_v19 = vadd.f32 -1.0, %v7560_v15 }
 0x9d3   : > { %v8829_v48 = vadd.f32 -1.0, %v7561_v18  ;;  %v9853_v28 = vpop.eup %9852  ;;  %9876 = vpow2.f32 %v7491_v34  ;;  %v7519_v37 = vmul.f32 1.442695, %v7449_v55  ;;  %v7530_v51 = vadd.f32 1.0, %v9851_v23 }
 0x9d4   : > { %v8830_v50 = vadd.f32 -1.0, %v7562_v14  ;;  %v9855_v9 = vpop.eup %9854  ;;  %9878 = vpow2.f32 %v7493_v1  ;;  %v7521_v12 = vmul.f32 1.442695, %v7450_v49  ;;  %v7565_v22 = vmul.f32 %v7529_v17, %v7529_v17 }
 0x9d5   : > { %v8831_v43 = vadd.f32 -1.0, %v7563_v16  ;;  %v9857_v4 = vpop.eup %9856  ;;  %9880 = vpow2.f32 %v7495_v44  ;;  %v7566_v40 = vmul.f32 %v7530_v51, %v7530_v51  ;;  %v15488_v42 = vmul.f32 %v8827_v45, %v15328_v8 }
 0x9d6   : > { %v7667_v60 = vadd.f32 1.0, %v7559_v41  ;;  %v9859_v7 = vpop.eup %9858  ;;  %9882 = vpow2.f32 %v7497_v20  ;;  %v8833_v5 = vadd.f32 -1.0, %v7565_v22  ;;  %v15491_v34 = vmul.f32 %v8828_v19, %v15331_v56 }
 0x9d7   : > { %v15494_v55 = vmul.f32 %v8829_v48, %v15334_v33  ;;  %v9861_v1 = vpop.eup %9860  ;;  %9884 = vpow2.f32 %v7499_v24  ;;  %v15497_v49 = vmul.f32 %v8830_v50, %v15337_v3  ;;  %v15500_v44 = vmul.f32 %v8831_v43, %v15340_v26 }
 0x9d8   : > { %v7668_v8 = vadd.f32 1.0, %v7560_v15  ;;  %v9863_v46 = vpop.eup %9862  ;;  %9886 = vpow2.f32 %v7501_v2  ;;  %v8834_v41 = vadd.f32 -1.0, %v7566_v40  ;;  %v7669_v20 = vadd.f32 1.0, %v7561_v18 }
 0x9d9   : > { %v7670_v45 = vadd.f32 1.0, %v7562_v14  ;;  %v9865_v23 = vpop.eup %9864  ;;  %9888 = vpow2.f32 %v15471_v57  ;;  %v15504_v56 = vmul.f32 %v8833_v5, %v15346_v47  ;;  %v7671_v33 = vadd.f32 1.0, %v7563_v16 }
 0x9da   : > { %v7528_v24 = vadd.f32 1.0, %v9847_v11  ;;  %v9867_v17 = vpop.eup %9866  ;;  %9890 = vpow2.f32 %v15473_v35  ;;  %v7533_v3 = vadd.f32 1.0, %v9857_v4  ;;  %v7531_v26 = vadd.f32 1.0, %v9853_v28 }
 0x9db   : > { %v7534_v19 = vadd.f32 1.0, %v9859_v7  ;;  %v15507_v15 = vpop.eup %9868  ;;  %9892 = vpow2.f32 %v15475_v10  ;;  %v7673_v2 = vadd.f32 1.0, %v7565_v22  ;;  %v7532_v14 = vadd.f32 1.0, %v9855_v9 }
 0x9dc   : > { %v7564_v18 = vmul.f32 %v7528_v24, %v7528_v24  ;;  %v15510_v48 = vpop.eup %9870  ;;  %9894 = vpow2.f32 %v15477_v39  ;;  %v7569_v47 = vmul.f32 %v7533_v3, %v7533_v3  ;;  %v7567_v57 = vmul.f32 %v7531_v26, %v7531_v26 }
 0x9dd   : > { %v7570_v11 = vmul.f32 %v7534_v19, %v7534_v19  ;;  %v9873_v16 = vpop.eup %9872  ;;  %9896 = vpow2.f32 %v15479_v38  ;;  %v15515_v35 = vmul.f32 %v8834_v41, %v15349_v31  ;;  %v7568_v51 = vmul.f32 %v7532_v14, %v7532_v14 }
 0x9de   : > { %v8832_v28 = vadd.f32 -1.0, %v7564_v18  ;;  %v9875_v50 = vpop.eup %9874  ;;  %9898 = vpow2.f32 %v15481_v53  ;;  %v8837_v10 = vadd.f32 -1.0, %v7569_v47  ;;  %v8835_v9 = vadd.f32 -1.0, %v7567_v57 }
 0x9df   : > { %v7537_v22 = vadd.f32 1.0, %v9865_v23  ;;  %9900 = vpow2.f32 %v15483_v62  ;;  %v7674_v39 = vadd.f32 1.0, %v7566_v40  ;;  %v7672_v43 = vadd.f32 1.0, %v7564_v18 }
 0x9e0   : > { %v7677_v4 = vadd.f32 1.0, %v7569_v47  ;;  %v9877_v7 = vpop.eup %9876  ;;  %9902 = vpow2.f32 %v7519_v37  ;;  %v15520_v38 = vmul.f32 %v8832_v28, %v15343_v13  ;;  %v7675_v31 = vadd.f32 1.0, %v7567_v57 }
 0x9e1   : > { %v8838_v5 = vadd.f32 -1.0, %v7570_v11  ;;  %v15522_v41 = vpop.eup %9878  ;;  %9904 = vpow2.f32 %v7521_v12  ;;  %v15525_v53 = vmul.f32 %v8837_v10, %v15358_v30  ;;  %v15528_v23 = vmul.f32 %v8835_v9, %v15352_v63 }
 0x9e2   : > { %v8836_v62 = vadd.f32 -1.0, %v7568_v51  ;;  %v9881_v40 = vpop.eup %9880  ;;  %9906 = vrcp.f32 %v7667_v60  ;;  %v7573_v24 = vmul.f32 %v7537_v22, %v7537_v22  ;;  %v7535_v3 = vadd.f32 1.0, %v9861_v1 }
 0x9e3   : > { %v7538_v37 = vadd.f32 1.0, %v9867_v17  ;;  %v9883_v26 = vpop.eup %9882  ;;  %9908 = vrcp.f32 %v7668_v8  ;;  %v7678_v13 = vadd.f32 1.0, %v7570_v11  ;;  %v7536_v19 = vadd.f32 1.0, %v9863_v46 }
 0x9e4   : > { %v7541_v18 = vadd.f32 1.0, %v9873_v16  ;;  %v15530_v14 = vpop.eup %9884  ;;  %9910 = vrcp.f32 %v7669_v20  ;;  %v15533_v30 = vmul.f32 %v8838_v5, %v15361_v61  ;;  %v8841_v12 = vadd.f32 -1.0, %v7573_v24 }
 0x9e5   : > { %v7571_v63 = vmul.f32 %v7535_v3, %v7535_v3  ;;  %v15535_v47 = vpop.eup %9886  ;;  %9912 = vrcp.f32 %v7670_v45  ;;  %v7574_v60 = vmul.f32 %v7538_v37, %v7538_v37  ;;  %v7572_v57 = vmul.f32 %v7536_v19, %v7536_v19 }
 0x9e6   : > { %v7577_v1 = vmul.f32 %v7541_v18, %v7541_v18  ;;  %v15537_v17 = vpop.eup %9888  ;;  %9914 = vrcp.f32 %v7671_v33  ;;  %v15540_v8 = vmul.f32 %v8836_v62, %v15355_v6  ;;  %v7676_v46 = vadd.f32 1.0, %v7568_v51 }
 0x9e7   : > { %v8839_v11 = vadd.f32 -1.0, %v7571_v63  ;;  %v15542_v20 = vpop.eup %9890  ;;  %9916 = vrcp.f32 %v7673_v2  ;;  %v15545_v61 = vmul.f32 %v8841_v12, %v15370_v0  ;;  %v7681_v16 = vadd.f32 1.0, %v7573_v24 }
 0x9e8   : > { %v8842_v28 = vadd.f32 -1.0, %v7574_v60  ;;  %v15547_v45 = vpop.eup %9892  ;;  %9918 = vrcp.f32 %v7674_v39  ;;  %v7679_v10 = vadd.f32 1.0, %v7571_v63  ;;  %v7682_v9 = vadd.f32 1.0, %v7574_v60 }
 0x9e9   : > { %v8840_v22 = vadd.f32 -1.0, %v7572_v57  ;;  %v15549_v33 = vpop.eup %9894  ;;  %9920 = vrcp.f32 %v7672_v43  ;;  %v15552_v6 = vmul.f32 %v8839_v11, %v15364_v32  ;;  %v7680_v51 = vadd.f32 1.0, %v7572_v57 }
 0x9ea   : > { %v8845_v2 = vadd.f32 -1.0, %v7577_v1  ;;  %v15554_v5 = vpop.eup %9896  ;;  %9922 = vrcp.f32 %v7677_v4  ;;  %v15557_v0 = vmul.f32 %v8842_v28, %v15373_v27  ;;  %v7539_v39 = vadd.f32 1.0, %v15507_v15 }
 0x9eb   : > { %v7542_v62 = vadd.f32 1.0, %v9875_v50  ;;  %v15560_v24 = vpop.eup %9898  ;;  %9924 = vrcp.f32 %v7675_v31  ;;  %v7540_v3 = vadd.f32 1.0, %v15510_v48  ;;  %v7545_v43 = vadd.f32 1.0, %v9881_v40 }
 0x9ec   : > { %v7543_v37 = vadd.f32 1.0, %v9877_v7  ;;  %v15563_v32 = vpop.eup %9900  ;;  %9926 = vrcp.f32 %v7678_v13  ;;  %v15567_v4 = vmul.f32 %v8840_v22, %v15367_v29  ;;  %v7575_v27 = vmul.f32 %v7539_v39, %v7539_v39 }
 0x9ed   : > { %v7578_v19 = vmul.f32 %v7542_v62, %v7542_v62  ;;  %v15569_v18 = vpop.eup %9902  ;;  %9928 = vrcp.f32 %v7676_v46  ;;  %v15572_v15 = vmul.f32 %v8845_v2, %v15382_v58  ;;  %v7685_v50 = vadd.f32 1.0, %v7577_v1  ;;  %v16606_v2 = vld [vmem:[#allocation70_spill] sm:$0xff] }
 0x9ee   : > { %v7576_v48 = vmul.f32 %v7540_v3, %v7540_v3  ;;  %v15574_v31 = vpop.eup %9904  ;;  %9930 = vrcp.f32 %v7681_v16  ;;  %v8843_v7 = vadd.f32 -1.0, %v7575_v27  ;;  %v7581_v40 = vmul.f32 %v7545_v43, %v7545_v43 }
 0x9ef   : > { %v15576_v12 = vadd.f32 1.0, %v9883_v26  ;;  %v9907_v13 = vpop.eup %9906  ;;  %9932 = vrcp.f32 %v7679_v10  ;;  %v7683_v29 = vadd.f32 1.0, %v7575_v27  ;;  %v8846_v63 = vadd.f32 -1.0, %v7578_v19 }
 0x9f0   : > { %v15582_v60 = vmul.f32 %v7543_v37, %v7543_v37  ;;  %v9909_v58 = vpop.eup %9908  ;;  %v7704_v57 = vmul.f32 %v9907_v13, %v15488_v42  ;;  %9934 = vrcp.f32 %v7682_v9  ;;  %v7686_v1 = vadd.f32 1.0, %v7578_v19  ;;  %v16607_v9 = vld [vmem:[#allocation72_spill] sm:$0xff]  ;;  %v16609_v19 = vld [vmem:[#allocation65_spill] sm:$0xff] }
 0x9f1   : > { %v8844_v46 = vadd.f32 -1.0, %v7576_v48  ;;  %v9911_v11 = vpop.eup %9910  ;;  %v7706_v16 = vmul.f32 %v9909_v58, %v15491_v34  ;;  %9936 = vrcp.f32 %v7680_v51  ;;  %v15587_v26 = vmul.f32 %v8843_v7, %v15376_v52  ;;  %v15596_v52 = vpop.f32.mrf.mxu0  ;;  %v16610_v7 = vld [vmem:[#allocation77_spill] sm:$0xff] }
 0x9f2   : > { %v7684_v28 = vadd.f32 1.0, %v7576_v48  ;;  %v9913_v22 = vpop.eup %9912  ;;  %v7708_v10 = vmul.f32 %v9911_v11, %v15494_v55  ;;  %v8338_v39 = vmul.f32 %v7704_v57, %v16606_v2  ;;  %9938 = vrcp.f32 %v7685_v50  ;;  %v16608_v55 = vld [vmem:[#allocation76_spill] sm:$0xff]  ;;  %v16612_v57 = vld [vmem:[#allocation78_spill] sm:$0xff] }
 0x9f3   : > { %v7689_v62 = vadd.f32 1.0, %v7581_v40  ;;  %v9915_v3 = vpop.eup %9914  ;;  %v7710_v42 = vmul.f32 %v9913_v22, %v15497_v49  ;;  %v8339_v43 = vmul.f32 %v7706_v16, %v16607_v9  ;;  %9940 = vrcp.f32 %v7683_v29  ;;  %v16611_v29 = vld [vmem:[#allocation66_spill] sm:$0xff]  ;;  %v16613_v16 = vld [vmem:[#allocation108_spill] sm:$0xff] }
 0x9f4   : > { %v15594_v34 = vmul.f32 %v8846_v63, %v15385_v54  ;;  %v9917_v51 = vpop.eup %9916  ;;  %v7712_v37 = vmul.f32 %v9915_v3, %v15500_v44  ;;  %v8340_v27 = vmul.f32 %v7708_v10, %v16608_v55  ;;  %v8374_v50 = vadd.f32 %v8338_v39, %v16609_v19  ;;  %v16615_v10 = vld [vmem:[#allocation109_spill] sm:$0xff]  ;;  %v15615_v39 = vpop.f32.mrf.mxu0 }
 0x9f5   : > { %9942 = vrcp.f32 %v7686_v1  ;;  %v9919_v48 = vpop.eup %9918  ;;  %v7716_v49 = vmul.f32 %v9917_v51, %v15504_v56  ;;  %v8341_v13 = vmul.f32 %v7710_v42, %v16610_v7  ;;  %v8375_v58 = vadd.f32 %v8339_v43, %v16611_v29  ;;  %v16614_v1 = vld [vmem:[#allocation80_spill] sm:$0xff]  ;;  %v16616_v42 = vld [vmem:[#allocation81_spill] sm:$0xff]  ;;  %v16617_v43 = vld [vmem:[#allocation110_spill] sm:$0xff] }
 0x9f6   : > { %9944 = vrcp.f32 %v7684_v28  ;;  %v9921_v54 = vpop.eup %9920  ;;  %v7718_v63 = vmul.f32 %v9919_v48, %v15515_v35  ;;  %v8342_v11 = vmul.f32 %v7712_v37, %v16612_v57  ;;  %v8376_v44 = vadd.f32 %v8340_v27, %v16613_v16  ;;  %8410 = vst [vmem:[%s15608_s11] sm:$0xff] %v8374_v50  ;;  %v16618_v27 = vld [vmem:[#allocation67_spill] sm:$0xff]  ;;  %v16620_v48 = vld [vmem:[#allocation45_spill] sm:$0xff]  ;;  %v16623_v57 = vld [vmem:[#allocation112_spill] sm:$0xff] }
 0x9f7   : > { %9946 = vrcp.f32 %v7689_v62  ;;  %v9923_v56 = vpop.eup %9922  ;;  %v8344_v22 = vmul.f32 %v7716_v49, %v16614_v1  ;;  %v8377_v28 = vadd.f32 %v8341_v13, %v16615_v10  ;;  %v7714_v2 = vmul.f32 %v9921_v54, %v15520_v38  ;;  %8411 = vst [vmem:[%s15608_s11 + $0x8] sm:$0xff] %v8375_v58  ;;  %v16619_v38 = vld [vmem:[#allocation79_spill] sm:$0xff]  ;;  %v16621_v13 = vld [vmem:[#allocation68_spill] sm:$0xff]  ;;  %v16622_v58 = vld [vmem:[#allocation86_spill] sm:$0xff] }
 0x9f8   : > { %v8849_v35 = vadd.f32 -1.0, %v7581_v40  ;;  %v9925_v3 = vpop.eup %9924  ;;  %v8345_v9 = vmul.f32 %v7718_v63, %v16616_v42  ;;  %v8378_v51 = vadd.f32 %v8342_v11, %v16617_v43  ;;  %8412 = vst [vmem:[%s15608_s11 + $0x10] sm:$0xff] %v8376_v44  ;;  %v7724_v62 = vmul.f32 %v9923_v56, %v15525_v53  ;;  %v16624_v16 = vld [vmem:[#allocation83_spill] sm:$0xff]  ;;  %v15639_v56 = vpop.f32.mrf.mxu0  ;;  %v16628_v43 = vld [vmem:[#allocation84_spill] sm:$0xff] }
 0x9f9   : > { %v7687_v37 = vadd.f32 1.0, %v15582_v60  ;;  %v9927_v55 = vpop.eup %9926  ;;  %v8380_v19 = vadd.f32 %v8344_v22, %v16618_v27  ;;  %v8343_v50 = vmul.f32 %v7714_v2, %v16619_v38  ;;  %8413 = vst [vmem:[%s15608_s11 + $0x18] sm:$0xff] %v8377_v28  ;;  %v7720_v40 = vmul.f32 %v9925_v3, %v15528_v23  ;;  %v16626_v10 = vld [vmem:[#allocation87_spill] sm:$0xff] }
 0x9fa   : > { %v7648_v49 = vmul.f32 %v8844_v46, %v16620_v48  ;;  %v9929_v7 = vpop.eup %9928  ;;  %v8381_v29 = vadd.f32 %v8345_v9, %v16621_v13  ;;  %8414 = vst [vmem:[%s15608_s11 + $0x20] sm:$0xff] %v8378_v51  ;;  %v8348_v53 = vmul.f32 %v7724_v62, %v16622_v58  ;;  %v7726_v54 = vmul.f32 %v9927_v55, %v15533_v30  ;;  %v16625_v30 = vld [vmem:[#allocation69_spill] sm:$0xff]  ;;  %v16629_v55 = vld [vmem:[#allocation71_spill] sm:$0xff]  ;;  %v16632_v48 = vld [vmem:[#allocation98_spill] sm:$0xff]  ;;  %v15661_v13 = vpop.f32.mrf.mxu0 }
 0x9fb   : > { %9948 = vrcp.f32 %v7687_v37  ;;  %v9931_v63 = vpop.eup %9930  ;;  %v8379_v11 = vadd.f32 %v8343_v50, %v16623_v57  ;;  %8416 = vst [vmem:[%s15608_s11 + $0x30] sm:$0xff] %v8380_v19  ;;  %v8346_v44 = vmul.f32 %v7720_v40, %v16624_v16  ;;  %v7722_v23 = vmul.f32 %v9929_v7, %v15540_v8  ;;  %v16627_v8 = vld [vmem:[#allocation113_spill] sm:$0xff]  ;;  %v16630_v19 = vld [vmem:[#allocation106_spill] sm:$0xff] }
 0x9fc   : > { %v15637_v46 = vmul.f32 %v15576_v12, %v15576_v12  ;;  %v9933_v1 = vpop.eup %9932  ;;  %8417 = vst [vmem:[%s15608_s11 + $0x38] sm:$0xff] %v8381_v29  ;;  %v8384_v22 = vadd.f32 %v8348_v53, %v16625_v30  ;;  %v8349_v28 = vmul.f32 %v7726_v54, %v16626_v10  ;;  %v7732_v2 = vmul.f32 %v9931_v63, %v15545_v61  ;;  %v16631_v50 = vld [vmem:[#allocation73_spill] sm:$0xff]  ;;  %v16633_v58 = vld [vmem:[#allocation74_spill] sm:$0xff]  ;;  %v16634_v53 = vld [vmem:[#allocation107_spill] sm:$0xff] }
 0x9fd   : > { %v7653_v3 = vmul.f32 %v8849_v35, %v15394_v36  ;;  %v9935_v42 = vpop.eup %9934  ;;  %8415 = vst [vmem:[%s15608_s11 + $0x28] sm:$0xff] %v8379_v11  ;;  %v8382_v9 = vadd.f32 %v8346_v44, %v16627_v8  ;;  %v8347_v12 = vmul.f32 %v7722_v23, %v16628_v43  ;;  %v7728_v51 = vmul.f32 %v9933_v1, %v15552_v6  ;;  %v16635_v11 = vld [vmem:[#allocation116_spill] sm:$0xff]  ;;  %v16637_v30 = vld [vmem:[#allocation115_spill] sm:$0xff]  ;;  %v16638_v10 = vld [vmem:[#allocation118_spill] sm:$0xff] }
 0x9fe   : > { %v7544_v62 = vadd.f32 1.0, %v15522_v41  ;;  %v9937_v37 = vpop.eup %9936  ;;  %8420 = vst [vmem:[%s15608_s11 + $0x50] sm:$0xff] %v8384_v22  ;;  %v8385_v27 = vadd.f32 %v8349_v28, %v16629_v55  ;;  %v8352_v38 = vmul.f32 %v7732_v2, %v16630_v19  ;;  %v7734_v61 = vmul.f32 %v9935_v42, %v15557_v0  ;;  %v16639_v8 = vld [vmem:[#allocation75_spill] sm:$0xff]  ;;  %v16643_v19 = vld [vmem:[#allocation37_spill] sm:$0xff] }
 0x9ff   : > { %v7690_v36 = vadd.f32 1.0, %v15637_v46  ;;  %v9939_v35 = vpop.eup %9938  ;;  %8418 = vst [vmem:[%s15608_s11 + $0x40] sm:$0xff] %v8382_v9  ;;  %v8383_v40 = vadd.f32 %v8347_v12, %v16631_v50  ;;  %v8350_v6 = vmul.f32 %v7728_v51, %v16632_v48  ;;  %v7730_v7 = vmul.f32 %v9937_v37, %v15567_v4  ;;  %v16636_v4 = vld [vmem:[#allocation100_spill] sm:$0xff]  ;;  %v15680_v51 = vpop.f32.mrf.mxu0  ;;  %v16642_v55 = vld [vmem:[#allocation119_spill] sm:$0xff] }
 0xa00   : > { %v8847_v41 = vadd.f32 -1.0, %v15582_v60  ;;  %v9941_v29 = vpop.eup %9940  ;;  %8421 = vst [vmem:[%s15608_s11 + $0x58] sm:$0xff] %v8385_v27  ;;  %v8388_v0 = vadd.f32 %v8352_v38, %v16633_v58  ;;  %v8353_v54 = vmul.f32 %v7734_v61, %v16634_v53  ;;  %v7740_v63 = vmul.f32 %v9939_v35, %v15572_v15  ;;  %v16644_v38 = vld [vmem:[#allocation114_spill] sm:$0xff]  ;;  %v16648_v53 = vld [vmem:[#allocation43_spill] sm:$0xff] }
 0xa01   : > { %9950 = vrcp.f32 %v7690_v36  ;;  %8419 = vst [vmem:[%s15608_s11 + $0x48] sm:$0xff] %v8383_v40  ;;  %v8386_v16 = vadd.f32 %v8350_v6, %v16635_v11  ;;  %v8351_v44 = vmul.f32 %v7730_v7, %v16636_v4  ;;  %v7736_v60 = vmul.f32 %v9941_v29, %v15587_v26  ;;  %v16640_v26 = vld [vmem:[#allocation111_spill] sm:$0xff]  ;;  %v16646_v40 = vld [vmem:[#allocation90_spill] sm:$0xff]  ;;  %v16647_v7 = vld [vmem:[#allocation40_spill] sm:$0xff] }
 0xa02   : > { %v9943_v57 = vpop.eup %9942  ;;  %v7580_v23 = vmul.f32 %v7544_v62, %v7544_v62  ;;  %8424 = vst [vmem:[%s15608_s11 + $0x70] sm:$0xff] %v8388_v0  ;;  %v8389_v22 = vadd.f32 %v8353_v54, %v16637_v30  ;;  %v8356_v28 = vmul.f32 %v7740_v63, %v16638_v10  ;;  %v7549_v2 = vadd.f32 1.0, %v15537_v17  ;;  %v16641_v62 = vld [vmem:[#allocation33_spill] sm:$0xff] }
 0xa03   : > { %v9945_v1 = vpop.eup %9944  ;;  %v7742_v15 = vmul.f32 %v9943_v57, %v15594_v34  ;;  %9952 = vpow2.f32 %v15485_v59  ;;  %8422 = vst [vmem:[%s15608_s11 + $0x60] sm:$0xff] %v8386_v16  ;;  %v8387_v9 = vadd.f32 %v8351_v44, %v16639_v8  ;;  %v8354_v43 = vmul.f32 %v7736_v60, %v16640_v26 }
 0xa04   : > { %v9947_v42 = vpop.eup %9946  ;;  %v7738_v12 = vmul.f32 %v9945_v1, %v7648_v49  ;;  %8425 = vst [vmem:[%s15608_s11 + $0x78] sm:$0xff] %v8389_v22  ;;  %v8392_v37 = vadd.f32 %v8356_v28, %v16641_v62  ;;  %v7688_v17 = vadd.f32 1.0, %v7580_v23  ;;  %v7651_v36 = vmul.f32 %v8847_v41, %v15388_v21  ;;  %v16645_v49 = vld [vmem:[#allocation38_spill] sm:$0xff]  ;;  %v15697_v41 = vpop.f32.mrf.mxu0 }
 0xa05   : > { %v8357_v34 = vmul.f32 %v7742_v15, %v16642_v55  ;;  %v7748_v27 = vmul.f32 %v9947_v42, %v7653_v3  ;;  %8423 = vst [vmem:[%s15608_s11 + $0x68] sm:$0xff] %v8387_v9  ;;  %v8390_v59 = vadd.f32 %v8354_v43, %v16643_v19  ;;  %v7585_v35 = vmul.f32 %v7549_v2, %v7549_v2  ;;  %v16651_v15 = vld [vmem:[#allocation52_spill] sm:$0xff] }
 0xa06   : > { %v8355_v61 = vmul.f32 %v7738_v12, %v16644_v38  ;;  %8428 = vst [vmem:[%s15608_s11 + $0x90] sm:$0xff] %v8392_v37  ;;  %9954 = vrcp.f32 %v7688_v17  ;;  %v7547_v6 = vadd.f32 1.0, %v15530_v14  ;;  %v8850_v58 = vadd.f32 -1.0, %v15637_v46  ;;  %v16649_v46 = vld [vmem:[#allocation64_spill] sm:$0xff]  ;;  %v15708_v22 = vpop.f32.mrf.mxu0 }
 0xa07   : > { %v8393_v50 = vadd.f32 %v8357_v34, %v16645_v49  ;;  %v8360_v48 = vmul.f32 %v7748_v27, %v16646_v40  ;;  %8426 = vst [vmem:[%s15608_s11 + $0x80] sm:$0xff] %v8390_v59  ;;  %v7693_v0 = vadd.f32 1.0, %v7585_v35  ;;  %v7550_v21 = vadd.f32 1.0, %v15542_v20  ;;  %v16650_v20 = vld [vmem:[#allocation85_spill] sm:$0xff]  ;;  %v16652_v55 = vld [vmem:[#allocation92_spill] sm:$0xff] }
 0xa08   : > { %v9949_v3 = vpop.eup %9948  ;;  %v8391_v29 = vadd.f32 %v8355_v61, %v16647_v7  ;;  %v7583_v57 = vmul.f32 %v7547_v6, %v7547_v6  ;;  %v7548_v11 = vadd.f32 1.0, %v15535_v47  ;;  %v7553_v16 = vadd.f32 1.0, %v15554_v5  ;;  %v15715_v12 = vpop.f32.mrf.mxu0  ;;  %v16653_v61 = vld [vmem:[#allocation48_spill] sm:$0xff] }
 0xa09   : > { %8429 = vst [vmem:[%s15608_s11 + $0x98] sm:$0xff] %v8393_v50  ;;  %v8396_v54 = vadd.f32 %v8360_v48, %v16648_v53  ;;  %v7744_v63 = vmul.f32 %v9949_v3, %v7651_v36  ;;  %9956 = vrcp.f32 %v7693_v0  ;;  %v7586_v14 = vmul.f32 %v7550_v21, %v7550_v21 }
 0xa0a   : > { %8427 = vst [vmem:[%s15608_s11 + $0x88] sm:$0xff] %v8391_v29  ;;  %v8276_v4 = vadd.f32 %v15596_v52, %v16649_v46  ;;  %v7691_v60 = vadd.f32 1.0, %v7583_v57  ;;  %v7584_v1 = vmul.f32 %v7548_v11, %v7548_v11  ;;  %v7589_v10 = vmul.f32 %v7553_v16, %v7553_v16  ;;  %v15728_v50 = vpop.f32.mrf.mxu0 }
 0xa0b   : > { %8432 = vst [vmem:[%s15608_s11 + $0xb0] sm:$0xff] %v8396_v54  ;;  %v8358_v44 = vmul.f32 %v7744_v63, %v16650_v20  ;;  %v7694_v30 = vadd.f32 1.0, %v7586_v14  ;;  %v7551_v47 = vadd.f32 1.0, %v15547_v45  ;;  %v7654_v2 = vmul.f32 %v8850_v58, %v16651_v15  ;;  %v16654_v58 = vld [vmem:[#allocation11_spill] sm:$0xff]  ;;  %v16655_v63 = vld [vmem:[#allocation82_spill] sm:$0xff] }
 0xa0c   : > { %9958 = vrcp.f32 %v7691_v60  ;;  %v7692_v42 = vadd.f32 1.0, %v7584_v1  ;;  %v8848_v52 = vadd.f32 -1.0, %v7580_v23  ;;  %v7697_v9 = vadd.f32 1.0, %v7589_v10  ;;  %v15741_v16 = vpop.f32.mrf.mxu0 }
 0xa0d   : > { %v8394_v28 = vadd.f32 %v8358_v44, %v8276_v4  ;;  %9960 = vrcp.f32 %v7694_v30  ;;  %v7587_v26 = vmul.f32 %v7551_v47, %v7551_v47  ;;  %v8287_v43 = vadd.f32 %v15615_v39, %v16649_v46  ;;  %v16656_v44 = vld [vmem:[#allocation95_spill] sm:$0xff]  ;;  %v16657_v30 = vld [vmem:[#allocation120_spill] sm:$0xff] }
 0xa0e   : > { %v9951_v5 = vpop.eup %9950  ;;  %9962 = vrcp.f32 %v7692_v42  ;;  %v7554_v45 = vadd.f32 1.0, %v15560_v24  ;;  %v7552_v62 = vadd.f32 1.0, %v15549_v33  ;;  %v8853_v27 = vadd.f32 -1.0, %v7585_v35 }
 0xa0f   : > { %8430 = vst [vmem:[%s15608_s11 + $0xa0] sm:$0xff] %v8394_v28  ;;  %v7750_v8 = vmul.f32 %v9951_v5, %v7654_v2  ;;  %9964 = vrcp.f32 %v7697_v9  ;;  %v7695_v17 = vadd.f32 1.0, %v7587_v26  ;;  %v7557_v59 = vadd.f32 1.0, %v15569_v18  ;;  %v8310_v9 = vpop.f32.mrf.mxu0 }
 0xa10   : > { %v9953_v37 = vpop.eup %9952  ;;  %v7590_v23 = vmul.f32 %v7554_v45, %v7554_v45  ;;  %v15720_v19 = vmul.f32 %v7552_v62, %v7552_v62  ;;  %v7555_v39 = vadd.f32 1.0, %v15563_v32  ;;  %v7652_v36 = vmul.f32 %v8848_v52, %v16653_v61  ;;  %v16659_v45 = vld [vmem:[#allocation94_spill] sm:$0xff] }
 0xa11   : > { %v8361_v34 = vmul.f32 %v7750_v8, %v16652_v55  ;;  %9966 = vrcp.f32 %v7695_v17  ;;  %v7558_v33 = vadd.f32 1.0, %v15574_v31  ;;  %v8279_v35 = vadd.f32 %v15639_v56, %v16649_v46  ;;  %v16658_v8 = vld [vmem:[#allocation117_spill] sm:$0xff]  ;;  %v16661_v17 = vld [vmem:[#allocation20_spill] sm:$0xff] }
 0xa12   : > { %v8851_v49 = vadd.f32 -1.0, %v7583_v57  ;;  %v7698_v40 = vadd.f32 1.0, %v7590_v23  ;;  %v7696_v48 = vadd.f32 1.0, %v15720_v19  ;;  %v7593_v6 = vmul.f32 %v7557_v59, %v7557_v59 }
 0xa13   : > { %v8397_v38 = vadd.f32 %v8361_v34, %v8287_v43  ;;  %v9955_v24 = vpop.eup %9954  ;;  %v15732_v32 = vmul.f32 %v7555_v39, %v7555_v39  ;;  %v15734_v3 = vmul.f32 %v7558_v33, %v7558_v33  ;;  %v7657_v7 = vmul.f32 %v8853_v27, %v15406_v25 }
 0xa14   : > { %v7746_v18 = vmul.f32 %v9955_v24, %v7652_v36  ;;  %v8300_v31 = vadd.f32 %v15661_v13, %v16649_v46  ;;  %v8854_v29 = vadd.f32 -1.0, %v7586_v14  ;;  %9968 = vrcp.f32 %v7698_v40  ;;  %v16663_v40 = vld [vmem:[#allocation19_spill] sm:$0xff] }
 0xa15   : > { %8433 = vst [vmem:[%s15608_s11 + $0xb8] sm:$0xff] %v8397_v38  ;;  %9970 = vrcp.f32 %v7696_v48  ;;  %v7701_v21 = vadd.f32 1.0, %v7593_v6  ;;  %v7556_v53 = vadd.f32 1.0, %v9953_v37  ;;  %v7655_v57 = vmul.f32 %v8851_v49, %v16655_v63  ;;  %v16660_v37 = vld [vmem:[#allocation13_spill] sm:$0xff]  ;;  %v16666_v63 = vld [vmem:[#allocation96_spill] sm:$0xff] }
 0xa16   : > { %v9957_v56 = vpop.eup %9956  ;;  %v8359_v0 = vmul.f32 %v7746_v18, %v16654_v58  ;;  %v8852_v11 = vadd.f32 -1.0, %v7584_v1  ;;  %v7699_v25 = vadd.f32 1.0, %v15732_v32  ;;  %v8857_v20 = vadd.f32 -1.0, %v7589_v10  ;;  %v9385_v18 = vpop.f32.mrf.mxu0 }
 0xa17   : > { %v7756_v54 = vmul.f32 %v9957_v56, %v7657_v7  ;;  %9972 = vrcp.f32 %v7701_v21  ;;  %v7702_v13 = vadd.f32 1.0, %v15734_v3  ;;  %v7658_v47 = vmul.f32 %v8854_v29, %v16657_v30  ;;  %v16669_v30 = vld [vmem:[#allocation99_spill] sm:$0xff] }
 0xa18   : > { %v8395_v4 = vadd.f32 %v8359_v0, %v8279_v35  ;;  %v8855_v28 = vadd.f32 -1.0, %v7587_v26  ;;  %9974 = vrcp.f32 %v7699_v25  ;;  %v7592_v2 = vmul.f32 %v7556_v53, %v7556_v53  ;;  %v16665_v0 = vld [vmem:[#allocation89_spill] sm:$0xff] }
 0xa19   : > { %v9959_v14 = vpop.eup %9958  ;;  %v8364_v60 = vmul.f32 %v7756_v54, %v16656_v44  ;;  %9976 = vrcp.f32 %v7702_v13  ;;  %v8292_v10 = vadd.f32 %v15680_v51, %v16649_v46  ;;  %v7656_v52 = vmul.f32 %v8852_v11, %v16658_v8  ;;  %v16662_v51 = vld [vmem:[#allocation121_spill] sm:$0xff]  ;;  %v16667_v11 = vld [vmem:[#allocation88_spill] sm:$0xff] }
 0xa1a   : > { %v9961_v15 = vpop.eup %9960  ;;  %8431 = vst [vmem:[%s15608_s11 + $0xa8] sm:$0xff] %v8395_v4  ;;  %v7752_v1 = vmul.f32 %v9959_v14, %v7655_v57  ;;  %v8303_v26 = vadd.f32 %v15697_v41, %v16649_v46  ;;  %v7661_v55 = vmul.f32 %v8857_v20, %v16660_v37  ;;  %v7700_v34 = vadd.f32 1.0, %v7592_v2  ;;  %v8323_v20 = vpop.f32.mrf.mxu0  ;;  %v16668_v14 = vld [vmem:[#allocation91_spill] sm:$0xff]  ;;  %v16672_v8 = vld [vmem:[#allocation16_spill] sm:$0xff] }
 0xa1b   : > { %v8400_v5 = vadd.f32 %v8364_v60, %v8300_v31  ;;  %v7758_v42 = vmul.f32 %v9961_v15, %v7658_v47  ;;  %v9963_v43 = vpop.eup %9962  ;;  %v7659_v38 = vmul.f32 %v8855_v28, %v16662_v51  ;;  %v8858_v61 = vadd.f32 -1.0, %v7590_v23  ;;  %v16664_v31 = vld [vmem:[#allocation97_spill] sm:$0xff]  ;;  %v16670_v15 = vld [vmem:[#allocation14_spill] sm:$0xff] }
 0xa1c   : > { %v8362_v62 = vmul.f32 %v7752_v1, %v16659_v45  ;;  %v9965_v27 = vpop.eup %9964  ;;  %v7754_v39 = vmul.f32 %v9963_v43, %v7656_v52  ;;  %v8856_v24 = vadd.f32 -1.0, %v15720_v19  ;;  %9978 = vrcp.f32 %v7700_v34 }
 0xa1d   : > { %8436 = vst [vmem:[%s15608_s11 + $0xd0] sm:$0xff] %v8400_v5  ;;  %v8365_v59 = vmul.f32 %v7758_v42, %v16661_v17  ;;  %v7764_v33 = vmul.f32 %v9965_v27, %v7661_v55  ;;  %v8295_v49 = vadd.f32 %v15708_v22, %v16649_v46  ;;  %v8316_v7 = vadd.f32 %v15715_v12, %v16649_v46  ;;  %v16671_v5 = vld [vmem:[#allocation21_spill] sm:$0xff]  ;;  %v16673_v55 = vld [vmem:[#allocation103_spill] sm:$0xff] }
 0xa1e   : > { %v8398_v36 = vadd.f32 %v8362_v62, %v8292_v10  ;;  %v9967_v35 = vpop.eup %9966  ;;  %v8363_v48 = vmul.f32 %v7754_v39, %v16663_v40  ;;  %v8861_v56 = vadd.f32 -1.0, %v7593_v6  ;;  %v8308_v58 = vadd.f32 %v15728_v50, %v16649_v46 }
 0xa1f   : > { %v8401_v41 = vadd.f32 %v8365_v59, %v8303_v26  ;;  %v8368_v23 = vmul.f32 %v7764_v33, %v16664_v31  ;;  %v7760_v29 = vmul.f32 %v9967_v35, %v7659_v38  ;;  %v7662_v22 = vmul.f32 %v8858_v61, %v16665_v0  ;;  %v16674_v59 = vld [vmem:[#allocation8_spill] sm:$0xff] }
 0xa20   : > { %8434 = vst [vmem:[%s15608_s11 + $0xc0] sm:$0xff] %v8398_v36  ;;  %v8399_v19 = vadd.f32 %v8363_v48, %v8295_v49  ;;  %v8859_v21 = vadd.f32 -1.0, %v15732_v32  ;;  %v7660_v12 = vmul.f32 %v8856_v24, %v16667_v11  ;;  %v8862_v25 = vadd.f32 -1.0, %v15734_v3  ;;  %v16675_v38 = vld [vmem:[#allocation60_spill] sm:$0xff]  ;;  %v16676_v36 = vld [vmem:[#allocation15_spill] sm:$0xff] }
 0xa21   : > { %8437 = vst [vmem:[%s15608_s11 + $0xd8] sm:$0xff] %v8401_v41  ;;  %v9969_v53 = vpop.eup %9968  ;;  %v8404_v54 = vadd.f32 %v8368_v23, %v8316_v7  ;;  %v8366_v57 = vmul.f32 %v7760_v29, %v16666_v63  ;;  %v7665_v44 = vmul.f32 %v8861_v56, %v16668_v14  ;;  %v8319_v32 = vadd.f32 %v15741_v16, %v16649_v46  ;;  %v9386_v16 = vpop.f32.mrf.mxu0 }
 0xa22   : > { %v9971_v4 = vpop.eup %9970  ;;  %8435 = vst [vmem:[%s15608_s11 + $0xc8] sm:$0xff] %v8399_v19  ;;  %v7766_v6 = vmul.f32 %v9969_v53, %v7662_v22  ;;  %v8311_v28 = vadd.f32 %v8310_v9, %v16649_v46  ;;  %v7663_v3 = vmul.f32 %v8859_v21, %v16670_v15  ;;  %v7666_v52 = vmul.f32 %v8862_v25, %v16672_v8 }
 0xa23   : > { %8440 = vst [vmem:[%s15608_s11 + $0xf0] sm:$0xff] %v8404_v54  ;;  %v8402_v13 = vadd.f32 %v8366_v57, %v8308_v58  ;;  %v7762_v50 = vmul.f32 %v9971_v4, %v7660_v12  ;;  %v8860_v43 = vadd.f32 -1.0, %v7592_v2  ;;  %v8332_v9 = vadd.f32 %v9385_v18, %v16649_v46  ;;  %v8326_v41 = vpop.f32.mrf.mxu0  ;;  %v16677_v18 = vld [vmem:[#allocation9_spill] sm:$0xff] }
 0xa24   : > { %v9973_v60 = vpop.eup %9972  ;;  %v8369_v47 = vmul.f32 %v7766_v6, %v16669_v30  ;;  %v8324_v17 = vadd.f32 %v8323_v20, %v16649_v46  ;;  %v8335_v51 = vadd.f32 %v9386_v16, %v16649_v46  ;;  %v8327_v48 = vadd.f32 %v8326_v41, %v16649_v46 }
 0xa25   : > { %v9975_v1 = vpop.eup %9974  ;;  %8438 = vst [vmem:[%s15608_s11 + $0xe0] sm:$0xff] %v8402_v13  ;;  %v8367_v10 = vmul.f32 %v7762_v50, %v16671_v5  ;;  %v7772_v42 = vmul.f32 %v9973_v60, %v7665_v44  ;;  %v7664_v33 = vmul.f32 %v8860_v43, %v16676_v36 }
 0xa26   : > { %v9977_v45 = vpop.eup %9976  ;;  %v8405_v62 = vadd.f32 %v8369_v47, %v8319_v32  ;;  %v7768_v26 = vmul.f32 %v9975_v1, %v7663_v3 }
 0xa27   : > { %v8403_v37 = vadd.f32 %v8367_v10, %v8311_v28  ;;  %v8372_v34 = vmul.f32 %v7772_v42, %v16673_v55  ;;  %v7774_v27 = vmul.f32 %v9977_v45, %v7666_v52 }
 0xa28   : > { %8441 = vst [vmem:[%s15608_s11 + $0xf8] sm:$0xff] %v8405_v62  ;;  %v8370_v2 = vmul.f32 %v7768_v26, %v16674_v59 }
 0xa29   : > { %8439 = vst [vmem:[%s15608_s11 + $0xe8] sm:$0xff] %v8403_v37  ;;  %v8408_v39 = vadd.f32 %v8372_v34, %v8332_v9  ;;  %v8373_v61 = vmul.f32 %v7774_v27, %v16675_v38  ;;  %v9979_v24 = vpop.eup %9978 }
 0xa2a   : > { %v8406_v35 = vadd.f32 %v8370_v2, %v8324_v17  ;;  %v7770_v40 = vmul.f32 %v9979_v24, %v7664_v33 }
 0xa2b   : > { %8444 = vst [vmem:[%s15608_s11 + $0x110] sm:$0xff] %v8408_v39  ;;  %v8409_v49 = vadd.f32 %v8373_v61, %v8335_v51 }
 0xa2c   : > { %8442 = vst [vmem:[%s15608_s11 + $0x100] sm:$0xff] %v8406_v35  ;;  %v8371_v7 = vmul.f32 %v7770_v40, %v16677_v18 }
 0xa2d   : > { %8445 = vst [vmem:[%s15608_s11 + $0x118] sm:$0xff] %v8409_v49 }
 0xa2e   : > { %v8407_v31 = vadd.f32 %v8371_v7, %v8327_v48 }
 0xa30   : > { %8443 = vst [vmem:[%s15608_s11 + $0x108] sm:$0xff] %v8407_v31 }
 0xa31   : > { %10050 = shalt.err (!%p10047_p3)
}
 0xa32   : > { %s10051_s28 = scalar_lea.hbm %s15804_s21, 4608  ;;  %s10055_s27 = scalar_lea.hbm %s15861_s10, 9216 }
 0xa33   : > { %p10052_p4 = scmp.ne.s32.totalorder %s15804_s21, %s10051_s28  ;;  %p10056_p9 = scmp.lt.s32.totalorder %s15804_s21, %s15861_s10 }
 0xa34   : > { %p10057_p10 = scmp.lt.s32.totalorder %s10055_s27, %s10051_s28 }
 0xa35   : > { %p10053_p7 = pnand %p10052_p4, %p10198_p5 }
 0xa36   : > { %p10058_p11 = por %p10057_p10, %p10056_p9 }
 0xa37   : > { %p10054_p8 = pneg %p10053_p7 }
 0xa39   : > { %p10059_p12 = pnand %p10058_p11, %p10054_p8 }
 0xa3b   : > { %10062 = shalt.err (!%p10059_p12)
}
 0xa3c   : > { %s10103_s25 = smov 128   ;;  %s10104_s26 = smov 8  }
 0xa3d   : > { %9407 = dma.vmem_to_hbm [thread:$0]  (%p10198_p5), %s15806_s20, 4608, %s15804_s21, %s15811_s17, %s10103_s25, %s10103_s25, %s10104_s26  }
 0xa3e PF: > { %p9413_p13 = scmp.ge.s32.totalorder %s10097_s16, 2  ;;  %s8475_s30 = sand.u32 1, %s10085_s13  }
 0xa3f   : > { %s8476_s28 = scalar_lea.sflag [#allocation4], %s8475_s30 }
 0xa40   : > { %p9410_p0 = pnand %p9413_p13, %p10202_p6 }
 0xa42   : > { %p9411_p1 = pneg %p9410_p0 }
 0xa44   : > { %10080 = dma.done.wait (%p9411_p1), %s8476_s28, 4608  }
 0xa45   : > { %10082 = vsyncadd (%p9411_p1), %s8476_s28, 4294962688  ;;  %p20_p2 = scmp.ge.s32.totalorder %s10185_s19, 4   ;;  %s16678_s13 = smov %s10089_s14 }
 0xa46   : > { %s16679_s14 = smov %s10093_s15  ;;  %s16680_s15 = smov %s10196_s22 }
 0xa47   : > { %s16681_s16 = smov %s10185_s19  ;;  %22 = sbr.rel (!%p20_p2) target bundleno = 3 (0x3), region = 101 }
 0xa4c   :  { %8481 = vsyncpa [#allocation4], 1 }
 0xa4d   :  { %8483 = vsyncpa [#allocation4 + $0x1], 1 }

</bundles_post_ra>
